<compile_context>
chip_gen: v5e
topology: v5e:2x2
jax: 0.10.0
libtpu: 0.0.40
codegen_flags: <defaults>
</compile_context>

<pallas_src>
import math
import functools

import jax
import jax.numpy as jnp
from jax.experimental import pallas as pl
from jax.experimental.pallas import tpu as pltpu

_INV_SQRT2 = 1.0 / math.sqrt(2.0)
_SQRT_2_OVER_PI = 0.7978845608028654
_GELU_C = 0.044715
_PADW = 8  # 8-wide zero borders keep the W-axis pad concat on the aligned path.


def _gelu(x, approx):
    if approx:
        # tanh-approximate GELU: transcendental runs on the EUP slot.
        x3 = x * x * x
        return 0.5 * x * (1.0 + jnp.tanh(_SQRT_2_OVER_PI * (x + _GELU_C * x3)))
    # exact erf GELU (torch.nn.GELU() default numerics)
    return 0.5 * x * (1.0 + jax.lax.erf(x * _INV_SQRT2))


def _convnext_block_kernel(x_main_ref, x_top_ref, x_bot_ref,
                           wdw_ref, bdw_ref, nw_ref, nb_ref,
                           w1_ref, b1_ref, w2_ref, b2_ref, gamma_ref,
                           out_ref, *, TH, W, C, bf16_elem, approx_gelu):
    i = pl.program_id(1)
    nh = pl.num_programs(1)

    # ---- assemble (TH+2, W, C) row band; halo rows zeroed at image edges ----
    top = jnp.where(i == 0, 0.0, x_top_ref[...])            # (1, W, C)
    bot = jnp.where(i == nh - 1, 0.0, x_bot_ref[...])       # (1, W, C)
    xb = jnp.concatenate([top, x_main_ref[...], bot], axis=0)   # (TH+2, W, C)

    # ---- build the three W-shifted bands ONCE (one slice per dw tap) ----
    zc = jnp.zeros((TH + 2, _PADW, C), jnp.float32)
    xbp = jnp.concatenate([zc, xb, zc], axis=1)              # aligned 8-wide pad
    cols = (xbp[:, _PADW - 1:_PADW - 1 + W, :],              # tap at column w-1
            xb,                                              # tap at column w
            xbp[:, _PADW + 1:_PADW + 1 + W, :])              # tap at column w+1

    # ---- depthwise 3x3 conv (only cheap leading-axis slices in the loop) ----
    wdw = wdw_ref[...]                                       # (3, 3, C)
    acc = jnp.broadcast_to(bdw_ref[0, :], (TH, W, C))        # init from dw bias
    for dh in range(3):
        for dw in range(3):
            acc = acc + cols[dw][dh:dh + TH] * wdw[dh, dw]

    # ---- LayerNorm over channels, fused sum / sum-of-squares (eps = 1e-6) ----
    inv_c = 1.0 / C
    mean = jnp.sum(acc, axis=-1, keepdims=True) * inv_c
    ex2 = jnp.sum(acc * acc, axis=-1, keepdims=True) * inv_c
    var = ex2 - mean * mean
    xn = (acc - mean) * jax.lax.rsqrt(var + 1e-6)
    xn = xn * nw_ref[0, :] + nb_ref[0, :]

    # ---- pwconv1 -> GELU -> pwconv2 (bf16 MXU operands, f32 accumulation) ----
    h = xn.reshape(TH * W, C).astype(jnp.bfloat16)
    h1 = jnp.dot(h, w1_ref[...], preferred_element_type=jnp.float32)
    if bf16_elem:
        # v6e/v7x: bf16 VPU/EUP -> run the 4C-wide epilogue at 2 elems/lane.
        h1 = h1.astype(jnp.bfloat16) + b1_ref[0, :].astype(jnp.bfloat16)
    else:
        h1 = h1 + b1_ref[0, :]
    h1 = _gelu(h1, approx_gelu)
    h2 = jnp.dot(h1.astype(jnp.bfloat16), w2_ref[...],
                 preferred_element_type=jnp.float32)
    h2 = (h2 + b2_ref[0, :]) * gamma_ref[0, :]

    # TODO(synk): for C not a multiple of 128 (e.g. 96/192) a lane-dense
    # (TH, W*C) output layout would avoid masked partial stores; skipped since
    # the required in-kernel (TH*W, C)->(TH, W*C) relayout reshape is not a
    # universally supported Mosaic lowering.
    out_ref[...] = h2.reshape(TH, W, C)


def _chip_config():
    """Returns (vmem_limit_bytes, bf16_elementwise) per TPU generation."""
    kind = ""
    try:
        kind = jax.devices()[0].device_kind.lower()
    except Exception:
        pass
    if "v7" in kind or "tpu7" in kind:
        return 52 * 1024 * 1024, True        # v7x: 64 MiB VMEM per TC
    if "v6" in kind:
        return 100 * 1024 * 1024, True       # 128 MiB physical VMEM, bf16 VPU/EUP
    if "v5" in kind:
        return 100 * 1024 * 1024, False      # 128 MiB VMEM; no bf16 VPU/EUP
    return 48 * 1024 * 1024, False           # unknown / older: conservative, f32


def _step_vmem_bytes(th, W, C):
    """Rough per-grid-step VMEM footprint (bytes) used to bound tile_h."""
    Cm = 4 * C
    band = (th + 2) * W * C * 4                    # assembled row band (f32)
    padded = (th + 2) * (W + 2 * _PADW) * C * 4    # zero-padded band
    shifted = 2 * (th + 2) * W * C * 4             # two W-shifted copies
    acc = 2 * th * W * C * 4                       # dwconv acc + normalized copy
    h1 = 2 * th * W * Cm * 4                       # f32 matmul acc + epilogue temp
    io = 2 * (2 * th * W * C * 4 + 2 * W * C * 4)  # dbl-buffered in/out + halos
    wts = 2 * 2 * C * Cm * 2                       # w1+w2 bf16 (x2 buffers)
    vecs = (9 * C + 6 * C + 2 * Cm) * 4 * 2
    return band + padded + shifted + acc + h1 + io + wts + vecs


def _pick_tile_h(H, W, C, vmem_limit_bytes):
    """Largest divisor of H whose estimated per-step footprint fits in ~60% of
    the VMEM limit (headroom for compiler temporaries)."""
    budget = 0.6 * vmem_limit_bytes
    best = 1
    for th in range(1, H + 1):
        if H % th == 0 and _step_vmem_bytes(th, W, C) <= budget:
            best = th
    # TODO(synk): for H with no good divisor (e.g. 7x7 late stages) a ragged
    # last band or folding batch images into one band would keep TH*W large.
    return best


def _build_pallas_call(B, H, W, C, TH, vmem_limit_bytes, bf16_elem,
                       approx_gelu, single_buffer_weights):
    Cm = 4 * C
    nH = H // TH
    kernel = functools.partial(_convnext_block_kernel, TH=TH, W=W, C=C,
                               bf16_elem=bf16_elem, approx_gelu=approx_gelu)

    def main_map(b, i):
        return (b, i, 0, 0)

    def top_map(b, i):   # 1-row halo; clamp at the top edge (masked in-kernel)
        return (b, jnp.maximum(i * TH - 1, 0), 0, 0)

    def bot_map(b, i):   # 1-row halo; clamp at the bottom edge (masked in-kernel)
        return (b, jnp.minimum((i + 1) * TH, H - 1), 0, 0)

    rep2 = lambda b, i: (0, 0)
    rep3 = lambda b, i: (0, 0, 0)

    if single_buffer_weights:
        # Grid-invariant operands: one VMEM copy instead of a double buffer.
        def const_spec(shape, imap):
            return pl.BlockSpec(shape, imap, pipeline_mode=pl.Buffered(1))
    else:
        def const_spec(shape, imap):
            return pl.BlockSpec(shape, imap)

    return pl.pallas_call(
        kernel,
        out_shape=jax.ShapeDtypeStruct((B, H, W, C), jnp.float32),
        grid_spec=pltpu.PrefetchScalarGridSpec(
            num_scalar_prefetch=0,
            grid=(B, nH),
            in_specs=[
                pl.BlockSpec((pl.Squeezed(), TH, W, C), main_map),   # main rows
                pl.BlockSpec((pl.Squeezed(), 1, W, C), top_map),     # halo above
                pl.BlockSpec((pl.Squeezed(), 1, W, C), bot_map),     # halo below
                const_spec((3, 3, C), rep3),                         # dw weight
                const_spec((1, C), rep2),                            # dw bias
                const_spec((1, C), rep2),                            # ln weight
                const_spec((1, C), rep2),                            # ln bias
                const_spec((C, Cm), rep2),                           # w1 (bf16)
                const_spec((1, Cm), rep2),                           # b1
                const_spec((Cm, C), rep2),                           # w2 (bf16)
                const_spec((1, C), rep2),                            # b2
                const_spec((1, C), rep2),                            # gamma
            ],
            out_specs=pl.BlockSpec((pl.Squeezed(), TH, W, C), main_map),
        ),
        compiler_params=pltpu.CompilerParams(
            dimension_semantics=("parallel", "parallel"),
            vmem_limit_bytes=vmem_limit_bytes,
        ),
    )


def convnext_block_nhwc(x_nhwc, params, *, tile_h=None, approx_gelu=True):
    """x_nhwc: (B, H, W, C) float32. Returns (B, H, W, C) float32."""
    B, H, W, C = x_nhwc.shape
    Cm = 4 * C
    vmem_limit_bytes, bf16_elem = _chip_config()
    if tile_h is None:
        tile_h = _pick_tile_h(H, W, C, vmem_limit_bytes)
    if H % tile_h != 0:
        raise ValueError(f"tile_h={tile_h} must divide H={H}")

    wdw = params["dw_w"]                         # (3, 3, C) f32
    bdw = params["dw_b"].reshape(1, C)
    nw = params["ln_w"].reshape(1, C)
    nb = params["ln_b"].reshape(1, C)
    w1 = params["w1"].astype(jnp.bfloat16)       # (C, 4C) bf16 (half HBM/VMEM)
    b1 = params["b1"].reshape(1, Cm)
    w2 = params["w2"].astype(jnp.bfloat16)       # (4C, C) bf16
    b2 = params["b2"].reshape(1, C)
    gamma = params["gamma"].reshape(1, C)

    def run(single_buffer_weights):
        call = _build_pallas_call(B, H, W, C, tile_h, vmem_limit_bytes,
                                  bf16_elem, approx_gelu, single_buffer_weights)
        return call(x_nhwc, x_nhwc, x_nhwc, wdw, bdw, nw, nb,
                    w1, b1, w2, b2, gamma)

    try:
        return run(True)
    except Exception:
        # pipeline_mode=Buffered(1) not accepted by this JAX/Mosaic build:
        # fall back to default double buffering (identical results).
        return run(False)


def convnext_block(x_nchw, params, *, tile_h=None, approx_gelu=True):
    """NCHW interface matching the PyTorch module."""
    x_nhwc = jnp.transpose(x_nchw, (0, 2, 3, 1))
    out_nhwc = convnext_block_nhwc(x_nhwc, params, tile_h=tile_h,
                                   approx_gelu=approx_gelu)
    return jnp.transpose(out_nhwc, (0, 3, 1, 2))


def reference(x_nchw, params):
    """Pure-JAX f32 reference mirroring the PyTorch forward (exact erf GELU)."""
    B, C, H, W = x_nchw.shape
    x = jnp.transpose(x_nchw, (0, 2, 3, 1))
    xp = jnp.pad(x, ((0, 0), (1, 1), (1, 1), (0, 0)))
    acc = jnp.zeros((B, H, W, C), jnp.float32)
    for dh in range(3):
        for dw in range(3):
            acc = acc + xp[:, dh:dh + H, dw:dw + W, :] * params["dw_w"][dh, dw]
    acc = acc + params["dw_b"]
    mean = jnp.mean(acc, axis=-1, keepdims=True)
    var = jnp.mean((acc - mean) ** 2, axis=-1, keepdims=True)
    xn = (acc - mean) / jnp.sqrt(var + 1e-6) * params["ln_w"] + params["ln_b"]
    h1 = xn @ params["w1"] + params["b1"]
    h1 = 0.5 * h1 * (1.0 + jax.lax.erf(h1 / jnp.sqrt(2.0)))
    h2 = h1 @ params["w2"] + params["b2"]
    h2 = h2 * params["gamma"]
    return jnp.transpose(h2, (0, 3, 1, 2))


def init_params(key, dim, scale_value=1.0):
    ks = jax.random.split(key, 6)
    Cm = 4 * dim
    return {
        "dw_w": 0.1 * jax.random.normal(ks[0], (3, 3, dim), jnp.float32),
        "dw_b": 0.01 * jax.random.normal(ks[1], (dim,), jnp.float32),
        "ln_w": jnp.ones((dim,), jnp.float32),
        "ln_b": jnp.zeros((dim,), jnp.float32),
        "w1": 0.05 * jax.random.normal(ks[2], (dim, Cm), jnp.float32),
        "b1": 0.01 * jax.random.normal(ks[3], (Cm,), jnp.float32),
        "w2": 0.05 * jax.random.normal(ks[4], (Cm, dim), jnp.float32),
        "b2": 0.01 * jax.random.normal(ks[5], (dim,), jnp.float32),
        "gamma": scale_value * jnp.ones((dim,), jnp.float32),
    }


if __name__ == "__main__":
    B, C, H, W = 2, 32, 16, 16
    key = jax.random.PRNGKey(0)
    kx, kp = jax.random.split(key)
    x = jax.random.normal(kx, (B, C, H, W), jnp.float32)
    params = init_params(kp, C, scale_value=1.0)

    out = jax.block_until_ready(convnext_block(x, params))
    ref = jax.block_until_ready(reference(x, params))

    assert out.shape == (B, C, H, W)
    # bf16 MXU operands (+ bf16 epilogue on v6e/v7x) and tanh-approx GELU vs.
    # the all-f32 exact-erf reference: expected max abs error is a few 1e-3.
    err = float(jnp.max(jnp.abs(out - ref)))
    assert err < 3e-2, err

    print("KERNEL_OK")
</pallas_src>

<mosaic_0001>
module attributes {stable_mosaic.version = 11 : i64} {
  func.func @_convnext_block_kernel(%arg0: i32, %arg1: i32, %arg2: memref<1x16x16x32xf32, #tpu.memory_space<vmem>>, %arg3: memref<1x1x16x32xf32, #tpu.memory_space<vmem>>, %arg4: memref<1x1x16x32xf32, #tpu.memory_space<vmem>>, %arg5: memref<3x3x32xf32, #tpu.memory_space<vmem>>, %arg6: memref<1x32xf32, #tpu.memory_space<vmem>>, %arg7: memref<1x32xf32, #tpu.memory_space<vmem>>, %arg8: memref<1x32xf32, #tpu.memory_space<vmem>>, %arg9: memref<32x128xbf16, #tpu.memory_space<vmem>>, %arg10: memref<1x128xf32, #tpu.memory_space<vmem>>, %arg11: memref<128x32xbf16, #tpu.memory_space<vmem>>, %arg12: memref<1x32xf32, #tpu.memory_space<vmem>>, %arg13: memref<1x32xf32, #tpu.memory_space<vmem>>, %arg14: memref<1x16x16x32xf32, #tpu.memory_space<vmem>>) attributes {dimension_semantics = [#tpu.dimension_semantics<parallel>, #tpu.dimension_semantics<parallel>], iteration_bounds = array<i64: 2, 1>, scalar_prefetch = 0 : i64, scratch_operands = 0 : i64, tpu.core_type = #tpu.core_type<tc>, window_params = [{transform_indices = @transform_0, window_bounds = array<i64: 1, 16, 16, 32>}, {transform_indices = @transform_1, window_bounds = array<i64: 1, 1, 16, 32>}, {transform_indices = @transform_2, window_bounds = array<i64: 1, 1, 16, 32>}, {pipeline_mode = #tpu.pipeline_mode<synchronous>, transform_indices = @transform_3, window_bounds = array<i64: 3, 3, 32>}, {pipeline_mode = #tpu.pipeline_mode<synchronous>, transform_indices = @transform_4, window_bounds = array<i64: 1, 32>}, {pipeline_mode = #tpu.pipeline_mode<synchronous>, transform_indices = @transform_5, window_bounds = array<i64: 1, 32>}, {pipeline_mode = #tpu.pipeline_mode<synchronous>, transform_indices = @transform_6, window_bounds = array<i64: 1, 32>}, {pipeline_mode = #tpu.pipeline_mode<synchronous>, transform_indices = @transform_7, window_bounds = array<i64: 32, 128>}, {pipeline_mode = #tpu.pipeline_mode<synchronous>, transform_indices = @transform_8, window_bounds = array<i64: 1, 128>}, {pipeline_mode = #tpu.pipeline_mode<synchronous>, transform_indices = @transform_9, window_bounds = array<i64: 128, 32>}, {pipeline_mode = #tpu.pipeline_mode<synchronous>, transform_indices = @transform_10, window_bounds = array<i64: 1, 32>}, {pipeline_mode = #tpu.pipeline_mode<synchronous>, transform_indices = @transform_11, window_bounds = array<i64: 1, 32>}, {transform_indices = @transform_12, window_bounds = array<i64: 1, 16, 16, 32>}]} {
    %c0_i32 = arith.constant 0 : i32
    %0 = arith.cmpi eq, %arg1, %c0_i32 : i32
    %c0 = arith.constant 0 : index
    %c0_0 = arith.constant 0 : index
    %c0_1 = arith.constant 0 : index
    %c0_2 = arith.constant 0 : index
    %1 = vector.load %arg3[%c0, %c0_0, %c0_1, %c0_2] : memref<1x1x16x32xf32, #tpu.memory_space<vmem>>, vector<1x1x16x32xf32>
    %2 = vector.shape_cast %1 : vector<1x1x16x32xf32> to vector<1x16x32xf32>
    %cst = arith.constant 0.000000e+00 : f32
    %3 = vector.broadcast %cst : f32 to vector<1x16x32xf32>
    %4 = arith.select %0, %3, %2 : vector<1x16x32xf32>
    %c0_i32_3 = arith.constant 0 : i32
    %5 = arith.cmpi eq, %arg1, %c0_i32_3 : i32
    %c0_4 = arith.constant 0 : index
    %c0_5 = arith.constant 0 : index
    %c0_6 = arith.constant 0 : index
    %c0_7 = arith.constant 0 : index
    %6 = vector.load %arg4[%c0_4, %c0_5, %c0_6, %c0_7] : memref<1x1x16x32xf32, #tpu.memory_space<vmem>>, vector<1x1x16x32xf32>
    %7 = vector.shape_cast %6 : vector<1x1x16x32xf32> to vector<1x16x32xf32>
    %cst_8 = arith.constant 0.000000e+00 : f32
    %8 = vector.broadcast %cst_8 : f32 to vector<1x16x32xf32>
    %9 = arith.select %5, %8, %7 : vector<1x16x32xf32>
    %c0_9 = arith.constant 0 : index
    %c0_10 = arith.constant 0 : index
    %c0_11 = arith.constant 0 : index
    %c0_12 = arith.constant 0 : index
    %10 = vector.load %arg2[%c0_9, %c0_10, %c0_11, %c0_12] : memref<1x16x16x32xf32, #tpu.memory_space<vmem>>, vector<1x16x16x32xf32>
    %11 = vector.shape_cast %10 : vector<1x16x16x32xf32> to vector<16x16x32xf32>
    %12 = tpu.concatenate %4, %11, %9 in 0 : vector<1x16x32xf32>, vector<16x16x32xf32>, vector<1x16x32xf32> -> vector<18x16x32xf32>
    %cst_13 = arith.constant 0.000000e+00 : f32
    %13 = vector.broadcast %cst_13 : f32 to vector<18x8x32xf32>
    %14 = tpu.concatenate %13, %12, %13 in 1 : vector<18x8x32xf32>, vector<18x16x32xf32>, vector<18x8x32xf32> -> vector<18x32x32xf32>
    %15 = vector.extract_strided_slice %14 {offsets = [0, 7, 0], sizes = [18, 16, 32], strides = [1, 1, 1]} : vector<18x32x32xf32> to vector<18x16x32xf32>
    %16 = vector.extract_strided_slice %14 {offsets = [0, 9, 0], sizes = [18, 16, 32], strides = [1, 1, 1]} : vector<18x32x32xf32> to vector<18x16x32xf32>
    %c0_14 = arith.constant 0 : index
    %c0_15 = arith.constant 0 : index
    %c0_16 = arith.constant 0 : index
    %17 = vector.load %arg5[%c0_14, %c0_15, %c0_16] : memref<3x3x32xf32, #tpu.memory_space<vmem>>, vector<3x3x32xf32>
    %c0_17 = arith.constant 0 : index
    %c0_18 = arith.constant 0 : index
    %18 = vector.load %arg6[%c0_17, %c0_18] : memref<1x32xf32, #tpu.memory_space<vmem>>, vector<1x32xf32>
    %19 = vector.shape_cast %18 : vector<1x32xf32> to vector<32xf32>
    %20 = vector.shape_cast %19 : vector<32xf32> to vector<1x1x32xf32>
    %21 = vector.broadcast %20 : vector<1x1x32xf32> to vector<16x16x32xf32>
    %22 = vector.extract_strided_slice %15 {offsets = [0, 0, 0], sizes = [16, 16, 32], strides = [1, 1, 1]} : vector<18x16x32xf32> to vector<16x16x32xf32>
    %23 = vector.extract_strided_slice %17 {offsets = [0, 0, 0], sizes = [1, 1, 32], strides = [1, 1, 1]} : vector<3x3x32xf32> to vector<1x1x32xf32>
    %24 = vector.shape_cast %23 : vector<1x1x32xf32> to vector<32xf32>
    %25 = vector.shape_cast %24 : vector<32xf32> to vector<1x1x32xf32>
    %26 = vector.broadcast %25 : vector<1x1x32xf32> to vector<16x16x32xf32>
    %27 = arith.mulf %22, %26 : vector<16x16x32xf32>
    %28 = arith.addf %21, %27 : vector<16x16x32xf32>
    %29 = vector.extract_strided_slice %12 {offsets = [0, 0, 0], sizes = [16, 16, 32], strides = [1, 1, 1]} : vector<18x16x32xf32> to vector<16x16x32xf32>
    %30 = vector.extract_strided_slice %17 {offsets = [0, 1, 0], sizes = [1, 1, 32], strides = [1, 1, 1]} : vector<3x3x32xf32> to vector<1x1x32xf32>
    %31 = vector.shape_cast %30 : vector<1x1x32xf32> to vector<32xf32>
    %32 = vector.shape_cast %31 : vector<32xf32> to vector<1x1x32xf32>
    %33 = vector.broadcast %32 : vector<1x1x32xf32> to vector<16x16x32xf32>
    %34 = arith.mulf %29, %33 : vector<16x16x32xf32>
    %35 = arith.addf %28, %34 : vector<16x16x32xf32>
    %36 = vector.extract_strided_slice %16 {offsets = [0, 0, 0], sizes = [16, 16, 32], strides = [1, 1, 1]} : vector<18x16x32xf32> to vector<16x16x32xf32>
    %37 = vector.extract_strided_slice %17 {offsets = [0, 2, 0], sizes = [1, 1, 32], strides = [1, 1, 1]} : vector<3x3x32xf32> to vector<1x1x32xf32>
    %38 = vector.shape_cast %37 : vector<1x1x32xf32> to vector<32xf32>
    %39 = vector.shape_cast %38 : vector<32xf32> to vector<1x1x32xf32>
    %40 = vector.broadcast %39 : vector<1x1x32xf32> to vector<16x16x32xf32>
    %41 = arith.mulf %36, %40 : vector<16x16x32xf32>
    %42 = arith.addf %35, %41 : vector<16x16x32xf32>
    %43 = vector.extract_strided_slice %15 {offsets = [1, 0, 0], sizes = [16, 16, 32], strides = [1, 1, 1]} : vector<18x16x32xf32> to vector<16x16x32xf32>
    %44 = vector.extract_strided_slice %17 {offsets = [1, 0, 0], sizes = [1, 1, 32], strides = [1, 1, 1]} : vector<3x3x32xf32> to vector<1x1x32xf32>
    %45 = vector.shape_cast %44 : vector<1x1x32xf32> to vector<32xf32>
    %46 = vector.shape_cast %45 : vector<32xf32> to vector<1x1x32xf32>
    %47 = vector.broadcast %46 : vector<1x1x32xf32> to vector<16x16x32xf32>
    %48 = arith.mulf %43, %47 : vector<16x16x32xf32>
    %49 = arith.addf %42, %48 : vector<16x16x32xf32>
    %50 = vector.extract_strided_slice %12 {offsets = [1, 0, 0], sizes = [16, 16, 32], strides = [1, 1, 1]} : vector<18x16x32xf32> to vector<16x16x32xf32>
    %51 = vector.extract_strided_slice %17 {offsets = [1, 1, 0], sizes = [1, 1, 32], strides = [1, 1, 1]} : vector<3x3x32xf32> to vector<1x1x32xf32>
    %52 = vector.shape_cast %51 : vector<1x1x32xf32> to vector<32xf32>
    %53 = vector.shape_cast %52 : vector<32xf32> to vector<1x1x32xf32>
    %54 = vector.broadcast %53 : vector<1x1x32xf32> to vector<16x16x32xf32>
    %55 = arith.mulf %50, %54 : vector<16x16x32xf32>
    %56 = arith.addf %49, %55 : vector<16x16x32xf32>
    %57 = vector.extract_strided_slice %16 {offsets = [1, 0, 0], sizes = [16, 16, 32], strides = [1, 1, 1]} : vector<18x16x32xf32> to vector<16x16x32xf32>
    %58 = vector.extract_strided_slice %17 {offsets = [1, 2, 0], sizes = [1, 1, 32], strides = [1, 1, 1]} : vector<3x3x32xf32> to vector<1x1x32xf32>
    %59 = vector.shape_cast %58 : vector<1x1x32xf32> to vector<32xf32>
    %60 = vector.shape_cast %59 : vector<32xf32> to vector<1x1x32xf32>
    %61 = vector.broadcast %60 : vector<1x1x32xf32> to vector<16x16x32xf32>
    %62 = arith.mulf %57, %61 : vector<16x16x32xf32>
    %63 = arith.addf %56, %62 : vector<16x16x32xf32>
    %64 = vector.extract_strided_slice %15 {offsets = [2, 0, 0], sizes = [16, 16, 32], strides = [1, 1, 1]} : vector<18x16x32xf32> to vector<16x16x32xf32>
    %65 = vector.extract_strided_slice %17 {offsets = [2, 0, 0], sizes = [1, 1, 32], strides = [1, 1, 1]} : vector<3x3x32xf32> to vector<1x1x32xf32>
    %66 = vector.shape_cast %65 : vector<1x1x32xf32> to vector<32xf32>
    %67 = vector.shape_cast %66 : vector<32xf32> to vector<1x1x32xf32>
    %68 = vector.broadcast %67 : vector<1x1x32xf32> to vector<16x16x32xf32>
    %69 = arith.mulf %64, %68 : vector<16x16x32xf32>
    %70 = arith.addf %63, %69 : vector<16x16x32xf32>
    %71 = vector.extract_strided_slice %12 {offsets = [2, 0, 0], sizes = [16, 16, 32], strides = [1, 1, 1]} : vector<18x16x32xf32> to vector<16x16x32xf32>
    %72 = vector.extract_strided_slice %17 {offsets = [2, 1, 0], sizes = [1, 1, 32], strides = [1, 1, 1]} : vector<3x3x32xf32> to vector<1x1x32xf32>
    %73 = vector.shape_cast %72 : vector<1x1x32xf32> to vector<32xf32>
    %74 = vector.shape_cast %73 : vector<32xf32> to vector<1x1x32xf32>
    %75 = vector.broadcast %74 : vector<1x1x32xf32> to vector<16x16x32xf32>
    %76 = arith.mulf %71, %75 : vector<16x16x32xf32>
    %77 = arith.addf %70, %76 : vector<16x16x32xf32>
    %78 = vector.extract_strided_slice %16 {offsets = [2, 0, 0], sizes = [16, 16, 32], strides = [1, 1, 1]} : vector<18x16x32xf32> to vector<16x16x32xf32>
    %79 = vector.extract_strided_slice %17 {offsets = [2, 2, 0], sizes = [1, 1, 32], strides = [1, 1, 1]} : vector<3x3x32xf32> to vector<1x1x32xf32>
    %80 = vector.shape_cast %79 : vector<1x1x32xf32> to vector<32xf32>
    %81 = vector.shape_cast %80 : vector<32xf32> to vector<1x1x32xf32>
    %82 = vector.broadcast %81 : vector<1x1x32xf32> to vector<16x16x32xf32>
    %83 = arith.mulf %78, %82 : vector<16x16x32xf32>
    %84 = arith.addf %77, %83 : vector<16x16x32xf32>
    %cst_19 = arith.constant dense<0.000000e+00> : vector<16x16xf32>
    %85 = vector.multi_reduction <add>, %84, %cst_19 [2] : vector<16x16x32xf32> to vector<16x16xf32>
    %86 = vector.shape_cast %85 : vector<16x16xf32> to vector<16x16x1xf32>
    %cst_20 = arith.constant 3.125000e-02 : f32
    %87 = vector.broadcast %cst_20 : f32 to vector<16x16x1xf32>
    %88 = arith.mulf %86, %87 : vector<16x16x1xf32>
    %89 = arith.mulf %84, %84 : vector<16x16x32xf32>
    %cst_21 = arith.constant dense<0.000000e+00> : vector<16x16xf32>
    %90 = vector.multi_reduction <add>, %89, %cst_21 [2] : vector<16x16x32xf32> to vector<16x16xf32>
    %91 = vector.shape_cast %90 : vector<16x16xf32> to vector<16x16x1xf32>
    %cst_22 = arith.constant 3.125000e-02 : f32
    %92 = vector.broadcast %cst_22 : f32 to vector<16x16x1xf32>
    %93 = arith.mulf %91, %92 : vector<16x16x1xf32>
    %94 = arith.mulf %88, %88 : vector<16x16x1xf32>
    %95 = arith.subf %93, %94 : vector<16x16x1xf32>
    %96 = vector.broadcast %88 : vector<16x16x1xf32> to vector<16x16x32xf32>
    %97 = arith.subf %84, %96 : vector<16x16x32xf32>
    %cst_23 = arith.constant 9.99999997E-7 : f32
    %98 = vector.broadcast %cst_23 : f32 to vector<16x16x1xf32>
    %99 = arith.addf %95, %98 : vector<16x16x1xf32>
    %100 = math.rsqrt %99 : vector<16x16x1xf32>
    %101 = vector.broadcast %100 : vector<16x16x1xf32> to vector<16x16x32xf32>
    %102 = arith.mulf %97, %101 : vector<16x16x32xf32>
    %c0_24 = arith.constant 0 : index
    %c0_25 = arith.constant 0 : index
    %103 = vector.load %arg7[%c0_24, %c0_25] : memref<1x32xf32, #tpu.memory_space<vmem>>, vector<1x32xf32>
    %104 = vector.shape_cast %103 : vector<1x32xf32> to vector<32xf32>
    %105 = vector.shape_cast %104 : vector<32xf32> to vector<1x1x32xf32>
    %106 = vector.broadcast %105 : vector<1x1x32xf32> to vector<16x16x32xf32>
    %107 = arith.mulf %102, %106 : vector<16x16x32xf32>
    %c0_26 = arith.constant 0 : index
    %c0_27 = arith.constant 0 : index
    %108 = vector.load %arg8[%c0_26, %c0_27] : memref<1x32xf32, #tpu.memory_space<vmem>>, vector<1x32xf32>
    %109 = vector.shape_cast %108 : vector<1x32xf32> to vector<32xf32>
    %110 = vector.shape_cast %109 : vector<32xf32> to vector<1x1x32xf32>
    %111 = vector.broadcast %110 : vector<1x1x32xf32> to vector<16x16x32xf32>
    %112 = arith.addf %107, %111 : vector<16x16x32xf32>
    %113 = vector.shape_cast %112 : vector<16x16x32xf32> to vector<256x32xf32>
    %114 = arith.truncf %113 : vector<256x32xf32> to vector<256x32xbf16>
    %c0_28 = arith.constant 0 : index
    %c0_29 = arith.constant 0 : index
    %115 = vector.load %arg9[%c0_28, %c0_29] : memref<32x128xbf16, #tpu.memory_space<vmem>>, vector<32x128xbf16>
    %cst_30 = arith.constant dense<0.000000e+00> : vector<256x128xf32>
    %116 = tpu.matmul %114, %115, %cst_30 {dimension_numbers = #tpu.dot_dimension_numbers<[1], [0], [0], [1], [0, 0, 1, 1], [], []>} : vector<256x32xbf16>, vector<32x128xbf16>, vector<256x128xf32> -> vector<256x128xf32>
    %c0_31 = arith.constant 0 : index
    %c0_32 = arith.constant 0 : index
    %117 = vector.load %arg10[%c0_31, %c0_32] : memref<1x128xf32, #tpu.memory_space<vmem>>, vector<1x128xf32>
    %118 = vector.shape_cast %117 : vector<1x128xf32> to vector<128xf32>
    %119 = vector.shape_cast %118 : vector<128xf32> to vector<1x128xf32>
    %120 = vector.broadcast %119 : vector<1x128xf32> to vector<256x128xf32>
    %121 = arith.addf %116, %120 : vector<256x128xf32>
    %122 = arith.mulf %121, %121 : vector<256x128xf32>
    %123 = arith.mulf %122, %121 : vector<256x128xf32>
    %cst_33 = arith.constant 5.000000e-01 : f32
    %124 = vector.broadcast %cst_33 : f32 to vector<256x128xf32>
    %125 = arith.mulf %124, %121 : vector<256x128xf32>
    %cst_34 = arith.constant 4.471500e-02 : f32
    %126 = vector.broadcast %cst_34 : f32 to vector<256x128xf32>
    %127 = arith.mulf %126, %123 : vector<256x128xf32>
    %128 = arith.addf %121, %127 : vector<256x128xf32>
    %cst_35 = arith.constant 0.797884583 : f32
    %129 = vector.broadcast %cst_35 : f32 to vector<256x128xf32>
    %130 = arith.mulf %129, %128 : vector<256x128xf32>
    %131 = math.tanh %130 : vector<256x128xf32>
    %cst_36 = arith.constant 1.000000e+00 : f32
    %132 = vector.broadcast %cst_36 : f32 to vector<256x128xf32>
    %133 = arith.addf %132, %131 : vector<256x128xf32>
    %134 = arith.mulf %125, %133 : vector<256x128xf32>
    %135 = arith.truncf %134 : vector<256x128xf32> to vector<256x128xbf16>
    %c0_37 = arith.constant 0 : index
    %c0_38 = arith.constant 0 : index
    %136 = vector.load %arg11[%c0_37, %c0_38] : memref<128x32xbf16, #tpu.memory_space<vmem>>, vector<128x32xbf16>
    %cst_39 = arith.constant dense<0.000000e+00> : vector<256x32xf32>
    %137 = tpu.matmul %135, %136, %cst_39 {dimension_numbers = #tpu.dot_dimension_numbers<[1], [0], [0], [1], [0, 0, 1, 1], [], []>} : vector<256x128xbf16>, vector<128x32xbf16>, vector<256x32xf32> -> vector<256x32xf32>
    %c0_40 = arith.constant 0 : index
    %c0_41 = arith.constant 0 : index
    %138 = vector.load %arg12[%c0_40, %c0_41] : memref<1x32xf32, #tpu.memory_space<vmem>>, vector<1x32xf32>
    %139 = vector.shape_cast %138 : vector<1x32xf32> to vector<32xf32>
    %140 = vector.shape_cast %139 : vector<32xf32> to vector<1x32xf32>
    %141 = vector.broadcast %140 : vector<1x32xf32> to vector<256x32xf32>
    %142 = arith.addf %137, %141 : vector<256x32xf32>
    %c0_42 = arith.constant 0 : index
    %c0_43 = arith.constant 0 : index
    %143 = vector.load %arg13[%c0_42, %c0_43] : memref<1x32xf32, #tpu.memory_space<vmem>>, vector<1x32xf32>
    %144 = vector.shape_cast %143 : vector<1x32xf32> to vector<32xf32>
    %145 = vector.shape_cast %144 : vector<32xf32> to vector<1x32xf32>
    %146 = vector.broadcast %145 : vector<1x32xf32> to vector<256x32xf32>
    %147 = arith.mulf %142, %146 : vector<256x32xf32>
    %148 = vector.shape_cast %147 : vector<256x32xf32> to vector<16x16x32xf32>
    %c0_44 = arith.constant 0 : index
    %c0_45 = arith.constant 0 : index
    %c0_46 = arith.constant 0 : index
    %c0_47 = arith.constant 0 : index
    %149 = vector.load %arg14[%c0_44, %c0_45, %c0_46, %c0_47] : memref<1x16x16x32xf32, #tpu.memory_space<vmem>>, vector<1x16x16x32xf32>
    %150 = vector.shape_cast %149 : vector<1x16x16x32xf32> to vector<16x16x32xf32>
    %151 = vector.shape_cast %148 : vector<16x16x32xf32> to vector<1x16x16x32xf32>
    tpu.vector_store %arg14[%c0_44, %c0_45, %c0_46, %c0_47], %151 {strides = array<i32>} : memref<1x16x16x32xf32, #tpu.memory_space<vmem>>, vector<1x16x16x32xf32>,
    return
  }
  func.func @transform_0(%arg0: i32, %arg1: i32) -> (i32, i32, i32, i32) {
    %c0_i32 = arith.constant 0 : i32
    %c0_i32_0 = arith.constant 0 : i32
    %c0_i32_1 = arith.constant 0 : i32
    return %arg0, %arg1, %c0_i32, %c0_i32_0 : i32, i32, i32, i32
  }
  func.func @transform_1(%arg0: i32, %arg1: i32) -> (i32, i32, i32, i32) {
    %c16_i32 = arith.constant 16 : i32
    %0 = arith.muli %arg1, %c16_i32 : i32
    %c1_i32 = arith.constant 1 : i32
    %1 = arith.subi %0, %c1_i32 : i32
    %c0_i32 = arith.constant 0 : i32
    %2 = arith.maxsi %1, %c0_i32 : i32
    %c0_i32_0 = arith.constant 0 : i32
    %c0_i32_1 = arith.constant 0 : i32
    %c0_i32_2 = arith.constant 0 : i32
    return %arg0, %2, %c0_i32_0, %c0_i32_1 : i32, i32, i32, i32
  }
  func.func @transform_2(%arg0: i32, %arg1: i32) -> (i32, i32, i32, i32) {
    %c1_i32 = arith.constant 1 : i32
    %0 = arith.addi %arg1, %c1_i32 : i32
    %c16_i32 = arith.constant 16 : i32
    %1 = arith.muli %0, %c16_i32 : i32
    %c15_i32 = arith.constant 15 : i32
    %2 = arith.minsi %1, %c15_i32 : i32
    %c0_i32 = arith.constant 0 : i32
    %c0_i32_0 = arith.constant 0 : i32
    %c0_i32_1 = arith.constant 0 : i32
    return %arg0, %2, %c0_i32, %c0_i32_0 : i32, i32, i32, i32
  }
  func.func @transform_3(%arg0: i32, %arg1: i32) -> (i32, i32, i32) {
    %c0_i32 = arith.constant 0 : i32
    %c0_i32_0 = arith.constant 0 : i32
    %c0_i32_1 = arith.constant 0 : i32
    %c0_i32_2 = arith.constant 0 : i32
    return %c0_i32, %c0_i32_0, %c0_i32_1 : i32, i32, i32
  }
  func.func @transform_4(%arg0: i32, %arg1: i32) -> (i32, i32) {
    %c0_i32 = arith.constant 0 : i32
    %c0_i32_0 = arith.constant 0 : i32
    %c0_i32_1 = arith.constant 0 : i32
    return %c0_i32, %c0_i32_0 : i32, i32
  }
  func.func @transform_5(%arg0: i32, %arg1: i32) -> (i32, i32) {
    %c0_i32 = arith.constant 0 : i32
    %c0_i32_0 = arith.constant 0 : i32
    %c0_i32_1 = arith.constant 0 : i32
    return %c0_i32, %c0_i32_0 : i32, i32
  }
  func.func @transform_6(%arg0: i32, %arg1: i32) -> (i32, i32) {
    %c0_i32 = arith.constant 0 : i32
    %c0_i32_0 = arith.constant 0 : i32
    %c0_i32_1 = arith.constant 0 : i32
    return %c0_i32, %c0_i32_0 : i32, i32
  }
  func.func @transform_7(%arg0: i32, %arg1: i32) -> (i32, i32) {
    %c0_i32 = arith.constant 0 : i32
    %c0_i32_0 = arith.constant 0 : i32
    %c0_i32_1 = arith.constant 0 : i32
    return %c0_i32, %c0_i32_0 : i32, i32
  }
  func.func @transform_8(%arg0: i32, %arg1: i32) -> (i32, i32) {
    %c0_i32 = arith.constant 0 : i32
    %c0_i32_0 = arith.constant 0 : i32
    %c0_i32_1 = arith.constant 0 : i32
    return %c0_i32, %c0_i32_0 : i32, i32
  }
  func.func @transform_9(%arg0: i32, %arg1: i32) -> (i32, i32) {
    %c0_i32 = arith.constant 0 : i32
    %c0_i32_0 = arith.constant 0 : i32
    %c0_i32_1 = arith.constant 0 : i32
    return %c0_i32, %c0_i32_0 : i32, i32
  }
  func.func @transform_10(%arg0: i32, %arg1: i32) -> (i32, i32) {
    %c0_i32 = arith.constant 0 : i32
    %c0_i32_0 = arith.constant 0 : i32
    %c0_i32_1 = arith.constant 0 : i32
    return %c0_i32, %c0_i32_0 : i32, i32
  }
  func.func @transform_11(%arg0: i32, %arg1: i32) -> (i32, i32) {
    %c0_i32 = arith.constant 0 : i32
    %c0_i32_0 = arith.constant 0 : i32
    %c0_i32_1 = arith.constant 0 : i32
    return %c0_i32, %c0_i32_0 : i32, i32
  }
  func.func @transform_12(%arg0: i32, %arg1: i32) -> (i32, i32, i32, i32) {
    %c0_i32 = arith.constant 0 : i32
    %c0_i32_0 = arith.constant 0 : i32
    %c0_i32_1 = arith.constant 0 : i32
    return %arg0, %arg1, %c0_i32, %c0_i32_0 : i32, i32, i32, i32
  }
}

module attributes {stable_mosaic.version = 11 : i64} {
  func.func @_convnext_block_kernel(%arg0: i32, %arg1: i32, %arg2: memref<1x16x16x32xf32, #tpu.memory_space<vmem>>, %arg3: memref<1x1x16x32xf32, #tpu.memory_space<vmem>>, %arg4: memref<1x1x16x32xf32, #tpu.memory_space<vmem>>, %arg5: memref<3x3x32xf32, #tpu.memory_space<vmem>>, %arg6: memref<1x32xf32, #tpu.memory_space<vmem>>, %arg7: memref<1x32xf32, #tpu.memory_space<vmem>>, %arg8: memref<1x32xf32, #tpu.memory_space<vmem>>, %arg9: memref<32x128xbf16, #tpu.memory_space<vmem>>, %arg10: memref<1x128xf32, #tpu.memory_space<vmem>>, %arg11: memref<128x32xbf16, #tpu.memory_space<vmem>>, %arg12: memref<1x32xf32, #tpu.memory_space<vmem>>, %arg13: memref<1x32xf32, #tpu.memory_space<vmem>>, %arg14: memref<1x16x16x32xf32, #tpu.memory_space<vmem>>) attributes {dimension_semantics = [#tpu.dimension_semantics<parallel>, #tpu.dimension_semantics<parallel>], iteration_bounds = array<i64: 2, 1>, scalar_prefetch = 0 : i64, scratch_operands = 0 : i64, tpu.core_type = #tpu.core_type<tc>, window_params = [{transform_indices = @transform_0, window_bounds = array<i64: 1, 16, 16, 32>}, {transform_indices = @transform_1, window_bounds = array<i64: 1, 1, 16, 32>}, {transform_indices = @transform_2, window_bounds = array<i64: 1, 1, 16, 32>}, {pipeline_mode = #tpu.pipeline_mode<synchronous>, transform_indices = @transform_3, window_bounds = array<i64: 3, 3, 32>}, {pipeline_mode = #tpu.pipeline_mode<synchronous>, transform_indices = @transform_4, window_bounds = array<i64: 1, 32>}, {pipeline_mode = #tpu.pipeline_mode<synchronous>, transform_indices = @transform_5, window_bounds = array<i64: 1, 32>}, {pipeline_mode = #tpu.pipeline_mode<synchronous>, transform_indices = @transform_6, window_bounds = array<i64: 1, 32>}, {pipeline_mode = #tpu.pipeline_mode<synchronous>, transform_indices = @transform_7, window_bounds = array<i64: 32, 128>}, {pipeline_mode = #tpu.pipeline_mode<synchronous>, transform_indices = @transform_8, window_bounds = array<i64: 1, 128>}, {pipeline_mode = #tpu.pipeline_mode<synchronous>, transform_indices = @transform_9, window_bounds = array<i64: 128, 32>}, {pipeline_mode = #tpu.pipeline_mode<synchronous>, transform_indices = @transform_10, window_bounds = array<i64: 1, 32>}, {pipeline_mode = #tpu.pipeline_mode<synchronous>, transform_indices = @transform_11, window_bounds = array<i64: 1, 32>}, {transform_indices = @transform_12, window_bounds = array<i64: 1, 16, 16, 32>}]} {
    %c0_i32 = arith.constant 0 : i32
    %0 = arith.cmpi eq, %arg1, %c0_i32 : i32
    %c0 = arith.constant 0 : index
    %c0_0 = arith.constant 0 : index
    %c0_1 = arith.constant 0 : index
    %c0_2 = arith.constant 0 : index
    %1 = vector.load %arg3[%c0, %c0_0, %c0_1, %c0_2] : memref<1x1x16x32xf32, #tpu.memory_space<vmem>>, vector<1x1x16x32xf32>
    %2 = vector.shape_cast %1 : vector<1x1x16x32xf32> to vector<1x16x32xf32>
    %cst = arith.constant 0.000000e+00 : f32
    %3 = vector.broadcast %cst : f32 to vector<1x16x32xf32>
    %4 = arith.select %0, %3, %2 : vector<1x16x32xf32>
    %c0_i32_3 = arith.constant 0 : i32
    %5 = arith.cmpi eq, %arg1, %c0_i32_3 : i32
    %c0_4 = arith.constant 0 : index
    %c0_5 = arith.constant 0 : index
    %c0_6 = arith.constant 0 : index
    %c0_7 = arith.constant 0 : index
    %6 = vector.load %arg4[%c0_4, %c0_5, %c0_6, %c0_7] : memref<1x1x16x32xf32, #tpu.memory_space<vmem>>, vector<1x1x16x32xf32>
    %7 = vector.shape_cast %6 : vector<1x1x16x32xf32> to vector<1x16x32xf32>
    %cst_8 = arith.constant 0.000000e+00 : f32
    %8 = vector.broadcast %cst_8 : f32 to vector<1x16x32xf32>
    %9 = arith.select %5, %8, %7 : vector<1x16x32xf32>
    %c0_9 = arith.constant 0 : index
    %c0_10 = arith.constant 0 : index
    %c0_11 = arith.constant 0 : index
    %c0_12 = arith.constant 0 : index
    %10 = vector.load %arg2[%c0_9, %c0_10, %c0_11, %c0_12] : memref<1x16x16x32xf32, #tpu.memory_space<vmem>>, vector<1x16x16x32xf32>
    %11 = vector.shape_cast %10 : vector<1x16x16x32xf32> to vector<16x16x32xf32>
    %12 = tpu.concatenate %4, %11, %9 in 0 : vector<1x16x32xf32>, vector<16x16x32xf32>, vector<1x16x32xf32> -> vector<18x16x32xf32>
    %cst_13 = arith.constant 0.000000e+00 : f32
    %13 = vector.broadcast %cst_13 : f32 to vector<18x8x32xf32>
    %14 = tpu.concatenate %13, %12, %13 in 1 : vector<18x8x32xf32>, vector<18x16x32xf32>, vector<18x8x32xf32> -> vector<18x32x32xf32>
    %15 = vector.extract_strided_slice %14 {offsets = [0, 7, 0], sizes = [18, 16, 32], strides = [1, 1, 1]} : vector<18x32x32xf32> to vector<18x16x32xf32>
    %16 = vector.extract_strided_slice %14 {offsets = [0, 9, 0], sizes = [18, 16, 32], strides = [1, 1, 1]} : vector<18x32x32xf32> to vector<18x16x32xf32>
    %c0_14 = arith.constant 0 : index
    %c0_15 = arith.constant 0 : index
    %c0_16 = arith.constant 0 : index
    %17 = vector.load %arg5[%c0_14, %c0_15, %c0_16] : memref<3x3x32xf32, #tpu.memory_space<vmem>>, vector<3x3x32xf32>
    %c0_17 = arith.constant 0 : index
    %c0_18 = arith.constant 0 : index
    %18 = vector.load %arg6[%c0_17, %c0_18] : memref<1x32xf32, #tpu.memory_space<vmem>>, vector<1x32xf32>
    %19 = vector.shape_cast %18 : vector<1x32xf32> to vector<32xf32>
    %20 = vector.shape_cast %19 : vector<32xf32> to vector<1x1x32xf32>
    %21 = vector.broadcast %20 : vector<1x1x32xf32> to vector<16x16x32xf32>
    %22 = vector.extract_strided_slice %15 {offsets = [0, 0, 0], sizes = [16, 16, 32], strides = [1, 1, 1]} : vector<18x16x32xf32> to vector<16x16x32xf32>
    %23 = vector.extract_strided_slice %17 {offsets = [0, 0, 0], sizes = [1, 1, 32], strides = [1, 1, 1]} : vector<3x3x32xf32> to vector<1x1x32xf32>
    %24 = vector.shape_cast %23 : vector<1x1x32xf32> to vector<32xf32>
    %25 = vector.shape_cast %24 : vector<32xf32> to vector<1x1x32xf32>
    %26 = vector.broadcast %25 : vector<1x1x32xf32> to vector<16x16x32xf32>
    %27 = arith.mulf %22, %26 : vector<16x16x32xf32>
    %28 = arith.addf %21, %27 : vector<16x16x32xf32>
    %29 = vector.extract_strided_slice %12 {offsets = [0, 0, 0], sizes = [16, 16, 32], strides = [1, 1, 1]} : vector<18x16x32xf32> to vector<16x16x32xf32>
    %30 = vector.extract_strided_slice %17 {offsets = [0, 1, 0], sizes = [1, 1, 32], strides = [1, 1, 1]} : vector<3x3x32xf32> to vector<1x1x32xf32>
    %31 = vector.shape_cast %30 : vector<1x1x32xf32> to vector<32xf32>
    %32 = vector.shape_cast %31 : vector<32xf32> to vector<1x1x32xf32>
    %33 = vector.broadcast %32 : vector<1x1x32xf32> to vector<16x16x32xf32>
    %34 = arith.mulf %29, %33 : vector<16x16x32xf32>
    %35 = arith.addf %28, %34 : vector<16x16x32xf32>
    %36 = vector.extract_strided_slice %16 {offsets = [0, 0, 0], sizes = [16, 16, 32], strides = [1, 1, 1]} : vector<18x16x32xf32> to vector<16x16x32xf32>
    %37 = vector.extract_strided_slice %17 {offsets = [0, 2, 0], sizes = [1, 1, 32], strides = [1, 1, 1]} : vector<3x3x32xf32> to vector<1x1x32xf32>
    %38 = vector.shape_cast %37 : vector<1x1x32xf32> to vector<32xf32>
    %39 = vector.shape_cast %38 : vector<32xf32> to vector<1x1x32xf32>
    %40 = vector.broadcast %39 : vector<1x1x32xf32> to vector<16x16x32xf32>
    %41 = arith.mulf %36, %40 : vector<16x16x32xf32>
    %42 = arith.addf %35, %41 : vector<16x16x32xf32>
    %43 = vector.extract_strided_slice %15 {offsets = [1, 0, 0], sizes = [16, 16, 32], strides = [1, 1, 1]} : vector<18x16x32xf32> to vector<16x16x32xf32>
    %44 = vector.extract_strided_slice %17 {offsets = [1, 0, 0], sizes = [1, 1, 32], strides = [1, 1, 1]} : vector<3x3x32xf32> to vector<1x1x32xf32>
    %45 = vector.shape_cast %44 : vector<1x1x32xf32> to vector<32xf32>
    %46 = vector.shape_cast %45 : vector<32xf32> to vector<1x1x32xf32>
    %47 = vector.broadcast %46 : vector<1x1x32xf32> to vector<16x16x32xf32>
    %48 = arith.mulf %43, %47 : vector<16x16x32xf32>
    %49 = arith.addf %42, %48 : vector<16x16x32xf32>
    %50 = vector.extract_strided_slice %12 {offsets = [1, 0, 0], sizes = [16, 16, 32], strides = [1, 1, 1]} : vector<18x16x32xf32> to vector<16x16x32xf32>
    %51 = vector.extract_strided_slice %17 {offsets = [1, 1, 0], sizes = [1, 1, 32], strides = [1, 1, 1]} : vector<3x3x32xf32> to vector<1x1x32xf32>
    %52 = vector.shape_cast %51 : vector<1x1x32xf32> to vector<32xf32>
    %53 = vector.shape_cast %52 : vector<32xf32> to vector<1x1x32xf32>
    %54 = vector.broadcast %53 : vector<1x1x32xf32> to vector<16x16x32xf32>
    %55 = arith.mulf %50, %54 : vector<16x16x32xf32>
    %56 = arith.addf %49, %55 : vector<16x16x32xf32>
    %57 = vector.extract_strided_slice %16 {offsets = [1, 0, 0], sizes = [16, 16, 32], strides = [1, 1, 1]} : vector<18x16x32xf32> to vector<16x16x32xf32>
    %58 = vector.extract_strided_slice %17 {offsets = [1, 2, 0], sizes = [1, 1, 32], strides = [1, 1, 1]} : vector<3x3x32xf32> to vector<1x1x32xf32>
    %59 = vector.shape_cast %58 : vector<1x1x32xf32> to vector<32xf32>
    %60 = vector.shape_cast %59 : vector<32xf32> to vector<1x1x32xf32>
    %61 = vector.broadcast %60 : vector<1x1x32xf32> to vector<16x16x32xf32>
    %62 = arith.mulf %57, %61 : vector<16x16x32xf32>
    %63 = arith.addf %56, %62 : vector<16x16x32xf32>
    %64 = vector.extract_strided_slice %15 {offsets = [2, 0, 0], sizes = [16, 16, 32], strides = [1, 1, 1]} : vector<18x16x32xf32> to vector<16x16x32xf32>
    %65 = vector.extract_strided_slice %17 {offsets = [2, 0, 0], sizes = [1, 1, 32], strides = [1, 1, 1]} : vector<3x3x32xf32> to vector<1x1x32xf32>
    %66 = vector.shape_cast %65 : vector<1x1x32xf32> to vector<32xf32>
    %67 = vector.shape_cast %66 : vector<32xf32> to vector<1x1x32xf32>
    %68 = vector.broadcast %67 : vector<1x1x32xf32> to vector<16x16x32xf32>
    %69 = arith.mulf %64, %68 : vector<16x16x32xf32>
    %70 = arith.addf %63, %69 : vector<16x16x32xf32>
    %71 = vector.extract_strided_slice %12 {offsets = [2, 0, 0], sizes = [16, 16, 32], strides = [1, 1, 1]} : vector<18x16x32xf32> to vector<16x16x32xf32>
    %72 = vector.extract_strided_slice %17 {offsets = [2, 1, 0], sizes = [1, 1, 32], strides = [1, 1, 1]} : vector<3x3x32xf32> to vector<1x1x32xf32>
    %73 = vector.shape_cast %72 : vector<1x1x32xf32> to vector<32xf32>
    %74 = vector.shape_cast %73 : vector<32xf32> to vector<1x1x32xf32>
    %75 = vector.broadcast %74 : vector<1x1x32xf32> to vector<16x16x32xf32>
    %76 = arith.mulf %71, %75 : vector<16x16x32xf32>
    %77 = arith.addf %70, %76 : vector<16x16x32xf32>
    %78 = vector.extract_strided_slice %16 {offsets = [2, 0, 0], sizes = [16, 16, 32], strides = [1, 1, 1]} : vector<18x16x32xf32> to vector<16x16x32xf32>
    %79 = vector.extract_strided_slice %17 {offsets = [2, 2, 0], sizes = [1, 1, 32], strides = [1, 1, 1]} : vector<3x3x32xf32> to vector<1x1x32xf32>
    %80 = vector.shape_cast %79 : vector<1x1x32xf32> to vector<32xf32>
    %81 = vector.shape_cast %80 : vector<32xf32> to vector<1x1x32xf32>
    %82 = vector.broadcast %81 : vector<1x1x32xf32> to vector<16x16x32xf32>
    %83 = arith.mulf %78, %82 : vector<16x16x32xf32>
    %84 = arith.addf %77, %83 : vector<16x16x32xf32>
    %cst_19 = arith.constant dense<0.000000e+00> : vector<16x16xf32>
    %85 = vector.multi_reduction <add>, %84, %cst_19 [2] : vector<16x16x32xf32> to vector<16x16xf32>
    %86 = vector.shape_cast %85 : vector<16x16xf32> to vector<16x16x1xf32>
    %cst_20 = arith.constant 3.125000e-02 : f32
    %87 = vector.broadcast %cst_20 : f32 to vector<16x16x1xf32>
    %88 = arith.mulf %86, %87 : vector<16x16x1xf32>
    %89 = arith.mulf %84, %84 : vector<16x16x32xf32>
    %cst_21 = arith.constant dense<0.000000e+00> : vector<16x16xf32>
    %90 = vector.multi_reduction <add>, %89, %cst_21 [2] : vector<16x16x32xf32> to vector<16x16xf32>
    %91 = vector.shape_cast %90 : vector<16x16xf32> to vector<16x16x1xf32>
    %cst_22 = arith.constant 3.125000e-02 : f32
    %92 = vector.broadcast %cst_22 : f32 to vector<16x16x1xf32>
    %93 = arith.mulf %91, %92 : vector<16x16x1xf32>
    %94 = arith.mulf %88, %88 : vector<16x16x1xf32>
    %95 = arith.subf %93, %94 : vector<16x16x1xf32>
    %96 = vector.broadcast %88 : vector<16x16x1xf32> to vector<16x16x32xf32>
    %97 = arith.subf %84, %96 : vector<16x16x32xf32>
    %cst_23 = arith.constant 9.99999997E-7 : f32
    %98 = vector.broadcast %cst_23 : f32 to vector<16x16x1xf32>
    %99 = arith.addf %95, %98 : vector<16x16x1xf32>
    %100 = math.rsqrt %99 : vector<16x16x1xf32>
    %101 = vector.broadcast %100 : vector<16x16x1xf32> to vector<16x16x32xf32>
    %102 = arith.mulf %97, %101 : vector<16x16x32xf32>
    %c0_24 = arith.constant 0 : index
    %c0_25 = arith.constant 0 : index
    %103 = vector.load %arg7[%c0_24, %c0_25] : memref<1x32xf32, #tpu.memory_space<vmem>>, vector<1x32xf32>
    %104 = vector.shape_cast %103 : vector<1x32xf32> to vector<32xf32>
    %105 = vector.shape_cast %104 : vector<32xf32> to vector<1x1x32xf32>
    %106 = vector.broadcast %105 : vector<1x1x32xf32> to vector<16x16x32xf32>
    %107 = arith.mulf %102, %106 : vector<16x16x32xf32>
    %c0_26 = arith.constant 0 : index
    %c0_27 = arith.constant 0 : index
    %108 = vector.load %arg8[%c0_26, %c0_27] : memref<1x32xf32, #tpu.memory_space<vmem>>, vector<1x32xf32>
    %109 = vector.shape_cast %108 : vector<1x32xf32> to vector<32xf32>
    %110 = vector.shape_cast %109 : vector<32xf32> to vector<1x1x32xf32>
    %111 = vector.broadcast %110 : vector<1x1x32xf32> to vector<16x16x32xf32>
    %112 = arith.addf %107, %111 : vector<16x16x32xf32>
    %113 = vector.shape_cast %112 : vector<16x16x32xf32> to vector<256x32xf32>
    %114 = arith.truncf %113 : vector<256x32xf32> to vector<256x32xbf16>
    %c0_28 = arith.constant 0 : index
    %c0_29 = arith.constant 0 : index
    %115 = vector.load %arg9[%c0_28, %c0_29] : memref<32x128xbf16, #tpu.memory_space<vmem>>, vector<32x128xbf16>
    %cst_30 = arith.constant dense<0.000000e+00> : vector<256x128xf32>
    %116 = tpu.matmul %114, %115, %cst_30 {dimension_numbers = #tpu.dot_dimension_numbers<[1], [0], [0], [1], [0, 0, 1, 1], [], []>} : vector<256x32xbf16>, vector<32x128xbf16>, vector<256x128xf32> -> vector<256x128xf32>
    %c0_31 = arith.constant 0 : index
    %c0_32 = arith.constant 0 : index
    %117 = vector.load %arg10[%c0_31, %c0_32] : memref<1x128xf32, #tpu.memory_space<vmem>>, vector<1x128xf32>
    %118 = vector.shape_cast %117 : vector<1x128xf32> to vector<128xf32>
    %119 = vector.shape_cast %118 : vector<128xf32> to vector<1x128xf32>
    %120 = vector.broadcast %119 : vector<1x128xf32> to vector<256x128xf32>
    %121 = arith.addf %116, %120 : vector<256x128xf32>
    %122 = arith.mulf %121, %121 : vector<256x128xf32>
    %123 = arith.mulf %122, %121 : vector<256x128xf32>
    %cst_33 = arith.constant 5.000000e-01 : f32
    %124 = vector.broadcast %cst_33 : f32 to vector<256x128xf32>
    %125 = arith.mulf %124, %121 : vector<256x128xf32>
    %cst_34 = arith.constant 4.471500e-02 : f32
    %126 = vector.broadcast %cst_34 : f32 to vector<256x128xf32>
    %127 = arith.mulf %126, %123 : vector<256x128xf32>
    %128 = arith.addf %121, %127 : vector<256x128xf32>
    %cst_35 = arith.constant 0.797884583 : f32
    %129 = vector.broadcast %cst_35 : f32 to vector<256x128xf32>
    %130 = arith.mulf %129, %128 : vector<256x128xf32>
    %131 = math.tanh %130 : vector<256x128xf32>
    %cst_36 = arith.constant 1.000000e+00 : f32
    %132 = vector.broadcast %cst_36 : f32 to vector<256x128xf32>
    %133 = arith.addf %132, %131 : vector<256x128xf32>
    %134 = arith.mulf %125, %133 : vector<256x128xf32>
    %135 = arith.truncf %134 : vector<256x128xf32> to vector<256x128xbf16>
    %c0_37 = arith.constant 0 : index
    %c0_38 = arith.constant 0 : index
    %136 = vector.load %arg11[%c0_37, %c0_38] : memref<128x32xbf16, #tpu.memory_space<vmem>>, vector<128x32xbf16>
    %cst_39 = arith.constant dense<0.000000e+00> : vector<256x32xf32>
    %137 = tpu.matmul %135, %136, %cst_39 {dimension_numbers = #tpu.dot_dimension_numbers<[1], [0], [0], [1], [0, 0, 1, 1], [], []>} : vector<256x128xbf16>, vector<128x32xbf16>, vector<256x32xf32> -> vector<256x32xf32>
    %c0_40 = arith.constant 0 : index
    %c0_41 = arith.constant 0 : index
    %138 = vector.load %arg12[%c0_40, %c0_41] : memref<1x32xf32, #tpu.memory_space<vmem>>, vector<1x32xf32>
    %139 = vector.shape_cast %138 : vector<1x32xf32> to vector<32xf32>
    %140 = vector.shape_cast %139 : vector<32xf32> to vector<1x32xf32>
    %141 = vector.broadcast %140 : vector<1x32xf32> to vector<256x32xf32>
    %142 = arith.addf %137, %141 : vector<256x32xf32>
    %c0_42 = arith.constant 0 : index
    %c0_43 = arith.constant 0 : index
    %143 = vector.load %arg13[%c0_42, %c0_43] : memref<1x32xf32, #tpu.memory_space<vmem>>, vector<1x32xf32>
    %144 = vector.shape_cast %143 : vector<1x32xf32> to vector<32xf32>
    %145 = vector.shape_cast %144 : vector<32xf32> to vector<1x32xf32>
    %146 = vector.broadcast %145 : vector<1x32xf32> to vector<256x32xf32>
    %147 = arith.mulf %142, %146 : vector<256x32xf32>
    %148 = vector.shape_cast %147 : vector<256x32xf32> to vector<16x16x32xf32>
    %c0_44 = arith.constant 0 : index
    %c0_45 = arith.constant 0 : index
    %c0_46 = arith.constant 0 : index
    %c0_47 = arith.constant 0 : index
    %149 = vector.load %arg14[%c0_44, %c0_45, %c0_46, %c0_47] : memref<1x16x16x32xf32, #tpu.memory_space<vmem>>, vector<1x16x16x32xf32>
    %150 = vector.shape_cast %149 : vector<1x16x16x32xf32> to vector<16x16x32xf32>
    %151 = vector.shape_cast %148 : vector<16x16x32xf32> to vector<1x16x16x32xf32>
    tpu.vector_store %arg14[%c0_44, %c0_45, %c0_46, %c0_47], %151 {strides = array<i32>} : memref<1x16x16x32xf32, #tpu.memory_space<vmem>>, vector<1x16x16x32xf32>,
    return
  }
  func.func @transform_0(%arg0: i32, %arg1: i32) -> (i32, i32, i32, i32) {
    %c0_i32 = arith.constant 0 : i32
    %c0_i32_0 = arith.constant 0 : i32
    %c0_i32_1 = arith.constant 0 : i32
    return %arg0, %arg1, %c0_i32, %c0_i32_0 : i32, i32, i32, i32
  }
  func.func @transform_1(%arg0: i32, %arg1: i32) -> (i32, i32, i32, i32) {
    %c16_i32 = arith.constant 16 : i32
    %0 = arith.muli %arg1, %c16_i32 : i32
    %c1_i32 = arith.constant 1 : i32
    %1 = arith.subi %0, %c1_i32 : i32
    %c0_i32 = arith.constant 0 : i32
    %2 = arith.maxsi %1, %c0_i32 : i32
    %c0_i32_0 = arith.constant 0 : i32
    %c0_i32_1 = arith.constant 0 : i32
    %c0_i32_2 = arith.constant 0 : i32
    return %arg0, %2, %c0_i32_0, %c0_i32_1 : i32, i32, i32, i32
  }
  func.func @transform_2(%arg0: i32, %arg1: i32) -> (i32, i32, i32, i32) {
    %c1_i32 = arith.constant 1 : i32
    %0 = arith.addi %arg1, %c1_i32 : i32
    %c16_i32 = arith.constant 16 : i32
    %1 = arith.muli %0, %c16_i32 : i32
    %c15_i32 = arith.constant 15 : i32
    %2 = arith.minsi %1, %c15_i32 : i32
    %c0_i32 = arith.constant 0 : i32
    %c0_i32_0 = arith.constant 0 : i32
    %c0_i32_1 = arith.constant 0 : i32
    return %arg0, %2, %c0_i32, %c0_i32_0 : i32, i32, i32, i32
  }
  func.func @transform_3(%arg0: i32, %arg1: i32) -> (i32, i32, i32) {
    %c0_i32 = arith.constant 0 : i32
    %c0_i32_0 = arith.constant 0 : i32
    %c0_i32_1 = arith.constant 0 : i32
    %c0_i32_2 = arith.constant 0 : i32
    return %c0_i32, %c0_i32_0, %c0_i32_1 : i32, i32, i32
  }
  func.func @transform_4(%arg0: i32, %arg1: i32) -> (i32, i32) {
    %c0_i32 = arith.constant 0 : i32
    %c0_i32_0 = arith.constant 0 : i32
    %c0_i32_1 = arith.constant 0 : i32
    return %c0_i32, %c0_i32_0 : i32, i32
  }
  func.func @transform_5(%arg0: i32, %arg1: i32) -> (i32, i32) {
    %c0_i32 = arith.constant 0 : i32
    %c0_i32_0 = arith.constant 0 : i32
    %c0_i32_1 = arith.constant 0 : i32
    return %c0_i32, %c0_i32_0 : i32, i32
  }
  func.func @transform_6(%arg0: i32, %arg1: i32) -> (i32, i32) {
    %c0_i32 = arith.constant 0 : i32
    %c0_i32_0 = arith.constant 0 : i32
    %c0_i32_1 = arith.constant 0 : i32
    return %c0_i32, %c0_i32_0 : i32, i32
  }
  func.func @transform_7(%arg0: i32, %arg1: i32) -> (i32, i32) {
    %c0_i32 = arith.constant 0 : i32
    %c0_i32_0 = arith.constant 0 : i32
    %c0_i32_1 = arith.constant 0 : i32
    return %c0_i32, %c0_i32_0 : i32, i32
  }
  func.func @transform_8(%arg0: i32, %arg1: i32) -> (i32, i32) {
    %c0_i32 = arith.constant 0 : i32
    %c0_i32_0 = arith.constant 0 : i32
    %c0_i32_1 = arith.constant 0 : i32
    return %c0_i32, %c0_i32_0 : i32, i32
  }
  func.func @transform_9(%arg0: i32, %arg1: i32) -> (i32, i32) {
    %c0_i32 = arith.constant 0 : i32
    %c0_i32_0 = arith.constant 0 : i32
    %c0_i32_1 = arith.constant 0 : i32
    return %c0_i32, %c0_i32_0 : i32, i32
  }
  func.func @transform_10(%arg0: i32, %arg1: i32) -> (i32, i32) {
    %c0_i32 = arith.constant 0 : i32
    %c0_i32_0 = arith.constant 0 : i32
    %c0_i32_1 = arith.constant 0 : i32
    return %c0_i32, %c0_i32_0 : i32, i32
  }
  func.func @transform_11(%arg0: i32, %arg1: i32) -> (i32, i32) {
    %c0_i32 = arith.constant 0 : i32
    %c0_i32_0 = arith.constant 0 : i32
    %c0_i32_1 = arith.constant 0 : i32
    return %c0_i32, %c0_i32_0 : i32, i32
  }
  func.func @transform_12(%arg0: i32, %arg1: i32) -> (i32, i32, i32, i32) {
    %c0_i32 = arith.constant 0 : i32
    %c0_i32_0 = arith.constant 0 : i32
    %c0_i32_1 = arith.constant 0 : i32
    return %arg0, %arg1, %c0_i32, %c0_i32_0 : i32, i32, i32, i32
  }
}

</mosaic_0001>

<bundles_post_ra>
// kernel: tpu_custom_call.1
= control target key start
LH: loop header
LB: loop body
LE: loop exit
PB: predicated region body
PF: predicated region fallthrough
CT: control target
= control target key end

     0   :  { %s9132_s0 = inlined_call_operand.hbm [shape: f32[2,16,16,32], index: 0, kind: input, shape index: {}]   ;;  %s9133_s1 = inlined_call_operand.hbm [shape: f32[2,16,16,32], index: 1, kind: input, shape index: {}]   ;;  %s9134_s2 = inlined_call_operand.hbm [shape: f32[2,16,16,32], index: 2, kind: input, shape index: {}]   ;;  %s9135_s3 = inlined_call_operand.vmem [shape: f32[3,3,32], index: 3, kind: input, shape index: {}]   ;;  %s9136_s4 = inlined_call_operand.vmem [shape: f32[1,32], index: 4, kind: input, shape index: {}]   ;;  %s9137_s5 = inlined_call_operand.vmem [shape: f32[1,32], index: 5, kind: input, shape index: {}]   ;;  %s9138_s6 = inlined_call_operand.vmem [shape: f32[1,32], index: 6, kind: input, shape index: {}]   ;;  %s9139_s7 = inlined_call_operand.vmem [shape: bf16[32,128], index: 7, kind: input, shape index: {}]   ;;  %s9140_s8 = inlined_call_operand.vmem [shape: f32[1,128], index: 8, kind: input, shape index: {}]   ;;  %s9141_s9 = inlined_call_operand.vmem [shape: bf16[128,32], index: 9, kind: input, shape index: {}]   ;;  %s9142_s10 = inlined_call_operand.vmem [shape: f32[1,32], index: 10, kind: input, shape index: {}]   ;;  %s9143_s11 = inlined_call_operand.vmem [shape: f32[1,32], index: 11, kind: input, shape index: {}]   ;;  %s9144_s12 = inlined_call_operand.hbm [shape: f32[2,16,16,32], index: 12, kind: output, shape index: {}]  }
   0x1   :  { %9278 = sst [smem:[#allocation58_spill]] %s9133_s1 }
   0x2   :  { %9279 = sst [smem:[#allocation59_spill]] %s9140_s8 }
   0x3   :  { %9280 = sst [smem:[#allocation60_spill]] %s9141_s9 }
   0x4   :  { %9281 = sst [smem:[#allocation61_spill]] %s9142_s10 }
   0x5   :  { %9282 = sst [smem:[#allocation62_spill]] %s9143_s11 }
   0x6   :  { %9283 = sst [smem:[#allocation63_spill]] %s9144_s12 }
   0x7   :  { %17 = vsyncpa [#allocation3], 0 }
   0x8   :  { %19 = vsyncpa [#allocation3 + $0x1], 0 }
   0x9   :  { %20 = vsyncpa [#allocation6], 0 }
   0xa   :  { %22 = vsyncpa [#allocation6 + $0x1], 0 }
   0xb   :  { %23 = vsyncpa [#allocation4], 0 }
   0xc   :  { %25 = vsyncpa [#allocation4 + $0x1], 0  ;;  %s5053_s21 = smov 0   ;;  %s5055_s22 = smov 0  }
   0xd   :  { %s5057_s23 = smov 0   ;;  %s5059_s24 = smov 0  }
   0xe   :  { %s5061_s25 = smov 0   ;;  %s5063_s26 = smov 0  }
   0xf LB: > { %9284 = sst [smem:[#allocation12_spill]] %s4962_s21  ;;  %s5084_s27 = sadd.s32 4294967295, %s4982_s26   ;;  %s4982_s26 = sphi %s5063_s26, %s31_s26   ;;  %s4978_s25 = sphi %s5061_s25, %s9609_s25   ;;  %s4974_s24 = sphi %s5059_s24, %s9608_s24   ;;  %s4970_s23 = sphi %s5057_s23, %s9607_s23   ;;  %s4966_s22 = sphi %s5055_s22, %s9611_s22   ;;  %s4962_s21 = sphi %s5053_s21, %s9610_s21  }
  0x10   : > { %9285 = sst [smem:[#allocation13_spill]] %s4970_s23  ;;  %s4450_s28 = sadd.s32 4294967294, %s4982_s26  }
  0x11   : > { %9286 = sst [smem:[#allocation14_spill]] %s4974_s24  ;;  %s43_s29 = sadd.s32 1, %s4978_s25 }
  0x12   : > { %9287 = sst [smem:[#allocation15_spill]] %s4978_s25  ;;  %s52_s30 = sadd.s32 1, %s4970_s23 }
  0x13   : > { %9288 = sst [smem:[#allocation16_spill]] %s4982_s26  ;;  %p45_p0 = scmp.ge.s32.totalorder %s43_s29, 2 }
  0x14   : > { %p59_p1 = scmp.ne.s32.totalorder %s4970_s23, %s4966_s22  ;;  %p60_p2 = scmp.eq.s32.totalorder %s4982_s26, 0 }
  0x15   : > { %p65_p3 = scmp.ne.s32.totalorder %s4966_s22, %s4962_s21  ;;  %s9613_s29 = smov (%p45_p0, %s43_s29), 0 }
  0x16   : > { %9289 = sst [smem:[#allocation17_spill]] %s9613_s29  ;;  %p5096_p4 = por %p60_p2, %p59_p1 }
  0x17   : > { %p66_p5 = scmp.eq.s32.totalorder %s5084_s27, 0  ;;  %s47_s14 = ssub.s32 %s4978_s25, %s9613_s29 }
  0x18   : > { %p352_p6 = scmp.eq.s32.totalorder %s5084_s27, 1  ;;  %p50_p7 = scmp.eq.s32.totalorder %s47_s14, 0 }
  0x19   : > { %p5104_p8 = por %p66_p5, %p65_p3  ;;  %p358_p10 = scmp.eq.s32.totalorder %s4450_s28, 1 }
  0x1a   : > { %p5108_p9 = por %p352_p6, %p59_p1  ;;  %p4452_p12 = scmp.ge.s32.totalorder %s4982_s26, 2 }
  0x1b   : > { %s5113_s17 = scalar_select %p50_p7, %s4970_s23, %s52_s30  }
  0x1c   : > { %s9292_s16 = scalar_select %p5108_p9, 1, 0 }
  0x1d   : > { %9294 = sst [smem:[#allocation19_spill]] %s5113_s17  ;;  %p5115_p11 = por %p358_p10, %p65_p3 }
  0x1e   : > { %9293 = sst [smem:[#allocation18_spill]] %s9292_s16  ;;  %p4576_p13 = scmp.lt.s32.totalorder %s4982_s26, 2 }
  0x1f   : > { %s9295_s18 = scalar_select %p5115_p11, 1, 0 }
  0x20   : > { %s5122_s19 = sand.u32 1, %s4970_s23   ;;  %s5125_s20 = sshll.u32 %s4978_s25, 8 }
  0x21   : > { %9296 = sst [smem:[#allocation20_spill]] %s9295_s18  ;;  %p5129_p0 = pnand %p4576_p13, %p5096_p4 }
  0x22   : > { %s430_s28 = sand.u32 1, %s4982_s26   ;;  %s4456_s30 = sshll.u32 %s5122_s19, 4 }
  0x23   : > { %s9298_s1 = sld [smem:[#allocation58_spill]]  ;;  %s434_s21 = scalar_lea.vmem [#allocation5], %s4456_s30 }
  0x24   : > { %s448_s16 = sshll.u32 %s434_s21, 4  ;;  %s431_s13 = scalar_lea.sflag [#allocation6], %s430_s28  ;;  %s449_s16 = int_to_ptr.vmem [resolvable:$true] %s448_s16 }
  0x25   : > { %s4984_s25 = smov 128   ;;  %s4985_s12 = smov 8  }
  0x26   : > { %p4462_p1 = scmp.ge.s32.totalorder %s4982_s26, 1  ;;  %p484_p2 = scmp.lt.s32.totalorder %s4982_s26, 3 }
  0x27   : > { %s462_s24 = scalar_lea.vmem [#allocation7], %s4456_s30  ;;  %s4453_s21 = sshll.u32 %s5122_s19, 8 }
  0x28   : > { %s476_s29 = sshll.u32 %s462_s24, 4  ;;  %p5143_p3 = pnand %p4462_p1, %p484_p2  ;;  %s477_s29 = int_to_ptr.vmem [resolvable:$true] %s476_s29 }
  0x29   : > { %s445_s18 = scalar_lea.hbm %s9298_s1, %s5125_s20  ;;  %s417_s28 = scalar_lea.hbm %s9132_s0, %s5125_s20 }
  0x2a   : > { %s446_s23 = sshll.u32 %s445_s18, 4  ;;  %s418_s11 = sshll.u32 %s417_s28, 4  ;;  %s447_s23 = int_to_ptr.hbm [resolvable:$true] %s446_s23  ;;  %s419_s11 = int_to_ptr.hbm [resolvable:$true] %s418_s11 }
  0x2b   : > { %4568 = dma.hbm_to_vmem [thread:$0]  (!%p5129_p0), %s447_s23, 256, %s449_s16, %s431_s13, %s4984_s25, %s4984_s25, %s4985_s12  }
  0x2c   : > { %s409_s10 = scalar_lea.vmem [#allocation2], %s4453_s21  ;;  %s406_s23 = scalar_lea.sflag [#allocation3], %s5122_s19 }
  0x2d   : > { %s420_s8 = sshll.u32 %s409_s10, 4  ;;  %s4531_s16 = sadd.s32 240, %s5125_s20  ;;  %s421_s8 = int_to_ptr.vmem [resolvable:$true] %s420_s8 }
  0x2e   : > { %4565 = dma.hbm_to_vmem [thread:$0]  (!%p5129_p0), %s419_s11, 4096, %s421_s8, %s406_s23, %s4984_s25, %s4984_s25, %s4985_s12  }
  0x2f   : > { %s473_s26 = scalar_lea.hbm %s9134_s2, %s4531_s16  ;;  %488 = sbr.rel (%p5143_p3) target bundleno = 963 (0x3c3), region = 68 }
  0x30   : > { %s474_s9 = sshll.u32 %s473_s26, 4  ;;  %s475_s9 = int_to_ptr.hbm [resolvable:$true] %s474_s9 }
  0x31   : > { %4571 = dma.hbm_to_vmem [thread:$0]  (!%p5129_p0), %s475_s9, 256, %s477_s29, %s431_s13, %s4984_s25, %s4984_s25, %s4985_s12  }
  0x34   : > { %s5164_s1 = sand.u32 1, %s4966_s22  }
  0x35   : > { %s4463_s8 = sshll.u32 %s5164_s1, 8  ;;  %s491_s10 = scalar_lea.sflag [#allocation3], %s5164_s1 }
  0x36   : > { %s5170_s11 = scalar_lea.vmem [#allocation2], %s4463_s8 }
  0x37   : > { %4949 = dma.done.wait (%p5104_p8), %s491_s10, 4096  }
  0x38   : > { %4951 = vsyncadd (%p5104_p8), %s491_s10, 4294963200  ;;  %s500_s9 = sand.u32 1, %s5084_s27  }
  0x39   : > { %s501_s12 = scalar_lea.sflag [#allocation6], %s500_s9 }
  0x3a   : > { %4953 = dma.done.wait (%p5104_p8), %s501_s12, 512  }
  0x3b   : > { %4955 = vsyncadd (%p5104_p8), %s501_s12, 4294966784  ;;  %v621_v0 = vld [vmem:[%s9135_s3] sm:$0x7]  ;;  %vm972_vm0 = vcmask 1045504   ;;  %v622_v1 = vld [vmem:[%s9135_s3 + $0x4] sm:$0x7] }
  0x3c   : > { %v623_v2 = vld [vmem:[%s9135_s3 + $0x8] sm:$0x7]  ;;  %v5196_v4 = vld [vmem:[%s9136_s4] ss:$0 sm:$0xff]  ;;  %v5198_v5 = vperm.slane %v621_v0, 0  ;;  %v5200_v6 = vperm.slane %v621_v0, 1 }
  0x3d   : > { %v5191_v3 = vld [vmem:[%s5170_s11 + $0x8] sm:$0xff]  ;;  %v5202_v7 = vperm.slane %v621_v0, 2  ;;  %vm760_vm1 = vcmask 1046528   ;;  %v5204_v8 = vperm.slane %v622_v1, 0  ;;  %v5206_v9 = vperm.slane %v622_v1, 1  ;;  %v5213_v12 = vld [vmem:[%s5170_s11 + $0x18] sm:$0xff] }
  0x3e   : > { %v5208_v10 = vperm.slane %v622_v1, 2  ;;  %v5210_v11 = vperm.slane %v623_v2, 1  ;;  %v629_v13 = vmul.f32 0.0, %v5198_v5  ;;  %v696_v14 = vmul.f32 0.0, %v5200_v6  ;;  %v5226_v20 = vld [vmem:[%s5170_s11] sm:$0xff]  ;;  %v5240_v28 = vld [vmem:[%s5170_s11 + $0x10] sm:$0xff] }
  0x3f   : > { %9300 = vst [vmem:[#allocation21_spill] sm:$0xff] %v5202_v7  ;;  %v906_v15 = vmul.f32 0.0, %v5202_v7  ;;  %v5218_v16 = vperm.slane %v623_v2, 0  ;;  %v1218_v17 = vmul.f32 %v5206_v9, %v5191_v3  ;;  %v5237_v27 = vperm.slane %v623_v2, 2  ;;  %v5281_v0 = vld [vmem:[%s5170_s11 + $0x20] sm:$0xff]  ;;  %s9532_s15 = sld [smem:[#allocation60_spill]] }
  0x40   : > { %9301 = vst [vmem:[#allocation22_spill] sm:$0xff] %v5206_v9  ;;  %v1427_v18 = vmul.f32 %v5208_v10, %v5191_v3  ;;  %v1428_v19 = vmul.f32 0.0, %v5208_v10  ;;  %v5229_v21 = vadd.f32 %v5196_v4, %v629_v13  ;;  %v761_v22 = vrot.slane %v696_v14, 1  ;;  %s9539_s16 = sld [smem:[#allocation59_spill]]  ;;  %s8954_s19 = scalar_lea.vmem [#allocation8], %s4463_s8 }
  0x41   : > { %9302 = vst [vmem:[#allocation23_spill] sm:$0xff] %v5208_v10  ;;  %v5231_v23 = vrot.slane %v906_v15, 2  ;;  %v1737_v26 = vmul.f32 %v5210_v11, %v5213_v12  ;;  %v1137_v30 = vmul.f32 %v5204_v8, %v5191_v3  ;;  %v5246_v31 = vmul.f32 0.0, %v5204_v8  ;;  %s9598_s9 = sld [smem:[#allocation61_spill]]  ;;  %s4310_s17 = sshll.u32 %s8954_s19, 4  ;;  %s4311_s17 = int_to_ptr.vmem [resolvable:$true] %s4310_s17 }
  0x42   : > { %9303 = vst [vmem:[#allocation24_spill] sm:$0xff] %v5229_v21  ;;  %v1493_v24 = vrot.slane %v1427_v18, 2  ;;  %v5233_v25 = vrot.slane %v1428_v19, 2  ;;  %v857_v29 = vadd.f32 %v761_v22, %v5229_v21  ;;  %v1217_v32 = vmul.f32 %v5206_v9, %v5226_v20  ;;  %s9599_s26 = sld [smem:[#allocation62_spill]]  ;;  %s4295_s18 = scalar_lea.sflag [#allocation4], %s5164_s1 }
  0x43   : > { %9304 = vst [vmem:[#allocation25_spill] sm:$0xff] %v5246_v31  ;;  %v1282_v33 = vrot.slane %v1218_v17, 1  ;;  %v1946_v34 = vmul.f32 %v5237_v27, %v5213_v12  ;;  %v1947_v35 = vmul.f32 0.0, %v5237_v27  ;;  %v1426_v36 = vmul.f32 %v5208_v10, %v5226_v20  ;;  %s9600_s8 = sld [smem:[#allocation14_spill]] }
  0x44   : > { %v1086_v37 = vadd.f32 %v5231_v23, %v857_v29  ;;  %v1656_v38 = vmul.f32 %v5218_v16, %v5213_v12  ;;  %v1281_v39 = vrot.slane %v1217_v32, 1  ;;  %v1736_v40 = vmul.f32 %v5210_v11, %v5240_v28  ;;  %s9601_s13 = sld [smem:[#allocation63_spill]] }
  0x45   : > { %v1496_v41 = vsel %vm972_vm0, %v1493_v24, %v5233_v25  ;;  %v1801_v42 = vrot.slane %v1737_v26, 1  ;;  %v1492_v43 = vrot.slane %v1426_v36, 2  ;;  %v1945_v44 = vmul.f32 %v5237_v27, %v5240_v28 }
  0x46   : > { %v1170_v45 = vadd.f32 %v1137_v30, %v1086_v37  ;;  %v1168_v46 = vadd.f32 %v5246_v31, %v1086_v37  ;;  %v5266_v47 = vmul.f32 0.0, %v5218_v16  ;;  %v1136_v48 = vmul.f32 %v5204_v8, %v5226_v20 }
  0x47   : > { %v2012_v49 = vrot.slane %v1946_v34, 2  ;;  %v5270_v50 = vrot.slane %v1947_v35, 2  ;;  %vm2180_vm2 = vcmask 260096   ;;  %v1800_v51 = vrot.slane %v1736_v40, 1 }
  0x48   : > { %9305 = vst [vmem:[#allocation26_spill] sm:$0xff] %v5266_v47  ;;  %vm2172_vm3 = vcmask 261127   ;;  %v1283_v52 = vsel %vm760_vm1, %v1281_v39, %v1282_v33  ;;  %v1379_v53 = vadd.f32 %v1282_v33, %v1170_v45  ;;  %v1377_v54 = vadd.f32 %v1281_v39, %v1168_v46 }
  0x49   : > { %9306 = vst [vmem:[#allocation27_spill] sm:$0xff] %v5270_v50  ;;  %v2011_v55 = vrot.slane %v1945_v44, 2  ;;  %v1169_v56 = vadd.f32 %v1136_v48, %v1086_v37  ;;  %v1494_v57 = vsel %vm972_vm0, %v1492_v43, %v1493_v24  ;;  %v1655_v58 = vmul.f32 %v5218_v16, %v5240_v28  ;;  %s4542_s20 = sshll.u32 %s9600_s8, 8 }
  0x4a   : > { %v698_v59 = vmul.f32 %v5200_v6, %v5226_v20  ;;  %v909_v60 = vmul.f32 %v5202_v7, %v5226_v20  ;;  %v1607_v61 = vadd.f32 %v1496_v41, %v1379_v53  ;;  %v1605_v62 = vadd.f32 %v1492_v43, %v1377_v54  ;;  %s4309_s29 = scalar_lea.hbm %s9601_s13, %s4542_s20  ;;  %s4916_s10 = scalar_lea.hbm %s9601_s13, 512 }
  0x4b   : > { %v1378_v63 = vadd.f32 %v1283_v52, %v1169_v56  ;;  %v5285_v1 = vmul.f32 %v5206_v9, %v5240_v28  ;;  %v2015_v2 = vsel %vm972_vm0, %v2012_v49, %v5270_v50  ;;  %v1802_v13 = vsel %vm760_vm1, %v1800_v51, %v1801_v42  ;;  %s4312_s21 = sshll.u32 %s4309_s29, 4  ;;  %s4313_s21 = int_to_ptr.hbm [resolvable:$true] %s4312_s21 }
  0x4c   : > { %v764_v14 = vrot.slane %v698_v59, 1  ;;  %v978_v15 = vrot.slane %v909_v60, 2  ;;  %v1689_v17 = vadd.f32 %v1656_v38, %v1607_v61  ;;  %v1687_v18 = vadd.f32 %v5266_v47, %v1605_v62  ;;  %s4910_s28 = sshra.s32 %s4313_s21, 4  ;;  %s4911_s28 = int_to_ptr.hbm [resolvable:$true] %s4910_s28 }
  0x4d   : > { %v1606_v19 = vadd.f32 %v1494_v57, %v1378_v63  ;;  %v2013_v22 = vsel %vm972_vm0, %v2011_v55, %v2012_v49  ;;  %v1284_v26 = vrot.slane %v5285_v1, 1  ;;  %v1429_v29 = vmul.f32 %v5208_v10, %v5240_v28  ;;  %s4912_s23 = scalar_lea.hbm %s4911_s28, 256  ;;  %p4917_p7 = scmp.lt.s32.totalorder %s4911_s28, %s9601_s13 }
  0x4e   : > { %v860_v24 = vadd.f32 %v764_v14, %v5229_v21  ;;  %v5298_v30 = vmul.f32 %v5210_v11, %v5281_v0  ;;  %v1898_v32 = vadd.f32 %v1801_v42, %v1689_v17  ;;  %v1896_v33 = vadd.f32 %v1800_v51, %v1687_v18  ;;  %p4913_p4 = scmp.ne.s32.totalorder %s4911_s28, %s4912_s23  ;;  %p4918_p8 = scmp.lt.s32.totalorder %s4916_s10, %s4912_s23 }
  0x4f   : > { %v1688_v34 = vadd.f32 %v1655_v58, %v1606_v19  ;;  %v632_v35 = vmul.f32 %v5198_v5, %v5226_v20  ;;  %v1948_v37 = vmul.f32 %v5237_v27, %v5281_v0  ;;  %v699_v38 = vmul.f32 %v5200_v6, %v5191_v3  ;;  %v5327_v58 = vld [vmem:[%s5170_s11 + $0x28] sm:$0xff] }
  0x50   : > { %v1089_v36 = vadd.f32 %v978_v15, %v860_v24  ;;  %v910_v39 = vmul.f32 %v5202_v7, %v5191_v3  ;;  %v5308_v40 = vadd.f32 %v2015_v2, %v1898_v32  ;;  %v5310_v41 = vadd.f32 %v2011_v55, %v1896_v33  ;;  %p4914_p5 = pnand %p4913_p4, %p5108_p9  ;;  %p4919_p10 = por %p4918_p8, %p4917_p7 }
  0x51   : > { %v1897_v42 = vadd.f32 %v1802_v13, %v1688_v34  ;;  %v665_v43 = vadd.f32 %v5196_v4, %v632_v35  ;;  %v1497_v20 = vrot.slane %v1429_v29, 2  ;;  %v765_v45 = vrot.slane %v699_v38, 1 }
  0x52   : > { %v1171_v44 = vadd.f32 %v5246_v31, %v1089_v36  ;;  %v979_v46 = vrot.slane %v910_v39, 2  ;;  %v2181_v48 = vsel %vm2180_vm2, %v5308_v40, 0.0  ;;  %v2173_v49 = vsel %vm2172_vm3, %v5310_v41, 0.0  ;;  %p4915_p6 = pneg %p4914_p5 }
  0x53   : > { %v5318_v51 = vadd.f32 %v2013_v22, %v1897_v42  ;;  %v2367_v52 = vmul.f32 %v5310_v41, %v5310_v41  ;;  %2182 = vadd.xlane.f32.xlu1 %v2181_v48  ;;  %2174 = vadd.xlane.f32.xlu0 %v2173_v49  ;;  %vm2176_vm4 = vcmask 261120   ;;  %v1803_v54 = vrot.slane %v5298_v30, 1 }
  0x54   : > { %v1380_v53 = vadd.f32 %v1284_v26, %v1171_v44  ;;  %v766_v55 = vsel %vm760_vm1, %v764_v14, %v765_v45  ;;  %v2016_v57 = vrot.slane %v1948_v37, 2  ;;  %v1138_v60 = vmul.f32 %v5204_v8, %v5240_v28  ;;  %p4920_p13 = pnand %p4919_p10, %p4915_p6 }
  0x55   : > { %v2368_v56 = vmul.f32 %v5318_v51, %v5318_v51  ;;  %v861_v59 = vadd.f32 %v766_v55, %v665_v43  ;;  %v2369_v61 = vmul.f32 %v5308_v40, %v5308_v40  ;;  %v980_v63 = vsel %vm972_vm0, %v978_v15, %v979_v46 }
  0x56   : > { %v1608_v62 = vadd.f32 %v1497_v20, %v1380_v53  ;;  %v1220_v1 = vmul.f32 %v5206_v9, %v5213_v12  ;;  %v2415_v13 = vsel %vm2172_vm3, %v2367_v52, 0.0  ;;  %v1430_v17 = vmul.f32 %v5208_v10, %v5213_v12  ;;  %v5369_v53 = vld [vmem:[%s5170_s11 + $0x30] sm:$0xff] }
  0x57   : > { %v2418_v2 = vsel %vm2176_vm4, %v2368_v56, 0.0  ;;  %v1090_v14 = vadd.f32 %v980_v63, %v861_v59  ;;  %v5343_v22 = vmul.f32 %v5210_v11, %v5327_v58  ;;  %v1949_v15 = vmul.f32 %v5237_v27, %v5327_v58 }
  0x58   : > { %2419 = vadd.xlane.f32.xlu2 %v2418_v2  ;;  %v1690_v18 = vadd.f32 %v5266_v47, %v1608_v62  ;;  %v1285_v19 = vrot.slane %v1220_v1, 1  ;;  %v2177_v24 = vsel %vm2176_vm4, %v5318_v51, 0.0  ;;  %v1498_v30 = vrot.slane %v1430_v17, 2 }
  0x59   : > { %v1172_v29 = vadd.f32 %v1138_v60, %v1090_v14  ;;  %v633_v32 = vmul.f32 %v5198_v5, %v5191_v3  ;;  %v1804_v35 = vrot.slane %v5343_v22, 1  ;;  %v2017_v36 = vrot.slane %v1949_v15, 2 }
  0x5a   : > { %v1899_v33 = vadd.f32 %v1803_v54, %v1690_v18  ;;  %v1286_v34 = vsel %vm760_vm1, %v1284_v26, %v1285_v19  ;;  %v1499_v38 = vsel %vm972_vm0, %v1497_v20, %v1498_v30  ;;  %v1657_v39 = vmul.f32 %v5218_v16, %v5281_v0 }
  0x5b   : > { %v1381_v37 = vadd.f32 %v1286_v34, %v1172_v29  ;;  %v666_v42 = vadd.f32 %v5196_v4, %v633_v32  ;;  %2416 = vadd.xlane.f32.xlu1 %v2415_v13  ;;  %2178 = vadd.xlane.f32.xlu0 %v2177_v24  ;;  %v2421_v43 = vsel %vm2180_vm2, %v2369_v61, 0.0  ;;  %v981_v26 = vsel %vm972_vm0, %v979_v46, %v5231_v23 }
  0x5c   : > { %v5358_v3 = vadd.f32 %v2016_v57, %v1899_v33  ;;  %v1139_v44 = vmul.f32 %v5204_v8, %v5213_v12  ;;  %v1805_v20 = vsel %vm760_vm1, %v1803_v54, %v1804_v35  ;;  %v2018_v49 = vsel %vm972_vm0, %v2016_v57, %v2017_v36 }
  0x5d   : > { %v1609_v48 = vadd.f32 %v1499_v38, %v1381_v37  ;;  %v862_v52 = vadd.f32 %v765_v45, %v666_v42  ;;  %v1500_v55 = vsel %vm972_vm0, %v1498_v30, %v5233_v25  ;;  %v1658_v56 = vmul.f32 %v5218_v16, %v5327_v58 }
  0x5e   : > { %v2370_v46 = vmul.f32 %v5358_v3, %v5358_v3  ;;  %v700_v59 = vmul.f32 %v5200_v6, %v5240_v28  ;;  %v911_v54 = vmul.f32 %v5202_v7, %v5240_v28  ;;  %v1221_v45 = vmul.f32 %v5206_v9, %v5281_v0 }
  0x5f   : > { %v1691_v60 = vadd.f32 %v1657_v39, %v1609_v48  ;;  %v1091_v61 = vadd.f32 %v981_v26, %v862_v52  ;;  %v2184_v57 = vsel %vm2172_vm3, %v5358_v3, 0.0  ;;  %v5387_v63 = vmul.f32 %v5208_v10, %v5281_v0 }
  0x60   : > { %2422 = vadd.xlane.f32.xlu2 %v2421_v43  ;;  %v767_v62 = vrot.slane %v700_v59, 1  ;;  %v5391_v1 = vmul.f32 %v5210_v11, %v5369_v53  ;;  %v2019_v14 = vsel %vm972_vm0, %v2017_v36, %v5270_v50  ;;  %v982_v17 = vrot.slane %v911_v54, 2 }
  0x61   : > { %v1900_v2 = vadd.f32 %v1805_v20, %v1691_v60  ;;  %v1173_v13 = vadd.f32 %v1139_v44, %v1091_v61  ;;  %v2424_v18 = vsel %vm2172_vm3, %v2370_v46, 0.0  ;;  %v1287_v24 = vrot.slane %v1221_v45, 1  ;;  %v5416_v44 = vld [vmem:[%s5170_s11 + $0x38] sm:$0xff] }
  0x62   : > { %v863_v15 = vadd.f32 %v767_v62, %v5229_v21  ;;  %v1950_v29 = vmul.f32 %v5237_v27, %v5369_v53  ;;  %v634_v33 = vmul.f32 %v5198_v5, %v5240_v28  ;;  %v701_v34 = vmul.f32 %v5200_v6, %v5213_v12 }
  0x63   : > { %v5399_v30 = vadd.f32 %v2018_v49, %v1900_v2  ;;  %v1382_v32 = vadd.f32 %v1285_v19, %v1173_v13  ;;  %2185 = vadd.xlane.f32.xlu0 %v2184_v57  ;;  %v1501_v37 = vrot.slane %v5387_v63, 2  ;;  %v1806_v38 = vrot.slane %v5391_v1, 1 }
  0x64   : > { %v1092_v36 = vadd.f32 %v982_v17, %v863_v15  ;;  %v912_v39 = vmul.f32 %v5202_v7, %v5213_v12  ;;  %v667_v28 = vadd.f32 %v5196_v4, %v634_v33  ;;  %v768_v48 = vrot.slane %v701_v34, 1 }
  0x65   : > { %v2187_v42 = vsel %vm2176_vm4, %v5399_v30, 0.0  ;;  %v1610_v43 = vadd.f32 %v1500_v55, %v1382_v32  ;;  %v2371_v19 = vmul.f32 %v5399_v30, %v5399_v30  ;;  %v1222_v49 = vmul.f32 %v5206_v9, %v5327_v58 }
  0x66   : > { %2188 = vadd.xlane.f32.xlu1 %v2187_v42  ;;  %v1174_v26 = vadd.f32 %v5246_v31, %v1092_v36  ;;  %v983_v20 = vrot.slane %v912_v39, 2  ;;  %v2020_v46 = vrot.slane %v1950_v29, 2  ;;  %v1140_v55 = vmul.f32 %v5204_v8, %v5281_v0 }
  0x67   : > { %v1692_v52 = vadd.f32 %v1658_v56, %v1610_v43  ;;  %v1432_v59 = vmul.f32 %v5208_v10, %v5327_v58  ;;  %v769_v61 = vsel %vm760_vm1, %v767_v62, %v768_v48  ;;  %v1288_v45 = vrot.slane %v1222_v49, 1 }
  0x68   : > { %v1383_v60 = vadd.f32 %v1287_v24, %v1174_v26  ;;  %v984_v54 = vsel %vm972_vm0, %v982_v17, %v983_v20  ;;  %v2427_v63 = vsel %vm2176_vm4, %v2371_v19, 0.0  ;;  %v864_v1 = vadd.f32 %v769_v61, %v667_v28 }
  0x69   : > { %v1901_v57 = vadd.f32 %v1804_v35, %v1692_v52  ;;  %v5431_v56 = vmul.f32 %v5210_v11, %v5416_v44  ;;  %v1502_v13 = vrot.slane %v1432_v59, 2  ;;  %v1951_v15 = vmul.f32 %v5237_v27, %v5416_v44 }
  0x6a   : > { %v1611_v2 = vadd.f32 %v1501_v37, %v1383_v60  ;;  %v635_v62 = vmul.f32 %v5198_v5, %v5213_v12  ;;  %v1093_v29 = vadd.f32 %v984_v54, %v864_v1  ;;  %v1659_v22 = vmul.f32 %v5218_v16, %v5369_v53 }
  0x6b   : > { %v5437_v17 = vadd.f32 %v2019_v14, %v1901_v57  ;;  %v1807_v35 = vrot.slane %v5431_v56, 1  ;;  %2425 = vadd.xlane.f32.xlu0 %v2424_v18  ;;  %v1289_v33 = vsel %vm760_vm1, %v1287_v24, %v1288_v45  ;;  %v2021_v34 = vrot.slane %v1951_v15, 2 }
  0x6c   : > { %v1693_v32 = vadd.f32 %v5266_v47, %v1611_v2  ;;  %v668_v36 = vadd.f32 %v5196_v4, %v635_v62  ;;  %v1175_v14 = vadd.f32 %v1140_v55, %v1093_v29  ;;  %v985_v42 = vsel %vm972_vm0, %v983_v20, %v5231_v23 }
  0x6d   : > { %9307 = vst [vmem:[#allocation28_spill] sm:$0xff] %v5437_v17  ;;  %v2190_v39 = vsel %vm2180_vm2, %v5437_v17, 0.0  ;;  %v2372_v12 = vmul.f32 %v5437_v17, %v5437_v17  ;;  %v1503_v43 = vsel %vm972_vm0, %v1501_v37, %v1502_v13  ;;  %v1808_v28 = vsel %vm760_vm1, %v1806_v38, %v1807_v35 }
  0x6e   : > { %2191 = vadd.xlane.f32.xlu2 %v2190_v39  ;;  %2428 = vadd.xlane.f32.xlu1 %v2427_v63  ;;  %v1902_v18 = vadd.f32 %v1806_v38, %v1693_v32  ;;  %v865_v24 = vadd.f32 %v768_v48, %v668_v36  ;;  %v1384_v19 = vadd.f32 %v1289_v33, %v1175_v14  ;;  %v5464_v48 = vld [vmem:[%s5170_s11 + $0x40] sm:$0xff] }
  0x6f   : > { %v2022_v26 = vsel %vm972_vm0, %v2020_v46, %v2021_v34  ;;  %v1141_v49 = vmul.f32 %v5204_v8, %v5327_v58  ;;  %v2430_v52 = vsel %vm2180_vm2, %v2372_v12, 0.0  ;;  %v1504_v59 = vsel %vm972_vm0, %v1502_v13, %v5233_v25 }
  0x70   : > { %v5459_v55 = vadd.f32 %v2020_v46, %v1902_v18  ;;  %v1094_v20 = vadd.f32 %v985_v42, %v865_v24  ;;  %v1612_v37 = vadd.f32 %v1503_v43, %v1384_v19  ;;  %v702_v60 = vmul.f32 %v5200_v6, %v5281_v0 }
  0x71   : > { %v913_v38 = vmul.f32 %v5202_v7, %v5281_v0  ;;  %v1223_v61 = vmul.f32 %v5206_v9, %v5369_v53  ;;  %v1433_v63 = vmul.f32 %v5208_v10, %v5369_v53  ;;  %v1660_v2 = vmul.f32 %v5218_v16, %v5416_v44 }
  0x72   : > { %9308 = vst [vmem:[#allocation29_spill] sm:$0xff] %v5459_v55  ;;  %v2193_v46 = vsel %vm2172_vm3, %v5459_v55, 0.0  ;;  %v1176_v54 = vadd.f32 %v1141_v49, %v1094_v20  ;;  %v2373_v57 = vmul.f32 %v5459_v55, %v5459_v55  ;;  %v1694_v1 = vadd.f32 %v1659_v22, %v1612_v37 }
  0x73   : > { %v770_v13 = vrot.slane %v702_v60, 1  ;;  %v986_v15 = vrot.slane %v913_v38, 2  ;;  %2194 = vadd.xlane.f32.xlu0 %v2193_v46  ;;  %v2023_v29 = vsel %vm972_vm0, %v2021_v34, %v5270_v50  ;;  %v1290_v32 = vrot.slane %v1223_v61, 1 }
  0x74   : > { %v1385_v62 = vadd.f32 %v1288_v45, %v1176_v54  ;;  %v1742_v33 = vmul.f32 %v5210_v11, %v5464_v48  ;;  %v1903_v36 = vadd.f32 %v1808_v28, %v1694_v1  ;;  %v2433_v39 = vsel %vm2172_vm3, %v2373_v57, 0.0 }
  0x75   : > { %v866_v12 = vadd.f32 %v770_v13, %v5229_v21  ;;  %v636_v22 = vmul.f32 %v5198_v5, %v5281_v0  ;;  %v1505_v42 = vrot.slane %v1433_v63, 2  ;;  %v703_v45 = vmul.f32 %v5200_v6, %v5327_v58 }
  0x76   : > { %2431 = vadd.xlane.f32.xlu2 %v2430_v52  ;;  %v1613_v14 = vadd.f32 %v1504_v59, %v1385_v62  ;;  %v914_v34 = vmul.f32 %v5202_v7, %v5327_v58  ;;  %v5492_v18 = vadd.f32 %v2022_v26, %v1903_v36  ;;  %v1952_v24 = vmul.f32 %v5237_v27, %v5464_v48  ;;  %v5503_v26 = vld [vmem:[%s5170_s11 + $0x48] sm:$0xff] }
  0x77   : > { %v1095_v43 = vadd.f32 %v986_v15, %v866_v12  ;;  %v669_v19 = vadd.f32 %v5196_v4, %v636_v22  ;;  %v1809_v0 = vrot.slane %v1742_v33, 1  ;;  %v771_v49 = vrot.slane %v703_v45, 1 }
  0x78   : > { %9309 = vst [vmem:[#allocation30_spill] sm:$0xff] %v5492_v18  ;;  %v1695_v28 = vadd.f32 %v1660_v2, %v1613_v14  ;;  %v987_v52 = vrot.slane %v914_v34, 2  ;;  %v2196_v20 = vsel %vm2176_vm4, %v5492_v18, 0.0  ;;  %v2374_v59 = vmul.f32 %v5492_v18, %v5492_v18 }
  0x79   : > { %v1177_v37 = vadd.f32 %v5246_v31, %v1095_v43  ;;  %v5507_v60 = vmul.f32 %v5206_v9, %v5416_v44  ;;  %2197 = vadd.xlane.f32.xlu1 %v2196_v20  ;;  %v772_v61 = vsel %vm760_vm1, %v770_v13, %v771_v49  ;;  %v1434_v54 = vmul.f32 %v5208_v10, %v5416_v44 }
  0x7a   : > { %v1904_v38 = vadd.f32 %v1807_v35, %v1695_v28  ;;  %v988_v46 = vsel %vm972_vm0, %v986_v15, %v987_v52  ;;  %v867_v63 = vadd.f32 %v772_v61, %v669_v19  ;;  %v1142_v1 = vmul.f32 %v5204_v8, %v5369_v53  ;;  %v5547_v61 = vld [vmem:[%s5170_s11 + $0x50] sm:$0xff] }
  0x7b   : > { %v1386_v57 = vadd.f32 %v1290_v32, %v1177_v37  ;;  %v1291_v2 = vrot.slane %v5507_v60, 1  ;;  %2434 = vadd.xlane.f32.xlu0 %v2433_v39  ;;  %v2024_v33 = vrot.slane %v1952_v24, 2  ;;  %v1506_v56 = vrot.slane %v1434_v54, 2 }
  0x7c   : > { %v5518_v62 = vadd.f32 %v2023_v29, %v1904_v38  ;;  %v5522_v35 = vmul.f32 %v5210_v11, %v5503_v26  ;;  %v2436_v13 = vsel %vm2176_vm4, %v2374_v59, 0.0  ;;  %v1096_v36 = vadd.f32 %v988_v46, %v867_v63 }
  0x7d   : > { %v1614_v15 = vadd.f32 %v1505_v42, %v1386_v57  ;;  %v1953_v12 = vmul.f32 %v5237_v27, %v5503_v26  ;;  %v1292_v39 = vsel %vm760_vm1, %v1290_v32, %v1291_v2  ;;  %v637_v24 = vmul.f32 %v5198_v5, %v5327_v58 }
  0x7e   : > { %9310 = vst [vmem:[#allocation31_spill] sm:$0xff] %v5518_v62  ;;  %v2199_v22 = vsel %vm2180_vm2, %v5518_v62, 0.0  ;;  %v2375_v29 = vmul.f32 %v5518_v62, %v5518_v62  ;;  %v1810_v14 = vrot.slane %v5522_v35, 1  ;;  %v1178_v34 = vadd.f32 %v1142_v1, %v1096_v36 }
  0x7f   : > { %2200 = vadd.xlane.f32.xlu2 %v2199_v22  ;;  %v1696_v45 = vadd.f32 %v5266_v47, %v1614_v15  ;;  %v2025_v43 = vrot.slane %v1953_v12, 2  ;;  %v1507_v28 = vsel %vm972_vm0, %v1505_v42, %v1506_v56  ;;  %v1661_v20 = vmul.f32 %v5218_v16, %v5464_v48 }
  0x80   : > { %v2439_v19 = vsel %vm2180_vm2, %v2375_v29, 0.0  ;;  %v1811_v32 = vsel %vm760_vm1, %v1809_v0, %v1810_v14  ;;  %v1387_v37 = vadd.f32 %v1292_v39, %v1178_v34  ;;  %v670_v60 = vadd.f32 %v5196_v4, %v637_v24 }
  0x81   : > { %v1905_v59 = vadd.f32 %v1809_v0, %v1696_v45  ;;  %v989_v38 = vsel %vm972_vm0, %v987_v52, %v5231_v23  ;;  %2437 = vadd.xlane.f32.xlu1 %v2436_v13  ;;  %v2026_v58 = vsel %vm972_vm0, %v2024_v33, %v2025_v43  ;;  %v1143_v42 = vmul.f32 %v5204_v8, %v5416_v44 }
  0x82   : > { %v1508_v46 = vsel %vm972_vm0, %v1506_v56, %v5233_v25  ;;  %v704_v0 = vmul.f32 %v5200_v6, %v5369_v53  ;;  %v1615_v57 = vadd.f32 %v1507_v28, %v1387_v37  ;;  %v868_v63 = vadd.f32 %v771_v49, %v670_v60 }
  0x83   : > { %v5556_v54 = vadd.f32 %v2024_v33, %v1905_v59  ;;  %v915_v52 = vmul.f32 %v5202_v7, %v5369_v53  ;;  %v1225_v13 = vmul.f32 %v5206_v9, %v5464_v48  ;;  %v1435_v15 = vmul.f32 %v5208_v10, %v5464_v48 }
  0x84   : > { %v773_v1 = vrot.slane %v704_v0, 1  ;;  %v5566_v56 = vmul.f32 %v5210_v11, %v5547_v61  ;;  %v1697_v36 = vadd.f32 %v1661_v20, %v1615_v57  ;;  %v1097_v12 = vadd.f32 %v989_v38, %v868_v63 }
  0x85   : > { %9311 = vst [vmem:[#allocation32_spill] sm:$0xff] %v5556_v54  ;;  %v2202_v33 = vsel %vm2172_vm3, %v5556_v54, 0.0  ;;  %v2376_v49 = vmul.f32 %v5556_v54, %v5556_v54  ;;  %v1662_v22 = vmul.f32 %v5218_v16, %v5503_v26  ;;  %v2027_v29 = vsel %vm972_vm0, %v2025_v43, %v5270_v50 }
  0x86   : > { %2203 = vadd.xlane.f32.xlu0 %v2202_v33  ;;  %v869_v39 = vadd.f32 %v773_v1, %v5229_v21  ;;  %v990_v45 = vrot.slane %v915_v52, 2  ;;  %v1906_v34 = vadd.f32 %v1811_v32, %v1697_v36  ;;  %v1179_v24 = vadd.f32 %v1143_v42, %v1097_v12 }
  0x87   : > { %2440 = vadd.xlane.f32.xlu2 %v2439_v19  ;;  %v1293_v28 = vrot.slane %v1225_v13, 1  ;;  %v1509_v59 = vrot.slane %v1435_v15, 2  ;;  %v2442_v20 = vsel %vm2172_vm3, %v2376_v49, 0.0  ;;  %v638_v60 = vmul.f32 %v5198_v5, %v5369_v53 }
  0x88   : > { %v1098_v37 = vadd.f32 %v990_v45, %v869_v39  ;;  %v705_v38 = vmul.f32 %v5200_v6, %v5416_v44  ;;  %v5582_v0 = vadd.f32 %v2026_v58, %v1906_v34  ;;  %v1388_v43 = vadd.f32 %v1291_v2, %v1179_v24 }
  0x89   : > { %v1812_v57 = vrot.slane %v5566_v56, 1  ;;  %v916_v19 = vmul.f32 %v5202_v7, %v5416_v44  ;;  %v1954_v42 = vmul.f32 %v5237_v27, %v5547_v61  ;;  %v671_v63 = vadd.f32 %v5196_v4, %v638_v60  ;;  %v5596_v56 = vld [vmem:[%s5170_s11 + $0x58] sm:$0xff] }
  0x8a   : > { %9312 = vst [vmem:[#allocation33_spill] sm:$0xff] %v5582_v0  ;;  %v1180_v32 = vadd.f32 %v5246_v31, %v1098_v37  ;;  %v774_v53 = vrot.slane %v705_v38, 1  ;;  %v2205_v52 = vsel %vm2176_vm4, %v5582_v0, 0.0  ;;  %v1616_v13 = vadd.f32 %v1508_v46, %v1388_v43 }
  0x8b   : > { %v2377_v2 = vmul.f32 %v5582_v0, %v5582_v0  ;;  %v991_v58 = vrot.slane %v916_v19, 2  ;;  %2206 = vadd.xlane.f32.xlu1 %v2205_v52  ;;  %v1226_v36 = vmul.f32 %v5206_v9, %v5503_v26  ;;  %v1436_v12 = vmul.f32 %v5208_v10, %v5503_v26 }
  0x8c   : > { %v1389_v15 = vadd.f32 %v1293_v28, %v1180_v32  ;;  %v775_v33 = vsel %vm760_vm1, %v773_v1, %v774_v53  ;;  %v1698_v49 = vadd.f32 %v1662_v22, %v1616_v13  ;;  %v1144_v34 = vmul.f32 %v5204_v8, %v5464_v48 }
  0x8d   : > { %v870_v39 = vadd.f32 %v775_v33, %v671_v63  ;;  %v992_v46 = vsel %vm972_vm0, %v990_v45, %v991_v58  ;;  %v2028_v37 = vrot.slane %v1954_v42, 2  ;;  %v1294_v60 = vrot.slane %v1226_v36, 1 }
  0x8e   : > { %2443 = vadd.xlane.f32.xlu0 %v2442_v20  ;;  %v1617_v24 = vadd.f32 %v1509_v59, %v1389_v15  ;;  %v1510_v38 = vrot.slane %v1436_v12, 2  ;;  %v1907_v1 = vadd.f32 %v1810_v14, %v1698_v49  ;;  %v5610_v19 = vmul.f32 %v5210_v11, %v5596_v56 }
  0x8f   : > { %v1099_v43 = vadd.f32 %v992_v46, %v870_v39  ;;  %v1955_v22 = vmul.f32 %v5237_v27, %v5596_v56  ;;  %v2445_v45 = vsel %vm2176_vm4, %v2377_v2, 0.0  ;;  %v1295_v20 = vsel %vm760_vm1, %v1293_v28, %v1294_v60 }
  0x90   : > { %v1699_v32 = vadd.f32 %v5266_v47, %v1617_v24  ;;  %v639_v42 = vmul.f32 %v5198_v5, %v5416_v44  ;;  %v5619_v63 = vadd.f32 %v2027_v29, %v1907_v1  ;;  %v1813_v14 = vrot.slane %v5610_v19, 1  ;;  %v5642_v1 = vld [vmem:[%s5170_s11 + $0x60] sm:$0xff] }
  0x91   : > { %v1181_v35 = vadd.f32 %v1144_v34, %v1099_v43  ;;  %v2029_v52 = vrot.slane %v1955_v22, 2  ;;  %v1511_v15 = vsel %vm972_vm0, %v1509_v59, %v1510_v38  ;;  %v1663_v2 = vmul.f32 %v5218_v16, %v5547_v61 }
  0x92   : > { %9313 = vst [vmem:[#allocation34_spill] sm:$0xff] %v5619_v63  ;;  %v1908_v13 = vadd.f32 %v1812_v57, %v1699_v32  ;;  %v672_v33 = vadd.f32 %v5196_v4, %v639_v42  ;;  %v2208_v28 = vsel %vm2180_vm2, %v5619_v63, 0.0  ;;  %v2378_v44 = vmul.f32 %v5619_v63, %v5619_v63 }
  0x93   : > { %v1390_v29 = vadd.f32 %v1295_v20, %v1181_v35  ;;  %v993_v36 = vsel %vm972_vm0, %v991_v58, %v5231_v23  ;;  %2209 = vadd.xlane.f32.xlu2 %v2208_v28  ;;  %2446 = vadd.xlane.f32.xlu1 %v2445_v45  ;;  %v1145_v49 = vmul.f32 %v5204_v8, %v5503_v26 }
  0x94   : > { %v5632_v12 = vadd.f32 %v2028_v37, %v1908_v13  ;;  %v871_v59 = vadd.f32 %v774_v53, %v672_v33  ;;  %v2448_v39 = vsel %vm2180_vm2, %v2378_v44, 0.0  ;;  %v1814_v34 = vsel %vm760_vm1, %v1812_v57, %v1813_v14 }
  0x95   : > { %v1618_v46 = vadd.f32 %v1511_v15, %v1390_v29  ;;  %v2030_v24 = vsel %vm972_vm0, %v2028_v37, %v2029_v52  ;;  %v1512_v53 = vsel %vm972_vm0, %v1510_v38, %v5233_v25  ;;  %v706_v32 = vmul.f32 %v5200_v6, %v5464_v48 }
  0x96   : > { %9314 = vst [vmem:[#allocation35_spill] sm:$0xff] %v5632_v12  ;;  %v2211_v58 = vsel %vm2172_vm3, %v5632_v12, 0.0  ;;  %v1100_v43 = vadd.f32 %v993_v36, %v871_v59  ;;  %v2379_v22 = vmul.f32 %v5632_v12, %v5632_v12  ;;  %v917_v57 = vmul.f32 %v5202_v7, %v5464_v48 }
  0x97   : > { %2212 = vadd.xlane.f32.xlu0 %v2211_v58  ;;  %v1700_v45 = vadd.f32 %v1663_v2, %v1618_v46  ;;  %v1227_v37 = vmul.f32 %v5206_v9, %v5547_v61  ;;  %v1664_v42 = vmul.f32 %v5218_v16, %v5596_v56  ;;  %v1437_v38 = vmul.f32 %v5208_v10, %v5547_v61 }
  0x98   : > { %v1182_v20 = vadd.f32 %v1145_v49, %v1100_v43  ;;  %v5662_v35 = vmul.f32 %v5210_v11, %v5642_v1  ;;  %v2031_v15 = vsel %vm972_vm0, %v2029_v52, %v5270_v50  ;;  %v776_v2 = vrot.slane %v706_v32, 1 }
  0x99   : > { %v1909_v13 = vadd.f32 %v1814_v34, %v1700_v45  ;;  %v994_v33 = vrot.slane %v917_v57, 2  ;;  %v2451_v44 = vsel %vm2172_vm3, %v2379_v22, 0.0  ;;  %v1296_v29 = vrot.slane %v1227_v37, 1  ;;  %v5687_v57 = vld [vmem:[%s5170_s11 + $0x68] sm:$0xff] }
  0x9a   : > { %v1391_v28 = vadd.f32 %v1294_v60, %v1182_v20  ;;  %v5669_v36 = vmul.f32 %v5237_v27, %v5642_v1  ;;  %v872_v49 = vadd.f32 %v776_v2, %v5229_v21  ;;  %v640_v46 = vmul.f32 %v5198_v5, %v5464_v48 }
  0x9b   : > { %v5671_v59 = vadd.f32 %v2030_v24, %v1909_v13  ;;  %v707_v52 = vmul.f32 %v5200_v6, %v5503_v26  ;;  %2449 = vadd.xlane.f32.xlu2 %v2448_v39  ;;  %v1513_v34 = vrot.slane %v1437_v38, 2  ;;  %v1815_v58 = vrot.slane %v5662_v35, 1 }
  0x9c   : > { %v1619_v60 = vadd.f32 %v1512_v53, %v1391_v28  ;;  %v918_v43 = vmul.f32 %v5202_v7, %v5503_v26  ;;  %v1101_v45 = vadd.f32 %v994_v33, %v872_v49  ;;  %v673_v48 = vadd.f32 %v5196_v4, %v640_v46 }
  0x9d   : > { %9315 = vst [vmem:[#allocation36_spill] sm:$0xff] %v5671_v59  ;;  %v2214_v24 = vsel %vm2176_vm4, %v5671_v59, 0.0  ;;  %v2380_v22 = vmul.f32 %v5671_v59, %v5671_v59  ;;  %v777_v39 = vrot.slane %v707_v52, 1  ;;  %v1228_v37 = vmul.f32 %v5206_v9, %v5596_v56 }
  0x9e   : > { %2215 = vadd.xlane.f32.xlu1 %v2214_v24  ;;  %v1701_v32 = vadd.f32 %v1664_v42, %v1619_v60  ;;  %v995_v53 = vrot.slane %v918_v43, 2  ;;  %v1183_v20 = vadd.f32 %v5246_v31, %v1101_v45  ;;  %v2032_v38 = vrot.slane %v5669_v36, 2 }
  0x9f   : > { %2452 = vadd.xlane.f32.xlu0 %v2451_v44  ;;  %v1146_v35 = vmul.f32 %v5204_v8, %v5547_v61  ;;  %v1438_v13 = vmul.f32 %v5208_v10, %v5596_v56  ;;  %v778_v28 = vsel %vm760_vm1, %v776_v2, %v777_v39  ;;  %v1297_v46 = vrot.slane %v1228_v37, 1 }
  0xa0   : > { %v1910_v42 = vadd.f32 %v1813_v14, %v1701_v32  ;;  %v996_v49 = vsel %vm972_vm0, %v994_v33, %v995_v53  ;;  %v2454_v44 = vsel %vm2176_vm4, %v2380_v22, 0.0  ;;  %v1392_v52 = vadd.f32 %v1296_v29, %v1183_v20 }
  0xa1   : > { %v873_v60 = vadd.f32 %v778_v28, %v673_v48  ;;  %v5704_v36 = vmul.f32 %v5210_v11, %v5687_v57  ;;  %v1514_v24 = vrot.slane %v1438_v13, 2  ;;  %v1957_v19 = vmul.f32 %v5237_v27, %v5687_v57 }
  0xa2   : > { %v5706_v43 = vadd.f32 %v2031_v15, %v1910_v42  ;;  %v641_v14 = vmul.f32 %v5198_v5, %v5503_v26  ;;  %v1620_v2 = vadd.f32 %v1513_v34, %v1392_v52  ;;  %v1298_v45 = vsel %vm760_vm1, %v1296_v29, %v1297_v46 }
  0xa3   : > { %v1102_v33 = vadd.f32 %v996_v49, %v873_v60  ;;  %v1816_v22 = vrot.slane %v5704_v36, 1  ;;  %v2033_v32 = vrot.slane %v1957_v19, 2  ;;  %v997_v13 = vsel %vm972_vm0, %v995_v53, %v5231_v23 }
  0xa4   : > { %9316 = vst [vmem:[#allocation37_spill] sm:$0xff] %v5706_v43  ;;  %v2217_v48 = vsel %vm2180_vm2, %v5706_v43, 0.0  ;;  %v2381_v15 = vmul.f32 %v5706_v43, %v5706_v43  ;;  %v674_v37 = vadd.f32 %v5196_v4, %v641_v14  ;;  %v1702_v20 = vadd.f32 %v5266_v47, %v1620_v2  ;;  %v5733_v14 = vld [vmem:[%s5170_s11 + $0x70] sm:$0xff] }
  0xa5   : > { %2218 = vadd.xlane.f32.xlu2 %v2217_v48  ;;  %v1184_v26 = vadd.f32 %v1146_v35, %v1102_v33  ;;  %v1515_v29 = vsel %vm972_vm0, %v1513_v34, %v1514_v24  ;;  %v1665_v42 = vmul.f32 %v5218_v16, %v5642_v1  ;;  %v1147_v49 = vmul.f32 %v5204_v8, %v5596_v56 }
  0xa6   : > { %2455 = vadd.xlane.f32.xlu1 %v2454_v44  ;;  %v874_v28 = vadd.f32 %v777_v39, %v674_v37  ;;  %v2457_v52 = vsel %vm2180_vm2, %v2381_v15, 0.0  ;;  %v1911_v60 = vadd.f32 %v1815_v58, %v1702_v20  ;;  %v1817_v35 = vsel %vm760_vm1, %v1815_v58, %v1816_v22 }
  0xa7   : > { %v1393_v19 = vadd.f32 %v1298_v45, %v1184_v26  ;;  %v2034_v53 = vsel %vm972_vm0, %v2032_v38, %v2033_v32  ;;  %v708_v34 = vmul.f32 %v5200_v6, %v5547_v61  ;;  %v919_v39 = vmul.f32 %v5202_v7, %v5547_v61 }
  0xa8   : > { %v1103_v44 = vadd.f32 %v997_v13, %v874_v28  ;;  %v5739_v2 = vadd.f32 %v2032_v38, %v1911_v60  ;;  %v1229_v45 = vmul.f32 %v5206_v9, %v5642_v1  ;;  %v5745_v58 = vmul.f32 %v5208_v10, %v5642_v1 }
  0xa9   : > { %v1621_v33 = vadd.f32 %v1515_v29, %v1393_v19  ;;  %v1516_v15 = vsel %vm972_vm0, %v1514_v24, %v5233_v25  ;;  %v779_v37 = vrot.slane %v708_v34, 1  ;;  %v998_v20 = vrot.slane %v919_v39, 2 }
  0xaa   : > { %9317 = vst [vmem:[#allocation38_spill] sm:$0xff] %v5739_v2  ;;  %v1185_v48 = vadd.f32 %v1147_v49, %v1103_v44  ;;  %v2220_v26 = vsel %vm2172_vm3, %v5739_v2, 0.0  ;;  %v2382_v38 = vmul.f32 %v5739_v2, %v5739_v2  ;;  %v5755_v29 = vmul.f32 %v5210_v11, %v5733_v14 }
  0xab   : > { %v1703_v13 = vadd.f32 %v1665_v42, %v1621_v33  ;;  %2221 = vadd.xlane.f32.xlu0 %v2220_v26  ;;  %v1666_v49 = vmul.f32 %v5218_v16, %v5687_v57  ;;  %v2035_v24 = vsel %vm972_vm0, %v2033_v32, %v5270_v50  ;;  %v875_v60 = vadd.f32 %v779_v37, %v5229_v21 }
  0xac   : > { %v1394_v28 = vadd.f32 %v1297_v46, %v1185_v48  ;;  %v1299_v42 = vrot.slane %v1229_v45, 1  ;;  %v1517_v44 = vrot.slane %v5745_v58, 2  ;;  %v642_v34 = vmul.f32 %v5198_v5, %v5547_v61 }
  0xad   : > { %2458 = vadd.xlane.f32.xlu2 %v2457_v52  ;;  %v1912_v19 = vadd.f32 %v1817_v35, %v1703_v13  ;;  %v1104_v33 = vadd.f32 %v998_v20, %v875_v60  ;;  %v709_v46 = vmul.f32 %v5200_v6, %v5596_v56  ;;  %v920_v48 = vmul.f32 %v5202_v7, %v5596_v56  ;;  %v5780_v60 = vld [vmem:[%s5170_s11 + $0x78] sm:$0xff] }
  0xae   : > { %v1622_v39 = vadd.f32 %v1516_v15, %v1394_v28  ;;  %v2460_v52 = vsel %vm2172_vm3, %v2382_v38, 0.0  ;;  %v1818_v35 = vrot.slane %v5755_v29, 1  ;;  %v675_v45 = vadd.f32 %v5196_v4, %v642_v34 }
  0xaf   : > { %v5769_v32 = vadd.f32 %v2034_v53, %v1912_v19  ;;  %v1186_v26 = vadd.f32 %v5246_v31, %v1104_v33  ;;  %v780_v61 = vrot.slane %v709_v46, 1  ;;  %v999_v15 = vrot.slane %v920_v48, 2 }
  0xb0   : > { %v1704_v58 = vadd.f32 %v1666_v49, %v1622_v39  ;;  %v1958_v28 = vmul.f32 %v5237_v27, %v5733_v14  ;;  %v5784_v53 = vmul.f32 %v5206_v9, %v5687_v57  ;;  %v1440_v4 = vmul.f32 %v5208_v10, %v5687_v57 }
  0xb1   : > { %9318 = vst [vmem:[#allocation39_spill] sm:$0xff] %v5769_v32  ;;  %v2223_v13 = vsel %vm2176_vm4, %v5769_v32, 0.0  ;;  %v1395_v29 = vadd.f32 %v1299_v42, %v1186_v26  ;;  %v781_v49 = vsel %vm760_vm1, %v779_v37, %v780_v61  ;;  %v1000_v19 = vsel %vm972_vm0, %v998_v20, %v999_v15 }
  0xb2   : > { %2224 = vadd.xlane.f32.xlu1 %v2223_v13  ;;  %v1913_v38 = vadd.f32 %v1816_v22, %v1704_v58  ;;  %v2383_v34 = vmul.f32 %v5769_v32, %v5769_v32  ;;  %v876_v39 = vadd.f32 %v781_v49, %v675_v45  ;;  %v1148_v33 = vmul.f32 %v5204_v8, %v5642_v1 }
  0xb3   : > { %v1300_v46 = vrot.slane %v5784_v53, 1  ;;  %2461 = vadd.xlane.f32.xlu0 %v2460_v52  ;;  %v1623_v13 = vadd.f32 %v1517_v44, %v1395_v29  ;;  %v1518_v36 = vrot.slane %v1440_v4, 2  ;;  %v5801_v22 = vmul.f32 %v5210_v11, %v5780_v60 }
  0xb4   : > { %v5797_v48 = vadd.f32 %v2035_v24, %v1913_v38  ;;  %v2036_v37 = vrot.slane %v1958_v28, 2  ;;  %v1105_v20 = vadd.f32 %v1000_v19, %v876_v39  ;;  %v1959_v45 = vmul.f32 %v5237_v27, %v5780_v60 }
  0xb5   : > { %v1301_v58 = vsel %vm760_vm1, %v1299_v42, %v1300_v46  ;;  %v1705_v52 = vadd.f32 %v5266_v47, %v1623_v13  ;;  %v2463_v4 = vsel %vm2176_vm4, %v2383_v34, 0.0  ;;  %v643_v42 = vmul.f32 %v5198_v5, %v5596_v56  ;;  %v5827_v56 = vld [vmem:[%s9136_s4] ss:$0 sm:$0xff] }
  0xb6   : > { %9319 = vst [vmem:[#allocation40_spill] sm:$0xff] %v5797_v48  ;;  %v2226_v26 = vsel %vm2180_vm2, %v5797_v48, 0.0  ;;  %v2384_v24 = vmul.f32 %v5797_v48, %v5797_v48  ;;  %v1187_v28 = vadd.f32 %v1148_v33, %v1105_v20  ;;  %v2037_v38 = vrot.slane %v1959_v45, 2  ;;  %v5854_v48 = vld [vmem:[%s5170_s11 + $0x80] sm:$0xff] }
  0xb7   : > { %2227 = vadd.xlane.f32.xlu2 %v2226_v26  ;;  %v1914_v29 = vadd.f32 %v1818_v35, %v1705_v52  ;;  %v1519_v49 = vsel %vm972_vm0, %v1517_v44, %v1518_v36  ;;  %v1667_v19 = vmul.f32 %v5218_v16, %v5733_v14  ;;  %v1001_v39 = vsel %vm972_vm0, %v999_v15, %v5231_v23 }
  0xb8   : > { %v2466_v13 = vsel %vm2180_vm2, %v2384_v24, 0.0  ;;  %v1396_v53 = vadd.f32 %v1301_v58, %v1187_v28  ;;  %v9320_v26 = vrot.slane %v5801_v22, 1  ;;  %v676_v44 = vadd.f32 %v5827_v56, %v643_v42 }
  0xb9   : > { %v5830_v33 = vadd.f32 %v2036_v37, %v1914_v29  ;;  %v2038_v20 = vsel %vm972_vm0, %v2036_v37, %v2037_v38  ;;  %v1149_v15 = vmul.f32 %v5204_v8, %v5687_v57  ;;  %v710_v58 = vmul.f32 %v5200_v6, %v5642_v1 }
  0xba   : > { %v1820_v34 = vsel %vm760_vm1, %v1818_v35, %v9320_v26  ;;  %2464 = vadd.xlane.f32.xlu1 %v2463_v4  ;;  %v1624_v35 = vadd.f32 %v1519_v49, %v1396_v53  ;;  %v877_v45 = vadd.f32 %v780_v61, %v676_v44  ;;  %v921_v24 = vmul.f32 %v5202_v7, %v5642_v1 }
  0xbb   : > { %9321 = vst [vmem:[#allocation41_spill] sm:$0xff] %v5830_v33  ;;  %v1231_v52 = vmul.f32 %v5206_v9, %v5733_v14  ;;  %v2229_v4 = vsel %vm2172_vm3, %v5830_v33, 0.0  ;;  %v2385_v37 = vmul.f32 %v5830_v33, %v5830_v33  ;;  %v782_v28 = vrot.slane %v710_v58, 1 }
  0xbc   : > { %v1441_v42 = vmul.f32 %v5208_v10, %v5733_v14  ;;  %2230 = vadd.xlane.f32.xlu0 %v2229_v4  ;;  %v1706_v29 = vadd.f32 %v1667_v19, %v1624_v35  ;;  %v1106_v53 = vadd.f32 %v1001_v39, %v877_v45  ;;  %v1520_v61 = vsel %vm972_vm0, %v1518_v36, %v5233_v25 }
  0xbd   : > { %v1002_v49 = vrot.slane %v921_v24, 2  ;;  %v1668_v26 = vmul.f32 %v5218_v16, %v5780_v60  ;;  %v2039_v44 = vsel %vm972_vm0, %v2037_v38, %v5270_v50  ;;  %v878_v58 = vadd.f32 %v782_v28, %v5229_v21 }
  0xbe   : > { %v1302_v33 = vrot.slane %v1231_v52, 1  ;;  %v1915_v32 = vadd.f32 %v1820_v34, %v1706_v29  ;;  %v1188_v4 = vadd.f32 %v1149_v15, %v1106_v53  ;;  %v2469_v19 = vsel %vm2172_vm3, %v2385_v37, 0.0 }
  0xbf   : > { %2467 = vadd.xlane.f32.xlu2 %v2466_v13  ;;  %v644_v36 = vmul.f32 %v5198_v5, %v5642_v1  ;;  %v1107_v39 = vadd.f32 %v1002_v49, %v878_v58  ;;  %v1521_v35 = vrot.slane %v1441_v42, 2  ;;  %v711_v45 = vmul.f32 %v5200_v6, %v5687_v57 }
  0xc0   : > { %v922_v38 = vmul.f32 %v5202_v7, %v5687_v57  ;;  %v5864_v24 = vadd.f32 %v2038_v20, %v1915_v32  ;;  %v1397_v52 = vadd.f32 %v1300_v46, %v1188_v4  ;;  %v1750_v13 = vmul.f32 %v5210_v11, %v5854_v48  ;;  %v5877_v46 = vld [vmem:[%s5170_s11 + $0x88] sm:$0xff] }
  0xc1   : > { %v677_v34 = vadd.f32 %v5827_v56, %v644_v36  ;;  %v1189_v15 = vadd.f32 %v5246_v31, %v1107_v39  ;;  %v1960_v1 = vmul.f32 %v5237_v27, %v5854_v48  ;;  %v783_v37 = vrot.slane %v711_v45, 1 }
  0xc2   : > { %9322 = vst [vmem:[#allocation42_spill] sm:$0xff] %v5864_v24  ;;  %v1003_v42 = vrot.slane %v922_v38, 2  ;;  %v2232_v29 = vsel %vm2176_vm4, %v5864_v24, 0.0  ;;  %v1625_v53 = vadd.f32 %v1520_v61, %v1397_v52  ;;  %v2386_v32 = vmul.f32 %v5864_v24, %v5864_v24 }
  0xc3   : > { %v5881_v20 = vmul.f32 %v5206_v9, %v5780_v60  ;;  %2233 = vadd.xlane.f32.xlu1 %v2232_v29  ;;  %v1398_v58 = vadd.f32 %v1302_v33, %v1189_v15  ;;  %v784_v4 = vsel %vm760_vm1, %v782_v28, %v783_v37  ;;  %v1442_v39 = vmul.f32 %v5208_v10, %v5780_v60 }
  0xc4   : > { %v1004_v36 = vsel %vm972_vm0, %v1002_v49, %v1003_v42  ;;  %v1707_v45 = vadd.f32 %v1668_v26, %v1625_v53  ;;  %2470 = vadd.xlane.f32.xlu0 %v2469_v19  ;;  %v879_v61 = vadd.f32 %v784_v4, %v677_v34  ;;  %v1150_v38 = vmul.f32 %v5204_v8, %v5733_v14 }
  0xc5   : > { %v1303_v52 = vrot.slane %v5881_v20, 1  ;;  %v1626_v24 = vadd.f32 %v1521_v35, %v1398_v58  ;;  %v1821_v2 = vrot.slane %v1750_v13, 1  ;;  %v1522_v43 = vrot.slane %v1442_v39, 2 }
  0xc6   : > { %v5892_v15 = vmul.f32 %v5210_v11, %v5877_v46  ;;  %v9323_v28 = vrot.slane %v5801_v22, 1  ;;  %v2040_v29 = vrot.slane %v1960_v1, 2  ;;  %v1108_v59 = vadd.f32 %v1004_v36, %v879_v61  ;;  %v2183_v19 = vpop.xlane.xlu1 %2182  ;;  %v2175_v34 = vpop.xlane.xlu0 %2174 }
  0xc7   : > { %v5898_v26 = vmul.f32 %v5237_v27, %v5877_v46  ;;  %v2472_v53 = vsel %vm2176_vm4, %v2386_v32, 0.0  ;;  %v1708_v13 = vadd.f32 %v5266_v47, %v1626_v24  ;;  %v1304_v20 = vsel %vm760_vm1, %v1302_v33, %v1303_v52 }
  0xc8   : > { %v1916_v49 = vadd.f32 %v9323_v28, %v1707_v45  ;;  %v645_v58 = vmul.f32 %v5198_v5, %v5687_v57  ;;  %v1190_v22 = vadd.f32 %v1150_v38, %v1108_v59  ;;  %v1523_v1 = vsel %vm972_vm0, %v1521_v35, %v1522_v43 }
  0xc9   : > { %v1669_v36 = vmul.f32 %v5218_v16, %v5854_v48  ;;  %v1917_v39 = vadd.f32 %v1821_v2, %v1708_v13  ;;  %v1822_v45 = vrot.slane %v5892_v15, 1  ;;  %v2041_v32 = vrot.slane %v5898_v26, 2 }
  0xca   : > { %v5905_v4 = vadd.f32 %v2039_v44, %v1916_v49  ;;  %v678_v24 = vadd.f32 %v5827_v56, %v645_v58  ;;  %v1399_v61 = vadd.f32 %v1304_v20, %v1190_v22  ;;  %v1005_v57 = vsel %vm972_vm0, %v1003_v42, %v5231_v23 }
  0xcb   : > { %v1151_v59 = vmul.f32 %v5204_v8, %v5780_v60  ;;  %v2420_v44 = vpop.xlane.xlu2 %2419  ;;  %2473 = vadd.xlane.f32.xlu1 %v2472_v53  ;;  %v5921_v38 = vadd.f32 %v2040_v29, %v1917_v39  ;;  %v1823_v26 = vsel %vm760_vm1, %v1821_v2, %v1822_v45  ;;  %v2042_v42 = vsel %vm972_vm0, %v2040_v29, %v2041_v32 }
  0xcc   : > { %9324 = vst [vmem:[#allocation43_spill] sm:$0xff] %v5905_v4  ;;  %v2235_v33 = vsel %vm2180_vm2, %v5905_v4, 0.0  ;;  %v2387_v35 = vmul.f32 %v5905_v4, %v5905_v4  ;;  %v880_v15 = vadd.f32 %v783_v37, %v678_v24  ;;  %v1627_v28 = vadd.f32 %v1523_v1, %v1399_v61 }
  0xcd   : > { %2236 = vadd.xlane.f32.xlu2 %v2235_v33  ;;  %9325 = vst [vmem:[#allocation44_spill] sm:$0xff] %v5921_v38  ;;  %v2238_v49 = vsel %vm2172_vm3, %v5921_v38, 0.0  ;;  %v1524_v53 = vsel %vm972_vm0, %v1522_v43, %v5233_v25  ;;  %v5929_v58 = vmul.f32 0.03125, %v2183_v19  ;;  %v2388_v22 = vmul.f32 %v5921_v38, %v5921_v38 }
  0xce   : > { %v1109_v13 = vadd.f32 %v1005_v57, %v880_v15  ;;  %2239 = vadd.xlane.f32.xlu0 %v2238_v49  ;;  %v1709_v20 = vadd.f32 %v1669_v36, %v1627_v28  ;;  %v2417_v37 = vpop.xlane.xlu1 %2416  ;;  %v2179_v1 = vpop.xlane.xlu0 %2178  ;;  %v2475_v39 = vsel %vm2180_vm2, %v2387_v35, 0.0  ;;  %v5938_v2 = vmul.f32 %v5200_v6, %v5733_v14 }
  0xcf   : > { %v5934_v33 = vmul.f32 0.03125, %v2179_v1  ;;  %v1670_v43 = vmul.f32 %v5218_v16, %v5877_v46  ;;  %v5942_v19 = vmul.f32 0.03125, %v2175_v34  ;;  %v2560_v36 = vmul.f32 0.03125, %v2420_v44 }
  0xd0   : > { %v1191_v24 = vadd.f32 %v1151_v59, %v1109_v13  ;;  %v1918_v29 = vadd.f32 %v1823_v26, %v1709_v20  ;;  %v2559_v57 = vmul.f32 0.03125, %v2417_v37  ;;  %v785_v59 = vrot.slane %v5938_v2, 1 }
  0xd1   : > { %v2608_v15 = vmul.f32 %v5934_v33, %v5934_v33  ;;  %v2478_v28 = vsel %vm2172_vm3, %v2388_v22, 0.0  ;;  %v5952_v26 = vmul.f32 %v5202_v7, %v5733_v14  ;;  %v5956_v34 = vmul.f32 %v5206_v9, %v5854_v48 }
  0xd2   : > { %v1400_v61 = vadd.f32 %v1303_v52, %v1191_v24  ;;  %v5947_v35 = vadd.f32 %v2042_v42, %v1918_v29  ;;  %v881_v20 = vadd.f32 %v785_v59, %v5229_v21  ;;  %v2609_v1 = vmul.f32 %v5929_v58, %v5929_v58 }
  0xd3   : > { %v2423_v49 = vpop.xlane.xlu2 %2422  ;;  %v2656_v44 = vsub.f32 %v2560_v36, %v2608_v15  ;;  %v1006_v22 = vrot.slane %v5952_v26, 2  ;;  %v2607_v24 = vmul.f32 %v5942_v19, %v5942_v19 }
  0xd4   : > { %9326 = vst [vmem:[#allocation45_spill] sm:$0xff] %v5947_v35  ;;  %v1628_v52 = vadd.f32 %v1524_v53, %v1400_v61  ;;  %v2561_v13 = vmul.f32 0.03125, %v2423_v49  ;;  %v2241_v42 = vsel %vm2176_vm4, %v5947_v35, 0.0  ;;  %v5969_v53 = vld [vmem:[%s5170_s11 + $0x90] sm:$0xff]  ;;  %v2389_v29 = vmul.f32 %v5947_v35, %v5947_v35 }
  0xd5   : > { %2476 = vadd.xlane.f32.xlu2 %v2475_v39  ;;  %2242 = vadd.xlane.f32.xlu1 %v2241_v42  ;;  %v5966_v2 = vadd.f32 1e-06, %v2656_v44  ;;  %v2043_v39 = vsel %vm972_vm0, %v2041_v32, %v5270_v50  ;;  %v1110_v36 = vadd.f32 %v1006_v22, %v881_v20  ;;  %v2655_v15 = vsub.f32 %v2559_v57, %v2607_v24 }
  0xd6   : > { %v1710_v37 = vadd.f32 %v1670_v43, %v1628_v52  ;;  %2479 = vadd.xlane.f32.xlu0 %v2478_v28  ;;  %v1305_v43 = vrot.slane %v5956_v34, 1  ;;  %v2657_v49 = vsub.f32 %v2561_v13, %v2609_v1  ;;  %v1443_v52 = vmul.f32 %v5208_v10, %v5854_v48  ;;  %v2186_v12 = vpop.xlane.xlu0 %2185 }
  0xd7   : > { %4636 = vrsqrt.f32 %v5966_v2  ;;  %v1192_v26 = vadd.f32 %v5246_v31, %v1110_v36  ;;  %v5982_v32 = vmul.f32 %v5210_v11, %v5969_v53  ;;  %v646_v44 = vmul.f32 %v5198_v5, %v5733_v14 }
  0xd8   : > { %v1919_v61 = vadd.f32 %v1822_v45, %v1710_v37  ;;  %v2481_v45 = vsel %vm2176_vm4, %v2389_v29, 0.0  ;;  %v1525_v34 = vrot.slane %v1443_v52, 2  ;;  %v5991_v13 = vmul.f32 %v5237_v27, %v5969_v53 }
  0xd9   : > { %v1401_v57 = vadd.f32 %v1305_v43, %v1192_v26  ;;  %v5995_v42 = vadd.f32 1e-06, %v2655_v15  ;;  %v5997_v37 = vadd.f32 1e-06, %v2657_v49  ;;  %v713_v1 = vmul.f32 %v5200_v6, %v5780_v60  ;;  %v2189_v54 = vpop.xlane.xlu1 %2188 }
  0xda   : > { %v5984_v28 = vadd.f32 %v2043_v39, %v1919_v61  ;;  %v1824_v24 = vrot.slane %v5982_v32, 1  ;;  %v924_v39 = vmul.f32 %v5202_v7, %v5780_v60  ;;  %v6006_v29 = vmul.f32 %v5206_v9, %v5877_v46 }
  0xdb   : > { %v1629_v14 = vadd.f32 %v1525_v34, %v1401_v57  ;;  %v679_v61 = vadd.f32 %v5827_v56, %v646_v44  ;;  %v786_v15 = vrot.slane %v713_v1, 1  ;;  %v2044_v52 = vrot.slane %v5991_v13, 2 }
  0xdc   : > { %9327 = vst [vmem:[#allocation46_spill] sm:$0xff] %v5984_v28  ;;  %v2244_v20 = vsel %vm2180_vm2, %v5984_v28, 0.0  ;;  %v2390_v36 = vmul.f32 %v5984_v28, %v5984_v28  ;;  %v1007_v32 = vrot.slane %v924_v39, 2  ;;  %4638 = vrsqrt.f32 %v5995_v42  ;;  %v6021_v28 = vld [vmem:[%s5170_s11 + $0x98] sm:$0xff] }
  0xdd   : > { %2245 = vadd.xlane.f32.xlu2 %v2244_v20  ;;  %2482 = vadd.xlane.f32.xlu1 %v2481_v45  ;;  %v6011_v49 = vpop.eup %4636  ;;  %v1711_v26 = vadd.f32 %v5266_v47, %v1629_v14  ;;  %v787_v57 = vsel %vm760_vm1, %v785_v59, %v786_v15  ;;  %v1444_v45 = vmul.f32 %v5208_v10, %v5877_v46  ;;  %4640 = vrsqrt.f32 %v5997_v37 }
  0xde   : > { %v1152_v44 = vmul.f32 %v5204_v8, %v5854_v48  ;;  %v1306_v1 = vrot.slane %v6006_v29, 1  ;;  %v2484_v13 = vsel %vm2180_vm2, %v2390_v36, 0.0  ;;  %v2810_v14 = vmul.f32 %v6011_v49, %v5966_v2 }
  0xdf   : > { %v1920_v20 = vadd.f32 %v1824_v24, %v1711_v26  ;;  %v882_v39 = vadd.f32 %v787_v57, %v679_v61  ;;  %v1008_v59 = vsel %vm972_vm0, %v1006_v22, %v1007_v32  ;;  %v1526_v38 = vrot.slane %v1444_v45, 2 }
  0xe0   : > { %v6034_v26 = vmul.f32 %v5210_v11, %v6021_v28  ;;  %v1307_v36 = vsel %vm760_vm1, %v1305_v43, %v1306_v1  ;;  %v2811_v61 = vmul.f32 %v6011_v49, %v2810_v14  ;;  %v6044_v57 = vmul.f32 %v5237_v27, %v6021_v28 }
  0xe1   : > { %v6030_v35 = vadd.f32 %v2044_v52, %v1920_v20  ;;  %v1111_v4 = vadd.f32 %v1008_v59, %v882_v39  ;;  %v1527_v20 = vsel %vm972_vm0, %v1525_v34, %v1526_v38  ;;  %v647_v39 = vmul.f32 %v5198_v5, %v5780_v60  ;;  %v2192_v18 = vpop.xlane.xlu2 %2191 }
  0xe2   : > { %v6039_v63 = vpop.eup %4638  ;;  %v1671_v59 = vmul.f32 %v5218_v16, %v5969_v53  ;;  %v6072_v17 = vmul.f32 0.03125, %v2186_v12  ;;  %vm2816_vm5 = vweird.f32 %v6011_v49  ;;  %vm2815_vm6 = vweird.f32 %v5966_v2 }
  0xe3   : > { %9328 = vst [vmem:[#allocation47_spill] sm:$0xff] %v6030_v35  ;;  %v2247_v29 = vsel %vm2172_vm3, %v6030_v35, 0.0  ;;  %v1193_v22 = vadd.f32 %v1152_v44, %v1111_v4  ;;  %v6046_v45 = vpop.eup %4640  ;;  %v2800_v4 = vmul.f32 %v6039_v63, %v5995_v42  ;;  %v2045_v44 = vrot.slane %v6044_v57, 2  ;;  %vm6115_vm7 = vmor %vm2815_vm6, %vm2816_vm5 }
  0xe4   : > { %2248 = vadd.xlane.f32.xlu0 %v2247_v29  ;;  %v680_v14 = vadd.f32 %v5827_v56, %v647_v39  ;;  %v2812_v29 = vmul.f32 0.5, %v2811_v61  ;;  %v2820_v34 = vmul.f32 %v6046_v45, %v5997_v37  ;;  %vm2806_vm8 = vweird.f32 %v6039_v63 }
  0xe5   : > { %2485 = vadd.xlane.f32.xlu2 %v2484_v13  ;;  %v1825_v13 = vrot.slane %v6034_v26, 1  ;;  %v1402_v43 = vadd.f32 %v1307_v36, %v1193_v22  ;;  %v1009_v26 = vsel %vm972_vm0, %v1007_v32, %v5231_v23  ;;  %v1153_v22 = vmul.f32 %v5204_v8, %v5877_v46 }
  0xe6   : > { %v883_v36 = vadd.f32 %v786_v15, %v680_v14  ;;  %v2801_v57 = vmul.f32 %v6039_v63, %v2800_v4  ;;  %v2046_v39 = vsel %vm972_vm0, %v2044_v52, %v2045_v44  ;;  %v2813_v55 = vsub.f32 1.5, %v2812_v29 }
  0xe7   : > { %v1630_v0 = vadd.f32 %v1527_v20, %v1402_v43  ;;  %v1826_v60 = vsel %vm760_vm1, %v1824_v24, %v1825_v13  ;;  %v2821_v20 = vmul.f32 %v6046_v45, %v2820_v34  ;;  %v2391_v32 = vmul.f32 %v6030_v35, %v6030_v35  ;;  %v2426_v24 = vpop.xlane.xlu0 %2425 }
  0xe8   : > { %v1112_v61 = vadd.f32 %v1009_v26, %v883_v36  ;;  %v1672_v4 = vmul.f32 %v5218_v16, %v6021_v28  ;;  %v2562_v34 = vmul.f32 0.03125, %v2426_v24  ;;  %v6084_v26 = vmul.f32 0.5, %v2801_v57 }
  0xe9   : > { %v1712_v62 = vadd.f32 %v1671_v59, %v1630_v0  ;;  %v2487_v29 = vsel %vm2172_vm3, %v2391_v32, 0.0  ;;  %v6087_v12 = vmul.f32 %v6011_v49, %v2813_v55  ;;  %v6099_v57 = vmul.f32 %v5202_v7, %v5854_v48  ;;  %v2429_v32 = vpop.xlane.xlu1 %2428 }
  0xea   : > { %v1194_v14 = vadd.f32 %v1153_v22, %v1112_v61  ;;  %v714_v22 = vmul.f32 %v5200_v6, %v5854_v48  ;;  %v6102_v55 = vmul.f32 0.03125, %v2189_v54  ;;  %v2047_v2 = vsel %vm972_vm0, %v2045_v44, %v5270_v50 }
  0xeb   : > { %v1921_v43 = vadd.f32 %v1826_v60, %v1712_v62  ;;  %v1528_v62 = vsel %vm972_vm0, %v1526_v38, %v5233_v25  ;;  %v6089_v60 = vmul.f32 0.5, %v2821_v20  ;;  %v6153_v0 = vmul.f32 %v5200_v6, %v5877_v46 }
  0xec   : > { %v1403_v59 = vadd.f32 %v1306_v1, %v1194_v14  ;;  %2488 = vadd.xlane.f32.xlu0 %v2487_v29  ;;  %v2610_v1 = vmul.f32 %v6072_v17, %v6072_v17  ;;  %v788_v24 = vrot.slane %v714_v22, 1  ;;  %v6110_v14 = vmul.f32 %v5206_v9, %v5969_v53 }
  0xed   : > { %v6077_v52 = vadd.f32 %v2046_v39, %v1921_v43  ;;  %v6104_v39 = vmul.f32 0.03125, %v2192_v18  ;;  %v2611_v44 = vmul.f32 %v6102_v55, %v6102_v55  ;;  %v648_v18 = vmul.f32 %v5198_v5, %v5854_v48  ;;  %v4533_v48 = vld [vmem:[%s9139_s7 + $0x8] sm:$0xff] }
  0xee   : > { %v1631_v38 = vadd.f32 %v1528_v62, %v1403_v59  ;;  %v2658_v43 = vsub.f32 %v2562_v34, %v2610_v1  ;;  %v2803_v62 = vsub.f32 1.5, %v6084_v26  ;;  %v1010_v59 = vrot.slane %v6099_v57, 2  ;;  %v2432_v34 = vpop.xlane.xlu2 %2431  ;;  %v6128_v26 = vld [vmem:[%s5170_s11 + $0xa0] sm:$0xff]  ;;  %3682 = vmatpush.bf16.msra.mxu0 %v4533_v48  ;;  %4544 = vmatpush.bf16.msra.mxu3 %v4533_v48 }
  0xef   : > { %9329 = vst [vmem:[#allocation48_spill] sm:$0xff] %v6077_v52  ;;  %v2250_v36 = vsel %vm2176_vm4, %v6077_v52, 0.0  ;;  %v2392_v61 = vmul.f32 %v6077_v52, %v6077_v52  ;;  %v2612_v1 = vmul.f32 %v6104_v39, %v6104_v39  ;;  %v2563_v57 = vmul.f32 0.03125, %v2429_v32 }
  0xf0   : > { %2251 = vadd.xlane.f32.xlu1 %v2250_v36  ;;  %v1713_v20 = vadd.f32 %v1672_v4, %v1631_v38  ;;  %v2818_v4 = vsel %vm6115_vm7, %v6011_v49, %v6087_v12  ;;  %v884_v36 = vadd.f32 %v788_v24, %v5229_v21  ;;  %v6133_v38 = vmul.f32 %v5208_v10, %v5969_v53 }
  0xf1   : > { %v2490_v22 = vsel %vm2176_vm4, %v2392_v61, 0.0  ;;  %v2564_v54 = vmul.f32 0.03125, %v2432_v34  ;;  %v6147_v15 = vmul.f32 %v5210_v11, %v6128_v26  ;;  %v681_v34 = vadd.f32 %v5827_v56, %v648_v18 }
  0xf2   : > { %v1922_v29 = vadd.f32 %v1825_v13, %v1713_v20  ;;  %v6142_v13 = vadd.f32 1e-06, %v2658_v43  ;;  %v1113_v12 = vadd.f32 %v1010_v59, %v884_v36  ;;  %v1308_v20 = vrot.slane %v6110_v14, 1 }
  0xf3   : > { %v1529_v32 = vrot.slane %v6133_v38, 2  ;;  %v6161_v14 = vmul.f32 %v5202_v7, %v5877_v46  ;;  %v9194_v36 = vrot.slane %v6153_v0, 1  ;;  %vm2805_vm9 = vweird.f32 %v5995_v42 }
  0xf4   : > { %v6140_v49 = vadd.f32 %v2047_v2, %v1922_v29  ;;  %v1195_v43 = vadd.f32 %v5246_v31, %v1113_v12  ;;  %v2659_v2 = vsub.f32 %v2563_v57, %v2611_v44  ;;  %v6169_v29 = vmul.f32 %v5237_v27, %v6128_v26  ;;  %vm6257_vm11 = vmor %vm2805_vm9, %vm2806_vm8 }
  0xf5   : > { %4642 = vrsqrt.f32 %v6142_v13  ;;  %v2660_v44 = vsub.f32 %v2564_v54, %v2612_v1  ;;  %v790_v18 = vsel %vm760_vm1, %v788_v24, %v9194_v36  ;;  %v6183_v57 = vmul.f32 %v5206_v9, %v6021_v28 }
  0xf6   : > { %9332 = vst [vmem:[#allocation49_spill] sm:$0xff] %v6140_v49  ;;  %v2253_v61 = vsel %vm2180_vm2, %v6140_v49, 0.0  ;;  %v2393_v38 = vmul.f32 %v6140_v49, %v6140_v49  ;;  %v1827_v12 = vrot.slane %v6147_v15, 1  ;;  %v885_v48 = vadd.f32 %v790_v18, %v681_v34  ;;  %v6204_v34 = vld [vmem:[%s5170_s11 + $0xa8] sm:$0xff] }
  0xf7   : > { %2254 = vadd.xlane.f32.xlu2 %v2253_v61  ;;  %v6187_v61 = vmul.f32 %v5208_v10, %v6021_v28  ;;  %v1154_v49 = vmul.f32 %v5204_v8, %v5969_v53  ;;  %v9333_v1 = vsub.f32 %v5318_v51, %v5934_v33  ;;  %v6195_v24 = vadd.f32 1e-06, %v2659_v2  ;;  %v6211_v33 = vld [vmem:[%s9137_s5] ss:$0 sm:$0xff] }
  0xf8   : > { %2491 = vadd.xlane.f32.xlu1 %v2490_v22  ;;  %v1404_v22 = vadd.f32 %v1308_v20, %v1195_v43  ;;  %v2048_v36 = vrot.slane %v6169_v29, 2  ;;  %v9334_v52 = vrot.slane %v6161_v14, 2  ;;  %v9199_v31 = vrot.slane %v6183_v57, 1  ;;  %9335 = vst [vmem:[#allocation50_spill] sm:$0xff] %v6211_v33 }
  0xf9   : > { %v3280_v54 = vmul.f32 %v2818_v4, %v9333_v1  ;;  %v2804_v51 = vmul.f32 %v6039_v63, %v2803_v62  ;;  %vm2826_vm10 = vweird.f32 %v6046_v45  ;;  %v6214_v4 = vadd.f32 1e-06, %v2660_v44 }
  0xfa   : > { %v1632_v43 = vadd.f32 %v1529_v32, %v1404_v22  ;;  %v1012_v35 = vsel %vm972_vm0, %v1010_v59, %v9334_v52  ;;  %v2493_v22 = vsel %vm2180_vm2, %v2393_v38, 0.0  ;;  %v1530_v52 = vrot.slane %v6187_v61, 2 }
  0xfb   : > { %v1114_v18 = vadd.f32 %v1012_v35, %v885_v48  ;;  %v6217_v59 = vpop.eup %4642  ;;  %v9336_v2 = vsub.f32 1.5, %v6089_v60  ;;  %v1310_v62 = vsel %vm760_vm1, %v1308_v20, %v9199_v31  ;;  %v3332_v48 = vmul.f32 %v6211_v33, %v3280_v54 }
  0xfc   : > { %v1714_v15 = vadd.f32 %v5266_v47, %v1632_v43  ;;  %v2195_v43 = vpop.xlane.xlu0 %2194  ;;  %4644 = vrsqrt.f32 %v6195_v24  ;;  %v1531_v44 = vsel %vm972_vm0, %v1529_v32, %v1530_v52  ;;  %v6232_v60 = vmul.f32 %v5210_v11, %v6204_v34 }
  0xfd   : > { %v2824_v35 = vmul.f32 %v6046_v45, %v9336_v2  ;;  %v1196_v38 = vadd.f32 %v1154_v49, %v1114_v18  ;;  %v1673_v20 = vmul.f32 %v5218_v16, %v6128_v26  ;;  %v6240_v54 = vmul.f32 %v5237_v27, %v6204_v34 }
  0xfe   : > { %v1923_v29 = vadd.f32 %v1827_v12, %v1714_v15  ;;  %v2830_v32 = vmul.f32 %v6217_v59, %v6142_v13  ;;  %4646 = vrsqrt.f32 %v6214_v4  ;;  %v9200_v15 = vrot.slane %v6232_v60, 1 }
  0xff   : > { %2494 = vadd.xlane.f32.xlu2 %v2493_v22  ;;  %v1405_v49 = vadd.f32 %v1310_v62, %v1196_v38  ;;  %v4532_v22 = vld [vmem:[%s9139_s7] sm:$0xff]  ;;  %v649_v18 = vmul.f32 %v5198_v5, %v5877_v46  ;;  %v2703_v2 = vsub.f32 %v5310_v41, %v5942_v19  ;;  %vm2825_vm12 = vweird.f32 %v5997_v37 }
 0x100   : > { %v6234_v1 = vadd.f32 %v2048_v36, %v1923_v29  ;;  %v6264_v38 = vld [vmem:[%s9138_s6] ss:$0 sm:$0xff]  ;;  %3683 = vmatpush.bf16.msra.mxu0 %v4532_v22  ;;  %4545 = vmatpush.bf16.msra.mxu3 %v4532_v22  ;;  %v2808_v41 = vsel %vm6257_vm11, %v6039_v63, %v2804_v51  ;;  %vm6274_vm13 = vmor %vm2825_vm12, %vm2826_vm10  ;;  %v1829_v42 = vsel %vm760_vm1, %v1827_v12, %v9200_v15  ;;  %v2049_v37 = vrot.slane %v6240_v54, 2 }
 0x101   : > { %v1633_v62 = vadd.f32 %v1531_v44, %v1405_v49  ;;  %v682_v44 = vadd.f32 %v5827_v56, %v649_v18  ;;  %v6284_v49 = vadd.f32 %v6264_v38, %v3332_v48  ;;  %v2828_v63 = vsel %vm6274_vm13, %v6046_v45, %v2824_v35  ;;  %v2201_v45 = vpop.xlane.xlu2 %2200 }
 0x102   : > { %9337 = vst [vmem:[#allocation51_spill] sm:$0xff] %v6234_v1  ;;  %v2256_v46 = vsel %vm2172_vm3, %v6234_v1, 0.0  ;;  %v9342_v22 = vrot.slane %v6161_v14, 2  ;;  %v6293_v31 = vpop.eup %4644  ;;  %v2831_v12 = vmul.f32 %v6217_v59, %v2830_v32  ;;  %v2050_v54 = vsel %vm972_vm0, %v2048_v36, %v2049_v37 }
 0x103   : > { %2257 = vadd.xlane.f32.xlu0 %v2256_v46  ;;  %v1715_v51 = vadd.f32 %v1673_v20, %v1633_v62  ;;  %v2198_v46 = vpop.xlane.xlu1 %2197  ;;  %v9343_v48 = vrot.slane %v6153_v0, 1  ;;  %v1155_v19 = vmul.f32 %v5204_v8, %v6021_v28  ;;  %v6303_v14 = vmul.f32 %v2808_v41, %v2703_v2 }
 0x104   : > { %v1013_v29 = vsel %vm972_vm0, %v9342_v22, %v5231_v23  ;;  %v6301_v20 = vpop.eup %4646  ;;  %v9344_v62 = vsub.f32 %v5308_v40, %v5929_v58  ;;  %v2840_v2 = vmul.f32 %v6293_v31, %v6195_v24  ;;  %v6321_v58 = vmul.f32 0.03125, %v2195_v43 }
 0x105   : > { %v886_v18 = vadd.f32 %v9343_v48, %v682_v44  ;;  %v1924_v35 = vadd.f32 %v1829_v42, %v1715_v51  ;;  %v2394_v42 = vmul.f32 %v6234_v1, %v6234_v1  ;;  %v2435_v51 = vpop.xlane.xlu0 %2434  ;;  %v6317_v48 = vmul.f32 0.5, %v2831_v12 }
 0x106   : > { %v6308_v22 = vmul.f32 %v2828_v63, %v9344_v62  ;;  %v2850_v63 = vmul.f32 %v6301_v20, %v6214_v4  ;;  %v1532_v12 = vsel %vm972_vm0, %v1530_v52, %v5233_v25  ;;  %v1674_v43 = vmul.f32 %v5218_v16, %v6204_v34  ;;  %v9347_v62 = vld [vmem:[#allocation28_spill] sm:$0xff] }
 0x107   : > { %v1115_v32 = vadd.f32 %v1013_v29, %v886_v18  ;;  %v6313_v44 = vadd.f32 %v2050_v54, %v1924_v35  ;;  %v9346_v54 = vrot.slane %v6183_v57, 1  ;;  %v2565_v35 = vmul.f32 0.03125, %v2435_v51 }
 0x108   : > { %v716_v61 = vmul.f32 %v5200_v6, %v5969_v53  ;;  %v927_v57 = vmul.f32 %v5202_v7, %v5969_v53  ;;  %v2833_v52 = vsub.f32 1.5, %v6317_v48  ;;  %v2851_v51 = vmul.f32 %v6301_v20, %v2850_v63 }
 0x109   : > { %9345 = vst [vmem:[#allocation52_spill] sm:$0xff] %v6313_v44  ;;  %v1197_v40 = vadd.f32 %v1155_v19, %v1115_v32  ;;  %v2259_v29 = vsel %vm2176_vm4, %v6313_v44, 0.0  ;;  %v2496_v19 = vsel %vm2172_vm3, %v2394_v42, 0.0  ;;  %v2395_v41 = vmul.f32 %v6313_v44, %v6313_v44 }
 0x10a   : > { %2260 = vadd.xlane.f32.xlu1 %v2259_v29  ;;  %v2613_v42 = vmul.f32 %v6321_v58, %v6321_v58  ;;  %v1014_v32 = vrot.slane %v927_v57, 2  ;;  %v6353_v36 = vmul.f32 %v5206_v9, %v6128_v26  ;;  %v6355_v15 = vmul.f32 0.03125, %v2198_v46 }
 0x10b   : > { %v1406_v18 = vadd.f32 %v9346_v54, %v1197_v40  ;;  %2497 = vadd.xlane.f32.xlu0 %v2496_v19  ;;  %v2841_v40 = vmul.f32 %v6293_v31, %v2840_v2  ;;  %v2438_v54 = vpop.xlane.xlu1 %2437  ;;  %v791_v19 = vrot.slane %v716_v61, 1  ;;  %v6357_v48 = vmul.f32 0.03125, %v2201_v45 }
 0x10c   : > { %9348 = vst [vmem:[#allocation28_spill] sm:$0xff] %v6355_v15  ;;  %v2661_v2 = vsub.f32 %v2565_v35, %v2613_v42  ;;  %v2499_v63 = vsel %vm2176_vm4, %v2395_v41, 0.0  ;;  %v6365_v61 = vmul.f32 %v5208_v10, %v6128_v26  ;;  %v9350_v46 = vrot.slane %v6232_v60, 1 }
 0x10d   : > { %v1634_v29 = vadd.f32 %v1532_v12, %v1406_v18  ;;  %9349 = vst [vmem:[#allocation53_spill] sm:$0xff] %v6357_v48  ;;  %v2441_v12 = vpop.xlane.xlu2 %2440  ;;  %v2051_v18 = vsel %vm972_vm0, %v2049_v37, %v5270_v50  ;;  %v887_v44 = vadd.f32 %v791_v19, %v5229_v21  ;;  %v6367_v57 = vmul.f32 0.5, %v2841_v40 }
 0x10e   : > { %v2566_v45 = vmul.f32 0.03125, %v2438_v54  ;;  %v650_v35 = vmul.f32 %v5198_v5, %v5969_v53  ;;  %v6376_v37 = vmul.f32 0.5, %v2851_v51  ;;  %v2567_v41 = vmul.f32 0.03125, %v2441_v12  ;;  %v9352_v53 = vld [vmem:[#allocation25_spill] sm:$0xff] }
 0x10f   : > { %v1716_v0 = vadd.f32 %v1674_v43, %v1634_v29  ;;  %v6372_v29 = vld [vmem:[%s5170_s11 + $0xb0] sm:$0xff]  ;;  %v1116_v42 = vadd.f32 %v1014_v32, %v887_v44  ;;  %v1311_v1 = vrot.slane %v6353_v36, 1  ;;  %v2614_v40 = vmul.f32 %v6355_v15, %v6355_v15 }
 0x110   : > { %v2615_v60 = vmul.f32 %v6357_v48, %v6357_v48  ;;  %vm2836_vm14 = vweird.f32 %v6217_v59  ;;  %v1533_v54 = vrot.slane %v6365_v61, 2  ;;  %v6392_v36 = vmul.f32 %v5210_v11, %v6372_v29 }
 0x111   : > { %v1925_v43 = vadd.f32 %v9350_v46, %v1716_v0  ;;  %v6385_v0 = vadd.f32 1e-06, %v2661_v2  ;;  %v1198_v51 = vadd.f32 %v9352_v53, %v1116_v42  ;;  %v6396_v44 = vmul.f32 %v5200_v6, %v6021_v28 }
 0x112   : > { %2500 = vadd.xlane.f32.xlu1 %v2499_v63  ;;  %v683_v2 = vadd.f32 %v5827_v56, %v650_v35  ;;  %v6403_v63 = vmul.f32 %v5202_v7, %v6021_v28  ;;  %vm2835_vm15 = vweird.f32 %v6142_v13  ;;  %v2663_v61 = vsub.f32 %v2567_v41, %v2615_v60  ;;  %v6430_v35 = vld [vmem:[%s5170_s11 + $0xb8] sm:$0xff] }
 0x113   : > { %v6379_v50 = vadd.f32 %v2051_v18, %v1925_v43  ;;  %v2662_v18 = vsub.f32 %v2566_v45, %v2614_v40  ;;  %v1407_v46 = vadd.f32 %v1311_v1, %v1198_v51  ;;  %v6408_v43 = vmul.f32 %v5237_v27, %v6372_v29  ;;  %vm6470_vm8 = vmor %vm2835_vm15, %vm2836_vm14 }
 0x114   : > { %v9215_v42 = vrot.slane %v6396_v44, 1  ;;  %v6416_v40 = vmul.f32 %v5206_v9, %v6204_v34  ;;  %4648 = vrsqrt.f32 %v6385_v0  ;;  %v1830_v60 = vrot.slane %v6392_v36, 1 }
 0x115   : > { %9351 = vst [vmem:[#allocation54_spill] sm:$0xff] %v6379_v50  ;;  %v2262_v12 = vsel %vm2180_vm2, %v6379_v50, 0.0  ;;  %v2396_v45 = vmul.f32 %v6379_v50, %v6379_v50  ;;  %v1635_v41 = vadd.f32 %v1533_v54, %v1407_v46  ;;  %v6427_v50 = vadd.f32 1e-06, %v2662_v18 }
 0x116   : > { %2263 = vadd.xlane.f32.xlu2 %v2262_v12  ;;  %v6420_v12 = vmul.f32 %v5208_v10, %v6204_v34  ;;  %v793_v51 = vsel %vm760_vm1, %v791_v19, %v9215_v42  ;;  %v9353_v21 = vrot.slane %v6403_v63, 2  ;;  %v1156_v10 = vmul.f32 %v5204_v8, %v6128_v26 }
 0x117   : > { %v888_v53 = vadd.f32 %v793_v51, %v683_v2  ;;  %v2834_v46 = vmul.f32 %v6217_v59, %v2833_v52  ;;  %vm2845_vm5 = vweird.f32 %v6195_v24  ;;  %vm2846_vm6 = vweird.f32 %v6293_v31 }
 0x118   : > { %v1016_v48 = vsel %vm972_vm0, %v1014_v32, %v9353_v21  ;;  %v1717_v19 = vadd.f32 %v5266_v47, %v1635_v41  ;;  %v2052_v36 = vrot.slane %v6408_v43, 2  ;;  %v2502_v18 = vsel %vm2180_vm2, %v2396_v45, 0.0  ;;  %v2210_v45 = vpop.xlane.xlu2 %2209  ;;  %vm6511_vm10 = vmor %vm2845_vm5, %vm2846_vm6 }
 0x119   : > { %v1117_v2 = vadd.f32 %v1016_v48, %v888_v53  ;;  %v9218_v51 = vrot.slane %v6416_v40, 1  ;;  %v9219_v21 = vrot.slane %v6420_v12, 2  ;;  %v2843_v32 = vsub.f32 1.5, %v6367_v57 }
 0x11a   : > { %v2853_v42 = vsub.f32 1.5, %v6376_v37  ;;  %v1926_v52 = vadd.f32 %v1830_v60, %v1717_v19  ;;  %v6449_v15 = vmul.f32 %v5210_v11, %v6430_v35  ;;  %4650 = vrsqrt.f32 %v6427_v50  ;;  %v6457_v53 = vpop.eup %4648 }
 0x11b   : > { %v6452_v41 = vadd.f32 1e-06, %v2663_v61  ;;  %v1199_v43 = vadd.f32 %v1156_v10, %v1117_v2  ;;  %v1313_v48 = vsel %vm760_vm1, %v1311_v1, %v9218_v51  ;;  %vm2856_vm7 = vweird.f32 %v6301_v20  ;;  %v2207_v2 = vpop.xlane.xlu1 %2206 }
 0x11c   : > { %v6460_v57 = vadd.f32 %v2052_v36, %v1926_v52  ;;  %v1535_v37 = vsel %vm972_vm0, %v1533_v54, %v9219_v21  ;;  %v1675_v61 = vmul.f32 %v5218_v16, %v6372_v29  ;;  %v6478_v19 = vmul.f32 %v5237_v27, %v6430_v35 }
 0x11d   : > { %v1408_v1 = vadd.f32 %v1313_v48, %v1199_v43  ;;  %v3331_v54 = vmul.f32 %v6211_v33, %v6303_v14  ;;  %v2838_v13 = vsel %vm6470_vm8, %v6217_v59, %v2834_v46  ;;  %v2844_v52 = vmul.f32 %v6293_v31, %v2843_v32 }
 0x11e   : > { %2503 = vadd.xlane.f32.xlu2 %v2502_v18  ;;  %9354 = vst [vmem:[#allocation55_spill] sm:$0xff] %v6460_v57  ;;  %v2204_v18 = vpop.xlane.xlu0 %2203  ;;  %v2854_v43 = vmul.f32 %v6301_v20, %v2853_v42  ;;  %v2265_v48 = vsel %vm2172_vm3, %v6460_v57, 0.0  ;;  %v2860_v51 = vmul.f32 %v6457_v53, %v6385_v0  ;;  %4652 = vrsqrt.f32 %v6452_v41 }
 0x11f   : > { %2266 = vadd.xlane.f32.xlu0 %v2265_v48  ;;  %v1636_v14 = vadd.f32 %v1535_v37, %v1408_v1  ;;  %v9220_v21 = vrot.slane %v6478_v19, 2  ;;  %vm2855_vm9 = vweird.f32 %v6214_v4  ;;  %v9357_v59 = vrot.slane %v6449_v15, 1 }
 0x120   : > { %v3333_v42 = vmul.f32 %v6211_v33, %v6308_v22  ;;  %v3383_v32 = vadd.f32 %v6264_v38, %v3331_v54  ;;  %v6500_v10 = vpop.eup %4650  ;;  %v9358_v48 = vsub.f32 %v5358_v3, %v6072_v17  ;;  %vm3479_vm11 = vcmask 1040384   ;;  %vm6522_vm12 = vmor %vm2855_vm9, %vm2856_vm7 }
 0x121   : > { %v1832_v46 = vsel %vm760_vm1, %v1830_v60, %v9357_v59  ;;  %v1718_v60 = vadd.f32 %v1675_v61, %v1636_v14  ;;  %v651_v22 = vmul.f32 %v5198_v5, %v6021_v28  ;;  %v2848_v1 = vsel %vm6511_vm10, %v6293_v31, %v2844_v52 }
 0x122   : > { %v6505_v37 = vmul.f32 %v2838_v13, %v9358_v48  ;;  %v2054_v17 = vsel %vm972_vm0, %v2052_v36, %v9220_v21  ;;  %v3385_v24 = vadd.f32 %v6264_v38, %v3333_v42  ;;  %v3480_v61 = vrot.slane %v3383_v32, 7  ;;  %v9381_v21 = vld [vmem:[#allocation27_spill] sm:$0xff] }
 0x123   : > { %v2858_v28 = vsel %vm6522_vm12, %v6301_v20, %v2854_v43  ;;  %v2861_v54 = vmul.f32 %v6457_v53, %v2860_v51  ;;  %v1927_v31 = vadd.f32 %v1832_v46, %v1718_v60  ;;  %v684_v13 = vadd.f32 %v5827_v56, %v651_v22  ;;  %v9369_v22 = vld [vmem:[#allocation29_spill] sm:$0xff] }
 0x124   : > { %v2870_v52 = vmul.f32 %v6500_v10, %v6427_v50  ;;  %v9363_v14 = vrot.slane %v6284_v49, 7  ;;  %v3483_v36 = vrot.slane %v3385_v24, 7  ;;  %v9364_v42 = vrot.slane %v6403_v63, 2  ;;  %v6544_v48 = vpop.eup %4652 }
 0x125   : > { %v9365_v20 = vsub.f32 %v5399_v30, %v6102_v55  ;;  %v6551_v56 = vadd.f32 %v2054_v17, %v1927_v31  ;;  %v9367_v43 = vrot.slane %v6396_v44, 1  ;;  %v1157_v4 = vmul.f32 %v5204_v8, %v6204_v34 }
 0x126   : > { %v3482_v59 = vsel %vm3479_vm11, %v3480_v61, %v9363_v14  ;;  %v1017_v32 = vsel %vm972_vm0, %v9364_v42, %v5231_v23  ;;  %v9368_v63 = vsub.f32 %v9347_v62, %v6104_v39  ;;  %v9370_v30 = vmov %v9363_v14  ;;  %v2444_v39 = vpop.xlane.xlu0 %2443  ;;  %v2447_v62 = vpop.xlane.xlu1 %2446 }
 0x127   : > { %v6549_v51 = vmul.f32 %v2848_v1, %v9365_v20  ;;  %9366 = vst [vmem:[#allocation56_spill] sm:$0xff] %v6551_v56  ;;  %v889_v46 = vadd.f32 %v9367_v43, %v684_v13  ;;  %v3484_v55 = vsel %vm3479_vm11, %v9370_v30, %v3483_v36  ;;  %v6567_v1 = vmul.f32 0.03125, %v2204_v18  ;;  %v2450_v42 = vpop.xlane.xlu2 %2449 }
 0x128   : > { %v6560_v60 = vmul.f32 %v2858_v28, %v9368_v63  ;;  %v2268_v44 = vsel %vm2176_vm4, %v6551_v56, 0.0  ;;  %v3592_v17 = vpack.c.bf16 %v3484_v55, %v3482_v59  ;;  %v2397_v61 = vmul.f32 %v6460_v57, %v6460_v57 }
 0x129   : > { %v1118_v24 = vadd.f32 %v1017_v32, %v889_v46  ;;  %v6573_v28 = vmul.f32 0.5, %v2861_v54  ;;  %v2871_v31 = vmul.f32 %v6500_v10, %v2870_v52  ;;  %v2880_v49 = vmul.f32 %v6544_v48, %v6452_v41  ;;  %2269 = vadd.xlane.f32.xlu1 %v2268_v44 }
 0x12a   : > { %v6578_v18 = vmul.f32 0.03125, %v2207_v2  ;;  %4475 = vmatmul.msk.bf16.vlgmr.msra.gmra.mxu0 %vm2176_vm4, %v3592_v17  ;;  %v9372_v14 = vrot.slane %v6420_v12, 2  ;;  %v6585_v36 = vmul.f32 0.03125, %v2210_v45  ;;  %v2505_v54 = vsel %vm2172_vm3, %v2397_v61, 0.0 }
 0x12b   : > { %v1200_v13 = vadd.f32 %v1157_v4, %v1118_v24  ;;  %v2616_v52 = vmul.f32 %v6567_v1, %v6567_v1  ;;  %2506 = vadd.xlane.f32.xlu0 %v2505_v54  ;;  %v2398_v2 = vmul.f32 %v6551_v56, %v6551_v56  ;;  %v2568_v32 = vmul.f32 0.03125, %v2444_v39  ;;  %v9375_v39 = vld [vmem:[#allocation28_spill] sm:$0xff] }
 0x12c   : > { %9371 = vst [vmem:[#allocation29_spill] sm:$0xff] %v6578_v18  ;;  %v1536_v59 = vsel %vm972_vm0, %v9372_v14, %v5233_v25  ;;  %v2569_v20 = vmul.f32 0.03125, %v2447_v62  ;;  %v9374_v43 = vrot.slane %v6416_v40, 1  ;;  %v1676_v12 = vmul.f32 %v5218_v16, %v6430_v35  ;;  %v9376_v62 = vld [vmem:[#allocation30_spill] sm:$0xff] }
 0x12d   : > { %9373 = vst [vmem:[#allocation57_spill] sm:$0xff] %v6585_v36  ;;  %v718_v45 = vmul.f32 %v5200_v6, %v6128_v26  ;;  %v6600_v4 = vmul.f32 %v5202_v7, %v6128_v26  ;;  %v2617_v63 = vmul.f32 %v6578_v18, %v6578_v18  ;;  %v2664_v30 = vsub.f32 %v2568_v32, %v2616_v52  ;;  %v9377_v52 = vld [vmem:[#allocation23_spill] sm:$0xff]  ;;  %v9378_v32 = vld [vmem:[#allocation53_spill] sm:$0xff] }
 0x12e   : > { %v1409_v46 = vadd.f32 %v9374_v43, %v1200_v13  ;;  %v2570_v55 = vmul.f32 0.03125, %v2450_v42  ;;  %v6606_v40 = vmul.f32 %v5206_v9, %v6372_v29  ;;  %v2508_v17 = vsel %vm2176_vm4, %v2398_v2, 0.0  ;;  %v9379_v43 = vld [vmem:[#allocation31_spill] sm:$0xff] }
 0x12f   : > { %v794_v24 = vrot.slane %v718_v45, 1  ;;  %v1018_v61 = vrot.slane %v6600_v4, 2  ;;  %v2618_v14 = vmul.f32 %v6585_v36, %v6585_v36  ;;  %v2665_v54 = vsub.f32 %v2569_v20, %v2617_v63  ;;  %v9380_v45 = vld [vmem:[#allocation24_spill] sm:$0xff] }
 0x130   : > { %v1637_v44 = vadd.f32 %v1536_v59, %v1409_v46  ;;  %v6616_v42 = vmul.f32 %v9377_v52, %v6372_v29  ;;  %v2863_v59 = vsub.f32 1.5, %v6573_v28  ;;  %v6622_v46 = vld [vmem:[%s5170_s11 + $0xc0] sm:$0xff]  ;;  %vm2866_vm13 = vweird.f32 %v6457_v53 }
 0x131   : > { %v890_v4 = vadd.f32 %v794_v24, %v9380_v45  ;;  %v2881_v13 = vmul.f32 %v6544_v48, %v2880_v49  ;;  %v9382_v20 = vrot.slane %v6478_v19, 2  ;;  %2509 = vadd.xlane.f32.xlu1 %v2508_v17  ;;  %v6631_v56 = vadd.f32 1e-06, %v2664_v30 }
 0x132   : > { %v1719_v2 = vadd.f32 %v1676_v12, %v1637_v44  ;;  %v2666_v3 = vsub.f32 %v2570_v55, %v2618_v14  ;;  %v2872_v57 = vmul.f32 0.5, %v2871_v31  ;;  %v9383_v28 = vrot.slane %v6449_v15, 1  ;;  %v9385_v15 = vld [vmem:[#allocation25_spill] sm:$0xff] }
 0x133   : > { %v2055_v63 = vsel %vm972_vm0, %v9382_v20, %v9381_v21  ;;  %v1119_v44 = vadd.f32 %v1018_v61, %v890_v4  ;;  %v1314_v45 = vrot.slane %v6606_v40, 1  ;;  %vm2865_vm14 = vweird.f32 %v6385_v0 }
 0x134   : > { %v1928_v12 = vadd.f32 %v9383_v28, %v1719_v2  ;;  %v6637_v36 = vadd.f32 1e-06, %v2665_v54  ;;  %v9229_v49 = vrot.slane %v6616_v42, 2  ;;  %v6642_v19 = vmul.f32 %v5210_v11, %v6622_v46  ;;  %vm6712_vm5 = vmor %vm2865_vm14, %vm2866_vm13 }
 0x135   : > { %v652_v30 = vmul.f32 %v5198_v5, %v6128_v26  ;;  %v1201_v55 = vadd.f32 %v9385_v15, %v1119_v44  ;;  %v6651_v40 = vmul.f32 %v5200_v6, %v6204_v34  ;;  %v6655_v17 = vmul.f32 %v5202_v7, %v6204_v34 }
 0x136   : > { %v6646_v31 = vadd.f32 %v2055_v63, %v1928_v12  ;;  %v2882_v14 = vmul.f32 0.5, %v2881_v13  ;;  %4654 = vrsqrt.f32 %v6631_v56  ;;  %v6658_v54 = vadd.f32 1e-06, %v2666_v3  ;;  %v6675_v3 = vld [vmem:[%s9136_s4] ss:$0 sm:$0xff] }
 0x137   : > { %v6662_v26 = vmul.f32 %v5237_v27, %v6622_v46  ;;  %v1410_v4 = vadd.f32 %v1314_v45, %v1201_v55  ;;  %v6669_v63 = vmul.f32 %v5206_v9, %v6430_v35  ;;  %v2873_v13 = vsub.f32 1.5, %v2872_v57 }
 0x138   : > { %9384 = vst [vmem:[#allocation28_spill] sm:$0xff] %v6646_v31  ;;  %v2271_v2 = vsel %vm2180_vm2, %v6646_v31, 0.0  ;;  %4656 = vrsqrt.f32 %v6637_v36  ;;  %v685_v28 = vadd.f32 %v6675_v3, %v652_v30  ;;  %v2399_v44 = vmul.f32 %v6646_v31, %v6646_v31  ;;  %v6692_v30 = vld [vmem:[%s5170_s11 + $0xc8] sm:$0xff] }
 0x139   : > { %2272 = vadd.xlane.f32.xlu2 %v2271_v2  ;;  %v1638_v55 = vadd.f32 %v9229_v49, %v1410_v4  ;;  %v1833_v57 = vrot.slane %v6642_v19, 1  ;;  %v6686_v2 = vmul.f32 %v9377_v52, %v6430_v35  ;;  %v2864_v20 = vmul.f32 %v6457_v53, %v2863_v59 }
 0x13a   : > { %vm2876_vm15 = vweird.f32 %v6500_v10  ;;  %4658 = vrsqrt.f32 %v6658_v54  ;;  %v9386_v12 = vrot.slane %v6651_v40, 1  ;;  %v2056_v19 = vrot.slane %v6662_v26, 2 }
 0x13b   : > { %v1720_v4 = vadd.f32 %v5266_v47, %v1638_v55  ;;  %v9387_v49 = vrot.slane %v6655_v17, 2  ;;  %v9237_v59 = vrot.slane %v6669_v63, 1  ;;  %v2874_v52 = vmul.f32 %v6500_v10, %v2873_v13 }
 0x13c   : > { %v796_v31 = vsel %vm760_vm1, %v794_v24, %v9386_v12  ;;  %v6703_v21 = vpop.eup %4654  ;;  %v2883_v18 = vsub.f32 1.5, %v2882_v14  ;;  %v1158_v7 = vmul.f32 %v5204_v8, %v6372_v29  ;;  %v9238_v26 = vrot.slane %v6686_v2, 2  ;;  %v2216_v24 = vpop.xlane.xlu1 %2215 }
 0x13d   : > { %v1020_v15 = vsel %vm972_vm0, %v1018_v61, %v9387_v49  ;;  %v891_v9 = vadd.f32 %v796_v31, %v685_v28  ;;  %v2511_v61 = vsel %vm2180_vm2, %v2399_v44, 0.0  ;;  %v1929_v49 = vadd.f32 %v1833_v57, %v1720_v4  ;;  %v2213_v4 = vpop.xlane.xlu0 %2212 }
 0x13e   : > { %v6720_v14 = vmul.f32 %v5210_v11, %v6692_v30  ;;  %v6722_v31 = vpop.eup %4656  ;;  %v2868_v13 = vsel %vm6712_vm5, %v6457_v53, %v2864_v20  ;;  %vm2875_vm6 = vweird.f32 %v6427_v50  ;;  %vm2886_vm7 = vweird.f32 %v6544_v48 }
 0x13f   : > { %v1120_v0 = vadd.f32 %v1020_v15, %v891_v9  ;;  %vm6731_vm8 = vmor %vm2875_vm6, %vm2876_vm15  ;;  %v6735_v12 = vadd.f32 %v2056_v19, %v1929_v49  ;;  %v1316_v44 = vsel %vm760_vm1, %v1314_v45, %v9237_v59  ;;  %v6742_v53 = vmul.f32 %v5237_v27, %v6692_v30 }
 0x140   : > { %v3334_v50 = vmul.f32 %v6211_v33, %v6505_v37  ;;  %v6746_v9 = vpop.eup %4658  ;;  %v2878_v15 = vsel %vm6731_vm8, %v6500_v10, %v2874_v52  ;;  %v2884_v20 = vmul.f32 %v6544_v48, %v2883_v18  ;;  %v3335_v45 = vmul.f32 %v6211_v33, %v6549_v51 }
 0x141   : > { %9392 = vst [vmem:[#allocation30_spill] sm:$0xff] %v6735_v12  ;;  %2512 = vadd.xlane.f32.xlu2 %v2511_v61  ;;  %v1202_v55 = vadd.f32 %v1158_v7, %v1120_v0  ;;  %v2274_v49 = vsel %vm2172_vm3, %v6735_v12, 0.0  ;;  %v9393_v37 = vrot.slane %v6616_v42, 2  ;;  %v1677_v10 = vmul.f32 %v5218_v16, %v6622_v46 }
 0x142   : > { %v2890_v7 = vmul.f32 %v6703_v21, %v6631_v56  ;;  %v2900_v51 = vmul.f32 %v6722_v31, %v6637_v36  ;;  %2275 = vadd.xlane.f32.xlu0 %v2274_v49  ;;  %v3336_v61 = vmul.f32 %v6211_v33, %v6560_v60  ;;  %v2910_v42 = vmul.f32 %v6746_v9, %v6658_v54  ;;  %v2219_v60 = vpop.xlane.xlu2 %2218 }
 0x143   : > { %v1539_v59 = vsel %vm972_vm0, %v9393_v37, %v9238_v26  ;;  %v1411_v52 = vadd.f32 %v1316_v44, %v1202_v55  ;;  %v9241_v0 = vrot.slane %v6742_v53, 2  ;;  %v3386_v28 = vadd.f32 %v6264_v38, %v3334_v50 }
 0x144   : > { %v3387_v37 = vadd.f32 %v6264_v38, %v3335_v45  ;;  %v9394_v26 = vsub.f32 %v9369_v22, %v6321_v58  ;;  %vm2885_vm9 = vweird.f32 %v6452_v41  ;;  %v3388_v55 = vadd.f32 %v6264_v38, %v3336_v61  ;;  %v2456_v50 = vpop.xlane.xlu1 %2455 }
 0x145   : > { %v1639_v44 = vadd.f32 %v1539_v59, %v1411_v52  ;;  %v9395_v49 = vsub.f32 %v9376_v62, %v9375_v39  ;;  %vm6789_vm10 = vmor %vm2885_vm9, %vm2886_vm7  ;;  %v9398_v58 = vrot.slane %v6720_v14, 1  ;;  %v3485_v41 = vrot.slane %v3386_v28, 7 }
 0x146   : > { %v6778_v18 = vmul.f32 %v2868_v13, %v9394_v26  ;;  %v3486_v59 = vrot.slane %v3387_v37, 7  ;;  %v2888_v26 = vsel %vm6789_vm10, %v6544_v48, %v2884_v20  ;;  %v3488_v39 = vrot.slane %v3388_v55, 7 }
 0x147   : > { %v6785_v33 = vmul.f32 %v2878_v15, %v9395_v49  ;;  %v1835_v22 = vsel %vm760_vm1, %v1833_v57, %v9398_v58  ;;  %v1721_v13 = vadd.f32 %v1677_v10, %v1639_v44  ;;  %v653_v62 = vmul.f32 %v5198_v5, %v6204_v34  ;;  %v9403_v58 = vld [vmem:[#allocation32_spill] sm:$0xff] }
 0x148   : > { %v2891_v15 = vmul.f32 %v6703_v21, %v2890_v7  ;;  %v2901_v45 = vmul.f32 %v6722_v31, %v2900_v51  ;;  %v2911_v52 = vmul.f32 %v6746_v9, %v2910_v42  ;;  %v2058_v57 = vsel %vm972_vm0, %v2056_v19, %v9241_v0 }
 0x149   : > { %v1930_v61 = vadd.f32 %v1835_v22, %v1721_v13  ;;  %v3487_v28 = vsel %vm3479_vm11, %v3485_v41, %v3486_v59  ;;  %v3489_v48 = vsel %vm3479_vm11, %v3486_v59, %v3488_v39  ;;  %v686_v20 = vadd.f32 %v6675_v3, %v653_v62 }
 0x14a   : > { %v9399_v34 = vsub.f32 %v9379_v43, %v9378_v32  ;;  %v3593_v7 = vpack.c.bf16 %v3489_v48, %v3487_v28  ;;  %v9400_v51 = vrot.slane %v6655_v17, 2  ;;  %v6819_v37 = vmul.f32 0.03125, %v2213_v4  ;;  %v2453_v43 = vpop.xlane.xlu0 %2452  ;;  %v9413_v17 = vld [vmem:[#allocation23_spill] sm:$0xff] }
 0x14b   : > { %v6821_v19 = vadd.f32 %v2058_v57, %v1930_v61  ;;  %v9402_v44 = vrot.slane %v6651_v40, 1  ;;  %v1159_v49 = vmul.f32 %v5204_v8, %v6430_v35  ;;  %v2400_v32 = vmul.f32 %v6735_v12, %v6735_v12  ;;  %v2459_v61 = vpop.xlane.xlu2 %2458 }
 0x14c   : > { %v6813_v10 = vmul.f32 %v2888_v26, %v9399_v34  ;;  %v1021_v42 = vsel %vm972_vm0, %v9400_v51, %v5231_v23  ;;  %v6831_v22 = vmul.f32 0.5, %v2891_v15  ;;  %v6833_v4 = vmul.f32 0.5, %v2901_v45  ;;  %4476 = vmatmul.msk.bf16.gmra.mxu0 %vm2176_vm4, %v3593_v7 }
 0x14d   : > { %9401 = vst [vmem:[#allocation53_spill] sm:$0xff] %v6821_v19  ;;  %v892_v55 = vadd.f32 %v9402_v44, %v686_v20  ;;  %v6836_v41 = vmul.f32 0.03125, %v2216_v24  ;;  %v6838_v40 = vmul.f32 0.5, %v2911_v52  ;;  %v2277_v59 = vsel %vm2176_vm4, %v6821_v19, 0.0 }
 0x14e   : > { %v9404_v13 = vrot.slane %v6686_v2, 2  ;;  %2278 = vadd.xlane.f32.xlu1 %v2277_v59  ;;  %v2619_v62 = vmul.f32 %v6819_v37, %v6819_v37  ;;  %v2514_v15 = vsel %vm2172_vm3, %v2400_v32, 0.0  ;;  %v2571_v45 = vmul.f32 0.03125, %v2453_v43  ;;  %v9405_v2 = vld [vmem:[#allocation21_spill] sm:$0xff]  ;;  %v9407_v32 = vld [vmem:[#allocation22_spill] sm:$0xff] }
 0x14f   : > { %v1121_v26 = vadd.f32 %v1021_v42, %v892_v55  ;;  %v2572_v24 = vmul.f32 0.03125, %v2456_v50  ;;  %2515 = vadd.xlane.f32.xlu0 %v2514_v15  ;;  %v2401_v52 = vmul.f32 %v6821_v19, %v6821_v19  ;;  %v720_v28 = vmul.f32 %v5200_v6, %v6372_v29  ;;  %v9408_v50 = vld [vmem:[#allocation29_spill] sm:$0xff]  ;;  %v9411_v15 = vld [vmem:[#allocation34_spill] sm:$0xff] }
 0x150   : > { %v1540_v39 = vsel %vm972_vm0, %v9404_v13, %v5233_v25  ;;  %v6855_v48 = vmul.f32 %v9405_v2, %v6372_v29  ;;  %v1678_v20 = vmul.f32 %v5218_v16, %v6692_v30  ;;  %v2620_v34 = vmul.f32 %v6836_v41, %v6836_v41  ;;  %v9409_v59 = vld [vmem:[#allocation33_spill] sm:$0xff] }
 0x151   : > { %v1203_v57 = vadd.f32 %v1159_v49, %v1121_v26  ;;  %v6861_v7 = vmul.f32 0.03125, %v2219_v60  ;;  %v2667_v51 = vsub.f32 %v2571_v45, %v2619_v62  ;;  %v9406_v42 = vrot.slane %v6669_v63, 1  ;;  %v9410_v13 = vld [vmem:[#allocation57_spill] sm:$0xff] }
 0x152   : > { %v797_v55 = vrot.slane %v720_v28, 1  ;;  %v1022_v49 = vrot.slane %v6855_v48, 2  ;;  %v6868_v43 = vmul.f32 %v9407_v32, %v6622_v46  ;;  %v2668_v60 = vsub.f32 %v2572_v24, %v2620_v34 }
 0x153   : > { %v1412_v44 = vadd.f32 %v9406_v42, %v1203_v57  ;;  %v2573_v0 = vmul.f32 0.03125, %v2459_v61  ;;  %v2893_v62 = vsub.f32 1.5, %v6831_v22  ;;  %v2517_v45 = vsel %vm2176_vm4, %v2401_v52, 0.0  ;;  %v9412_v57 = vld [vmem:[#allocation24_spill] sm:$0xff]  ;;  %v6890_v52 = vld [vmem:[%s5170_s11 + $0xd0] sm:$0xff] }
 0x154   : > { %v893_v28 = vadd.f32 %v797_v55, %v9412_v57  ;;  %vm2896_vm12 = vweird.f32 %v6703_v21  ;;  %v2903_v48 = vsub.f32 1.5, %v6833_v4  ;;  %v2621_v42 = vmul.f32 %v6861_v7, %v6861_v7  ;;  %v9414_v4 = vld [vmem:[#allocation27_spill] sm:$0xff] }
 0x155   : > { %v1640_v63 = vadd.f32 %v1540_v39, %v1412_v44  ;;  %v6881_v26 = vadd.f32 1e-06, %v2667_v51  ;;  %v6885_v24 = vmul.f32 %v9413_v17, %v6622_v46  ;;  %vm2906_vm13 = vweird.f32 %v6722_v31 }
 0x156   : > { %v2913_v22 = vsub.f32 1.5, %v6838_v40  ;;  %v1122_v61 = vadd.f32 %v1022_v49, %v893_v28  ;;  %v1317_v34 = vrot.slane %v6868_v43, 1  ;;  %vm2895_vm14 = vweird.f32 %v6631_v56  ;;  %2518 = vadd.xlane.f32.xlu1 %v2517_v45  ;;  %v9417_v28 = vld [vmem:[#allocation25_spill] sm:$0xff] }
 0x157   : > { %v1722_v39 = vadd.f32 %v1678_v20, %v1640_v63  ;;  %v9415_v51 = vrot.slane %v6742_v53, 2  ;;  %v6898_v19 = vadd.f32 1e-06, %v2668_v60  ;;  %v2669_v12 = vsub.f32 %v2573_v0, %v2621_v42  ;;  %vm6968_vm5 = vmor %vm2895_vm14, %vm2896_vm12 }
 0x158   : > { %v654_v40 = vmul.f32 %v5198_v5, %v6372_v29  ;;  %v9416_v20 = vrot.slane %v6720_v14, 1  ;;  %v1204_v57 = vadd.f32 %v9417_v28, %v1122_v61  ;;  %v6907_v43 = vmul.f32 %v5200_v6, %v6430_v35 }
 0x159   : > { %v2059_v44 = vsel %vm972_vm0, %v9415_v51, %v9414_v4  ;;  %v6911_v53 = vmul.f32 %v9405_v2, %v6430_v35  ;;  %4660 = vrsqrt.f32 %v6881_v26  ;;  %v1541_v0 = vrot.slane %v6885_v24, 2 }
 0x15a   : > { %v1931_v63 = vadd.f32 %v9416_v20, %v1722_v39  ;;  %v6917_v29 = vmul.f32 %v5210_v11, %v6890_v52  ;;  %v6921_v14 = vmul.f32 %v5237_v27, %v6890_v52  ;;  %v1413_v45 = vadd.f32 %v1317_v34, %v1204_v57 }
 0x15b   : > { %v6928_v39 = vmul.f32 %v9407_v32, %v6692_v30  ;;  %v2894_v24 = vmul.f32 %v6703_v21, %v2893_v62  ;;  %vm2916_vm15 = vweird.f32 %v6746_v9  ;;  %v687_v61 = vadd.f32 %v6675_v3, %v654_v40  ;;  %v6946_v40 = vld [vmem:[%s5170_s11 + $0xd8] sm:$0xff] }
 0x15c   : > { %v6923_v60 = vadd.f32 %v2059_v44, %v1931_v63  ;;  %v2904_v20 = vmul.f32 %v6722_v31, %v2903_v48  ;;  %v2914_v44 = vmul.f32 %v6746_v9, %v2913_v22  ;;  %v6940_v63 = vmul.f32 %v9413_v17, %v6692_v30 }
 0x15d   : > { %v6942_v42 = vadd.f32 1e-06, %v2669_v12  ;;  %v1641_v62 = vadd.f32 %v1541_v0, %v1413_v45  ;;  %v1836_v28 = vrot.slane %v6917_v29, 1  ;;  %v9419_v51 = vrot.slane %v6907_v43, 1 }
 0x15e   : > { %9418 = vst [vmem:[#allocation31_spill] sm:$0xff] %v6923_v60  ;;  %v2280_v57 = vsel %vm2180_vm2, %v6923_v60, 0.0  ;;  %v2402_v22 = vmul.f32 %v6923_v60, %v6923_v60  ;;  %4662 = vrsqrt.f32 %v6898_v19  ;;  %v2060_v4 = vrot.slane %v6921_v14, 2  ;;  %v9446_v60 = vld [vmem:[#allocation25_spill] sm:$0xff] }
 0x15f   : > { %2281 = vadd.xlane.f32.xlu2 %v2280_v57  ;;  %v799_v48 = vsel %vm760_vm1, %v797_v55, %v9419_v51  ;;  %v9248_v57 = vrot.slane %v6928_v39, 1  ;;  %v6956_v12 = vpop.eup %4660  ;;  %v1723_v45 = vadd.f32 %v5266_v47, %v1641_v62  ;;  %v9420_v17 = vrot.slane %v6911_v53, 2 }
 0x160   : > { %v894_v29 = vadd.f32 %v799_v48, %v687_v61  ;;  %v1160_v55 = vmul.f32 %v5204_v8, %v6622_v46  ;;  %vm2905_vm6 = vweird.f32 %v6637_v36  ;;  %vm2915_vm7 = vweird.f32 %v6658_v54 }
 0x161   : > { %v1024_v32 = vsel %vm972_vm0, %v1022_v49, %v9420_v17  ;;  %v1542_v61 = vrot.slane %v6940_v63, 2  ;;  %v6977_v17 = vmul.f32 %v5210_v11, %v6946_v40  ;;  %v2898_v49 = vsel %vm6968_vm5, %v6703_v21, %v2894_v24  ;;  %vm6984_vm8 = vmor %vm2905_vm6, %vm2906_vm13 }
 0x162   : > { %4664 = vrsqrt.f32 %v6942_v42  ;;  %v1932_v36 = vadd.f32 %v1836_v28, %v1723_v45  ;;  %v1123_v54 = vadd.f32 %v1024_v32, %v894_v29  ;;  %v2908_v51 = vsel %vm6984_vm8, %v6722_v31, %v2904_v20  ;;  %vm6994_vm9 = vmor %vm2915_vm7, %vm2916_vm15  ;;  %v2222_v29 = vpop.xlane.xlu0 %2221 }
 0x163   : > { %v2520_v21 = vsel %vm2180_vm2, %v2402_v22, 0.0  ;;  %v1319_v24 = vsel %vm760_vm1, %v1317_v34, %v9248_v57  ;;  %v7004_v48 = vmul.f32 %v5237_v27, %v6946_v40  ;;  %v2918_v31 = vsel %vm6994_vm9, %v6746_v9, %v2914_v44  ;;  %v9429_v44 = vld [vmem:[#allocation50_spill] sm:$0xff]  ;;  %v2228_v57 = vpop.xlane.xlu2 %2227 }
 0x164   : > { %v2920_v32 = vmul.f32 %v6956_v12, %v6881_v26  ;;  %v7011_v20 = vadd.f32 %v2060_v4, %v1932_v36  ;;  %v1205_v45 = vadd.f32 %v1160_v55, %v1123_v54  ;;  %v7013_v22 = vpop.eup %4662  ;;  %v9428_v34 = vsub.f32 %v9403_v58, %v6567_v1  ;;  %v2225_v36 = vpop.xlane.xlu1 %2224 }
 0x165   : > { %v1543_v56 = vsel %vm972_vm0, %v1541_v0, %v1542_v61  ;;  %v9249_v9 = vrot.slane %v6977_v17, 1  ;;  %v3337_v62 = vmul.f32 %v9429_v44, %v6778_v18  ;;  %v1679_v1 = vmul.f32 %v5218_v16, %v6890_v52 }
 0x166   : > { %9427 = vst [vmem:[#allocation32_spill] sm:$0xff] %v7011_v20  ;;  %v7018_v14 = vmul.f32 %v2898_v49, %v9428_v34  ;;  %v2283_v55 = vsel %vm2172_vm3, %v7011_v20, 0.0  ;;  %v1414_v54 = vadd.f32 %v1319_v24, %v1205_v45  ;;  %v3338_v58 = vmul.f32 %v9429_v44, %v6785_v33 }
 0x167   : > { %2521 = vadd.xlane.f32.xlu2 %v2520_v21  ;;  %v9430_v0 = vsub.f32 %v9409_v59, %v9408_v50  ;;  %v9431_v18 = vsub.f32 %v9411_v15, %v9410_v13  ;;  %2284 = vadd.xlane.f32.xlu0 %v2283_v55  ;;  %v9250_v21 = vrot.slane %v7004_v48, 2  ;;  %v3339_v24 = vmul.f32 %v9429_v44, %v6813_v10  ;;  %v9432_v13 = vld [vmem:[#allocation35_spill] sm:$0xff]  ;;  %v9433_v44 = vld [vmem:[#allocation36_spill] sm:$0xff] }
 0x168   : > { %v7045_v45 = vpop.eup %4664  ;;  %v2921_v33 = vmul.f32 %v6956_v12, %v2920_v32  ;;  %v2930_v50 = vmul.f32 %v7013_v22, %v6898_v19  ;;  %v1642_v59 = vadd.f32 %v1543_v56, %v1414_v54  ;;  %v3390_v55 = vadd.f32 %v6264_v38, %v3338_v58 }
 0x169   : > { %v7035_v49 = vmul.f32 %v2908_v51, %v9430_v0  ;;  %v7040_v34 = vmul.f32 %v2918_v31, %v9431_v18  ;;  %v3389_v51 = vadd.f32 %v6264_v38, %v3337_v62  ;;  %v1838_v31 = vsel %vm760_vm1, %v1836_v28, %v9249_v9 }
 0x16a   : > { %v3391_v10 = vadd.f32 %v6264_v38, %v3339_v24  ;;  %v1724_v0 = vadd.f32 %v1679_v1, %v1642_v59  ;;  %v655_v56 = vmul.f32 %v5198_v5, %v6430_v35  ;;  %v2940_v62 = vmul.f32 %v7045_v45, %v6942_v42 }
 0x16b   : > { %v3490_v18 = vrot.slane %v3389_v51, 7  ;;  %v2062_v54 = vsel %vm972_vm0, %v2060_v4, %v9250_v21  ;;  %v3491_v28 = vrot.slane %v3390_v55, 7  ;;  %v2922_v58 = vmul.f32 0.5, %v2921_v33 }
 0x16c   : > { %v3493_v15 = vrot.slane %v3391_v10, 7  ;;  %v2931_v38 = vmul.f32 %v7013_v22, %v2930_v50  ;;  %v1933_v24 = vadd.f32 %v1838_v31, %v1724_v0  ;;  %v688_v32 = vadd.f32 %v6675_v3, %v655_v56  ;;  %v2462_v10 = vpop.xlane.xlu0 %2461  ;;  %v9437_v0 = vld [vmem:[#allocation37_spill] sm:$0xff]  ;;  %v2465_v56 = vpop.xlane.xlu1 %2464 }
 0x16d   : > { %v3492_v1 = vsel %vm3479_vm11, %v3490_v18, %v3491_v28  ;;  %v9434_v35 = vrot.slane %v6911_v53, 2  ;;  %v7075_v9 = vmul.f32 0.03125, %v2222_v29  ;;  %v9436_v33 = vrot.slane %v6907_v43, 1 }
 0x16e   : > { %v3494_v59 = vsel %vm3479_vm11, %v3491_v28, %v3493_v15  ;;  %v7077_v4 = vadd.f32 %v2062_v54, %v1933_v24  ;;  %v1161_v31 = vmul.f32 %v5204_v8, %v6692_v30  ;;  %v2941_v18 = vmul.f32 %v7045_v45, %v2940_v62  ;;  %v2468_v54 = vpop.xlane.xlu2 %2467 }
 0x16f   : > { %v1025_v51 = vsel %vm972_vm0, %v9434_v35, %v5231_v23  ;;  %v3594_v55 = vpack.c.bf16 %v3494_v59, %v3492_v1  ;;  %v895_v50 = vadd.f32 %v9436_v33, %v688_v32  ;;  %v7086_v53 = vmul.f32 0.03125, %v2225_v36 }
 0x170   : > { %9435 = vst [vmem:[#allocation21_spill] sm:$0xff] %v7077_v4  ;;  %v2403_v29 = vmul.f32 %v7011_v20, %v7011_v20  ;;  %v7090_v28 = vmul.f32 0.5, %v2931_v38  ;;  %v2286_v43 = vsel %vm2176_vm4, %v7077_v4, 0.0  ;;  %v7095_v24 = vmul.f32 0.03125, %v2228_v57 }
 0x171   : > { %4477 = vmatmul.msk.bf16.gmra.mxu0 %vm2176_vm4, %v3594_v55  ;;  %v1124_v32 = vadd.f32 %v1025_v51, %v895_v50  ;;  %v2923_v1 = vsub.f32 1.5, %v2922_v58  ;;  %2287 = vadd.xlane.f32.xlu1 %v2286_v43  ;;  %v2622_v36 = vmul.f32 %v7075_v9, %v7075_v9  ;;  %v2404_v59 = vmul.f32 %v7077_v4, %v7077_v4  ;;  %v9440_v43 = vld [vmem:[#allocation22_spill] sm:$0xff] }
 0x172   : > { %9438 = vst [vmem:[#allocation29_spill] sm:$0xff] %v7095_v24  ;;  %v2523_v62 = vsel %vm2172_vm3, %v2403_v29, 0.0  ;;  %v2574_v35 = vmul.f32 0.03125, %v2462_v10  ;;  %v2575_v33 = vmul.f32 0.03125, %v2465_v56  ;;  %v2576_v15 = vmul.f32 0.03125, %v2468_v54 }
 0x173   : > { %v1206_v38 = vadd.f32 %v1161_v31, %v1124_v32  ;;  %2524 = vadd.xlane.f32.xlu0 %v2523_v62  ;;  %v1544_v57 = vsel %vm972_vm0, %v1542_v61, %v5233_v25  ;;  %v2623_v58 = vmul.f32 %v7086_v53, %v7086_v53  ;;  %v722_v51 = vmul.f32 %v5200_v6, %v6622_v46 }
 0x174   : > { %v7112_v55 = vmul.f32 %v9405_v2, %v6622_v46  ;;  %v9439_v50 = vrot.slane %v6928_v39, 1  ;;  %v1680_v10 = vmul.f32 %v5218_v16, %v6946_v40  ;;  %v2624_v63 = vmul.f32 %v7095_v24, %v7095_v24 }
 0x175   : > { %v2670_v61 = vsub.f32 %v2574_v35, %v2622_v36  ;;  %v2671_v29 = vsub.f32 %v2575_v33, %v2623_v58  ;;  %v800_v56 = vrot.slane %v722_v51, 1  ;;  %v7123_v32 = vmul.f32 %v9440_v43, %v6890_v52  ;;  %v9442_v35 = vld [vmem:[#allocation24_spill] sm:$0xff]  ;;  %v7141_v51 = vld [vmem:[%s5170_s11 + $0xe0] sm:$0xff] }
 0x176   : > { %v1415_v31 = vadd.f32 %v9439_v50, %v1206_v38  ;;  %v1026_v54 = vrot.slane %v7112_v55, 2  ;;  %v2526_v39 = vsel %vm2176_vm4, %v2404_v59, 0.0  ;;  %v2672_v38 = vsub.f32 %v2576_v15, %v2624_v63  ;;  %v9441_v50 = vld [vmem:[#allocation23_spill] sm:$0xff] }
 0x177   : > { %v7128_v21 = vmul.f32 %v9441_v50, %v6890_v52  ;;  %vm2926_vm10 = vweird.f32 %v6956_v12  ;;  %vm2936_vm12 = vweird.f32 %v7013_v22  ;;  %v2942_v36 = vmul.f32 0.5, %v2941_v18  ;;  %v9443_v55 = vld [vmem:[#allocation27_spill] sm:$0xff] }
 0x178   : > { %v1643_v62 = vadd.f32 %v1544_v57, %v1415_v31  ;;  %v896_v33 = vadd.f32 %v800_v56, %v9442_v35  ;;  %v7134_v58 = vmul.f32 %v6956_v12, %v2923_v1  ;;  %vm2925_vm13 = vweird.f32 %v6881_v26 }
 0x179   : > { %v2933_v57 = vsub.f32 1.5, %v7090_v28  ;;  %v7138_v15 = vadd.f32 1e-06, %v2670_v61  ;;  %vm2935_vm14 = vweird.f32 %v6898_v19  ;;  %v9444_v31 = vrot.slane %v7004_v48, 2  ;;  %2527 = vadd.xlane.f32.xlu1 %v2526_v39  ;;  %vm7205_vm15 = vmor %vm2925_vm13, %vm2926_vm10 }
 0x17a   : > { %v1725_v59 = vadd.f32 %v1680_v10, %v1643_v62  ;;  %v7148_v63 = vadd.f32 1e-06, %v2671_v29  ;;  %v1125_v1 = vadd.f32 %v1026_v54, %v896_v33  ;;  %v1320_v4 = vrot.slane %v7123_v32, 1  ;;  %vm7227_vm6 = vmor %vm2935_vm14, %vm2936_vm12 }
 0x17b   : > { %v2063_v18 = vsel %vm972_vm0, %v9444_v31, %v9443_v55  ;;  %v9445_v28 = vrot.slane %v6977_v17, 1  ;;  %v7153_v61 = vadd.f32 1e-06, %v2672_v38  ;;  %v1545_v62 = vrot.slane %v7128_v21, 2 }
 0x17c   : > { %v656_v20 = vmul.f32 %v5198_v5, %v6622_v46  ;;  %v1207_v48 = vadd.f32 %v9446_v60, %v1125_v1  ;;  %v7161_v39 = vmul.f32 %v5210_v11, %v7141_v51  ;;  %v7165_v29 = vmul.f32 %v5200_v6, %v6692_v30 }
 0x17d   : > { %v1934_v10 = vadd.f32 %v9445_v28, %v1725_v59  ;;  %v7169_v17 = vmul.f32 %v9405_v2, %v6692_v30  ;;  %4666 = vrsqrt.f32 %v7138_v15  ;;  %v7177_v21 = vmul.f32 %v9440_v43, %v6946_v40 }
 0x17e   : > { %v689_v46 = vadd.f32 %v6675_v3, %v656_v20  ;;  %4668 = vrsqrt.f32 %v7148_v63  ;;  %v1416_v38 = vadd.f32 %v1320_v4, %v1207_v48  ;;  %v7182_v33 = vmul.f32 %v5237_v27, %v7141_v51 }
 0x17f   : > { %v7171_v32 = vadd.f32 %v2063_v18, %v1934_v10  ;;  %v9258_v59 = vrot.slane %v7165_v29, 1  ;;  %v2943_v31 = vsub.f32 1.5, %v2942_v36  ;;  %v7190_v1 = vmul.f32 %v9441_v50, %v6946_v40 }
 0x180   : > { %v2934_v28 = vmul.f32 %v7013_v22, %v2933_v57  ;;  %v1644_v10 = vadd.f32 %v1545_v62, %v1416_v38  ;;  %v1839_v48 = vrot.slane %v7161_v39, 1  ;;  %4670 = vrsqrt.f32 %v7153_v61  ;;  %v7213_v38 = vld [vmem:[%s5170_s11 + $0xe8] sm:$0xff] }
 0x181   : > { %9447 = vst [vmem:[#allocation33_spill] sm:$0xff] %v7171_v32  ;;  %v2289_v18 = vsel %vm2180_vm2, %v7171_v32, 0.0  ;;  %v802_v36 = vsel %vm760_vm1, %v800_v56, %v9258_v59  ;;  %v2405_v24 = vmul.f32 %v7171_v32, %v7171_v32  ;;  %vm2945_vm5 = vweird.f32 %v6942_v42 }
 0x182   : > { %2290 = vadd.xlane.f32.xlu2 %v2289_v18  ;;  %v897_v20 = vadd.f32 %v802_v36, %v689_v46  ;;  %v1726_v56 = vadd.f32 %v5266_v47, %v1644_v10  ;;  %v2064_v39 = vrot.slane %v7182_v33, 2  ;;  %v1162_v46 = vmul.f32 %v5204_v8, %v6890_v52  ;;  %v2234_v10 = vpop.xlane.xlu1 %2233 }
 0x183   : > { %v7217_v18 = vpop.eup %4666  ;;  %v2928_v26 = vsel %vm7205_vm15, %v6956_v12, %v7134_v58  ;;  %vm2946_vm7 = vweird.f32 %v7045_v45  ;;  %v9452_v33 = vrot.slane %v7169_v17, 2  ;;  %v9263_v59 = vrot.slane %v7190_v1, 2 }
 0x184   : > { %v7236_v60 = vpop.eup %4668  ;;  %v2938_v12 = vsel %vm7227_vm6, %v7013_v22, %v2934_v28  ;;  %v2944_v19 = vmul.f32 %v7045_v45, %v2943_v31  ;;  %v1935_v58 = vadd.f32 %v1839_v48, %v1726_v56  ;;  %v2529_v32 = vsel %vm2180_vm2, %v2405_v24, 0.0  ;;  %v7261_v24 = vld [vmem:[%s9137_s5] ss:$0 sm:$0xff]  ;;  %vm7284_vm8 = vmor %vm2945_vm5, %vm2946_vm7 }
 0x185   : > { %v1028_v36 = vsel %vm972_vm0, %v1026_v54, %v9452_v33  ;;  %v9453_v47 = vrot.slane %v7177_v21, 1  ;;  %v7248_v54 = vmul.f32 %v5210_v11, %v7213_v38  ;;  %v7252_v33 = vmul.f32 %v5237_v27, %v7213_v38 }
 0x186   : > { %v1126_v57 = vadd.f32 %v1028_v36, %v897_v20  ;;  %v2950_v22 = vmul.f32 %v7217_v18, %v7138_v15  ;;  %v7256_v31 = vadd.f32 %v2064_v39, %v1935_v58  ;;  %v2960_v28 = vmul.f32 %v7236_v60, %v7148_v63  ;;  %v2231_v36 = vpop.xlane.xlu0 %2230 }
 0x187   : > { %v1322_v55 = vsel %vm760_vm1, %v1320_v4, %v9453_v47  ;;  %v3340_v47 = vmul.f32 %v7261_v24, %v7018_v14  ;;  %v7265_v4 = vpop.eup %4670  ;;  %v1547_v56 = vsel %vm972_vm0, %v1545_v62, %v9263_v59  ;;  %v9455_v58 = vsub.f32 %v9432_v13, %v6819_v37  ;;  %v9463_v14 = vld [vmem:[#allocation38_spill] sm:$0xff] }
 0x188   : > { %9454 = vst [vmem:[#allocation57_spill] sm:$0xff] %v7256_v31  ;;  %v1208_v20 = vadd.f32 %v1162_v46, %v1126_v57  ;;  %v3341_v46 = vmul.f32 %v7261_v24, %v7035_v49  ;;  %v2292_v62 = vsel %vm2172_vm3, %v7256_v31, 0.0  ;;  %v1681_v49 = vmul.f32 %v5218_v16, %v7141_v51 }
 0x189   : > { %v7278_v57 = vmul.f32 %v2928_v26, %v9455_v58  ;;  %v9459_v37 = vsub.f32 %v9433_v44, %v6836_v41  ;;  %v2948_v42 = vsel %vm7284_vm8, %v7045_v45, %v2944_v19  ;;  %2293 = vadd.xlane.f32.xlu0 %v2292_v62  ;;  %v3342_v26 = vmul.f32 %v7261_v24, %v7040_v34  ;;  %v7309_v41 = vld [vmem:[%s9138_s6] ss:$0 sm:$0xff] }
 0x18a   : > { %2530 = vadd.xlane.f32.xlu2 %v2529_v32  ;;  %v1417_v59 = vadd.f32 %v1322_v55, %v1208_v20  ;;  %v2065_v32 = vrot.slane %v7252_v33, 2  ;;  %v2237_v55 = vpop.xlane.xlu2 %2236  ;;  %v2951_v20 = vmul.f32 %v7217_v18, %v2950_v22  ;;  %v2970_v58 = vmul.f32 %v7265_v4, %v7153_v61 }
 0x18b   : > { %9456 = vst [vmem:[#allocation34_spill] sm:$0xff] %v7278_v57  ;;  %v7295_v13 = vmul.f32 %v2938_v12, %v9459_v37  ;;  %v3392_v45 = vadd.f32 %v7309_v41, %v3340_v47  ;;  %v2961_v44 = vmul.f32 %v7236_v60, %v2960_v28  ;;  %v9461_v12 = vrot.slane %v7248_v54, 1 }
 0x18c   : > { %v1645_v57 = vadd.f32 %v1547_v56, %v1417_v59  ;;  %v3393_v19 = vadd.f32 %v7309_v41, %v3341_v46  ;;  %v3394_v22 = vadd.f32 %v7309_v41, %v3342_v26  ;;  %v9462_v59 = vsub.f32 %v9437_v0, %v6861_v7  ;;  %v9464_v26 = vld [vmem:[#allocation39_spill] sm:$0xff] }
 0x18d   : > { %9460 = vst [vmem:[#allocation50_spill] sm:$0xff] %v7295_v13  ;;  %v1841_v34 = vsel %vm760_vm1, %v1839_v48, %v9461_v12  ;;  %v3495_v47 = vrot.slane %v3392_v45, 7  ;;  %v2066_v28 = vsel %vm972_vm0, %v2064_v39, %v2065_v32  ;;  %v657_v46 = vmul.f32 %v5198_v5, %v6692_v30 }
 0x18e   : > { %v7321_v56 = vmul.f32 %v2948_v42, %v9462_v59  ;;  %v1727_v37 = vadd.f32 %v1681_v49, %v1645_v57  ;;  %v3496_v13 = vrot.slane %v3393_v19, 7  ;;  %v3498_v48 = vrot.slane %v3394_v22, 7 }
 0x18f   : > { %v2952_v7 = vmul.f32 0.5, %v2951_v20  ;;  %v2971_v0 = vmul.f32 %v7265_v4, %v2970_v58  ;;  %v2962_v59 = vmul.f32 0.5, %v2961_v44  ;;  %v690_v45 = vadd.f32 %v6675_v3, %v657_v46 }
 0x190   : > { %v1936_v42 = vadd.f32 %v1841_v34, %v1727_v37  ;;  %v3497_v57 = vsel %vm3479_vm11, %v3495_v47, %v3496_v13  ;;  %v3499_v49 = vsel %vm3479_vm11, %v3496_v13, %v3498_v48  ;;  %v9466_v30 = vrot.slane %v7169_v17, 2  ;;  %v2471_v37 = vpop.xlane.xlu0 %2470 }
 0x191   : > { %v3595_v19 = vpack.c.bf16 %v3499_v49, %v3497_v57  ;;  %v7342_v12 = vmul.f32 0.03125, %v2231_v36  ;;  %v9468_v20 = vrot.slane %v7165_v29, 1  ;;  %v1163_v44 = vmul.f32 %v5204_v8, %v6946_v40  ;;  %v2474_v29 = vpop.xlane.xlu1 %2473 }
 0x192   : > { %v7336_v39 = vadd.f32 %v2066_v28, %v1936_v42  ;;  %v1029_v22 = vsel %vm972_vm0, %v9466_v30, %v5231_v23  ;;  %v7348_v34 = vmul.f32 0.03125, %v2234_v10  ;;  %v2406_v13 = vmul.f32 %v7256_v31, %v7256_v31 }
 0x193   : > { %9467 = vst [vmem:[#allocation36_spill] sm:$0xff] %v7342_v12  ;;  %v898_v58 = vadd.f32 %v9468_v20, %v690_v45  ;;  %v2953_v47 = vsub.f32 1.5, %v2952_v7  ;;  %v7352_v28 = vmul.f32 0.5, %v2971_v0  ;;  %4478 = vmatmul.msk.bf16.gmra.mxu0 %vm2176_vm4, %v3595_v19  ;;  %v7357_v36 = vmul.f32 0.03125, %v2237_v55  ;;  %v2477_v0 = vpop.xlane.xlu2 %2476 }
 0x194   : > { %9465 = vst [vmem:[#allocation35_spill] sm:$0xff] %v7336_v39  ;;  %v2295_v17 = vsel %vm2176_vm4, %v7336_v39, 0.0  ;;  %v2963_v48 = vsub.f32 1.5, %v2962_v59  ;;  %v9470_v10 = vrot.slane %v7190_v1, 2  ;;  %v2407_v7 = vmul.f32 %v7336_v39, %v7336_v39 }
 0x195   : > { %9469 = vst [vmem:[#allocation37_spill] sm:$0xff] %v7357_v36  ;;  %2296 = vadd.xlane.f32.xlu1 %v2295_v17  ;;  %v1127_v46 = vadd.f32 %v1029_v22, %v898_v58  ;;  %v1682_v57 = vmul.f32 %v5218_v16, %v7213_v38  ;;  %v2625_v55 = vmul.f32 %v7342_v12, %v7342_v12  ;;  %v2532_v49 = vsel %vm2172_vm3, %v2406_v13, 0.0 }
 0x196   : > { %v1548_v42 = vsel %vm972_vm0, %v9470_v10, %v5233_v25  ;;  %v2577_v59 = vmul.f32 0.03125, %v2471_v37  ;;  %v2626_v19 = vmul.f32 %v7348_v34, %v7348_v34  ;;  %2533 = vadd.xlane.f32.xlu0 %v2532_v49  ;;  %v2578_v1 = vmul.f32 0.03125, %v2474_v29 }
 0x197   : > { %v1209_v45 = vadd.f32 %v1163_v44, %v1127_v46  ;;  %v724_v30 = vmul.f32 %v5200_v6, %v6890_v52  ;;  %v2627_v22 = vmul.f32 %v7357_v36, %v7357_v36  ;;  %v2579_v58 = vmul.f32 0.03125, %v2477_v0 }
 0x198   : > { %v2673_v20 = vsub.f32 %v2577_v59, %v2625_v55  ;;  %v7378_v17 = vmul.f32 %v9405_v2, %v6890_v52  ;;  %vm2955_vm9 = vweird.f32 %v7138_v15  ;;  %v9471_v44 = vrot.slane %v7177_v21, 1 }
 0x199   : > { %v2535_v37 = vsel %vm2176_vm4, %v2407_v7, 0.0  ;;  %v2674_v29 = vsub.f32 %v2578_v1, %v2626_v19  ;;  %v803_v46 = vrot.slane %v724_v30, 1  ;;  %v7389_v0 = vmul.f32 %v9440_v43, %v7141_v51 }
 0x19a   : > { %v1418_v13 = vadd.f32 %v9471_v44, %v1209_v45  ;;  %v7384_v10 = vadd.f32 1e-06, %v2673_v20  ;;  %v1030_v49 = vrot.slane %v7378_v17, 2  ;;  %v7393_v55 = vmul.f32 %v9441_v50, %v7141_v51  ;;  %v9472_v20 = vld [vmem:[#allocation27_spill] sm:$0xff] }
 0x19b   : > { %vm2956_vm10 = vweird.f32 %v7217_v18  ;;  %vm2965_vm12 = vweird.f32 %v7148_v63  ;;  %v899_v7 = vadd.f32 %v803_v46, %v9442_v35  ;;  %v2954_v59 = vmul.f32 %v7217_v18, %v2953_v47  ;;  %v7410_v44 = vld [vmem:[%s5170_s11 + $0xf0] sm:$0xff] }
 0x19c   : > { %v1646_v21 = vadd.f32 %v1548_v42, %v1418_v13  ;;  %vm2966_vm13 = vweird.f32 %v7236_v60  ;;  %v2973_v45 = vsub.f32 1.5, %v7352_v28  ;;  %v2675_v19 = vsub.f32 %v2579_v58, %v2627_v22  ;;  %vm7450_vm15 = vmor %vm2955_vm9, %vm2956_vm10 }
 0x19d   : > { %v2964_v1 = vmul.f32 %v7236_v60, %v2963_v48  ;;  %vm2975_vm14 = vweird.f32 %v7153_v61  ;;  %v2067_v17 = vsel %vm972_vm0, %v2065_v32, %v9472_v20  ;;  %2536 = vadd.xlane.f32.xlu1 %v2535_v37  ;;  %v7407_v42 = vadd.f32 1e-06, %v2674_v29  ;;  %v9474_v37 = vld [vmem:[#allocation25_spill] sm:$0xff]  ;;  %vm7473_vm6 = vmor %vm2965_vm12, %vm2966_vm13 }
 0x19e   : > { %v1728_v30 = vadd.f32 %v1682_v57, %v1646_v21  ;;  %4672 = vrsqrt.f32 %v7384_v10  ;;  %v1128_v47 = vadd.f32 %v1030_v49, %v899_v7  ;;  %v1323_v28 = vrot.slane %v7389_v0, 1  ;;  %v7489_v7 = vld [vmem:[%s5170_s11 + $0xf8] sm:$0xff] }
 0x19f   : > { %v1549_v48 = vrot.slane %v7393_v55, 2  ;;  %v9473_v22 = vrot.slane %v7248_v54, 1  ;;  %v658_v33 = vmul.f32 %v5198_v5, %v6890_v52  ;;  %v7421_v32 = vmul.f32 %v5200_v6, %v6946_v40 }
 0x1a0   : > { %v7425_v58 = vmul.f32 %v9405_v2, %v6946_v40  ;;  %v7427_v13 = vadd.f32 1e-06, %v2675_v19  ;;  %v1210_v29 = vadd.f32 %v9474_v37, %v1128_v47  ;;  %v7432_v0 = vmul.f32 %v5210_v11, %v7410_v44 }
 0x1a1   : > { %v1937_v57 = vadd.f32 %v9473_v22, %v1728_v30  ;;  %v7436_v54 = vmul.f32 %v5237_v27, %v7410_v44  ;;  %4674 = vrsqrt.f32 %v7407_v42  ;;  %v9264_v55 = vrot.slane %v7421_v32, 1 }
 0x1a2   : > { %v7444_v21 = vmul.f32 %v9440_v43, %v7213_v38  ;;  %vm2976_vm5 = vweird.f32 %v7265_v4  ;;  %v1419_v19 = vadd.f32 %v1323_v28, %v1210_v29  ;;  %v691_v30 = vadd.f32 %v6675_v3, %v658_v33 }
 0x1a3   : > { %v7438_v52 = vadd.f32 %v2067_v17, %v1937_v57  ;;  %v9269_v17 = vrot.slane %v7425_v58, 2  ;;  %v2958_v47 = vsel %vm7450_vm15, %v7217_v18, %v2954_v59  ;;  %v2974_v22 = vmul.f32 %v7265_v4, %v2973_v45  ;;  %vm7496_vm7 = vmor %vm2975_vm14, %vm2976_vm5 }
 0x1a4   : > { %v7465_v57 = vmul.f32 %v9441_v50, %v7213_v38  ;;  %v7467_v62 = vpop.eup %4672  ;;  %4676 = vrsqrt.f32 %v7427_v13  ;;  %v1647_v18 = vadd.f32 %v1549_v48, %v1419_v19  ;;  %v1842_v59 = vrot.slane %v7432_v0, 1 }
 0x1a5   : > { %9475 = vst [vmem:[#allocation22_spill] sm:$0xff] %v7438_v52  ;;  %v2298_v15 = vsel %vm2180_vm2, %v7438_v52, 0.0  ;;  %v805_v45 = vsel %vm760_vm1, %v803_v46, %v9264_v55  ;;  %v2968_v33 = vsel %vm7473_vm6, %v7236_v60, %v2964_v1  ;;  %v2408_v63 = vmul.f32 %v7438_v52, %v7438_v52  ;;  %v9482_v46 = vld [vmem:[#allocation26_spill] sm:$0xff]  ;;  %v9483_v55 = vld [vmem:[#allocation29_spill] sm:$0xff] }
 0x1a6   : > { %2299 = vadd.xlane.f32.xlu2 %v2298_v15  ;;  %v2068_v29 = vrot.slane %v7436_v54, 2  ;;  %v1729_v19 = vadd.f32 %v9482_v46, %v1647_v18  ;;  %v900_v60 = vadd.f32 %v805_v45, %v691_v30  ;;  %v1032_v1 = vsel %vm972_vm0, %v1030_v49, %v9269_v17  ;;  %v9484_v15 = vld [vmem:[#allocation40_spill] sm:$0xff] }
 0x1a7   : > { %v1164_v54 = vmul.f32 %v5204_v8, %v7141_v51  ;;  %v7506_v3 = vpop.eup %4674  ;;  %v2720_v52 = vsub.f32 %v9484_v15, %v9483_v55  ;;  %v9485_v61 = vsub.f32 %v9463_v14, %v7075_v9  ;;  %v2978_v30 = vsel %vm7496_vm7, %v7265_v4, %v2974_v22 }
 0x1a8   : > { %v9272_v18 = vrot.slane %v7465_v57, 2  ;;  %v2980_v49 = vmul.f32 %v7467_v62, %v7384_v10  ;;  %v1938_v45 = vadd.f32 %v1842_v59, %v1729_v19  ;;  %v1129_v17 = vadd.f32 %v1032_v1, %v900_v60  ;;  %v9490_v1 = vld [vmem:[#allocation50_spill] sm:$0xff] }
 0x1a9   : > { %v7513_v39 = vmul.f32 %v2958_v47, %v9485_v61  ;;  %v7523_v31 = vmul.f32 %v5210_v11, %v7489_v7  ;;  %v9486_v9 = vsub.f32 %v9464_v26, %v7086_v53  ;;  %v2538_v55 = vsel %vm2180_vm2, %v2408_v63, 0.0  ;;  %v9488_v26 = vld [vmem:[#allocation34_spill] sm:$0xff]  ;;  %v2240_v63 = vpop.xlane.xlu0 %2239 }
 0x1aa   : > { %v9487_v4 = vrot.slane %v7444_v21, 1  ;;  %v7536_v22 = vmul.f32 %v5237_v27, %v7489_v7  ;;  %v7538_v15 = vpop.eup %4676  ;;  %v2990_v0 = vmul.f32 %v7506_v3, %v7407_v42  ;;  %v7542_v19 = vadd.f32 %v2068_v29, %v1938_v45 }
 0x1ab   : > { %v7528_v14 = vmul.f32 %v2968_v33, %v9486_v9  ;;  %v1211_v53 = vadd.f32 %v1164_v54, %v1129_v17  ;;  %v3343_v33 = vmul.f32 %v7261_v24, %v9488_v26  ;;  %v7546_v60 = vmul.f32 %v2978_v30, %v2720_v52  ;;  %v2243_v9 = vpop.xlane.xlu1 %2242 }
 0x1ac   : > { %v1325_v47 = vsel %vm760_vm1, %v1323_v28, %v9487_v4  ;;  %v1551_v28 = vsel %vm972_vm0, %v1549_v48, %v9272_v18  ;;  %v3344_v61 = vmul.f32 %v7261_v24, %v9490_v1  ;;  %v2246_v4 = vpop.xlane.xlu2 %2245  ;;  %v2981_v17 = vmul.f32 %v7467_v62, %v2980_v49  ;;  %v9492_v49 = vld [vmem:[#allocation42_spill] sm:$0xff] }
 0x1ad   : > { %9489 = vst [vmem:[#allocation23_spill] sm:$0xff] %v7546_v60  ;;  %v2301_v54 = vsel %vm2172_vm3, %v7542_v19, 0.0  ;;  %v1420_v45 = vadd.f32 %v1325_v47, %v1211_v53  ;;  %v1683_v52 = vmul.f32 %v5218_v16, %v7410_v44  ;;  %v3000_v26 = vmul.f32 %v7538_v15, %v7427_v13  ;;  %v9493_v60 = vld [vmem:[#allocation43_spill] sm:$0xff] }
 0x1ae   : > { %2539 = vadd.xlane.f32.xlu2 %v2538_v55  ;;  %2302 = vadd.xlane.f32.xlu0 %v2301_v54  ;;  %v3345_v55 = vmul.f32 %v7261_v24, %v7321_v56  ;;  %v2991_v47 = vmul.f32 %v7506_v3, %v2990_v0  ;;  %v3395_v27 = vadd.f32 %v7309_v41, %v3343_v33  ;;  %v9494_v12 = vrot.slane %v7523_v31, 1 }
 0x1af   : > { %v1648_v53 = vadd.f32 %v1551_v28, %v1420_v45  ;;  %v3396_v1 = vadd.f32 %v7309_v41, %v3344_v61  ;;  %v7577_v56 = vmul.f32 0.5, %v2981_v17  ;;  %v659_v0 = vmul.f32 %v5198_v5, %v6946_v40  ;;  %v7590_v61 = vld [vmem:[%s9136_s4] ss:$0 sm:$0xff] }
 0x1b0   : > { %v1844_v54 = vsel %vm760_vm1, %v1842_v59, %v9494_v12  ;;  %v3397_v30 = vadd.f32 %v7309_v41, %v3345_v55  ;;  %v3500_v18 = vrot.slane %v3395_v27, 7  ;;  %v3001_v33 = vmul.f32 %v7538_v15, %v3000_v26 }
 0x1b1   : > { %v1730_v46 = vadd.f32 %v1683_v52, %v1648_v53  ;;  %v9495_v28 = vrot.slane %v7536_v22, 2  ;;  %v3501_v48 = vrot.slane %v3396_v1, 7  ;;  %v7585_v12 = vmul.f32 0.5, %v2991_v47 }
 0x1b2   : > { %v3503_v36 = vrot.slane %v3397_v30, 7  ;;  %v692_v27 = vadd.f32 %v7590_v61, %v659_v0  ;;  %v9496_v40 = vrot.slane %v7425_v58, 2  ;;  %v1165_v30 = vmul.f32 %v5204_v8, %v7213_v38  ;;  %v2480_v58 = vpop.xlane.xlu0 %2479 }
 0x1b3   : > { %v2070_v45 = vsel %vm972_vm0, %v2068_v29, %v9495_v28  ;;  %v1939_v59 = vadd.f32 %v1844_v54, %v1730_v46  ;;  %v3502_v52 = vsel %vm3479_vm11, %v3500_v18, %v3501_v48  ;;  %v7601_v46 = vmul.f32 0.03125, %v2240_v63  ;;  %v2483_v63 = vpop.xlane.xlu1 %2482 }
 0x1b4   : > { %v1033_v17 = vsel %vm972_vm0, %v9496_v40, %v5231_v23  ;;  %v3504_v29 = vsel %vm3479_vm11, %v3501_v48, %v3503_v36  ;;  %v9497_v55 = vrot.slane %v7421_v32, 1  ;;  %v7607_v53 = vmul.f32 0.03125, %v2243_v9  ;;  %v2486_v48 = vpop.xlane.xlu2 %2485 }
 0x1b5   : > { %v7603_v26 = vadd.f32 %v2070_v45, %v1939_v59  ;;  %v3596_v1 = vpack.c.bf16 %v3504_v29, %v3502_v52  ;;  %v2983_v54 = vsub.f32 1.5, %v7577_v56  ;;  %v7610_v0 = vmul.f32 0.5, %v3001_v33 }
 0x1b6   : > { %v901_v47 = vadd.f32 %v9497_v55, %v692_v27  ;;  %v7612_v18 = vmul.f32 0.03125, %v2246_v4  ;;  %v2409_v36 = vmul.f32 %v7542_v19, %v7542_v19  ;;  %v9498_v9 = vrot.slane %v7465_v57, 2 }
 0x1b7   : > { %v2304_v28 = vsel %vm2176_vm4, %v7603_v26, 0.0  ;;  %4479 = vmatmul.msk.bf16.gmra.mxu0 %vm2176_vm4, %v3596_v1  ;;  %v2628_v4 = vmul.f32 %v7601_v46, %v7601_v46  ;;  %v2629_v33 = vmul.f32 %v7607_v53, %v7607_v53  ;;  %v2410_v27 = vmul.f32 %v7603_v26, %v7603_v26 }
 0x1b8   : > { %v1130_v32 = vadd.f32 %v1033_v17, %v901_v47  ;;  %v1552_v56 = vsel %vm972_vm0, %v9498_v9, %v5233_v25  ;;  %2305 = vadd.xlane.f32.xlu1 %v2304_v28  ;;  %v2630_v45 = vmul.f32 %v7612_v18, %v7612_v18  ;;  %v2541_v59 = vsel %vm2172_vm3, %v2409_v36, 0.0 }
 0x1b9   : > { %2542 = vadd.xlane.f32.xlu0 %v2541_v59  ;;  %v2580_v57 = vmul.f32 0.03125, %v2480_v58  ;;  %v2581_v17 = vmul.f32 0.03125, %v2483_v63  ;;  %v2582_v52 = vmul.f32 0.03125, %v2486_v48  ;;  %v1684_v29 = vmul.f32 %v5218_v16, %v7489_v7 }
 0x1ba   : > { %v1212_v40 = vadd.f32 %v1165_v30, %v1130_v32  ;;  %v2544_v1 = vsel %vm2176_vm4, %v2410_v27, 0.0  ;;  %v726_v55 = vmul.f32 %v5200_v6, %v7141_v51  ;;  %v7639_v47 = vmul.f32 %v9405_v2, %v7141_v51 }
 0x1bb   : > { %vm2986_vm8 = vweird.f32 %v7467_v62  ;;  %v9499_v30 = vrot.slane %v7444_v21, 1  ;;  %v2676_v58 = vsub.f32 %v2580_v57, %v2628_v4  ;;  %v2677_v63 = vsub.f32 %v2581_v17, %v2629_v33 }
 0x1bc   : > { %v2678_v48 = vsub.f32 %v2582_v52, %v2630_v45  ;;  %vm2996_vm9 = vweird.f32 %v7506_v3  ;;  %v806_v16 = vrot.slane %v726_v55, 1  ;;  %v1034_v28 = vrot.slane %v7639_v47, 2 }
 0x1bd   : > { %v1421_v36 = vadd.f32 %v9499_v30, %v1212_v40  ;;  %v7648_v32 = vmul.f32 %v9440_v43, %v7410_v44  ;;  %v7652_v9 = vmul.f32 %v9441_v50, %v7410_v44  ;;  %vm2985_vm10 = vweird.f32 %v7384_v10 }
 0x1be   : > { %vm3006_vm12 = vweird.f32 %v7538_v15  ;;  %v7656_v4 = vadd.f32 1e-06, %v2676_v58  ;;  %v7658_v33 = vadd.f32 1e-06, %v2677_v63  ;;  %v7660_v45 = vadd.f32 1e-06, %v2678_v48  ;;  %vm7731_vm15 = vmor %vm2985_vm10, %vm2986_vm8 }
 0x1bf   : > { %v1649_v21 = vadd.f32 %v1552_v56, %v1421_v36  ;;  %v7663_v59 = vmul.f32 %v7467_v62, %v2983_v54  ;;  %v2993_v27 = vsub.f32 1.5, %v7585_v12  ;;  %vm2995_vm13 = vweird.f32 %v7407_v42 }
 0x1c0   : > { %v902_v40 = vadd.f32 %v806_v16, %v9442_v35  ;;  %v660_v57 = vmul.f32 %v5198_v5, %v7141_v51  ;;  %v3003_v56 = vsub.f32 1.5, %v7610_v0  ;;  %vm3005_vm14 = vweird.f32 %v7427_v13  ;;  %2545 = vadd.xlane.f32.xlu1 %v2544_v1  ;;  %vm7746_vm5 = vmor %vm2995_vm13, %vm2996_vm9 }
 0x1c1   : > { %v1731_v17 = vadd.f32 %v1684_v29, %v1649_v21  ;;  %v9500_v52 = vrot.slane %v7536_v22, 2  ;;  %4678 = vrsqrt.f32 %v7656_v4  ;;  %v1326_v35 = vrot.slane %v7648_v32, 1  ;;  %vm7767_vm6 = vmor %vm3005_vm14, %vm3006_vm12 }
 0x1c2   : > { %4680 = vrsqrt.f32 %v7658_v33  ;;  %v1131_v12 = vadd.f32 %v1034_v28, %v902_v40  ;;  %v1766_v51 = vmul.f32 0.0, %v5210_v11  ;;  %v9501_v0 = vrot.slane %v7523_v31, 1  ;;  %v7721_v40 = vpop.xlane.xlu0 %2248 }
 0x1c3   : > { %v2071_v54 = vsel %vm972_vm0, %v9500_v52, %v9472_v20  ;;  %4682 = vrsqrt.f32 %v7660_v45  ;;  %v1553_v29 = vrot.slane %v7652_v9, 2  ;;  %v7686_v22 = vmul.f32 %v5200_v6, %v7213_v38  ;;  %v7738_v52 = vpop.xlane.xlu2 %2254 }
 0x1c4   : > { %v1940_v55 = vadd.f32 %v9501_v0, %v1731_v17  ;;  %v1213_v1 = vadd.f32 %v9474_v37, %v1131_v12  ;;  %v693_v47 = vadd.f32 %v7590_v61, %v660_v57  ;;  %v7692_v30 = vmul.f32 %v9405_v2, %v7213_v38  ;;  %v7723_v57 = vpop.xlane.xlu1 %2251 }
 0x1c5   : > { %v7696_v11 = vmul.f32 %v9440_v43, %v7489_v7  ;;  %v2994_v31 = vmul.f32 %v7506_v3, %v2993_v27  ;;  %v3004_v36 = vmul.f32 %v7538_v15, %v3003_v56  ;;  %v9276_v6 = vrot.slane %v7686_v22, 1 }
 0x1c6   : > { %v7700_v58 = vadd.f32 %v2071_v54, %v1940_v55  ;;  %v1422_v63 = vadd.f32 %v1326_v35, %v1213_v1  ;;  %v7703_v37 = vrot.slane %v1766_v51, 1  ;;  %v9277_v48 = vrot.slane %v7692_v30, 2 }
 0x1c7   : > { %v7708_v2 = vmul.f32 %v9441_v50, %v7489_v7  ;;  %v7710_v32 = vpop.eup %4678  ;;  %v808_v9 = vsel %vm760_vm1, %v806_v16, %v9276_v6  ;;  %v1166_v21 = vmul.f32 %v5204_v8, %v7410_v44  ;;  %v3346_v27 = vmul.f32 %v7261_v24, %v7513_v39 }
 0x1c8   : > { %v2307_v43 = vsel %vm2180_vm2, %v7700_v58, 0.0  ;;  %v7725_v50 = vpop.eup %4680  ;;  %v3010_v44 = vmul.f32 %v7710_v32, %v7656_v4  ;;  %v1650_v16 = vadd.f32 %v1553_v29, %v1422_v63  ;;  %v903_v39 = vadd.f32 %v808_v9, %v693_v47  ;;  %v9508_v63 = vld [vmem:[#allocation26_spill] sm:$0xff] }
 0x1c9   : > { %2308 = vadd.xlane.f32.xlu2 %v2307_v43  ;;  %v9275_v17 = vrot.slane %v7696_v11, 1  ;;  %v7740_v54 = vpop.eup %4682  ;;  %v2411_v12 = vmul.f32 %v7700_v58, %v7700_v58  ;;  %v3020_v51 = vmul.f32 %v7725_v50, %v7658_v33  ;;  %v1036_v0 = vsel %vm972_vm0, %v1034_v28, %v9277_v48 }
 0x1ca   : > { %v3347_v55 = vmul.f32 %v7261_v24, %v7528_v14  ;;  %v2988_v42 = vsel %vm7731_vm15, %v7467_v62, %v7663_v59  ;;  %v3011_v47 = vmul.f32 %v7710_v32, %v3010_v44  ;;  %v1732_v28 = vadd.f32 %v9508_v63, %v1650_v16  ;;  %v9509_v16 = vld [vmem:[#allocation23_spill] sm:$0xff] }
 0x1cb   : > { %v1554_v43 = vrot.slane %v7708_v2, 2  ;;  %v2998_v14 = vsel %vm7746_vm5, %v7506_v3, %v2994_v31  ;;  %v3008_v62 = vsel %vm7767_vm6, %v7538_v15, %v3004_v36  ;;  %v3030_v13 = vmul.f32 %v7740_v54, %v7660_v45 }
 0x1cc   : > { %v1132_v59 = vadd.f32 %v1036_v0, %v903_v39  ;;  %v3021_v9 = vmul.f32 %v7725_v50, %v3020_v51  ;;  %v1941_v56 = vadd.f32 %v7703_v37, %v1732_v28  ;;  %v1328_v44 = vsel %vm760_vm1, %v1326_v35, %v9275_v17  ;;  %v2492_v48 = vpop.xlane.xlu1 %2491 }
 0x1cd   : > { %v3348_v10 = vmul.f32 %v7261_v24, %v9509_v16  ;;  %v2547_v3 = vsel %vm2180_vm2, %v2411_v12, 0.0  ;;  %v3398_v15 = vadd.f32 %v7309_v41, %v3346_v27  ;;  %v3399_v36 = vadd.f32 %v7309_v41, %v3347_v55  ;;  %v9511_v27 = vld [vmem:[#allocation36_spill] sm:$0xff] }
 0x1ce   : > { %v1214_v31 = vadd.f32 %v1166_v21, %v1132_v59  ;;  %v3012_v1 = vmul.f32 0.5, %v3011_v47  ;;  %v7793_v39 = vadd.f32 %v9472_v20, %v1941_v56  ;;  %v1555_v51 = vsel %vm972_vm0, %v1553_v29, %v1554_v43  ;;  %v2489_v21 = vpop.xlane.xlu0 %2488  ;;  %v9510_v59 = vld [vmem:[#allocation41_spill] sm:$0xff] }
 0x1cf   : > { %v3400_v35 = vadd.f32 %v7309_v41, %v3348_v10  ;;  %v3031_v0 = vmul.f32 %v7740_v54, %v3030_v13  ;;  %v3505_v16 = vrot.slane %v3398_v15, 7  ;;  %v3506_v12 = vrot.slane %v3399_v36, 7  ;;  %v9514_v13 = vld [vmem:[#allocation37_spill] sm:$0xff] }
 0x1d0   : > { %v1423_v28 = vadd.f32 %v1328_v44, %v1214_v31  ;;  %v9512_v17 = vsub.f32 %v9510_v59, %v9511_v27  ;;  %v3022_v47 = vmul.f32 0.5, %v3021_v9  ;;  %v2310_v56 = vsel %vm2172_vm3, %v7793_v39, 0.0 }
 0x1d1   : > { %2548 = vadd.xlane.f32.xlu2 %v2547_v3  ;;  %v3508_v6 = vrot.slane %v3400_v35, 7  ;;  %v9513_v29 = vsub.f32 %v9492_v49, %v7348_v34  ;;  %v9515_v44 = vsub.f32 %v9493_v60, %v9514_v13  ;;  %2311 = vadd.xlane.f32.xlu0 %v2310_v56  ;;  %v9517_v3 = vld [vmem:[#allocation45_spill] sm:$0xff]  ;;  %v3507_v35 = vsel %vm3479_vm11, %v3505_v16, %v3506_v12  ;;  %v2495_v49 = vpop.xlane.xlu2 %2494 }
 0x1d2   : > { %v3297_v55 = vmul.f32 %v2988_v42, %v9512_v17  ;;  %v1651_v15 = vadd.f32 %v1555_v51, %v1423_v28  ;;  %v661_v17 = vmul.f32 %v5198_v5, %v7213_v38  ;;  %v9516_v42 = vld [vmem:[#allocation44_spill] sm:$0xff]  ;;  %v2725_v36 = vsub.f32 %v9517_v3, %v7607_v53 }
 0x1d3   : > { %v3298_v10 = vmul.f32 %v2998_v14, %v9513_v29  ;;  %v3299_v31 = vmul.f32 %v3008_v62, %v9515_v44  ;;  %v2724_v9 = vsub.f32 %v9516_v42, %v7601_v46  ;;  %v3509_v34 = vsel %vm3479_vm11, %v3506_v12, %v3508_v6 }
 0x1d4   : > { %v3013_v14 = vsub.f32 1.5, %v3012_v1  ;;  %v7819_v59 = vmul.f32 0.5, %v3031_v0  ;;  %v1733_v60 = vadd.f32 %v9508_v63, %v1651_v15  ;;  %v3597_v62 = vpack.c.bf16 %v3509_v34, %v3507_v35  ;;  %v2261_v29 = vpop.xlane.xlu1 %2260 }
 0x1d5   : > { %vm3015_vm1 = vweird.f32 %v7656_v4  ;;  %vm3016_vm7 = vweird.f32 %v7710_v32  ;;  %v3023_v5 = vsub.f32 1.5, %v3022_v47  ;;  %v694_v38 = vadd.f32 %v7590_v61, %v661_v17 }
 0x1d6   : > { %v1942_v51 = vadd.f32 %v7703_v37, %v1733_v60  ;;  %4480 = vmatmul.msk.bf16.gmra.mxu0 %vm2176_vm4, %v3597_v62  ;;  %v9518_v6 = vrot.slane %v7692_v30, 2  ;;  %v1167_v0 = vmul.f32 %v5204_v8, %v7489_v7  ;;  %v7834_v28 = vmul.f32 0.03125, %v7721_v40  ;;  %v2258_v47 = vpop.xlane.xlu0 %2257 }
 0x1d7   : > { %vm3026_vm8 = vweird.f32 %v7725_v50  ;;  %v9519_v16 = vrot.slane %v7686_v22, 1  ;;  %v7840_v12 = vmul.f32 0.03125, %v7723_v57  ;;  %v7843_v27 = vmul.f32 0.03125, %v7738_v52 }
 0x1d8   : > { %v1037_v1 = vsel %vm972_vm0, %v9518_v6, %v5231_v23  ;;  %v2412_v23 = vmul.f32 %v7793_v39, %v7793_v39  ;;  %v3014_v30 = vmul.f32 %v7710_v32, %v3013_v14  ;;  %v3033_v8 = vsub.f32 1.5, %v7819_v59 }
 0x1d9   : > { %v904_v61 = vadd.f32 %v9519_v16, %v694_v38  ;;  %v7850_v7 = vadd.f32 %v9472_v20, %v1942_v51  ;;  %v2583_v40 = vmul.f32 0.03125, %v2489_v21  ;;  %v7853_v22 = vmul.f32 %v7725_v50, %v3023_v5  ;;  %v2264_v59 = vpop.xlane.xlu2 %2263 }
 0x1da   : > { %vm3025_vm9 = vweird.f32 %v7658_v33  ;;  %vm3036_vm10 = vweird.f32 %v7740_v54  ;;  %v2631_v52 = vmul.f32 %v7834_v28, %v7834_v28  ;;  %v2632_v56 = vmul.f32 %v7840_v12, %v7840_v12 }
 0x1db   : > { %v1133_v57 = vadd.f32 %v1037_v1, %v904_v61  ;;  %v2313_v13 = vsel %vm2176_vm4, %v7850_v7, 0.0  ;;  %v2633_v21 = vmul.f32 %v7843_v27, %v7843_v27  ;;  %v2550_v44 = vsel %vm2172_vm3, %v2412_v23, 0.0  ;;  %vm7880_vm3 = vmor %vm3015_vm1, %vm3016_vm7 }
 0x1dc   : > { %v2413_v15 = vmul.f32 %v7850_v7, %v7850_v7  ;;  %vm3035_vm12 = vweird.f32 %v7660_v45  ;;  %2314 = vadd.xlane.f32.xlu1 %v2313_v13  ;;  %2551 = vadd.xlane.f32.xlu0 %v2550_v44  ;;  %v2679_v35 = vsub.f32 %v2583_v40, %v2631_v52  ;;  %v2584_v34 = vmul.f32 0.03125, %v2492_v48  ;;  %v2501_v52 = vpop.xlane.xlu1 %2500 }
 0x1dd   : > { %v1215_v17 = vadd.f32 %v1167_v0, %v1133_v57  ;;  %v2585_v14 = vmul.f32 0.03125, %v2495_v49  ;;  %v1556_v60 = vsel %vm972_vm0, %v1554_v43, %v5233_v25  ;;  %v3349_v62 = vmul.f32 %v7261_v24, %v3297_v55  ;;  %vm7912_vm0 = vmor %vm3025_vm9, %vm3026_vm8 }
 0x1de   : > { %v3350_v5 = vmul.f32 %v7261_v24, %v3298_v10  ;;  %v3351_v38 = vmul.f32 %v7261_v24, %v3299_v31  ;;  %v9522_v48 = vrot.slane %v7696_v11, 1  ;;  %v7886_v2 = vadd.f32 1e-06, %v2679_v35  ;;  %v2498_v40 = vpop.xlane.xlu0 %2497  ;;  %vm7930_vm13 = vmor %vm3035_vm12, %vm3036_vm10 }
 0x1df   : > { %v2680_v25 = vsub.f32 %v2584_v34, %v2632_v56  ;;  %v2681_v43 = vsub.f32 %v2585_v14, %v2633_v21  ;;  %v3018_v55 = vsel %vm7880_vm3, %v7710_v32, %v3014_v30  ;;  %v3401_v10 = vadd.f32 %v7309_v41, %v3349_v62  ;;  %v9527_v34 = vld [vmem:[#allocation46_spill] sm:$0xff] }
 0x1e0   : > { %v1424_v49 = vadd.f32 %v9522_v48, %v1215_v17  ;;  %v3402_v31 = vadd.f32 %v7309_v41, %v3350_v5  ;;  %v3403_v4 = vadd.f32 %v7309_v41, %v3351_v38  ;;  %v2553_v1 = vsel %vm2176_vm4, %v2413_v15, 0.0 }
 0x1e1   : > { %4684 = vrsqrt.f32 %v7886_v2  ;;  %v7896_v11 = vadd.f32 1e-06, %v2680_v25  ;;  %v7898_v0 = vadd.f32 1e-06, %v2681_v43  ;;  %v3510_v16 = vrot.slane %v3401_v10, 7 }
 0x1e2   : > { %v1652_v6 = vadd.f32 %v1556_v60, %v1424_v49  ;;  %v3511_v61 = vrot.slane %v3402_v31, 7  ;;  %v3513_v23 = vrot.slane %v3403_v4, 7  ;;  %v3034_v32 = vmul.f32 %v7740_v54, %v3033_v8 }
 0x1e3   : > { %4686 = vrsqrt.f32 %v7896_v11  ;;  %v7903_v57 = vmul.f32 0.03125, %v2258_v47  ;;  %v3300_v56 = vmul.f32 %v3018_v55, %v2724_v9  ;;  %v3028_v46 = vsel %vm7912_vm0, %v7725_v50, %v7853_v22  ;;  %v2504_v47 = vpop.xlane.xlu2 %2503 }
 0x1e4   : > { %v1734_v30 = vadd.f32 %v9508_v63, %v1652_v6  ;;  %4688 = vrsqrt.f32 %v7898_v0  ;;  %v3512_v63 = vsel %vm3479_vm11, %v3510_v16, %v3511_v61  ;;  %v3514_v8 = vsel %vm3479_vm11, %v3511_v61, %v3513_v23  ;;  %2554 = vadd.xlane.f32.xlu1 %v2553_v1  ;;  %v2270_v10 = vpop.xlane.xlu1 %2269 }
 0x1e5   : > { %v3598_v9 = vpack.c.bf16 %v3514_v8, %v3512_v63  ;;  %v7924_v33 = vmul.f32 0.03125, %v2261_v29  ;;  %v7934_v44 = vmul.f32 0.03125, %v2264_v59  ;;  %v2586_v15 = vmul.f32 0.03125, %v2498_v40 }
 0x1e6   : > { %v1943_v42 = vadd.f32 %v7703_v37, %v1734_v30  ;;  %v2587_v17 = vmul.f32 0.03125, %v2501_v52  ;;  %v2588_v50 = vmul.f32 0.03125, %v2504_v47  ;;  %v3038_v37 = vsel %vm7930_vm13, %v7740_v54, %v3034_v32  ;;  %v2267_v43 = vpop.xlane.xlu0 %2266  ;;  %v9528_v47 = vld [vmem:[#allocation47_spill] sm:$0xff] }
 0x1e7   : > { %v7936_v22 = vpop.eup %4684  ;;  %v2634_v45 = vmul.f32 %v7903_v57, %v7903_v57  ;;  %v2635_v35 = vmul.f32 %v7924_v33, %v7924_v33  ;;  %v2726_v14 = vsub.f32 %v9527_v34, %v7612_v18  ;;  %4481 = vmatmul.msk.bf16.gmra.mxu0 %vm2176_vm4, %v3598_v9  ;;  %v2636_v54 = vmul.f32 %v7934_v44, %v7934_v44 }
 0x1e8   : > { %v7942_v29 = vadd.f32 %v9472_v20, %v1943_v42  ;;  %v3040_v59 = vmul.f32 %v7936_v22, %v7886_v2  ;;  %v3301_v20 = vmul.f32 %v3028_v46, %v2725_v36  ;;  %v3352_v55 = vmul.f32 %v7261_v24, %v3300_v56 }
 0x1e9   : > { %v7955_v60 = vpop.eup %4686  ;;  %v2682_v5 = vsub.f32 %v2586_v15, %v2634_v45  ;;  %v2683_v38 = vsub.f32 %v2587_v17, %v2635_v35  ;;  %v3302_v51 = vmul.f32 %v3038_v37, %v2726_v14  ;;  %v2684_v25 = vsub.f32 %v2588_v50, %v2636_v54  ;;  %v9529_v15 = vld [vmem:[#allocation48_spill] sm:$0xff] }
 0x1ea   : > { %v2316_v62 = vsel %vm2180_vm2, %v7942_v29, 0.0  ;;  %v7962_v18 = vpop.eup %4688  ;;  %v3041_v48 = vmul.f32 %v7936_v22, %v3040_v59  ;;  %v3050_v49 = vmul.f32 %v7955_v60, %v7896_v11  ;;  %v2414_v53 = vmul.f32 %v7942_v29, %v7942_v29 }
 0x1eb   : > { %2317 = vadd.xlane.f32.xlu2 %v2316_v62  ;;  %v3060_v3 = vmul.f32 %v7962_v18, %v7898_v0  ;;  %v7971_v36 = vadd.f32 1e-06, %v2682_v5  ;;  %v7975_v6 = vadd.f32 1e-06, %v2683_v38  ;;  %v7977_v1 = vadd.f32 1e-06, %v2684_v25  ;;  %v2273_v23 = vpop.xlane.xlu2 %2272  ;;  %v8019_v38 = vpop.f32.mrf.mxu0 }
 0x1ec   : > { %v3042_v31 = vmul.f32 0.5, %v3041_v48  ;;  %v3051_v4 = vmul.f32 %v7955_v60, %v3050_v49  ;;  %v3353_v61 = vmul.f32 %v7261_v24, %v3301_v20  ;;  %v2556_v30 = vsel %vm2180_vm2, %v2414_v53, 0.0  ;;  %v2510_v34 = vpop.xlane.xlu1 %2509 }
 0x1ed   : > { %v3061_v16 = vmul.f32 %v7962_v18, %v3060_v3  ;;  %4690 = vrsqrt.f32 %v7971_v36  ;;  %v3354_v56 = vmul.f32 %v7261_v24, %v3302_v51  ;;  %v3404_v63 = vadd.f32 %v7309_v41, %v3352_v55  ;;  %v4541_v51 = vld [vmem:[%s9532_s15 + $0x38] sm:$0xff]  ;;  %v4540_v3 = vld [vmem:[%s9532_s15 + $0x30] sm:$0xff] }
 0x1ee   : > { %v3043_v40 = vsub.f32 1.5, %v3042_v31  ;;  %v3052_v32 = vmul.f32 0.5, %v3051_v4  ;;  %4692 = vrsqrt.f32 %v7975_v6  ;;  %v3405_v8 = vadd.f32 %v7309_v41, %v3353_v61  ;;  %v2507_v24 = vpop.xlane.xlu0 %2506  ;;  %4137 = vmatpush.bf16.msra.mxu1 %v4541_v51  ;;  %4546 = vmatpush.bf16.msra.mxu2 %v4541_v51  ;;  %v9541_v51 = vld [vmem:[#allocation54_spill] sm:$0xff] }
 0x1ef   : > { %v3062_v52 = vmul.f32 0.5, %v3061_v16  ;;  %4694 = vrsqrt.f32 %v7977_v1  ;;  %vm3046_vm14 = vweird.f32 %v7936_v22  ;;  %v3406_v9 = vadd.f32 %v7309_v41, %v3354_v56 }
 0x1f0   : > { %v3053_v13 = vsub.f32 1.5, %v3052_v32  ;;  %v3044_v46 = vmul.f32 %v7936_v22, %v3043_v40  ;;  %v2727_v21 = vsub.f32 %v9528_v47, %v7834_v28  ;;  %v2728_v17 = vsub.f32 %v9529_v15, %v7840_v12  ;;  %v9538_v47 = vld [vmem:[#allocation51_spill] sm:$0xff] }
 0x1f1   : > { %v3063_v42 = vsub.f32 1.5, %v3062_v52  ;;  %vm3045_vm2 = vweird.f32 %v7886_v2  ;;  %v3515_v37 = vrot.slane %v3404_v63, 7  ;;  %v3516_v45 = vrot.slane %v3405_v8, 7  ;;  %v9537_v63 = vld [vmem:[#allocation49_spill] sm:$0xff] }
 0x1f2   : > { %v3518_v35 = vrot.slane %v3406_v9, 7  ;;  %vm8000_vm15 = vmor %vm3045_vm2, %vm3046_vm14  ;;  %v3054_v28 = vmul.f32 %v7955_v60, %v3053_v13  ;;  %vm3056_vm5 = vweird.f32 %v7955_v60  ;;  %v8008_v59 = vmul.f32 0.03125, %v2267_v43  ;;  %4138 = vmatpush.bf16.msra.mxu1 %v4540_v3  ;;  %v4539_v9 = vld [vmem:[%s9532_s15 + $0x28] sm:$0xff]  ;;  %4547 = vmatpush.bf16.msra.mxu2 %v4540_v3 }
 0x1f3   : > { %2557 = vadd.xlane.f32.xlu2 %v2556_v30  ;;  %v7995_v50 = vpop.eup %4690  ;;  %v3048_v54 = vsel %vm8000_vm15, %v7936_v22, %v3044_v46  ;;  %v3064_v20 = vmul.f32 %v7962_v18, %v3063_v42  ;;  %vm3066_vm6 = vweird.f32 %v7962_v18  ;;  %v2513_v5 = vpop.xlane.xlu2 %2512  ;;  %vm3055_vm1 = vweird.f32 %v7896_v11 }
 0x1f4   : > { %v7998_v14 = vpop.eup %4692  ;;  %v3070_v12 = vmul.f32 %v7995_v50, %v7971_v36  ;;  %v8028_v49 = vmul.f32 0.03125, %v2270_v10  ;;  %vm8032_vm7 = vmor %vm3055_vm1, %vm3056_vm5  ;;  %vm3065_vm8 = vweird.f32 %v7898_v0  ;;  %v3517_v53 = vsel %vm3479_vm11, %v3515_v37, %v3516_v45  ;;  %v2279_v42 = vpop.xlane.xlu1 %2278  ;;  %v8114_v0 = vld [vmem:[%s9138_s6] ss:$0 sm:$0xff] }
 0x1f5   : > { %v8010_v2 = vpop.eup %4694  ;;  %v3080_v62 = vmul.f32 %v7998_v14, %v7975_v6  ;;  %v3519_v11 = vsel %vm3479_vm11, %v3516_v45, %v3518_v35  ;;  %v3303_v55 = vmul.f32 %v3048_v54, %v2727_v21  ;;  %v3058_v10 = vsel %vm8032_vm7, %v7955_v60, %v3054_v28  ;;  %vm8048_vm9 = vmor %vm3065_vm8, %vm3066_vm6  ;;  %v8077_v35 = vld [vmem:[%s9539_s16] ss:$0 sm:$0xff] }
 0x1f6   : > { %v3071_v48 = vmul.f32 %v7995_v50, %v3070_v12  ;;  %v3090_v22 = vmul.f32 %v8010_v2, %v7977_v1  ;;  %v3599_v31 = vpack.c.bf16 %v3519_v11, %v3517_v53  ;;  %v2637_v4 = vmul.f32 %v8008_v59, %v8008_v59  ;;  %v2276_v13 = vpop.xlane.xlu0 %2275  ;;  %v8084_v54 = vld [vmem:[%s9137_s5] ss:$0 sm:$0xff]  ;;  %4139 = vmatpush.bf16.msra.mxu1 %v4539_v9 }
 0x1f7   : > { %v3081_v43 = vmul.f32 %v7998_v14, %v3080_v62  ;;  %v3068_v16 = vsel %vm8048_vm9, %v7962_v18, %v3064_v20  ;;  %v8057_v61 = vmul.f32 0.03125, %v2273_v23  ;;  %v2589_v40 = vmul.f32 0.03125, %v2507_v24  ;;  %v8087_v20 = vpop.f32.mrf.mxu0  ;;  %v9540_v62 = vld [vmem:[#allocation52_spill] sm:$0xff]  ;;  %4548 = vmatpush.bf16.msra.mxu2 %v4539_v9  ;;  %v4538_v11 = vld [vmem:[%s9532_s15 + $0x20] sm:$0xff] }
 0x1f8   : > { %v2590_v32 = vmul.f32 0.03125, %v2510_v34  ;;  %v3072_v60 = vmul.f32 0.5, %v3071_v48  ;;  %v3091_v30 = vmul.f32 %v8010_v2, %v3090_v22  ;;  %4482 = vmatmul.msk.bf16.gmra.mxu0 %vm2176_vm4, %v3599_v31  ;;  %v2638_v52 = vmul.f32 %v8028_v49, %v8028_v49 }
 0x1f9   : > { %v2591_v56 = vmul.f32 0.03125, %v2513_v5  ;;  %v2729_v8 = vsub.f32 %v9537_v63, %v7843_v27  ;;  %v3082_v46 = vmul.f32 0.5, %v3081_v43  ;;  %v2639_v18 = vmul.f32 %v8057_v61, %v8057_v61 }
 0x1fa   : > { %v2685_v23 = vsub.f32 %v2589_v40, %v2637_v4  ;;  %v2730_v21 = vsub.f32 %v9538_v47, %v7903_v57  ;;  %v2686_v15 = vsub.f32 %v2590_v32, %v2638_v52  ;;  %v3304_v24 = vmul.f32 %v3058_v10, %v2728_v17  ;;  %4140 = vmatpush.bf16.msra.mxu1 %v4538_v11  ;;  %v4537_v32 = vld [vmem:[%s9532_s15 + $0x18] sm:$0xff]  ;;  %v4535_v57 = vld [vmem:[%s9532_s15 + $0x8] sm:$0xff] }
 0x1fb   : > { %v3305_v37 = vmul.f32 %v3068_v16, %v2729_v8  ;;  %v2687_v27 = vsub.f32 %v2591_v56, %v2639_v18  ;;  %v2282_v34 = vpop.xlane.xlu2 %2281  ;;  %v3073_v41 = vsub.f32 1.5, %v3072_v60  ;;  %v3092_v28 = vmul.f32 0.5, %v3091_v30  ;;  %4549 = vmatpush.bf16.msra.mxu2 %v4538_v11 }
 0x1fc   : > { %v8072_v45 = vadd.f32 1e-06, %v2685_v23  ;;  %v8079_v12 = vadd.f32 1e-06, %v2686_v15  ;;  %v3355_v17 = vmul.f32 %v8084_v54, %v3303_v55  ;;  %v2731_v5 = vsub.f32 %v9540_v62, %v7924_v33  ;;  %v2519_v52 = vpop.xlane.xlu1 %2518  ;;  %v9548_v33 = vld [vmem:[#allocation55_spill] sm:$0xff] }
 0x1fd   : > { %v2732_v48 = vsub.f32 %v9541_v51, %v7934_v44  ;;  %v3083_v22 = vsub.f32 1.5, %v3082_v46  ;;  %vm3075_vm10 = vweird.f32 %v7971_v36  ;;  %vm3076_vm12 = vweird.f32 %v7995_v50  ;;  %v9550_v51 = vld [vmem:[#allocation28_spill] sm:$0xff] }
 0x1fe   : > { %4696 = vrsqrt.f32 %v8072_v45  ;;  %vm3085_vm3 = vweird.f32 %v7975_v6  ;;  %vm3086_vm0 = vweird.f32 %v7998_v14  ;;  %v8099_v25 = vadd.f32 1e-06, %v2687_v27  ;;  %vm8134_vm2 = vmor %vm3075_vm10, %vm3076_vm12  ;;  %4141 = vmatpush.bf16.msra.mxu1 %v4537_v32 }
 0x1ff   : > { %4698 = vrsqrt.f32 %v8079_v12  ;;  %v8103_v43 = vadd.f32 %v8077_v35, %v8019_v38  ;;  %v3356_v53 = vmul.f32 %v8084_v54, %v3304_v24  ;;  %v3074_v3 = vmul.f32 %v7995_v50, %v3073_v41  ;;  %v2516_v38 = vpop.xlane.xlu0 %2515  ;;  %vm8153_vm15 = vmor %vm3085_vm3, %vm3086_vm0  ;;  %v4536_v41 = vld [vmem:[%s9532_s15 + $0x10] sm:$0xff]  ;;  %4550 = vmatpush.bf16.msra.mxu2 %v4537_v32 }
 0x200   : > { %v3093_v55 = vsub.f32 1.5, %v3092_v28  ;;  %v3357_v10 = vmul.f32 %v8084_v54, %v3305_v37  ;;  %v3407_v31 = vadd.f32 %v8114_v0, %v3355_v17  ;;  %v3084_v4 = vmul.f32 %v7998_v14, %v3083_v22 }
 0x201   : > { %4700 = vrsqrt.f32 %v8099_v25  ;;  %v3408_v16 = vadd.f32 %v8114_v0, %v3356_v53  ;;  %v8120_v40 = vmul.f32 0.03125, %v2276_v13  ;;  %vm3095_vm13 = vweird.f32 %v7977_v1 }
 0x202   : > { %vm3096_vm14 = vweird.f32 %v8010_v2  ;;  %v3409_v60 = vadd.f32 %v8114_v0, %v3357_v10  ;;  %v3520_v30 = vrot.slane %v3407_v31, 7  ;;  %v3765_v63 = vmul.f32 %v8103_v43, %v8103_v43  ;;  %4142 = vmatpush.bf16.msra.mxu1 %v4536_v41 }
 0x203   : > { %v3521_v8 = vrot.slane %v3408_v16, 7  ;;  %v8140_v46 = vmul.f32 0.03125, %v2279_v42  ;;  %v8142_v18 = vmul.f32 0.03125, %v2282_v34  ;;  %v2522_v23 = vpop.xlane.xlu2 %2521  ;;  %v3078_v15 = vsel %vm8134_vm2, %v7995_v50, %v3074_v3  ;;  %vm8179_vm5 = vmor %vm3095_vm13, %vm3096_vm14  ;;  %4551 = vmatpush.bf16.msra.mxu2 %v4536_v41 }
 0x204   : > { %v8128_v56 = vpop.eup %4696  ;;  %v3094_v42 = vmul.f32 %v8010_v2, %v3093_v55  ;;  %v3523_v37 = vrot.slane %v3409_v60, 7  ;;  %v3088_v27 = vsel %vm8153_vm15, %v7998_v14, %v3084_v4  ;;  %v2640_v6 = vmul.f32 %v8120_v40, %v8120_v40  ;;  %v3690_v14 = vpop.f32.mrf.mxu0 }
 0x205   : > { %v8144_v9 = vpop.eup %4698  ;;  %v3100_v24 = vmul.f32 %v8128_v56, %v8072_v45  ;;  %v3522_v34 = vsel %vm3479_vm11, %v3520_v30, %v3521_v8  ;;  %v2592_v22 = vmul.f32 0.03125, %v2516_v38  ;;  %v2593_v53 = vmul.f32 0.03125, %v2519_v52 }
 0x206   : > { %v3110_v50 = vmul.f32 %v8144_v9, %v8079_v12  ;;  %v3524_v17 = vsel %vm3479_vm11, %v3521_v8, %v3523_v37  ;;  %v2641_v10 = vmul.f32 %v8140_v46, %v8140_v46  ;;  %v2642_v31 = vmul.f32 %v8142_v18, %v8142_v18  ;;  %4143 = vmatpush.bf16.msra.mxu1 %v4535_v57 }
 0x207   : > { %v3101_v28 = vmul.f32 %v8128_v56, %v3100_v24  ;;  %v8173_v11 = vpop.eup %4700  ;;  %v3600_v55 = vpack.c.bf16 %v3524_v17, %v3522_v34  ;;  %v2594_v38 = vmul.f32 0.03125, %v2522_v23  ;;  %v3306_v4 = vmul.f32 %v3078_v15, %v2730_v21  ;;  %v2285_v8 = vpop.xlane.xlu0 %2284  ;;  %4552 = vmatpush.bf16.msra.mxu2 %v4535_v57  ;;  %v9551_v17 = vld [vmem:[#allocation30_spill] sm:$0xff] }
 0x208   : > { %v3098_v1 = vsel %vm8179_vm5, %v8010_v2, %v3094_v42  ;;  %v3120_v16 = vmul.f32 %v8173_v11, %v8099_v25  ;;  %v2688_v32 = vsub.f32 %v2592_v22, %v2640_v6  ;;  %v8198_v60 = vadd.f32 %v8077_v35, %v8087_v20  ;;  %v2288_v24 = vpop.xlane.xlu1 %2287 }
 0x209   : > { %4483 = vmatmul.msk.bf16.gmra.mxu0 %vm2176_vm4, %v3600_v55  ;;  %v2689_v30 = vsub.f32 %v2593_v53, %v2641_v10  ;;  %v2690_v52 = vsub.f32 %v2594_v38, %v2642_v31  ;;  %v3307_v2 = vmul.f32 %v3088_v27, %v2731_v5  ;;  %v3102_v47 = vmul.f32 0.5, %v3101_v28  ;;  %v9549_v5 = vld [vmem:[#allocation56_spill] sm:$0xff]  ;;  %v9552_v53 = vld [vmem:[#allocation53_spill] sm:$0xff]  ;;  %v9553_v31 = vld [vmem:[#allocation31_spill] sm:$0xff] }
 0x20a   : > { %v3111_v21 = vmul.f32 %v8144_v9, %v3110_v50  ;;  %v8207_v13 = vadd.f32 1e-06, %v2688_v32  ;;  %v3121_v20 = vmul.f32 %v8173_v11, %v3120_v16  ;;  %v3797_v23 = vmul.f32 %v3765_v63, %v8103_v43  ;;  %v4534_v32 = vld [vmem:[%s9532_s15] sm:$0xff] }
 0x20b   : > { %v8211_v15 = vadd.f32 1e-06, %v2689_v30  ;;  %v3308_v36 = vmul.f32 %v3098_v1, %v2732_v48  ;;  %v2733_v62 = vsub.f32 %v9548_v33, %v8008_v59  ;;  %v2734_v42 = vsub.f32 %v9549_v5, %v8028_v49  ;;  %v2291_v44 = vpop.xlane.xlu2 %2290  ;;  %4144 = vmatpush.bf16.msra.mxu1 %v4534_v32  ;;  %4553 = vmatpush.bf16.msra.mxu2 %v4534_v32  ;;  %v9561_v49 = vld [vmem:[#allocation32_spill] sm:$0xff] }
 0x20c   : > { %4702 = vrsqrt.f32 %v8207_v13  ;;  %v3766_v37 = vmul.f32 %v8198_v60, %v8198_v60  ;;  %v8224_v63 = vadd.f32 1e-06, %v2690_v52  ;;  %v3358_v27 = vmul.f32 %v8084_v54, %v3306_v4  ;;  %v8241_v10 = vpop.f32.mrf.mxu0 }
 0x20d   : > { %4704 = vrsqrt.f32 %v8211_v15  ;;  %v3103_v50 = vsub.f32 1.5, %v3102_v47  ;;  %v3112_v34 = vmul.f32 0.5, %v3111_v21  ;;  %v3359_v6 = vmul.f32 %v8084_v54, %v3307_v2 }
 0x20e   : > { %vm3105_vm6 = vweird.f32 %v8072_v45  ;;  %v3122_v41 = vmul.f32 0.5, %v3121_v20  ;;  %v8231_v28 = vmul.f32 0.044715, %v3797_v23  ;;  %4706 = vrsqrt.f32 %v8224_v63 }
 0x20f   : > { %vm3106_vm1 = vweird.f32 %v8128_v56  ;;  %vm3115_vm7 = vweird.f32 %v8079_v12  ;;  %v3360_v55 = vmul.f32 %v8084_v54, %v3308_v36  ;;  %vm3125_vm8 = vweird.f32 %v8099_v25 }
 0x210   : > { %v3798_v4 = vmul.f32 %v3766_v37, %v8198_v60  ;;  %v3410_v1 = vadd.f32 %v8114_v0, %v3358_v27  ;;  %v3411_v16 = vadd.f32 %v8114_v0, %v3359_v6  ;;  %v3104_v52 = vmul.f32 %v8128_v56, %v3103_v50  ;;  %v2525_v6 = vpop.xlane.xlu0 %2524  ;;  %vm8284_vm12 = vmor %vm3105_vm6, %vm3106_vm1 }
 0x211   : > { %v3113_v57 = vsub.f32 1.5, %v3112_v34  ;;  %v8256_v2 = vadd.f32 %v8077_v35, %v3690_v14  ;;  %v3412_v47 = vadd.f32 %v8114_v0, %v3360_v55  ;;  %v3123_v20 = vsub.f32 1.5, %v3122_v41 }
 0x212   : > { %v8252_v30 = vpop.eup %4702  ;;  %v3525_v36 = vrot.slane %v3410_v1, 7  ;;  %v8263_v37 = vmul.f32 0.03125, %v2285_v8  ;;  %v3526_v50 = vrot.slane %v3411_v16, 7  ;;  %v8267_v14 = vmul.f32 0.03125, %v2288_v24  ;;  %v2528_v24 = vpop.xlane.xlu1 %2527 }
 0x213   : > { %v8259_v21 = vpop.eup %4704  ;;  %v3130_v23 = vmul.f32 %v8252_v30, %v8207_v13  ;;  %v3528_v34 = vrot.slane %v3412_v47, 7  ;;  %vm3116_vm9 = vweird.f32 %v8144_v9  ;;  %vm3126_vm10 = vweird.f32 %v8173_v11 }
 0x214   : > { %v3140_v27 = vmul.f32 %v8259_v21, %v8211_v15  ;;  %v8269_v55 = vpop.eup %4706  ;;  %v3862_v41 = vmul.f32 0.044715, %v3798_v4  ;;  %v3114_v1 = vmul.f32 %v8144_v9, %v3113_v57  ;;  %v3767_v16 = vmul.f32 %v8256_v2, %v8256_v2  ;;  %vm8304_vm3 = vmor %vm3115_vm7, %vm3116_vm9 }
 0x215   : > { %v3131_v8 = vmul.f32 %v8252_v30, %v3130_v23  ;;  %v8278_v47 = vmul.f32 0.03125, %v2291_v44  ;;  %v3124_v4 = vmul.f32 %v8173_v11, %v3123_v20  ;;  %v3150_v57 = vmul.f32 %v8269_v55, %v8224_v63  ;;  %v2531_v44 = vpop.xlane.xlu2 %2530  ;;  %vm8315_vm0 = vmor %vm3125_vm8, %vm3126_vm10 }
 0x216   : > { %v3141_v32 = vmul.f32 %v8259_v21, %v3140_v27  ;;  %v3527_v23 = vsel %vm3479_vm11, %v3525_v36, %v3526_v50  ;;  %v3529_v27 = vsel %vm3479_vm11, %v3526_v50, %v3528_v34  ;;  %v3108_v3 = vsel %vm8284_vm12, %v8128_v56, %v3104_v52 }
 0x217   : > { %v3601_v22 = vpack.c.bf16 %v3529_v27, %v3527_v23  ;;  %v2643_v45 = vmul.f32 %v8263_v37, %v8263_v37  ;;  %v2644_v48 = vmul.f32 %v8267_v14, %v8267_v14  ;;  %v3132_v36 = vmul.f32 0.5, %v3131_v8 }
 0x218   : > { %v3142_v50 = vmul.f32 0.5, %v3141_v32  ;;  %v2595_v34 = vmul.f32 0.03125, %v2525_v6  ;;  %v2596_v38 = vmul.f32 0.03125, %v2528_v24  ;;  %v3118_v56 = vsel %vm8304_vm3, %v8144_v9, %v3114_v1  ;;  %v3695_v32 = vpop.f32.mrf.mxu0 }
 0x219   : > { %v3799_v12 = vmul.f32 %v3767_v16, %v8256_v2  ;;  %4484 = vmatmul.msk.bf16.vlgmr.msra.gmra.mxu3 %vm2176_vm4, %v3601_v22  ;;  %v2645_v6 = vmul.f32 %v8278_v47, %v8278_v47  ;;  %v2597_v8 = vmul.f32 0.03125, %v2531_v44  ;;  %v3128_v9 = vsel %vm8315_vm0, %v8173_v11, %v3124_v4 }
 0x21a   : > { %v3151_v1 = vmul.f32 %v8269_v55, %v3150_v57  ;;  %v2691_v25 = vsub.f32 %v2595_v34, %v2643_v45  ;;  %v2692_v24 = vsub.f32 %v2596_v38, %v2644_v48  ;;  %v3309_v23 = vmul.f32 %v3108_v3, %v2733_v62  ;;  %v2294_v3 = vpop.xlane.xlu0 %2293  ;;  %v9562_v45 = vld [vmem:[#allocation21_spill] sm:$0xff] }
 0x21b   : > { %vm3135_vm13 = vweird.f32 %v8207_v13  ;;  %vm3145_vm14 = vweird.f32 %v8211_v15  ;;  %v2693_v22 = vsub.f32 %v2597_v8, %v2645_v6  ;;  %v3133_v16 = vsub.f32 1.5, %v3132_v36 }
 0x21c   : > { %v3143_v27 = vsub.f32 1.5, %v3142_v50  ;;  %v8332_v44 = vadd.f32 1e-06, %v2691_v25  ;;  %v8334_v20 = vadd.f32 1e-06, %v2692_v24  ;;  %v3310_v11 = vmul.f32 %v3118_v56, %v2734_v42 }
 0x21d   : > { %v9560_v48 = vsub.f32 %v9550_v51, %v8057_v61  ;;  %v8342_v33 = vmul.f32 0.044715, %v3799_v12  ;;  %v8344_v62 = vadd.f32 1e-06, %v2693_v22  ;;  %vm3136_vm2 = vweird.f32 %v8252_v30 }
 0x21e   : > { %v3152_v4 = vmul.f32 0.5, %v3151_v1  ;;  %v8349_v57 = vadd.f32 %v8077_v35, %v8241_v10  ;;  %4708 = vrsqrt.f32 %v8332_v44  ;;  %vm3146_vm15 = vweird.f32 %v8259_v21  ;;  %v2297_v10 = vpop.xlane.xlu1 %2296  ;;  %vm8374_vm1 = vmor %vm3135_vm13, %vm3136_vm2 }
 0x21f   : > { %v3311_v59 = vmul.f32 %v3128_v9, %v9560_v48  ;;  %v2739_v61 = vsub.f32 %v9561_v49, %v8263_v37  ;;  %4710 = vrsqrt.f32 %v8334_v20  ;;  %v8357_v5 = vadd.f32 %v8077_v35, %v3695_v32  ;;  %vm8386_vm7 = vmor %vm3145_vm14, %vm3146_vm15 }
 0x220   : > { %v3134_v42 = vmul.f32 %v8252_v30, %v3133_v16  ;;  %v3144_v51 = vmul.f32 %v8259_v21, %v3143_v27  ;;  %vm3156_vm5 = vweird.f32 %v8269_v55  ;;  %4712 = vrsqrt.f32 %v8344_v62  ;;  %v8393_v1 = vpop.f32.mrf.mxu0 }
 0x221   : > { %vm3155_vm6 = vweird.f32 %v8224_v63  ;;  %v2740_v36 = vsub.f32 %v9562_v45, %v8267_v14  ;;  %v3893_v50 = vadd.f32 %v8231_v28, %v8103_v43  ;;  %v3894_v34 = vadd.f32 %v3862_v41, %v8198_v60  ;;  %v9569_v41 = vld [vmem:[#allocation33_spill] sm:$0xff] }
 0x222   : > { %v3361_v38 = vmul.f32 %v8084_v54, %v3309_v23  ;;  %v3153_v52 = vsub.f32 1.5, %v3152_v4  ;;  %v3768_v12 = vmul.f32 %v8349_v57, %v8349_v57  ;;  %v3362_v6 = vmul.f32 %v8084_v54, %v3310_v11  ;;  %vm8443_vm8 = vmor %vm3155_vm6, %vm3156_vm5 }
 0x223   : > { %v3363_v28 = vmul.f32 %v8084_v54, %v3311_v59  ;;  %v3769_v13 = vmul.f32 %v8357_v5, %v8357_v5  ;;  %v3925_v8 = vmul.f32 0.7978846, %v3893_v50  ;;  %v3926_v32 = vmul.f32 0.7978846, %v3894_v34  ;;  %v2300_v59 = vpop.xlane.xlu2 %2299 }
 0x224   : > { %v3413_v9 = vadd.f32 %v8114_v0, %v3361_v38  ;;  %v8395_v25 = vpop.eup %4708  ;;  %v3138_v24 = vsel %vm8374_vm1, %v8252_v30, %v3134_v42  ;;  %v3148_v15 = vsel %vm8386_vm7, %v8259_v21, %v3144_v51  ;;  %v3414_v23 = vadd.f32 %v8114_v0, %v3362_v6 }
 0x225   : > { %v3415_v22 = vadd.f32 %v8114_v0, %v3363_v28  ;;  %v8405_v16 = vpop.eup %4710  ;;  %v3160_v27 = vmul.f32 %v8395_v25, %v8332_v44  ;;  %4714 = vtanh.f32 %v3925_v8  ;;  %v8409_v48 = vmul.f32 0.03125, %v2294_v3  ;;  %v2534_v3 = vpop.xlane.xlu0 %2533 }
 0x226   : > { %v3530_v11 = vrot.slane %v3413_v9, 7  ;;  %v8411_v4 = vpop.eup %4712  ;;  %v3800_v30 = vmul.f32 %v3768_v12, %v8349_v57  ;;  %v3170_v21 = vmul.f32 %v8405_v16, %v8334_v20  ;;  %4716 = vtanh.f32 %v3926_v32 }
 0x227   : > { %v3531_v42 = vrot.slane %v3414_v23, 7  ;;  %v3154_v51 = vmul.f32 %v8269_v55, %v3153_v52  ;;  %v3161_v50 = vmul.f32 %v8395_v25, %v3160_v27  ;;  %v3180_v34 = vmul.f32 %v8411_v4, %v8344_v62 }
 0x228   : > { %v3533_v38 = vrot.slane %v3415_v22, 7  ;;  %v9567_v56 = vsub.f32 %v9551_v17, %v8120_v40  ;;  %v9568_v12 = vsub.f32 %v9552_v53, %v8140_v46  ;;  %v2741_v52 = vsub.f32 %v9569_v41, %v8278_v47  ;;  %v2537_v22 = vpop.xlane.xlu1 %2536 }
 0x229   : > { %v3171_v8 = vmul.f32 %v8405_v16, %v3170_v21  ;;  %v3532_v32 = vsel %vm3479_vm11, %v3530_v11, %v3531_v42  ;;  %v2646_v23 = vmul.f32 %v8409_v48, %v8409_v48  ;;  %v8437_v40 = vmul.f32 0.03125, %v2297_v10 }
 0x22a   : > { %v8423_v6 = vmul.f32 %v3138_v24, %v9567_v56  ;;  %v8428_v28 = vmul.f32 %v3148_v15, %v9568_v12  ;;  %v3534_v9 = vsel %vm3479_vm11, %v3531_v42, %v3533_v38  ;;  %v3162_v17 = vmul.f32 0.5, %v3161_v50 }
 0x22b   : > { %v3181_v53 = vmul.f32 %v8411_v4, %v3180_v34  ;;  %v3602_v24 = vpack.c.bf16 %v3534_v9, %v3532_v32  ;;  %v2598_v15 = vmul.f32 0.03125, %v2534_v3  ;;  %v4715_v27 = vpop.eup %4714  ;;  %v3158_v10 = vsel %vm8443_vm8, %v8269_v55, %v3154_v51 }
 0x22c   : > { %v3864_v11 = vmul.f32 0.044715, %v3800_v30  ;;  %v3801_v21 = vmul.f32 %v3769_v13, %v8357_v5  ;;  %v3829_v63 = vmul.f32 0.5, %v8103_v43  ;;  %v4717_v42 = vpop.eup %4716  ;;  %vm3165_vm9 = vweird.f32 %v8332_v44  ;;  %v3700_v13 = vpop.f32.mrf.mxu0 }
 0x22d   : > { %v3172_v38 = vmul.f32 0.5, %v3171_v8  ;;  %v3830_v50 = vmul.f32 0.5, %v8198_v60  ;;  %v3989_v34 = vadd.f32 1.0, %v4715_v27  ;;  %4485 = vmatmul.msk.bf16.gmra.mxu3 %vm2176_vm4, %v3602_v24  ;;  %v2694_v3 = vsub.f32 %v2598_v15, %v2646_v23  ;;  %v2540_v24 = vpop.xlane.xlu2 %2539 }
 0x22e   : > { %v3990_v56 = vadd.f32 1.0, %v4717_v42  ;;  %v2647_v12 = vmul.f32 %v8437_v40, %v8437_v40  ;;  %v8458_v55 = vmul.f32 0.03125, %v2300_v59  ;;  %v2599_v30 = vmul.f32 0.03125, %v2537_v22 }
 0x22f   : > { %v3163_v51 = vsub.f32 1.5, %v3162_v17  ;;  %vm3175_vm10 = vweird.f32 %v8334_v20  ;;  %v3182_v43 = vmul.f32 0.5, %v3181_v53  ;;  %v8461_v32 = vadd.f32 1e-06, %v2694_v3 }
 0x230   : > { %v9572_v60 = vsub.f32 %v9553_v31, %v8142_v18  ;;  %v4021_v9 = vmul.f32 %v3989_v34, %v3829_v63  ;;  %v4022_v23 = vmul.f32 %v3990_v56, %v3830_v50  ;;  %v2695_v46 = vsub.f32 %v2599_v30, %v2647_v12  ;;  %v9573_v18 = vld [vmem:[#allocation57_spill] sm:$0xff]  ;;  %v2306_v56 = vpop.xlane.xlu1 %2305 }
 0x231   : > { %v3173_v15 = vsub.f32 1.5, %v3172_v38  ;;  %v8466_v27 = vmul.f32 0.044715, %v3801_v21  ;;  %v8470_v59 = vadd.f32 %v8077_v35, %v8393_v1  ;;  %4718 = vrsqrt.f32 %v8461_v32  ;;  %v2303_v38 = vpop.xlane.xlu0 %2302 }
 0x232   : > { %v3314_v8 = vmul.f32 %v3158_v10, %v9572_v60  ;;  %vm3166_vm12 = vweird.f32 %v8395_v25  ;;  %vm3185_vm3 = vweird.f32 %v8344_v62  ;;  %v4053_v17 = vpack.c.bf16 %v4022_v23, %v4021_v9 }
 0x233   : > { %v2742_v31 = vsub.f32 %v9573_v18, %v8409_v48  ;;  %v2648_v53 = vmul.f32 %v8458_v55, %v8458_v55  ;;  %v3164_v22 = vmul.f32 %v8395_v25, %v3163_v51  ;;  %v3183_v10 = vsub.f32 1.5, %v3182_v43  ;;  %vm8495_vm14 = vmor %vm3165_vm9, %vm3166_vm12 }
 0x234   : > { %v8480_v21 = vadd.f32 1e-06, %v2695_v46  ;;  %v2600_v1 = vmul.f32 0.03125, %v2540_v24  ;;  %vm3176_vm0 = vweird.f32 %v8405_v16  ;;  %vm3186_vm13 = vweird.f32 %v8411_v4  ;;  %4145 = vmatmul.bf16.vlgmr.msra.gmra.mxu1 %v4053_v17  ;;  %v3702_v24 = vpop.f32.mrf.mxu0 }
 0x235   : > { %v3895_v63 = vadd.f32 %v8342_v33, %v8256_v2  ;;  %v3896_v42 = vadd.f32 %v3864_v11, %v8349_v57  ;;  %v3174_v50 = vmul.f32 %v8405_v16, %v3173_v15  ;;  %v3770_v34 = vmul.f32 %v8470_v59, %v8470_v59  ;;  %vm8516_vm2 = vmor %vm3175_vm10, %vm3176_vm0 }
 0x236   : > { %4720 = vrsqrt.f32 %v8480_v21  ;;  %v2696_v3 = vsub.f32 %v2600_v1, %v2648_v53  ;;  %v3364_v30 = vmul.f32 %v8084_v54, %v8423_v6  ;;  %v3365_v51 = vmul.f32 %v8084_v54, %v8428_v28  ;;  %vm8545_vm15 = vmor %vm3185_vm3, %vm3186_vm13  ;;  %v9580_v1 = vld [vmem:[#allocation35_spill] sm:$0xff] }
 0x237   : > { %v3927_v33 = vmul.f32 0.7978846, %v3895_v63  ;;  %v3928_v11 = vmul.f32 0.7978846, %v3896_v42  ;;  %v8503_v43 = vpop.eup %4718  ;;  %v3168_v60 = vsel %vm8495_vm14, %v8395_v25, %v3164_v22  ;;  %v3184_v44 = vmul.f32 %v8411_v4, %v3183_v10  ;;  %v9581_v42 = vld [vmem:[#allocation22_spill] sm:$0xff] }
 0x238   : > { %v8509_v9 = vadd.f32 1e-06, %v2696_v3  ;;  %v3366_v23 = vmul.f32 %v8084_v54, %v3314_v8  ;;  %v3190_v28 = vmul.f32 %v8503_v43, %v8461_v32  ;;  %v8523_v46 = vadd.f32 %v8077_v35, %v3700_v13 }
 0x239   : > { %4722 = vtanh.f32 %v3927_v33  ;;  %v3416_v25 = vadd.f32 %v8114_v0, %v3364_v30  ;;  %v3178_v8 = vsel %vm8516_vm2, %v8405_v16, %v3174_v50  ;;  %v3802_v20 = vmul.f32 %v3770_v34, %v8470_v59  ;;  %v2543_v6 = vpop.xlane.xlu0 %2542 }
 0x23a   : > { %4724 = vrsqrt.f32 %v8509_v9  ;;  %v3417_v15 = vadd.f32 %v8114_v0, %v3365_v51  ;;  %v3191_v17 = vmul.f32 %v8503_v43, %v3190_v28  ;;  %v3418_v13 = vadd.f32 %v8114_v0, %v3366_v23 }
 0x23b   : > { %4726 = vtanh.f32 %v3928_v11  ;;  %v3535_v53 = vrot.slane %v3416_v25, 7  ;;  %v8539_v10 = vmul.f32 %v3168_v60, %v2739_v61  ;;  %v2743_v63 = vsub.f32 %v9580_v1, %v8437_v40 }
 0x23c   : > { %v8534_v22 = vpop.eup %4720  ;;  %v2744_v50 = vsub.f32 %v9581_v42, %v8458_v55  ;;  %v3536_v34 = vrot.slane %v3417_v15, 7  ;;  %v3188_v37 = vsel %vm8545_vm15, %v8411_v4, %v3184_v44  ;;  %v3771_v62 = vmul.f32 %v8523_v46, %v8523_v46  ;;  %v2309_v3 = vpop.xlane.xlu2 %2308 }
 0x23d   : > { %v3200_v49 = vmul.f32 %v8534_v22, %v8480_v21  ;;  %v3538_v61 = vrot.slane %v3418_v13, 7  ;;  %v8563_v12 = vmul.f32 %v3178_v8, %v2740_v36  ;;  %v8565_v33 = vmul.f32 0.044715, %v3802_v20 }
 0x23e   : > { %v8567_v11 = vmul.f32 0.03125, %v2303_v38  ;;  %v8569_v30 = vmul.f32 0.03125, %v2306_v56  ;;  %v3192_v51 = vmul.f32 0.5, %v3191_v17  ;;  %v3537_v44 = vsel %vm3479_vm11, %v3535_v53, %v3536_v34  ;;  %v2546_v56 = vpop.xlane.xlu1 %2545 }
 0x23f   : > { %v4723_v4 = vpop.eup %4722  ;;  %v3201_v60 = vmul.f32 %v8534_v22, %v3200_v49  ;;  %v3539_v23 = vsel %vm3479_vm11, %v3536_v34, %v3538_v61  ;;  %v8579_v14 = vmul.f32 %v3188_v37, %v2741_v52  ;;  %v3831_v45 = vmul.f32 0.5, %v8256_v2  ;;  %v3705_v37 = vpop.f32.mrf.mxu0 }
 0x240   : > { %v8574_v28 = vpop.eup %4724  ;;  %v3991_v36 = vadd.f32 1.0, %v4723_v4  ;;  %v3603_v38 = vpack.c.bf16 %v3539_v23, %v3537_v44  ;;  %vm3195_vm5 = vweird.f32 %v8461_v32  ;;  %v3803_v20 = vmul.f32 %v3771_v62, %v8523_v46 }
 0x241   : > { %v4727_v25 = vpop.eup %4726  ;;  %v3210_v8 = vmul.f32 %v8574_v28, %v8509_v9  ;;  %v3832_v15 = vmul.f32 0.5, %v8349_v57  ;;  %v8587_v17 = vmul.f32 0.03125, %v2309_v3  ;;  %v3202_v47 = vmul.f32 0.5, %v3201_v60 }
 0x242   : > { %v3992_v41 = vadd.f32 1.0, %v4727_v25  ;;  %4486 = vmatmul.msk.bf16.gmra.mxu3 %vm2176_vm4, %v3603_v38  ;;  %v2649_v2 = vmul.f32 %v8567_v11, %v8567_v11  ;;  %v2601_v52 = vmul.f32 0.03125, %v2543_v6  ;;  %v3193_v13 = vsub.f32 1.5, %v3192_v51 }
 0x243   : > { %v2650_v53 = vmul.f32 %v8569_v30, %v8569_v30  ;;  %v8595_v16 = vadd.f32 %v8077_v35, %v3702_v24  ;;  %v2602_v34 = vmul.f32 0.03125, %v2546_v56  ;;  %v3211_v57 = vmul.f32 %v8574_v28, %v3210_v8 }
 0x244   : > { %v4023_v49 = vmul.f32 %v3991_v36, %v3831_v45  ;;  %v4024_v62 = vmul.f32 %v3992_v41, %v3832_v15  ;;  %v2697_v61 = vsub.f32 %v2601_v52, %v2649_v2  ;;  %vm3196_vm6 = vweird.f32 %v8503_v43  ;;  %v2549_v51 = vpop.xlane.xlu2 %2548 }
 0x245   : > { %vm3205_vm1 = vweird.f32 %v8480_v21  ;;  %v2651_v3 = vmul.f32 %v8587_v17, %v8587_v17  ;;  %v2698_v4 = vsub.f32 %v2602_v34, %v2650_v53  ;;  %v3203_v60 = vsub.f32 1.5, %v3202_v47  ;;  %v2312_v47 = vpop.xlane.xlu0 %2311  ;;  %vm8625_vm8 = vmor %vm3195_vm5, %vm3196_vm6 }
 0x246   : > { %v4054_v44 = vpack.c.bf16 %v4024_v62, %v4023_v49  ;;  %v8602_v24 = vadd.f32 1e-06, %v2697_v61  ;;  %v2603_v23 = vmul.f32 0.03125, %v2549_v51  ;;  %v3194_v6 = vmul.f32 %v8503_v43, %v3193_v13 }
 0x247   : > { %v8605_v38 = vmul.f32 0.044715, %v3803_v20  ;;  %v3772_v45 = vmul.f32 %v8595_v16, %v8595_v16  ;;  %v8609_v36 = vadd.f32 1e-06, %v2698_v4  ;;  %v3212_v56 = vmul.f32 0.5, %v3211_v57  ;;  %v3707_v4 = vpop.f32.mrf.mxu0 }
 0x248   : > { %4150 = vmatmul.bf16.gmra.mxu1 %v4054_v44  ;;  %4728 = vrsqrt.f32 %v8602_v24  ;;  %v2699_v25 = vsub.f32 %v2603_v23, %v2651_v3  ;;  %v8613_v8 = vadd.f32 %v8077_v35, %v3705_v37  ;;  %vm3206_vm7 = vweird.f32 %v8534_v22 }
 0x249   : > { %v2745_v15 = vsub.f32 %v7542_v19, %v8567_v11  ;;  %v2746_v20 = vsub.f32 %v7603_v26, %v8569_v30  ;;  %4730 = vrsqrt.f32 %v8609_v36  ;;  %v3204_v2 = vmul.f32 %v8534_v22, %v3203_v60  ;;  %vm8652_vm10 = vmor %vm3205_vm1, %vm3206_vm7 }
 0x24a   : > { %vm3215_vm9 = vweird.f32 %v8509_v9  ;;  %v2747_v52 = vsub.f32 %v7700_v58, %v8587_v17  ;;  %v8633_v13 = vadd.f32 1e-06, %v2699_v25  ;;  %v3897_v53 = vadd.f32 %v8466_v27, %v8357_v5 }
 0x24b   : > { %v3198_v32 = vsel %vm8625_vm8, %v8503_v43, %v3194_v6  ;;  %v3804_v34 = vmul.f32 %v3772_v45, %v8595_v16  ;;  %v3898_v37 = vadd.f32 %v8565_v33, %v8470_v59  ;;  %v3367_v57 = vmul.f32 %v8084_v54, %v8539_v10 }
 0x24c   : > { %v3213_v49 = vsub.f32 1.5, %v3212_v56  ;;  %4732 = vrsqrt.f32 %v8633_v13  ;;  %v3773_v62 = vmul.f32 %v8613_v8, %v8613_v8  ;;  %v3929_v61 = vmul.f32 0.7978846, %v3897_v53 }
 0x24d   : > { %v3930_v43 = vmul.f32 0.7978846, %v3898_v37  ;;  %v3368_v33 = vmul.f32 %v8084_v54, %v8563_v12  ;;  %v3369_v10 = vmul.f32 %v8084_v54, %v8579_v14  ;;  %v3419_v3 = vadd.f32 %v8114_v0, %v3367_v57 }
 0x24e   : > { %v8661_v51 = vpop.eup %4728  ;;  %v8666_v21 = vmul.f32 %v3198_v32, %v2742_v31  ;;  %v3208_v60 = vsel %vm8652_vm10, %v8534_v22, %v3204_v2  ;;  %vm3216_vm12 = vweird.f32 %v8574_v28  ;;  %4734 = vtanh.f32 %v3929_v61 }
 0x24f   : > { %v8672_v12 = vpop.eup %4730  ;;  %v8674_v14 = vmul.f32 0.044715, %v3804_v34  ;;  %v3220_v44 = vmul.f32 %v8661_v51, %v8602_v24  ;;  %4736 = vtanh.f32 %v3930_v43  ;;  %v3420_v23 = vadd.f32 %v8114_v0, %v3368_v33  ;;  %v2315_v48 = vpop.xlane.xlu1 %2314  ;;  %vm8702_vm3 = vmor %vm3215_vm9, %vm3216_vm12 }
 0x250   : > { %v3214_v18 = vmul.f32 %v8574_v28, %v3213_v49  ;;  %v3230_v31 = vmul.f32 %v8672_v12, %v8609_v36  ;;  %v3421_v22 = vadd.f32 %v8114_v0, %v3369_v10  ;;  %v3540_v6 = vrot.slane %v3419_v3, 7  ;;  %v2552_v49 = vpop.xlane.xlu0 %2551 }
 0x251   : > { %v8686_v45 = vmul.f32 %v3208_v60, %v2743_v63  ;;  %v3221_v56 = vmul.f32 %v8661_v51, %v3220_v44  ;;  %v3805_v25 = vmul.f32 %v3773_v62, %v8613_v8  ;;  %v3541_v41 = vrot.slane %v3420_v23, 7 }
 0x252   : > { %v8690_v2 = vpop.eup %4732  ;;  %v3231_v53 = vmul.f32 %v8672_v12, %v3230_v31  ;;  %v3543_v32 = vrot.slane %v3421_v22, 7  ;;  %v8693_v34 = vmul.f32 0.03125, %v2312_v47  ;;  %v8696_v37 = vadd.f32 %v8077_v35, %v3707_v4 }
 0x253   : > { %v3222_v1 = vmul.f32 0.5, %v3221_v56  ;;  %v3240_v63 = vmul.f32 %v8690_v2, %v8633_v13  ;;  %v3833_v57 = vmul.f32 0.5, %v8357_v5  ;;  %v3834_v47 = vmul.f32 0.5, %v8470_v59  ;;  %v3710_v22 = vpop.f32.mrf.mxu0 }
 0x254   : > { %v4735_v62 = vpop.eup %4734  ;;  %v3218_v61 = vsel %vm8702_vm3, %v8574_v28, %v3214_v18  ;;  %v3232_v27 = vmul.f32 0.5, %v3231_v53  ;;  %v3542_v9 = vsel %vm3479_vm11, %v3540_v6, %v3541_v41  ;;  %v3544_v43 = vsel %vm3479_vm11, %v3541_v41, %v3543_v32 }
 0x255   : > { %v4737_v33 = vpop.eup %4736  ;;  %v3241_v10 = vmul.f32 %v8690_v2, %v3240_v63  ;;  %v3993_v3 = vadd.f32 1.0, %v4735_v62  ;;  %v3604_v4 = vpack.c.bf16 %v3544_v43, %v3542_v9  ;;  %v8716_v60 = vmul.f32 0.03125, %v2315_v48 }
 0x256   : > { %v3994_v5 = vadd.f32 1.0, %v4737_v33  ;;  %v2652_v59 = vmul.f32 %v8693_v34, %v8693_v34  ;;  %v3774_v44 = vmul.f32 %v8696_v37, %v8696_v37  ;;  %v2604_v28 = vmul.f32 0.03125, %v2552_v49 }
 0x257   : > { %v3223_v23 = vsub.f32 1.5, %v3222_v1  ;;  %vm3225_vm0 = vweird.f32 %v8602_v24  ;;  %v3233_v18 = vsub.f32 1.5, %v3232_v27  ;;  %vm3235_vm13 = vweird.f32 %v8609_v36  ;;  %4487 = vmatmul.msk.bf16.gmra.mxu3 %vm2176_vm4, %v3604_v4  ;;  %v2555_v31 = vpop.xlane.xlu1 %2554 }
 0x258   : > { %v3242_v48 = vmul.f32 0.5, %v3241_v10  ;;  %v4025_v6 = vmul.f32 %v3993_v3, %v3833_v57  ;;  %v4026_v56 = vmul.f32 %v3994_v5, %v3834_v47  ;;  %v2700_v41 = vsub.f32 %v2604_v28, %v2652_v59 }
 0x259   : > { %v3320_v53 = vmul.f32 %v3218_v61, %v2744_v50  ;;  %v3869_v32 = vmul.f32 0.044715, %v3805_v25  ;;  %v2653_v40 = vmul.f32 %v8716_v60, %v8716_v60  ;;  %v2605_v1 = vmul.f32 0.03125, %v2555_v31 }
 0x25a   : > { %vm3226_vm14 = vweird.f32 %v8661_v51  ;;  %vm3245_vm2 = vweird.f32 %v8633_v13  ;;  %v4055_v63 = vpack.c.bf16 %v4026_v56, %v4025_v6  ;;  %v3806_v49 = vmul.f32 %v3774_v44, %v8696_v37 }
 0x25b   : > { %v8733_v62 = vadd.f32 1e-06, %v2700_v41  ;;  %v3224_v57 = vmul.f32 %v8661_v51, %v3223_v23  ;;  %v3234_v47 = vmul.f32 %v8672_v12, %v3233_v18  ;;  %vm3236_vm15 = vweird.f32 %v8672_v12  ;;  %vm8747_vm5 = vmor %vm3225_vm0, %vm3226_vm14  ;;  %v3712_v36 = vpop.f32.mrf.mxu0 }
 0x25c   : > { %v2701_v55 = vsub.f32 %v2605_v1, %v2653_v40  ;;  %v3243_v42 = vsub.f32 1.5, %v3242_v48  ;;  %4155 = vmatmul.bf16.gmra.mxu1 %v4055_v63  ;;  %v3899_v25 = vadd.f32 %v8605_v38, %v8523_v46  ;;  %v3900_v61 = vadd.f32 %v8674_v14, %v8595_v16  ;;  %vm8758_vm1 = vmor %vm3235_vm13, %vm3236_vm15 }
 0x25d   : > { %4738 = vrsqrt.f32 %v8733_v62  ;;  %vm3246_vm6 = vweird.f32 %v8690_v2  ;;  %v3835_v43 = vmul.f32 0.5, %v8523_v46  ;;  %v3836_v33 = vmul.f32 0.5, %v8595_v16 }
 0x25e   : > { %v2318_v50 = vpop.xlane.xlu2 %2317  ;;  %v8752_v9 = vadd.f32 1e-06, %v2701_v55  ;;  %v3870_v14 = vmul.f32 0.044715, %v3806_v49  ;;  %v3931_v24 = vmul.f32 0.7978846, %v3899_v25  ;;  %v3370_v3 = vmul.f32 %v8084_v54, %v8666_v21  ;;  %vm8799_vm7 = vmor %vm3245_vm2, %vm3246_vm6 }
 0x25f   : > { %v3932_v10 = vmul.f32 0.7978846, %v3900_v61  ;;  %v3228_v4 = vsel %vm8747_vm5, %v8661_v51, %v3224_v57  ;;  %v3238_v46 = vsel %vm8758_vm1, %v8672_v12, %v3234_v47  ;;  %v8772_v16 = vadd.f32 %v8077_v35, %v3710_v22 }
 0x260   : > { %4740 = vrsqrt.f32 %v8752_v9  ;;  %v3244_v5 = vmul.f32 %v8690_v2, %v3243_v42  ;;  %v3371_v21 = vmul.f32 %v8084_v54, %v8686_v45  ;;  %v3372_v59 = vmul.f32 %v8084_v54, %v3320_v53 }
 0x261   : > { %4742 = vtanh.f32 %v3931_v24  ;;  %v8778_v44 = vmul.f32 0.03125, %v2318_v50  ;;  %v3422_v51 = vadd.f32 %v8114_v0, %v3370_v3  ;;  %v8782_v12 = vadd.f32 %v8077_v35, %v3712_v36 }
 0x262   : > { %4744 = vtanh.f32 %v3932_v10  ;;  %v3321_v23 = vmul.f32 %v3228_v4, %v2745_v15  ;;  %v3423_v18 = vadd.f32 %v8114_v0, %v3371_v21  ;;  %v3424_v45 = vadd.f32 %v8114_v0, %v3372_v59  ;;  %v8833_v10 = vld [vmem:[%s9137_s5] ss:$0 sm:$0xff] }
 0x263   : > { %v8784_v28 = vpop.eup %4738  ;;  %v3901_v54 = vadd.f32 %v3869_v32, %v8613_v8  ;;  %v3322_v31 = vmul.f32 %v3238_v46, %v2746_v20  ;;  %v3775_v0 = vmul.f32 %v8772_v16, %v8772_v16  ;;  %v3545_v11 = vrot.slane %v3422_v51, 7 }
 0x264   : > { %v3250_v19 = vmul.f32 %v8784_v28, %v8733_v62  ;;  %v3248_v26 = vsel %vm8799_vm7, %v8690_v2, %v3244_v5  ;;  %v3546_v15 = vrot.slane %v3423_v18, 7  ;;  %v3548_v20 = vrot.slane %v3424_v45, 7  ;;  %v3715_v42 = vpop.f32.mrf.mxu0 }
 0x265   : > { %v3776_v13 = vmul.f32 %v8782_v12, %v8782_v12  ;;  %v2654_v48 = vmul.f32 %v8778_v44, %v8778_v44  ;;  %v3902_v41 = vadd.f32 %v3870_v14, %v8696_v37  ;;  %v3933_v1 = vmul.f32 0.7978846, %v3901_v54 }
 0x266   : > { %v2558_v30 = vpop.xlane.xlu2 %2557  ;;  %v8812_v22 = vpop.eup %4740  ;;  %v3251_v6 = vmul.f32 %v8784_v28, %v3250_v19  ;;  %v3547_v32 = vsel %vm3479_vm11, %v3545_v11, %v3546_v15  ;;  %v3549_v40 = vsel %vm3479_vm11, %v3546_v15, %v3548_v20  ;;  %v3323_v50 = vmul.f32 %v3248_v26, %v2747_v52  ;;  %v8863_v26 = vld [vmem:[%s9539_s16] ss:$0 sm:$0xff] }
 0x267   : > { %v2606_v56 = vmul.f32 0.03125, %v2558_v30  ;;  %v4743_v53 = vpop.eup %4742  ;;  %v3260_v2 = vmul.f32 %v8812_v22, %v8752_v9  ;;  %v3605_v55 = vpack.c.bf16 %v3549_v40, %v3547_v32  ;;  %v3808_v27 = vmul.f32 %v3776_v13, %v8782_v12 }
 0x268   : > { %v4745_v63 = vpop.eup %4744  ;;  %v3252_v49 = vmul.f32 0.5, %v3251_v6  ;;  %v3995_v47 = vadd.f32 1.0, %v4743_v53  ;;  %v3934_v24 = vmul.f32 0.7978846, %v3902_v41  ;;  %v3373_v3 = vmul.f32 %v8833_v10, %v3321_v23 }
 0x269   : > { %v2702_v57 = vsub.f32 %v2606_v56, %v2654_v48  ;;  %v3261_v25 = vmul.f32 %v8812_v22, %v3260_v2  ;;  %v3996_v61 = vadd.f32 1.0, %v4745_v63  ;;  %4488 = vmatmul.msk.bf16.gmra.mxu3 %vm2176_vm4, %v3605_v55  ;;  %4746 = vtanh.f32 %v3933_v1 }
 0x26a   : > { %v3253_v38 = vsub.f32 1.5, %v3252_v49  ;;  %v4027_v17 = vmul.f32 %v3995_v47, %v3835_v43  ;;  %v3807_v4 = vmul.f32 %v3775_v0, %v8772_v16  ;;  %v3374_v46 = vmul.f32 %v8833_v10, %v3322_v31  ;;  %v8844_v43 = vld [vmem:[%s9138_s6] ss:$0 sm:$0xff] }
 0x26b   : > { %v8827_v14 = vadd.f32 1e-06, %v2702_v57  ;;  %v3262_v58 = vmul.f32 0.5, %v3261_v25  ;;  %v4028_v52 = vmul.f32 %v3996_v61, %v3836_v33  ;;  %vm3256_vm8 = vweird.f32 %v8784_v28 }
 0x26c   : > { %v3872_v21 = vmul.f32 0.044715, %v3808_v27  ;;  %v3375_v59 = vmul.f32 %v8833_v10, %v3323_v50  ;;  %v3425_v33 = vadd.f32 %v8844_v43, %v3373_v3  ;;  %v3426_v51 = vadd.f32 %v8844_v43, %v3374_v46  ;;  %v3717_v31 = vpop.f32.mrf.mxu0 }
 0x26d   : > { %4748 = vrsqrt.f32 %v8827_v14  ;;  %v3263_v36 = vsub.f32 1.5, %v3262_v58  ;;  %v4056_v5 = vpack.c.bf16 %v4028_v52, %v4027_v17  ;;  %v3254_v23 = vmul.f32 %v8784_v28, %v3253_v38 }
 0x26e   : > { %4750 = vtanh.f32 %v3934_v24  ;;  %vm3266_vm9 = vweird.f32 %v8812_v22  ;;  %vm3255_vm10 = vweird.f32 %v8733_v62  ;;  %v3871_v45 = vmul.f32 0.044715, %v3807_v4 }
 0x26f   : > { %v3264_v18 = vmul.f32 %v8812_v22, %v3263_v36  ;;  %4160 = vmatmul.bf16.gmra.mxu1 %v4056_v5  ;;  %v3427_v54 = vadd.f32 %v8844_v43, %v3375_v59  ;;  %v4747_v35 = vpop.eup %4746  ;;  %vm8855_vm12 = vmor %vm3255_vm10, %vm3256_vm8  ;;  %vm3265_vm3 = vweird.f32 %v8752_v9  ;;  %v3550_v0 = vrot.slane %v3425_v33, 7 }
 0x270   : > { %v3551_v11 = vrot.slane %v3426_v51, 7  ;;  %v8866_v62 = vadd.f32 %v8863_v26, %v3717_v31  ;;  %v2748_v15 = vsub.f32 %v7793_v39, %v8693_v34  ;;  %v2749_v20 = vsub.f32 %v7850_v7, %v8716_v60  ;;  %vm8874_vm0 = vmor %vm3265_vm3, %vm3266_vm9 }
 0x271   : > { %v3553_v13 = vrot.slane %v3427_v54, 7  ;;  %v3904_v48 = vadd.f32 %v3872_v21, %v8782_v12  ;;  %v3258_v56 = vsel %vm8855_vm12, %v8784_v28, %v3254_v23  ;;  %v3268_v39 = vsel %vm8874_vm0, %v8812_v22, %v3264_v18 }
 0x272   : > { %v3838_v34 = vmul.f32 0.5, %v8696_v37  ;;  %v8888_v60 = vadd.f32 %v8863_v26, %v3715_v42  ;;  %v3903_v2 = vadd.f32 %v3871_v45, %v8772_v16  ;;  %v3997_v40 = vadd.f32 1.0, %v4747_v35 }
 0x273   : > { %v4749_v30 = vpop.eup %4748  ;;  %v3554_v53 = vsel %vm3479_vm11, %v3551_v11, %v3553_v13  ;;  %v3552_v28 = vsel %vm3479_vm11, %v3550_v0, %v3551_v11  ;;  %v3778_v1 = vmul.f32 %v8866_v62, %v8866_v62  ;;  %v3324_v22 = vmul.f32 %v3258_v56, %v2748_v15 }
 0x274   : > { %v4751_v6 = vpop.eup %4750  ;;  %v3270_v7 = vmul.f32 %v4749_v30, %v8827_v14  ;;  %v3325_v63 = vmul.f32 %v3268_v39, %v2749_v20  ;;  %v3606_v49 = vpack.c.bf16 %v3554_v53, %v3552_v28  ;;  %v3936_v57 = vmul.f32 0.7978846, %v3904_v48 }
 0x275   : > { %v3998_v41 = vadd.f32 1.0, %v4751_v6  ;;  %v3837_v47 = vmul.f32 0.5, %v8613_v8  ;;  %v3777_v42 = vmul.f32 %v8888_v60, %v8888_v60  ;;  %v3720_v50 = vpop.f32.mrf.mxu0  ;;  %v3935_v25 = vmul.f32 0.7978846, %v3903_v2 }
 0x276   : > { %v3271_v32 = vmul.f32 %v4749_v30, %v3270_v7  ;;  %vm3276_vm13 = vweird.f32 %v4749_v30  ;;  %v3810_v38 = vmul.f32 %v3778_v1, %v8866_v62  ;;  %4752 = vtanh.f32 %v3936_v57 }
 0x277   : > { %v4030_v55 = vmul.f32 %v3998_v41, %v3838_v34  ;;  %v4029_v27 = vmul.f32 %v3997_v40, %v3837_v47  ;;  %v3376_v24 = vmul.f32 %v8833_v10, %v3324_v22  ;;  %v3377_v3 = vmul.f32 %v8833_v10, %v3325_v63 }
 0x278   : > { %v3272_v37 = vmul.f32 0.5, %v3271_v32  ;;  %vm3275_vm14 = vweird.f32 %v8827_v14  ;;  %v2750_v17 = vsub.f32 %v7942_v29, %v8778_v44  ;;  %v3809_v52 = vmul.f32 %v3777_v42, %v8888_v60 }
 0x279   : > { %4489 = vmatmul.msk.bf16.gmra.mxu3 %vm2176_vm4, %v3606_v49  ;;  %v4057_v8 = vpack.c.bf16 %v4030_v55, %v4029_v27  ;;  %vm3277_vm2 = vmor %vm3275_vm14, %vm3276_vm13  ;;  %4754 = vtanh.f32 %v3935_v25  ;;  %v3874_v46 = vmul.f32 0.044715, %v3810_v38  ;;  %v3428_v5 = vadd.f32 %v8844_v43, %v3376_v24 }
 0x27a   : > { %v3273_v61 = vsub.f32 1.5, %v3272_v37  ;;  %v3429_v21 = vadd.f32 %v8844_v43, %v3377_v3  ;;  %v3873_v33 = vmul.f32 0.044715, %v3809_v52  ;;  %v8915_v35 = vadd.f32 %v8863_v26, %v3720_v50 }
 0x27b   : > { %v3906_v23 = vadd.f32 %v3874_v46, %v8866_v62  ;;  %v3555_v18 = vrot.slane %v3428_v5, 7  ;;  %v3839_v9 = vmul.f32 0.5, %v8772_v16  ;;  %v3842_v50 = vmul.f32 0.5, %v8866_v62 }
 0x27c   : > { %v3274_v58 = vmul.f32 %v4749_v30, %v3273_v61  ;;  %v4753_v59 = vpop.eup %4752  ;;  %v3556_v45 = vrot.slane %v3429_v21, 7  ;;  %v3905_v0 = vadd.f32 %v3873_v33, %v8888_v60  ;;  %v3779_v6 = vmul.f32 %v8915_v35, %v8915_v35 }
 0x27d   : > { %v3722_v51 = vpop.f32.mrf.mxu0  ;;  %v4000_v31 = vadd.f32 1.0, %v4753_v59  ;;  %v3938_v20 = vmul.f32 0.7978846, %v3906_v23  ;;  %v3841_v24 = vmul.f32 0.5, %v8888_v60 }
 0x27e   : > { %v3278_v4 = vsel %vm3277_vm2, %v4749_v30, %v3274_v58  ;;  %v8912_v54 = vadd.f32 %v8863_v26, %v3722_v51  ;;  %v3557_v30 = vsel %vm3479_vm11, %v3555_v18, %v3556_v45  ;;  %v3937_v39 = vmul.f32 0.7978846, %v3905_v0 }
 0x27f   : > { %v3326_v36 = vmul.f32 %v3278_v4, %v2750_v17  ;;  %4165 = vmatmul.bf16.gmra.mxu1 %v4057_v8  ;;  %v4755_v29 = vpop.eup %4754  ;;  %4756 = vtanh.f32 %v3938_v20  ;;  %v3811_v2 = vmul.f32 %v3779_v6, %v8915_v35 }
 0x280   : > { %v3999_v11 = vadd.f32 1.0, %v4755_v29  ;;  %4758 = vtanh.f32 %v3937_v39 }
 0x281   : > { %v3378_v14 = vmul.f32 %v8833_v10, %v3326_v36  ;;  %v3840_v10 = vmul.f32 0.5, %v8782_v12  ;;  %v3875_v1 = vmul.f32 0.044715, %v3811_v2 }
 0x282   : > { %v4031_v7 = vmul.f32 %v3999_v11, %v3839_v9  ;;  %v3843_v11 = vmul.f32 0.5, %v8915_v35 }
 0x283   : > { %v3430_v44 = vadd.f32 %v8844_v43, %v3378_v14  ;;  %v3780_v43 = vmul.f32 %v8912_v54, %v8912_v54  ;;  %v4032_v13 = vmul.f32 %v4000_v31, %v3840_v10  ;;  %v3907_v42 = vadd.f32 %v3875_v1, %v8915_v35 }
 0x285   : > { %v3558_v19 = vrot.slane %v3430_v44, 7  ;;  %v3812_v34 = vmul.f32 %v3780_v43, %v8912_v54  ;;  %v4058_v41 = vpack.c.bf16 %v4032_v13, %v4031_v7  ;;  %v4757_v28 = vpop.eup %4756  ;;  %v3939_v8 = vmul.f32 0.7978846, %v3907_v42 }
 0x286   : > { %v3725_v56 = vpop.f32.mrf.mxu0  ;;  %v4759_v57 = vpop.eup %4758  ;;  %v4002_v47 = vadd.f32 1.0, %v4757_v28 }
 0x287   : > { %v3559_v15 = vsel %vm3479_vm11, %v3556_v45, %v3558_v19  ;;  %v3726_v12 = vadd.f32 %v8863_v26, %v3725_v56  ;;  %v3876_v32 = vmul.f32 0.044715, %v3812_v34  ;;  %v4001_v25 = vadd.f32 1.0, %v4759_v57 }
 0x288   : > { %v3607_v48 = vpack.c.bf16 %v3559_v15, %v3557_v30  ;;  %v4034_v3 = vmul.f32 %v4002_v47, %v3842_v50  ;;  %v3844_v45 = vmul.f32 0.5, %v8912_v54 }
 0x289   : > { %v3781_v53 = vmul.f32 %v3726_v12, %v3726_v12  ;;  %v3908_v37 = vadd.f32 %v3876_v32, %v8912_v54  ;;  %v4033_v17 = vmul.f32 %v4001_v25, %v3841_v24  ;;  %v3845_v29 = vmul.f32 0.5, %v3726_v12  ;;  %v8942_v54 = vld [vmem:[%s9598_s9] ss:$0 sm:$0xff] }
 0x28a   : > { %4490 = vmatmul.msk.bf16.gmra.mxu3 %vm2176_vm4, %v3607_v48 }
 0x28b   : > { %v3813_v16 = vmul.f32 %v3781_v53, %v3726_v12  ;;  %v3940_v38 = vmul.f32 0.7978846, %v3908_v37  ;;  %v4059_v4 = vpack.c.bf16 %v4034_v3, %v4033_v17 }
 0x28d   : > { %v3877_v40 = vmul.f32 0.044715, %v3813_v16 }
 0x28e   : > { %v3727_v22 = vpop.f32.mrf.mxu0 }
 0x28f   : > { %4170 = vmatmul.bf16.gmra.mxu1 %v4058_v41  ;;  %v3728_v63 = vadd.f32 %v8863_v26, %v3727_v22  ;;  %v3909_v49 = vadd.f32 %v3877_v40, %v3726_v12  ;;  %v8947_v12 = vld [vmem:[%s9599_s26] ss:$0 sm:$0xff] }
 0x291   : > { %v3782_v55 = vmul.f32 %v3728_v63, %v3728_v63  ;;  %v3941_v27 = vmul.f32 0.7978846, %v3909_v49  ;;  %v3846_v44 = vmul.f32 0.5, %v3728_v63 }
 0x293   : > { %v3814_v61 = vmul.f32 %v3782_v55, %v3728_v63  ;;  %4760 = vtanh.f32 %v3941_v27 }
 0x294   : > { %4762 = vtanh.f32 %v3940_v38 }
 0x295   : > { %v3878_v58 = vmul.f32 0.044715, %v3814_v61  ;;  %4764 = vtanh.f32 %v3939_v8 }
 0x297   : > { %v3910_v52 = vadd.f32 %v3878_v58, %v3728_v63 }
 0x299   : > { %v3942_v46 = vmul.f32 0.7978846, %v3910_v52  ;;  %v4761_v36 = vpop.eup %4760 }
 0x29a   : > { %v4763_v5 = vpop.eup %4762  ;;  %v4005_v60 = vadd.f32 1.0, %v4761_v36 }
 0x29b   : > { %4766 = vtanh.f32 %v3942_v46  ;;  %v4765_v59 = vpop.eup %4764  ;;  %v4004_v51 = vadd.f32 1.0, %v4763_v5 }
 0x29c   : > { %v3730_v62 = vpop.f32.mrf.mxu3  ;;  %v4003_v31 = vadd.f32 1.0, %v4765_v59  ;;  %v4037_v0 = vmul.f32 %v4005_v60, %v3845_v29 }
 0x29d   : > { %v3731_v21 = vadd.f32 %v8863_v26, %v3730_v62  ;;  %v4036_v30 = vmul.f32 %v4004_v51, %v3844_v45 }
 0x29e   : > { %v4035_v13 = vmul.f32 %v4003_v31, %v3843_v11 }
 0x29f   : > { %4175 = vmatmul.bf16.gmra.mxu1 %v4059_v4  ;;  %v3783_v33 = vmul.f32 %v3731_v21, %v3731_v21  ;;  %v3847_v37 = vmul.f32 0.5, %v3731_v21 }
 0x2a0   : > { %v4060_v6 = vpack.c.bf16 %v4036_v30, %v4035_v13 }
 0x2a1   : > { %v4767_v14 = vpop.eup %4766  ;;  %v3815_v23 = vmul.f32 %v3783_v33, %v3731_v21 }
 0x2a2   : > { %v4006_v18 = vadd.f32 1.0, %v4767_v14 }
 0x2a3   : > { %v3879_v19 = vmul.f32 0.044715, %v3815_v23 }
 0x2a4   : > { %v4038_v10 = vmul.f32 %v4006_v18, %v3846_v44  ;;  %v3732_v15 = vpop.f32.mrf.mxu3 }
 0x2a5   : > { %v3733_v43 = vadd.f32 %v8863_v26, %v3732_v15  ;;  %v3911_v9 = vadd.f32 %v3879_v19, %v3731_v21 }
 0x2a6   : > { %v4061_v20 = vpack.c.bf16 %v4038_v10, %v4037_v0 }
 0x2a7   : > { %v3784_v48 = vmul.f32 %v3733_v43, %v3733_v43  ;;  %v3943_v39 = vmul.f32 0.7978846, %v3911_v9  ;;  %v3848_v42 = vmul.f32 0.5, %v3733_v43 }
 0x2a8   : > { %4185 = vmatmul.bf16.vlgmr.msra.gmra.mxu2 %v4061_v20 }
 0x2a9   : > { %v3816_v56 = vmul.f32 %v3784_v48, %v3733_v43  ;;  %4768 = vtanh.f32 %v3943_v39 }
 0x2ab   : > { %v3880_v7 = vmul.f32 0.044715, %v3816_v56 }
 0x2ad   : > { %v3912_v35 = vadd.f32 %v3880_v7, %v3733_v43 }
 0x2af   : > { %4180 = vmatmul.bf16.gmra.mxu1 %v4060_v6  ;;  %v3944_v41 = vmul.f32 0.7978846, %v3912_v35  ;;  %v4769_v40 = vpop.eup %4768 }
 0x2b0   : > { %v3735_v34 = vpop.f32.mrf.mxu3  ;;  %v4007_v63 = vadd.f32 1.0, %v4769_v40 }
 0x2b1   : > { %v4146_v53 = vpop.f32.mrf.mxu1  ;;  %v3736_v2 = vadd.f32 %v8863_v26, %v3735_v34  ;;  %4770 = vtanh.f32 %v3944_v41 }
 0x2b2   : > { %v4147_v16 = vadd.f32 %v8942_v54, %v4146_v53  ;;  %v4039_v38 = vmul.f32 %v4007_v63, %v3847_v37 }
 0x2b3   : > { %v3785_v32 = vmul.f32 %v3736_v2, %v3736_v2  ;;  %v3849_v45 = vmul.f32 0.5, %v3736_v2 }
 0x2b4   : > { %v4230_v28 = vmul.f32 %v8947_v12, %v4147_v16 }
 0x2b5   : > { %v3817_v1 = vmul.f32 %v3785_v32, %v3736_v2 }
 0x2b6   : > { %4262 = vst.msk [vmem:[%s8954_s19] sm:$0xff] %vm2176_vm4, %v4230_v28 }
 0x2b7   : > { %v3881_v22 = vmul.f32 0.044715, %v3817_v1  ;;  %v4771_v49 = vpop.eup %4770 }
 0x2b8   : > { %v3737_v57 = vpop.f32.mrf.mxu3  ;;  %v4008_v50 = vadd.f32 1.0, %v4771_v49 }
 0x2b9   : > { %v4148_v47 = vpop.f32.mrf.mxu1  ;;  %v3738_v55 = vadd.f32 %v8863_v26, %v3737_v57  ;;  %v3913_v25 = vadd.f32 %v3881_v22, %v3736_v2 }
 0x2ba   : > { %v4149_v61 = vadd.f32 %v8942_v54, %v4148_v47  ;;  %v4040_v24 = vmul.f32 %v4008_v50, %v3848_v42 }
 0x2bb   : > { %v3786_v27 = vmul.f32 %v3738_v55, %v3738_v55  ;;  %v3945_v17 = vmul.f32 0.7978846, %v3913_v25  ;;  %v3850_v31 = vmul.f32 0.5, %v3738_v55 }
 0x2bc   : > { %v4231_v3 = vmul.f32 %v8947_v12, %v4149_v61  ;;  %v4062_v8 = vpack.c.bf16 %v4040_v24, %v4039_v38 }
 0x2bd   : > { %v3818_v58 = vmul.f32 %v3786_v27, %v3738_v55  ;;  %4772 = vtanh.f32 %v3945_v17 }
 0x2be   : > { %4263 = vst.msk [vmem:[%s8954_s19 + $0x8] sm:$0xff] %vm2176_vm4, %v4231_v3  ;;  %4190 = vmatmul.bf16.gmra.mxu2 %v4062_v8 }
 0x2bf   : > { %v3882_v52 = vmul.f32 0.044715, %v3818_v58 }
 0x2c1   : > { %v3914_v4 = vadd.f32 %v3882_v52, %v3738_v55 }
 0x2c3   : > { %v3946_v46 = vmul.f32 0.7978846, %v3914_v4  ;;  %v4773_v59 = vpop.eup %4772 }
 0x2c4   : > { %v4009_v51 = vadd.f32 1.0, %v4773_v59 }
 0x2c5   : > { %v4151_v36 = vpop.f32.mrf.mxu1  ;;  %v3740_v62 = vpop.f32.mrf.mxu3  ;;  %4774 = vtanh.f32 %v3946_v46 }
 0x2c6   : > { %v4152_v5 = vadd.f32 %v8942_v54, %v4151_v36  ;;  %v3741_v21 = vadd.f32 %v8863_v26, %v3740_v62  ;;  %v4041_v30 = vmul.f32 %v4009_v51, %v3849_v45 }
 0x2c8   : > { %v4232_v33 = vmul.f32 %v8947_v12, %v4152_v5  ;;  %v3787_v60 = vmul.f32 %v3741_v21, %v3741_v21  ;;  %v3851_v63 = vmul.f32 0.5, %v3741_v21 }
 0x2ca   : > { %4264 = vst.msk [vmem:[%s8954_s19 + $0x10] sm:$0xff] %vm2176_vm4, %v4232_v33  ;;  %v3819_v14 = vmul.f32 %v3787_v60, %v3741_v21 }
 0x2cb   : > { %v4775_v23 = vpop.eup %4774 }
 0x2cc   : > { %v3883_v29 = vmul.f32 0.044715, %v3819_v14  ;;  %v4010_v19 = vadd.f32 1.0, %v4775_v23 }
 0x2cd   : > { %v4153_v44 = vpop.f32.mrf.mxu1  ;;  %v3742_v18 = vpop.f32.mrf.mxu3 }
 0x2ce   : > { %v4154_v0 = vadd.f32 %v8942_v54, %v4153_v44  ;;  %v3743_v10 = vadd.f32 %v8863_v26, %v3742_v18  ;;  %v3915_v11 = vadd.f32 %v3883_v29, %v3741_v21  ;;  %v4042_v15 = vmul.f32 %v4010_v19, %v3850_v31 }
 0x2d0   : > { %v4233_v43 = vmul.f32 %v8947_v12, %v4154_v0  ;;  %v3788_v20 = vmul.f32 %v3743_v10, %v3743_v10  ;;  %v4063_v9 = vpack.c.bf16 %v4042_v15, %v4041_v30  ;;  %v3947_v48 = vmul.f32 0.7978846, %v3915_v11 }
 0x2d1   : > { %v3852_v49 = vmul.f32 0.5, %v3743_v10 }
 0x2d2   : > { %4265 = vst.msk [vmem:[%s8954_s19 + $0x18] sm:$0xff] %vm2176_vm4, %v4233_v43  ;;  %v3820_v13 = vmul.f32 %v3788_v20, %v3743_v10  ;;  %4195 = vmatmul.bf16.gmra.mxu2 %v4063_v9  ;;  %4776 = vtanh.f32 %v3947_v48 }
 0x2d4   : > { %v3884_v6 = vmul.f32 0.044715, %v3820_v13 }
 0x2d6   : > { %v3916_v56 = vadd.f32 %v3884_v6, %v3743_v10 }
 0x2d8   : > { %v3948_v39 = vmul.f32 0.7978846, %v3916_v56  ;;  %v4777_v53 = vpop.eup %4776 }
 0x2d9   : > { %v4156_v7 = vpop.f32.mrf.mxu1  ;;  %v4011_v40 = vadd.f32 1.0, %v4777_v53 }
 0x2da   : > { %v4157_v35 = vadd.f32 %v8942_v54, %v4156_v7  ;;  %v3745_v34 = vpop.f32.mrf.mxu3  ;;  %4778 = vtanh.f32 %v3948_v39 }
 0x2db   : > { %v3746_v41 = vadd.f32 %v8863_v26, %v3745_v34  ;;  %v4043_v42 = vmul.f32 %v4011_v40, %v3851_v63 }
 0x2dc   : > { %v4234_v2 = vmul.f32 %v8947_v12, %v4157_v35 }
 0x2dd   : > { %v3789_v16 = vmul.f32 %v3746_v41, %v3746_v41  ;;  %v3853_v31 = vmul.f32 0.5, %v3746_v41 }
 0x2de   : > { %4266 = vst.msk [vmem:[%s8954_s19 + $0x20] sm:$0xff] %vm2176_vm4, %v4234_v2 }
 0x2df   : > { %v3821_v32 = vmul.f32 %v3789_v16, %v3746_v41 }
 0x2e0   : > { %v4779_v28 = vpop.eup %4778 }
 0x2e1   : > { %v3885_v1 = vmul.f32 0.044715, %v3821_v32  ;;  %v4158_v22 = vpop.f32.mrf.mxu1  ;;  %v4012_v57 = vadd.f32 1.0, %v4779_v28 }
 0x2e2   : > { %v4159_v37 = vadd.f32 %v8942_v54, %v4158_v22  ;;  %v3747_v47 = vpop.f32.mrf.mxu3 }
 0x2e3   : > { %v3748_v55 = vadd.f32 %v8863_v26, %v3747_v47  ;;  %v4044_v50 = vmul.f32 %v4012_v57, %v3852_v49  ;;  %v3917_v25 = vadd.f32 %v3885_v1, %v3746_v41 }
 0x2e4   : > { %v4235_v61 = vmul.f32 %v8947_v12, %v4159_v37 }
 0x2e5   : > { %v3790_v27 = vmul.f32 %v3748_v55, %v3748_v55  ;;  %v4064_v38 = vpack.c.bf16 %v4044_v50, %v4043_v42  ;;  %v3949_v3 = vmul.f32 0.7978846, %v3917_v25  ;;  %v3854_v19 = vmul.f32 0.5, %v3748_v55 }
 0x2e6   : > { %4267 = vst.msk [vmem:[%s8954_s19 + $0x28] sm:$0xff] %vm2176_vm4, %v4235_v61 }
 0x2e7   : > { %v3822_v24 = vmul.f32 %v3790_v27, %v3748_v55  ;;  %4200 = vmatmul.bf16.gmra.mxu2 %v4064_v38  ;;  %4780 = vtanh.f32 %v3949_v3 }
 0x2e9   : > { %v3886_v58 = vmul.f32 0.044715, %v3822_v24 }
 0x2eb   : > { %v3918_v17 = vadd.f32 %v3886_v58, %v3748_v55 }
 0x2ec   : > { %v4161_v8 = vpop.f32.mrf.mxu1  ;;  %v3750_v4 = vpop.f32.mrf.mxu3 }
 0x2ed   : > { %v4162_v52 = vadd.f32 %v8942_v54, %v4161_v8  ;;  %v3751_v46 = vadd.f32 %v8863_v26, %v3750_v4  ;;  %v3950_v36 = vmul.f32 0.7978846, %v3918_v17  ;;  %v4781_v21 = vpop.eup %4780 }
 0x2ee   : > { %v4013_v23 = vadd.f32 1.0, %v4781_v21 }
 0x2ef   : > { %v4236_v62 = vmul.f32 %v8947_v12, %v4162_v52  ;;  %v3791_v5 = vmul.f32 %v3751_v46, %v3751_v46  ;;  %4782 = vtanh.f32 %v3950_v36  ;;  %v3855_v37 = vmul.f32 0.5, %v3751_v46 }
 0x2f0   : > { %v4045_v11 = vmul.f32 %v4013_v23, %v3853_v31 }
 0x2f1   : > { %4268 = vst.msk [vmem:[%s8954_s19 + $0x30] sm:$0xff] %vm2176_vm4, %v4236_v62  ;;  %v3823_v59 = vmul.f32 %v3791_v5, %v3751_v46 }
 0x2f3   : > { %v3887_v33 = vmul.f32 0.044715, %v3823_v59 }
 0x2f4   : > { %v4163_v60 = vpop.f32.mrf.mxu1  ;;  %v3752_v51 = vpop.f32.mrf.mxu3 }
 0x2f5   : > { %v4164_v14 = vadd.f32 %v8942_v54, %v4163_v60  ;;  %v4783_v29 = vpop.eup %4782  ;;  %v3753_v44 = vadd.f32 %v8863_v26, %v3752_v51  ;;  %v3919_v18 = vadd.f32 %v3887_v33, %v3751_v46 }
 0x2f6   : > { %v4014_v0 = vadd.f32 1.0, %v4783_v29 }
 0x2f7   : > { %v4237_v45 = vmul.f32 %v8947_v12, %v4164_v14  ;;  %v3792_v10 = vmul.f32 %v3753_v44, %v3753_v44  ;;  %v3951_v43 = vmul.f32 0.7978846, %v3919_v18  ;;  %v3856_v47 = vmul.f32 0.5, %v3753_v44 }
 0x2f8   : > { %v4046_v30 = vmul.f32 %v4014_v0, %v3854_v19 }
 0x2f9   : > { %4269 = vst.msk [vmem:[%s8954_s19 + $0x38] sm:$0xff] %vm2176_vm4, %v4237_v45  ;;  %v3824_v15 = vmul.f32 %v3792_v10, %v3753_v44  ;;  %4784 = vtanh.f32 %v3951_v43 }
 0x2fa   : > { %v4065_v20 = vpack.c.bf16 %v4046_v30, %v4045_v11 }
 0x2fb   : > { %v3888_v9 = vmul.f32 0.044715, %v3824_v15 }
 0x2fc   : > { %v4166_v13 = vpop.f32.mrf.mxu1  ;;  %v3755_v6 = vpop.f32.mrf.mxu3  ;;  %4205 = vmatmul.bf16.gmra.mxu2 %v4065_v20 }
 0x2fd   : > { %v4167_v48 = vadd.f32 %v8942_v54, %v4166_v13  ;;  %v3756_v56 = vadd.f32 %v8863_v26, %v3755_v6  ;;  %v3920_v39 = vadd.f32 %v3888_v9, %v3753_v44 }
 0x2ff   : > { %v4238_v7 = vmul.f32 %v8947_v12, %v4167_v48  ;;  %v3793_v35 = vmul.f32 %v3756_v56, %v3756_v56  ;;  %v3952_v34 = vmul.f32 0.7978846, %v3920_v39  ;;  %v4785_v53 = vpop.eup %4784  ;;  %v3857_v18 = vmul.f32 0.5, %v3756_v56 }
 0x300   : > { %v4015_v63 = vadd.f32 1.0, %v4785_v53 }
 0x301   : > { %4270 = vst.msk [vmem:[%s8954_s19 + $0x40] sm:$0xff] %vm2176_vm4, %v4238_v7  ;;  %v3825_v41 = vmul.f32 %v3793_v35, %v3756_v56  ;;  %4786 = vtanh.f32 %v3952_v34 }
 0x302   : > { %v4047_v25 = vmul.f32 %v4015_v63, %v3855_v37 }
 0x303   : > { %v3889_v2 = vmul.f32 0.044715, %v3825_v41 }
 0x304   : > { %v4168_v16 = vpop.f32.mrf.mxu1  ;;  %v3757_v40 = vpop.f32.mrf.mxu3 }
 0x305   : > { %v4169_v32 = vadd.f32 %v8942_v54, %v4168_v16  ;;  %v3758_v28 = vadd.f32 %v8863_v26, %v3757_v40  ;;  %v3921_v1 = vadd.f32 %v3889_v2, %v3756_v56 }
 0x307   : > { %v4239_v22 = vmul.f32 %v8947_v12, %v4169_v32  ;;  %v4787_v49 = vpop.eup %4786  ;;  %v3794_v57 = vmul.f32 %v3758_v28, %v3758_v28  ;;  %v3953_v50 = vmul.f32 0.7978846, %v3921_v1  ;;  %v3858_v45 = vmul.f32 0.5, %v3758_v28 }
 0x308   : > { %v4016_v55 = vadd.f32 1.0, %v4787_v49 }
 0x309   : > { %4271 = vst.msk [vmem:[%s8954_s19 + $0x48] sm:$0xff] %vm2176_vm4, %v4239_v22  ;;  %v3826_v42 = vmul.f32 %v3794_v57, %v3758_v28  ;;  %4788 = vtanh.f32 %v3953_v50 }
 0x30a   : > { %v4048_v61 = vmul.f32 %v4016_v55, %v3856_v47 }
 0x30b   : > { %v3890_v27 = vmul.f32 0.044715, %v3826_v42 }
 0x30c   : > { %v4171_v38 = vpop.f32.mrf.mxu1  ;;  %v4066_v58 = vpack.c.bf16 %v4048_v61, %v4047_v25 }
 0x30d   : > { %v4172_v24 = vadd.f32 %v8942_v54, %v4171_v38  ;;  %v3760_v3 = vpop.f32.mrf.mxu3  ;;  %v3922_v17 = vadd.f32 %v3890_v27, %v3758_v28 }
 0x30e   : > { %v3761_v8 = vadd.f32 %v8863_v26, %v3760_v3  ;;  %4210 = vmatmul.bf16.gmra.mxu2 %v4066_v58 }
 0x30f   : > { %v4240_v52 = vmul.f32 %v8947_v12, %v4172_v24  ;;  %v3954_v46 = vmul.f32 0.7978846, %v3922_v17  ;;  %v4789_v62 = vpop.eup %4788 }
 0x310   : > { %v3795_v4 = vmul.f32 %v3761_v8, %v3761_v8  ;;  %v4017_v23 = vadd.f32 1.0, %v4789_v62  ;;  %v3859_v34 = vmul.f32 0.5, %v3761_v8 }
 0x311   : > { %4272 = vst.msk [vmem:[%s8954_s19 + $0x50] sm:$0xff] %vm2176_vm4, %v4240_v52  ;;  %4790 = vtanh.f32 %v3954_v46 }
 0x312   : > { %v3827_v36 = vmul.f32 %v3795_v4, %v3761_v8  ;;  %v4049_v10 = vmul.f32 %v4017_v23, %v3857_v18 }
 0x314   : > { %v3891_v5 = vmul.f32 0.044715, %v3827_v36  ;;  %v4173_v21 = vpop.f32.mrf.mxu1 }
 0x315   : > { %v4174_v59 = vadd.f32 %v8942_v54, %v4173_v21  ;;  %v3762_v33 = vpop.f32.mrf.mxu3 }
 0x316   : > { %v3763_v60 = vadd.f32 %v8863_v26, %v3762_v33  ;;  %v3923_v14 = vadd.f32 %v3891_v5, %v3761_v8 }
 0x317   : > { %v4241_v51 = vmul.f32 %v8947_v12, %v4174_v59  ;;  %v4791_v29 = vpop.eup %4790 }
 0x318   : > { %v3796_v44 = vmul.f32 %v3763_v60, %v3763_v60  ;;  %v4018_v31 = vadd.f32 1.0, %v4791_v29  ;;  %v3955_v0 = vmul.f32 0.7978846, %v3923_v14  ;;  %v3860_v41 = vmul.f32 0.5, %v3763_v60 }
 0x319   : > { %4273 = vst.msk [vmem:[%s8954_s19 + $0x58] sm:$0xff] %vm2176_vm4, %v4241_v51 }
 0x31a   : > { %v3828_v19 = vmul.f32 %v3796_v44, %v3763_v60  ;;  %v4050_v11 = vmul.f32 %v4018_v31, %v3858_v45  ;;  %4792 = vtanh.f32 %v3955_v0 }
 0x31c   : > { %v3892_v30 = vmul.f32 0.044715, %v3828_v19  ;;  %v4176_v15 = vpop.f32.mrf.mxu1  ;;  %v4067_v43 = vpack.c.bf16 %v4050_v11, %v4049_v10 }
 0x31d   : > { %v4177_v26 = vadd.f32 %v8942_v54, %v4176_v15 }
 0x31e   : > { %v3924_v20 = vadd.f32 %v3892_v30, %v3763_v60  ;;  %4215 = vmatmul.bf16.gmra.mxu2 %v4067_v43 }
 0x31f   : > { %v4242_v9 = vmul.f32 %v8947_v12, %v4177_v26 }
 0x320   : > { %v3956_v13 = vmul.f32 0.7978846, %v3924_v20  ;;  %v4793_v48 = vpop.eup %4792 }
 0x321   : > { %4274 = vst.msk [vmem:[%s8954_s19 + $0x60] sm:$0xff] %vm2176_vm4, %v4242_v9  ;;  %v4019_v7 = vadd.f32 1.0, %v4793_v48 }
 0x322   : > { %4794 = vtanh.f32 %v3956_v13 }
 0x323   : > { %v4051_v2 = vmul.f32 %v4019_v7, %v3859_v34 }
 0x324   : > { %v4178_v6 = vpop.f32.mrf.mxu1 }
 0x325   : > { %v4179_v56 = vadd.f32 %v8942_v54, %v4178_v6 }
 0x327   : > { %v4243_v39 = vmul.f32 %v8947_v12, %v4179_v56 }
 0x328   : > { %v4795_v35 = vpop.eup %4794 }
 0x329   : > { %4275 = vst.msk [vmem:[%s8954_s19 + $0x68] sm:$0xff] %vm2176_vm4, %v4243_v39  ;;  %v4020_v53 = vadd.f32 1.0, %v4795_v35 }
 0x32b   : > { %v4052_v16 = vmul.f32 %v4020_v53, %v3860_v41  ;;  %v4186_v1 = vpop.f32.mrf.mxu2 }
 0x32c   : > { %v4181_v32 = vpop.f32.mrf.mxu1  ;;  %v4187_v22 = vadd.f32 %v8942_v54, %v4186_v1 }
 0x32d   : > { %v4182_v40 = vadd.f32 %v8942_v54, %v4181_v32  ;;  %v4068_v28 = vpack.c.bf16 %v4052_v16, %v4051_v2 }
 0x32e   : > { %v4246_v49 = vmul.f32 %v8947_v12, %v4187_v22 }
 0x32f   : > { %v4244_v63 = vmul.f32 %v8947_v12, %v4182_v40  ;;  %4220 = vmatmul.bf16.gmra.mxu2 %v4068_v28 }
 0x330   : > { %4278 = vst.msk [vmem:[%s8954_s19 + $0x80] sm:$0xff] %vm2176_vm4, %v4246_v49 }
 0x331   : > { %4276 = vst.msk [vmem:[%s8954_s19 + $0x70] sm:$0xff] %vm2176_vm4, %v4244_v63 }
 0x333   : > { %v4188_v47 = vpop.f32.mrf.mxu2 }
 0x334   : > { %v4183_v57 = vpop.f32.mrf.mxu1  ;;  %v4189_v55 = vadd.f32 %v8942_v54, %v4188_v47 }
 0x335   : > { %v4184_v37 = vadd.f32 %v8942_v54, %v4183_v57 }
 0x336   : > { %v4247_v50 = vmul.f32 %v8947_v12, %v4189_v55 }
 0x337   : > { %v4245_v42 = vmul.f32 %v8947_v12, %v4184_v37 }
 0x338   : > { %4279 = vst.msk [vmem:[%s8954_s19 + $0x88] sm:$0xff] %vm2176_vm4, %v4247_v50 }
 0x339   : > { %4277 = vst.msk [vmem:[%s8954_s19 + $0x78] sm:$0xff] %vm2176_vm4, %v4245_v42 }
 0x341   : > { %v4191_v25 = vpop.f32.mrf.mxu2 }
 0x342   : > { %v4192_v61 = vadd.f32 %v8942_v54, %v4191_v25 }
 0x344   : > { %v4248_v27 = vmul.f32 %v8947_v12, %v4192_v61 }
 0x346   : > { %4280 = vst.msk [vmem:[%s8954_s19 + $0x90] sm:$0xff] %vm2176_vm4, %v4248_v27 }
 0x349   : > { %v4193_v38 = vpop.f32.mrf.mxu2 }
 0x34a   : > { %v4194_v24 = vadd.f32 %v8942_v54, %v4193_v38 }
 0x34c   : > { %v4249_v3 = vmul.f32 %v8947_v12, %v4194_v24 }
 0x34e   : > { %4281 = vst.msk [vmem:[%s8954_s19 + $0x98] sm:$0xff] %vm2176_vm4, %v4249_v3 }
 0x355   : > { %v4196_v58 = vpop.f32.mrf.mxu2 }
 0x356   : > { %v4197_v8 = vadd.f32 %v8942_v54, %v4196_v58 }
 0x358   : > { %v4250_v17 = vmul.f32 %v8947_v12, %v4197_v8 }
 0x35a   : > { %4282 = vst.msk [vmem:[%s8954_s19 + $0xa0] sm:$0xff] %vm2176_vm4, %v4250_v17 }
 0x35d   : > { %v4198_v52 = vpop.f32.mrf.mxu2 }
 0x35e   : > { %v4199_v4 = vadd.f32 %v8942_v54, %v4198_v52 }
 0x360   : > { %v4251_v46 = vmul.f32 %v8947_v12, %v4199_v4 }
 0x362   : > { %4283 = vst.msk [vmem:[%s8954_s19 + $0xa8] sm:$0xff] %vm2176_vm4, %v4251_v46 }
 0x36a   : > { %v4201_v36 = vpop.f32.mrf.mxu2 }
 0x36b   : > { %v4202_v62 = vadd.f32 %v8942_v54, %v4201_v36 }
 0x36d   : > { %v4252_v5 = vmul.f32 %v8947_v12, %v4202_v62 }
 0x36f   : > { %4284 = vst.msk [vmem:[%s8954_s19 + $0xb0] sm:$0xff] %vm2176_vm4, %v4252_v5 }
 0x372   : > { %v4203_v21 = vpop.f32.mrf.mxu2 }
 0x373   : > { %v4204_v59 = vadd.f32 %v8942_v54, %v4203_v21 }
 0x375   : > { %v4253_v33 = vmul.f32 %v8947_v12, %v4204_v59 }
 0x377   : > { %4285 = vst.msk [vmem:[%s8954_s19 + $0xb8] sm:$0xff] %vm2176_vm4, %v4253_v33 }
 0x37f   : > { %v4206_v60 = vpop.f32.mrf.mxu2 }
 0x380   : > { %v4207_v14 = vadd.f32 %v8942_v54, %v4206_v60 }
 0x382   : > { %v4254_v51 = vmul.f32 %v8947_v12, %v4207_v14 }
 0x384   : > { %4286 = vst.msk [vmem:[%s8954_s19 + $0xc0] sm:$0xff] %vm2176_vm4, %v4254_v51 }
 0x387   : > { %v4208_v23 = vpop.f32.mrf.mxu2 }
 0x388   : > { %v4209_v29 = vadd.f32 %v8942_v54, %v4208_v23 }
 0x38a   : > { %v4255_v44 = vmul.f32 %v8947_v12, %v4209_v29 }
 0x38c   : > { %4287 = vst.msk [vmem:[%s8954_s19 + $0xc8] sm:$0xff] %vm2176_vm4, %v4255_v44 }
 0x391   : > { %v4211_v18 = vpop.f32.mrf.mxu2 }
 0x392   : > { %v4212_v45 = vadd.f32 %v8942_v54, %v4211_v18 }
 0x394   : > { %v4256_v31 = vmul.f32 %v8947_v12, %v4212_v45 }
 0x396   : > { %4288 = vst.msk [vmem:[%s8954_s19 + $0xd0] sm:$0xff] %vm2176_vm4, %v4256_v31 }
 0x399   : > { %v4213_v19 = vpop.f32.mrf.mxu2 }
 0x39a   : > { %v4214_v0 = vadd.f32 %v8942_v54, %v4213_v19 }
 0x39c   : > { %v4257_v10 = vmul.f32 %v8947_v12, %v4214_v0 }
 0x39e   : > { %4289 = vst.msk [vmem:[%s8954_s19 + $0xd8] sm:$0xff] %vm2176_vm4, %v4257_v10 }
 0x3a1   : > { %v4216_v11 = vpop.f32.mrf.mxu2 }
 0x3a2   : > { %v4217_v30 = vadd.f32 %v8942_v54, %v4216_v11 }
 0x3a4   : > { %v4258_v15 = vmul.f32 %v8947_v12, %v4217_v30 }
 0x3a6   : > { %4290 = vst.msk [vmem:[%s8954_s19 + $0xe0] sm:$0xff] %vm2176_vm4, %v4258_v15 }
 0x3a9   : > { %v4218_v26 = vpop.f32.mrf.mxu2 }
 0x3aa   : > { %v4219_v43 = vadd.f32 %v8942_v54, %v4218_v26 }
 0x3ac   : > { %v4259_v20 = vmul.f32 %v8947_v12, %v4219_v43 }
 0x3ae   : > { %4291 = vst.msk [vmem:[%s8954_s19 + $0xe8] sm:$0xff] %vm2176_vm4, %v4259_v20 }
 0x3b2   : > { %v4221_v9 = vpop.f32.mrf.mxu2 }
 0x3b3   : > { %v4222_v13 = vadd.f32 %v8942_v54, %v4221_v9 }
 0x3b5   : > { %v4260_v48 = vmul.f32 %v8947_v12, %v4222_v13 }
 0x3b7   : > { %4292 = vst.msk [vmem:[%s8954_s19 + $0xf0] sm:$0xff] %vm2176_vm4, %v4260_v48 }
 0x3ba   : > { %v4223_v6 = vpop.f32.mrf.mxu2 }
 0x3bb   : > { %v4224_v56 = vadd.f32 %v8942_v54, %v4223_v6 }
 0x3bd   : > { %v4261_v39 = vmul.f32 %v8947_v12, %v4224_v56 }
 0x3bf   : > { %4293 = vst.msk [vmem:[%s8954_s19 + $0xf8] sm:$0xff] %vm2176_vm4, %v4261_v39 }
 0x3c0   : > { %4923 = shalt.err (!%p4920_p13)
}
 0x3c1   : > { %s4986_s1 = smov 128   ;;  %s4987_s25 = smov 8  }
 0x3c2   : > { %4560 = dma.vmem_to_hbm [thread:$0]  (%p5108_p9), %s4311_s17, 4096, %s4313_s21, %s4295_s18, %s4986_s1, %s4986_s1, %s4987_s25  }
 0x3c3 PF: > { %s9603_s26 = sld [smem:[#allocation12_spill]]  ;;  %p4573_p0 = pnand %p4452_p12, %p5115_p11 }
 0x3c4   : > { %s9605_s8 = sld [smem:[#allocation16_spill]] }
 0x3c5   : > { %p4574_p1 = pneg %p4573_p0 }
 0x3c9   : > { %s4327_s20 = sand.u32 1, %s9603_s26  }
 0x3ca   : > { %s4328_s11 = scalar_lea.sflag [#allocation4], %s4327_s20 }
 0x3cb   : > { %4957 = dma.done.wait (%p4574_p1), %s4328_s11, 4096  }
 0x3cc   : > { %4959 = vsyncadd (%p4574_p1), %s4328_s11, 4294963200  ;;  %s31_s26 = sadd.s32 1, %s9605_s8   ;;  %s9606_s14 = sld [smem:[#allocation13_spill]] }
 0x3cd   : > { %p28_p2 = scmp.ge.s32.totalorder %s31_s26, 4   ;;  %s9607_s23 = sld [smem:[#allocation19_spill]] }
 0x3ce   : > { %s9608_s24 = sld [smem:[#allocation15_spill]]  ;;  %s9610_s21 = smov %s4966_s22 }
 0x3cf   : > { %s9609_s25 = sld [smem:[#allocation17_spill]]  ;;  %30 = sbr.rel (!%p28_p2) target bundleno = 15 (0xf), region = 137 }
 0x3d2   : > { %s9611_s22 = smov %s9606_s14 }
 0x3d4   :  { %4334 = vsyncpa [#allocation3], 1 }
 0x3d5   :  { %4336 = vsyncpa [#allocation3 + $0x1], 1 }
 0x3d6   :  { %4337 = vsyncpa [#allocation6], 1 }
 0x3d7   :  { %4339 = vsyncpa [#allocation6 + $0x1], 1 }
 0x3d8   :  { %4340 = vsyncpa [#allocation4], 1 }
 0x3d9   :  { %4342 = vsyncpa [#allocation4 + $0x1], 1 }

// kernel: tpu_custom_call.1
= control target key start
LH: loop header
LB: loop body
LE: loop exit
PB: predicated region body
PF: predicated region fallthrough
CT: control target
= control target key end

     0   :  { %s9132_s0 = inlined_call_operand.hbm [shape: f32[2,16,16,32], index: 0, kind: input, shape index: {}]   ;;  %s9133_s1 = inlined_call_operand.hbm [shape: f32[2,16,16,32], index: 1, kind: input, shape index: {}]   ;;  %s9134_s2 = inlined_call_operand.hbm [shape: f32[2,16,16,32], index: 2, kind: input, shape index: {}]   ;;  %s9135_s3 = inlined_call_operand.vmem [shape: f32[3,3,32], index: 3, kind: input, shape index: {}]   ;;  %s9136_s4 = inlined_call_operand.vmem [shape: f32[1,32], index: 4, kind: input, shape index: {}]   ;;  %s9137_s5 = inlined_call_operand.vmem [shape: f32[1,32], index: 5, kind: input, shape index: {}]   ;;  %s9138_s6 = inlined_call_operand.vmem [shape: f32[1,32], index: 6, kind: input, shape index: {}]   ;;  %s9139_s7 = inlined_call_operand.vmem [shape: bf16[32,128], index: 7, kind: input, shape index: {}]   ;;  %s9140_s8 = inlined_call_operand.vmem [shape: f32[1,128], index: 8, kind: input, shape index: {}]   ;;  %s9141_s9 = inlined_call_operand.vmem [shape: bf16[128,32], index: 9, kind: input, shape index: {}]   ;;  %s9142_s10 = inlined_call_operand.vmem [shape: f32[1,32], index: 10, kind: input, shape index: {}]   ;;  %s9143_s11 = inlined_call_operand.vmem [shape: f32[1,32], index: 11, kind: input, shape index: {}]   ;;  %s9144_s12 = inlined_call_operand.hbm [shape: f32[2,16,16,32], index: 12, kind: output, shape index: {}]  }
   0x1   :  { %9278 = sst [smem:[#allocation58_spill]] %s9133_s1 }
   0x2   :  { %9279 = sst [smem:[#allocation59_spill]] %s9140_s8 }
   0x3   :  { %9280 = sst [smem:[#allocation60_spill]] %s9141_s9 }
   0x4   :  { %9281 = sst [smem:[#allocation61_spill]] %s9142_s10 }
   0x5   :  { %9282 = sst [smem:[#allocation62_spill]] %s9143_s11 }
   0x6   :  { %9283 = sst [smem:[#allocation63_spill]] %s9144_s12 }
   0x7   :  { %17 = vsyncpa [#allocation3], 0 }
   0x8   :  { %19 = vsyncpa [#allocation3 + $0x1], 0 }
   0x9   :  { %20 = vsyncpa [#allocation6], 0 }
   0xa   :  { %22 = vsyncpa [#allocation6 + $0x1], 0 }
   0xb   :  { %23 = vsyncpa [#allocation4], 0 }
   0xc   :  { %25 = vsyncpa [#allocation4 + $0x1], 0  ;;  %s5053_s21 = smov 0   ;;  %s5055_s22 = smov 0  }
   0xd   :  { %s5057_s23 = smov 0   ;;  %s5059_s24 = smov 0  }
   0xe   :  { %s5061_s25 = smov 0   ;;  %s5063_s26 = smov 0  }
   0xf LB: > { %9284 = sst [smem:[#allocation12_spill]] %s4962_s21  ;;  %s5084_s27 = sadd.s32 4294967295, %s4982_s26   ;;  %s4982_s26 = sphi %s5063_s26, %s31_s26   ;;  %s4978_s25 = sphi %s5061_s25, %s9609_s25   ;;  %s4974_s24 = sphi %s5059_s24, %s9608_s24   ;;  %s4970_s23 = sphi %s5057_s23, %s9607_s23   ;;  %s4966_s22 = sphi %s5055_s22, %s9611_s22   ;;  %s4962_s21 = sphi %s5053_s21, %s9610_s21  }
  0x10   : > { %9285 = sst [smem:[#allocation13_spill]] %s4970_s23  ;;  %s4450_s28 = sadd.s32 4294967294, %s4982_s26  }
  0x11   : > { %9286 = sst [smem:[#allocation14_spill]] %s4974_s24  ;;  %s43_s29 = sadd.s32 1, %s4978_s25 }
  0x12   : > { %9287 = sst [smem:[#allocation15_spill]] %s4978_s25  ;;  %s52_s30 = sadd.s32 1, %s4970_s23 }
  0x13   : > { %9288 = sst [smem:[#allocation16_spill]] %s4982_s26  ;;  %p45_p0 = scmp.ge.s32.totalorder %s43_s29, 2 }
  0x14   : > { %p59_p1 = scmp.ne.s32.totalorder %s4970_s23, %s4966_s22  ;;  %p60_p2 = scmp.eq.s32.totalorder %s4982_s26, 0 }
  0x15   : > { %p65_p3 = scmp.ne.s32.totalorder %s4966_s22, %s4962_s21  ;;  %s9613_s29 = smov (%p45_p0, %s43_s29), 0 }
  0x16   : > { %9289 = sst [smem:[#allocation17_spill]] %s9613_s29  ;;  %p5096_p4 = por %p60_p2, %p59_p1 }
  0x17   : > { %p66_p5 = scmp.eq.s32.totalorder %s5084_s27, 0  ;;  %s47_s14 = ssub.s32 %s4978_s25, %s9613_s29 }
  0x18   : > { %p352_p6 = scmp.eq.s32.totalorder %s5084_s27, 1  ;;  %p50_p7 = scmp.eq.s32.totalorder %s47_s14, 0 }
  0x19   : > { %p5104_p8 = por %p66_p5, %p65_p3  ;;  %p358_p10 = scmp.eq.s32.totalorder %s4450_s28, 1 }
  0x1a   : > { %p5108_p9 = por %p352_p6, %p59_p1  ;;  %p4452_p12 = scmp.ge.s32.totalorder %s4982_s26, 2 }
  0x1b   : > { %s5113_s17 = scalar_select %p50_p7, %s4970_s23, %s52_s30  }
  0x1c   : > { %s9292_s16 = scalar_select %p5108_p9, 1, 0 }
  0x1d   : > { %9294 = sst [smem:[#allocation19_spill]] %s5113_s17  ;;  %p5115_p11 = por %p358_p10, %p65_p3 }
  0x1e   : > { %9293 = sst [smem:[#allocation18_spill]] %s9292_s16  ;;  %p4576_p13 = scmp.lt.s32.totalorder %s4982_s26, 2 }
  0x1f   : > { %s9295_s18 = scalar_select %p5115_p11, 1, 0 }
  0x20   : > { %s5122_s19 = sand.u32 1, %s4970_s23   ;;  %s5125_s20 = sshll.u32 %s4978_s25, 8 }
  0x21   : > { %9296 = sst [smem:[#allocation20_spill]] %s9295_s18  ;;  %p5129_p0 = pnand %p4576_p13, %p5096_p4 }
  0x22   : > { %s430_s28 = sand.u32 1, %s4982_s26   ;;  %s4456_s30 = sshll.u32 %s5122_s19, 4 }
  0x23   : > { %s9298_s1 = sld [smem:[#allocation58_spill]]  ;;  %s434_s21 = scalar_lea.vmem [#allocation5], %s4456_s30 }
  0x24   : > { %s448_s16 = sshll.u32 %s434_s21, 4  ;;  %s431_s13 = scalar_lea.sflag [#allocation6], %s430_s28  ;;  %s449_s16 = int_to_ptr.vmem [resolvable:$true] %s448_s16 }
  0x25   : > { %s4984_s25 = smov 128   ;;  %s4985_s12 = smov 8  }
  0x26   : > { %p4462_p1 = scmp.ge.s32.totalorder %s4982_s26, 1  ;;  %p484_p2 = scmp.lt.s32.totalorder %s4982_s26, 3 }
  0x27   : > { %s462_s24 = scalar_lea.vmem [#allocation7], %s4456_s30  ;;  %s4453_s21 = sshll.u32 %s5122_s19, 8 }
  0x28   : > { %s476_s29 = sshll.u32 %s462_s24, 4  ;;  %p5143_p3 = pnand %p4462_p1, %p484_p2  ;;  %s477_s29 = int_to_ptr.vmem [resolvable:$true] %s476_s29 }
  0x29   : > { %s445_s18 = scalar_lea.hbm %s9298_s1, %s5125_s20  ;;  %s417_s28 = scalar_lea.hbm %s9132_s0, %s5125_s20 }
  0x2a   : > { %s446_s23 = sshll.u32 %s445_s18, 4  ;;  %s418_s11 = sshll.u32 %s417_s28, 4  ;;  %s447_s23 = int_to_ptr.hbm [resolvable:$true] %s446_s23  ;;  %s419_s11 = int_to_ptr.hbm [resolvable:$true] %s418_s11 }
  0x2b   : > { %4568 = dma.hbm_to_vmem [thread:$0]  (!%p5129_p0), %s447_s23, 256, %s449_s16, %s431_s13, %s4984_s25, %s4984_s25, %s4985_s12  }
  0x2c   : > { %s409_s10 = scalar_lea.vmem [#allocation2], %s4453_s21  ;;  %s406_s23 = scalar_lea.sflag [#allocation3], %s5122_s19 }
  0x2d   : > { %s420_s8 = sshll.u32 %s409_s10, 4  ;;  %s4531_s16 = sadd.s32 240, %s5125_s20  ;;  %s421_s8 = int_to_ptr.vmem [resolvable:$true] %s420_s8 }
  0x2e   : > { %4565 = dma.hbm_to_vmem [thread:$0]  (!%p5129_p0), %s419_s11, 4096, %s421_s8, %s406_s23, %s4984_s25, %s4984_s25, %s4985_s12  }
  0x2f   : > { %s473_s26 = scalar_lea.hbm %s9134_s2, %s4531_s16  ;;  %488 = sbr.rel (%p5143_p3) target bundleno = 963 (0x3c3), region = 68 }
  0x30   : > { %s474_s9 = sshll.u32 %s473_s26, 4  ;;  %s475_s9 = int_to_ptr.hbm [resolvable:$true] %s474_s9 }
  0x31   : > { %4571 = dma.hbm_to_vmem [thread:$0]  (!%p5129_p0), %s475_s9, 256, %s477_s29, %s431_s13, %s4984_s25, %s4984_s25, %s4985_s12  }
  0x34   : > { %s5164_s1 = sand.u32 1, %s4966_s22  }
  0x35   : > { %s4463_s8 = sshll.u32 %s5164_s1, 8  ;;  %s491_s10 = scalar_lea.sflag [#allocation3], %s5164_s1 }
  0x36   : > { %s5170_s11 = scalar_lea.vmem [#allocation2], %s4463_s8 }
  0x37   : > { %4949 = dma.done.wait (%p5104_p8), %s491_s10, 4096  }
  0x38   : > { %4951 = vsyncadd (%p5104_p8), %s491_s10, 4294963200  ;;  %s500_s9 = sand.u32 1, %s5084_s27  }
  0x39   : > { %s501_s12 = scalar_lea.sflag [#allocation6], %s500_s9 }
  0x3a   : > { %4953 = dma.done.wait (%p5104_p8), %s501_s12, 512  }
  0x3b   : > { %4955 = vsyncadd (%p5104_p8), %s501_s12, 4294966784  ;;  %v621_v0 = vld [vmem:[%s9135_s3] sm:$0x7]  ;;  %vm972_vm0 = vcmask 1045504   ;;  %v622_v1 = vld [vmem:[%s9135_s3 + $0x4] sm:$0x7] }
  0x3c   : > { %v623_v2 = vld [vmem:[%s9135_s3 + $0x8] sm:$0x7]  ;;  %v5196_v4 = vld [vmem:[%s9136_s4] ss:$0 sm:$0xff]  ;;  %v5198_v5 = vperm.slane %v621_v0, 0  ;;  %v5200_v6 = vperm.slane %v621_v0, 1 }
  0x3d   : > { %v5191_v3 = vld [vmem:[%s5170_s11 + $0x8] sm:$0xff]  ;;  %v5202_v7 = vperm.slane %v621_v0, 2  ;;  %vm760_vm1 = vcmask 1046528   ;;  %v5204_v8 = vperm.slane %v622_v1, 0  ;;  %v5206_v9 = vperm.slane %v622_v1, 1  ;;  %v5213_v12 = vld [vmem:[%s5170_s11 + $0x18] sm:$0xff] }
  0x3e   : > { %v5208_v10 = vperm.slane %v622_v1, 2  ;;  %v5210_v11 = vperm.slane %v623_v2, 1  ;;  %v629_v13 = vmul.f32 0.0, %v5198_v5  ;;  %v696_v14 = vmul.f32 0.0, %v5200_v6  ;;  %v5226_v20 = vld [vmem:[%s5170_s11] sm:$0xff]  ;;  %v5240_v28 = vld [vmem:[%s5170_s11 + $0x10] sm:$0xff] }
  0x3f   : > { %9300 = vst [vmem:[#allocation21_spill] sm:$0xff] %v5202_v7  ;;  %v906_v15 = vmul.f32 0.0, %v5202_v7  ;;  %v5218_v16 = vperm.slane %v623_v2, 0  ;;  %v1218_v17 = vmul.f32 %v5206_v9, %v5191_v3  ;;  %v5237_v27 = vperm.slane %v623_v2, 2  ;;  %v5281_v0 = vld [vmem:[%s5170_s11 + $0x20] sm:$0xff]  ;;  %s9532_s15 = sld [smem:[#allocation60_spill]] }
  0x40   : > { %9301 = vst [vmem:[#allocation22_spill] sm:$0xff] %v5206_v9  ;;  %v1427_v18 = vmul.f32 %v5208_v10, %v5191_v3  ;;  %v1428_v19 = vmul.f32 0.0, %v5208_v10  ;;  %v5229_v21 = vadd.f32 %v5196_v4, %v629_v13  ;;  %v761_v22 = vrot.slane %v696_v14, 1  ;;  %s9539_s16 = sld [smem:[#allocation59_spill]]  ;;  %s8954_s19 = scalar_lea.vmem [#allocation8], %s4463_s8 }
  0x41   : > { %9302 = vst [vmem:[#allocation23_spill] sm:$0xff] %v5208_v10  ;;  %v5231_v23 = vrot.slane %v906_v15, 2  ;;  %v1737_v26 = vmul.f32 %v5210_v11, %v5213_v12  ;;  %v1137_v30 = vmul.f32 %v5204_v8, %v5191_v3  ;;  %v5246_v31 = vmul.f32 0.0, %v5204_v8  ;;  %s9598_s9 = sld [smem:[#allocation61_spill]]  ;;  %s4310_s17 = sshll.u32 %s8954_s19, 4  ;;  %s4311_s17 = int_to_ptr.vmem [resolvable:$true] %s4310_s17 }
  0x42   : > { %9303 = vst [vmem:[#allocation24_spill] sm:$0xff] %v5229_v21  ;;  %v1493_v24 = vrot.slane %v1427_v18, 2  ;;  %v5233_v25 = vrot.slane %v1428_v19, 2  ;;  %v857_v29 = vadd.f32 %v761_v22, %v5229_v21  ;;  %v1217_v32 = vmul.f32 %v5206_v9, %v5226_v20  ;;  %s9599_s26 = sld [smem:[#allocation62_spill]]  ;;  %s4295_s18 = scalar_lea.sflag [#allocation4], %s5164_s1 }
  0x43   : > { %9304 = vst [vmem:[#allocation25_spill] sm:$0xff] %v5246_v31  ;;  %v1282_v33 = vrot.slane %v1218_v17, 1  ;;  %v1946_v34 = vmul.f32 %v5237_v27, %v5213_v12  ;;  %v1947_v35 = vmul.f32 0.0, %v5237_v27  ;;  %v1426_v36 = vmul.f32 %v5208_v10, %v5226_v20  ;;  %s9600_s8 = sld [smem:[#allocation14_spill]] }
  0x44   : > { %v1086_v37 = vadd.f32 %v5231_v23, %v857_v29  ;;  %v1656_v38 = vmul.f32 %v5218_v16, %v5213_v12  ;;  %v1281_v39 = vrot.slane %v1217_v32, 1  ;;  %v1736_v40 = vmul.f32 %v5210_v11, %v5240_v28  ;;  %s9601_s13 = sld [smem:[#allocation63_spill]] }
  0x45   : > { %v1496_v41 = vsel %vm972_vm0, %v1493_v24, %v5233_v25  ;;  %v1801_v42 = vrot.slane %v1737_v26, 1  ;;  %v1492_v43 = vrot.slane %v1426_v36, 2  ;;  %v1945_v44 = vmul.f32 %v5237_v27, %v5240_v28 }
  0x46   : > { %v1170_v45 = vadd.f32 %v1137_v30, %v1086_v37  ;;  %v1168_v46 = vadd.f32 %v5246_v31, %v1086_v37  ;;  %v5266_v47 = vmul.f32 0.0, %v5218_v16  ;;  %v1136_v48 = vmul.f32 %v5204_v8, %v5226_v20 }
  0x47   : > { %v2012_v49 = vrot.slane %v1946_v34, 2  ;;  %v5270_v50 = vrot.slane %v1947_v35, 2  ;;  %vm2180_vm2 = vcmask 260096   ;;  %v1800_v51 = vrot.slane %v1736_v40, 1 }
  0x48   : > { %9305 = vst [vmem:[#allocation26_spill] sm:$0xff] %v5266_v47  ;;  %vm2172_vm3 = vcmask 261127   ;;  %v1283_v52 = vsel %vm760_vm1, %v1281_v39, %v1282_v33  ;;  %v1379_v53 = vadd.f32 %v1282_v33, %v1170_v45  ;;  %v1377_v54 = vadd.f32 %v1281_v39, %v1168_v46 }
  0x49   : > { %9306 = vst [vmem:[#allocation27_spill] sm:$0xff] %v5270_v50  ;;  %v2011_v55 = vrot.slane %v1945_v44, 2  ;;  %v1169_v56 = vadd.f32 %v1136_v48, %v1086_v37  ;;  %v1494_v57 = vsel %vm972_vm0, %v1492_v43, %v1493_v24  ;;  %v1655_v58 = vmul.f32 %v5218_v16, %v5240_v28  ;;  %s4542_s20 = sshll.u32 %s9600_s8, 8 }
  0x4a   : > { %v698_v59 = vmul.f32 %v5200_v6, %v5226_v20  ;;  %v909_v60 = vmul.f32 %v5202_v7, %v5226_v20  ;;  %v1607_v61 = vadd.f32 %v1496_v41, %v1379_v53  ;;  %v1605_v62 = vadd.f32 %v1492_v43, %v1377_v54  ;;  %s4309_s29 = scalar_lea.hbm %s9601_s13, %s4542_s20  ;;  %s4916_s10 = scalar_lea.hbm %s9601_s13, 512 }
  0x4b   : > { %v1378_v63 = vadd.f32 %v1283_v52, %v1169_v56  ;;  %v5285_v1 = vmul.f32 %v5206_v9, %v5240_v28  ;;  %v2015_v2 = vsel %vm972_vm0, %v2012_v49, %v5270_v50  ;;  %v1802_v13 = vsel %vm760_vm1, %v1800_v51, %v1801_v42  ;;  %s4312_s21 = sshll.u32 %s4309_s29, 4  ;;  %s4313_s21 = int_to_ptr.hbm [resolvable:$true] %s4312_s21 }
  0x4c   : > { %v764_v14 = vrot.slane %v698_v59, 1  ;;  %v978_v15 = vrot.slane %v909_v60, 2  ;;  %v1689_v17 = vadd.f32 %v1656_v38, %v1607_v61  ;;  %v1687_v18 = vadd.f32 %v5266_v47, %v1605_v62  ;;  %s4910_s28 = sshra.s32 %s4313_s21, 4  ;;  %s4911_s28 = int_to_ptr.hbm [resolvable:$true] %s4910_s28 }
  0x4d   : > { %v1606_v19 = vadd.f32 %v1494_v57, %v1378_v63  ;;  %v2013_v22 = vsel %vm972_vm0, %v2011_v55, %v2012_v49  ;;  %v1284_v26 = vrot.slane %v5285_v1, 1  ;;  %v1429_v29 = vmul.f32 %v5208_v10, %v5240_v28  ;;  %s4912_s23 = scalar_lea.hbm %s4911_s28, 256  ;;  %p4917_p7 = scmp.lt.s32.totalorder %s4911_s28, %s9601_s13 }
  0x4e   : > { %v860_v24 = vadd.f32 %v764_v14, %v5229_v21  ;;  %v5298_v30 = vmul.f32 %v5210_v11, %v5281_v0  ;;  %v1898_v32 = vadd.f32 %v1801_v42, %v1689_v17  ;;  %v1896_v33 = vadd.f32 %v1800_v51, %v1687_v18  ;;  %p4913_p4 = scmp.ne.s32.totalorder %s4911_s28, %s4912_s23  ;;  %p4918_p8 = scmp.lt.s32.totalorder %s4916_s10, %s4912_s23 }
  0x4f   : > { %v1688_v34 = vadd.f32 %v1655_v58, %v1606_v19  ;;  %v632_v35 = vmul.f32 %v5198_v5, %v5226_v20  ;;  %v1948_v37 = vmul.f32 %v5237_v27, %v5281_v0  ;;  %v699_v38 = vmul.f32 %v5200_v6, %v5191_v3  ;;  %v5327_v58 = vld [vmem:[%s5170_s11 + $0x28] sm:$0xff] }
  0x50   : > { %v1089_v36 = vadd.f32 %v978_v15, %v860_v24  ;;  %v910_v39 = vmul.f32 %v5202_v7, %v5191_v3  ;;  %v5308_v40 = vadd.f32 %v2015_v2, %v1898_v32  ;;  %v5310_v41 = vadd.f32 %v2011_v55, %v1896_v33  ;;  %p4914_p5 = pnand %p4913_p4, %p5108_p9  ;;  %p4919_p10 = por %p4918_p8, %p4917_p7 }
  0x51   : > { %v1897_v42 = vadd.f32 %v1802_v13, %v1688_v34  ;;  %v665_v43 = vadd.f32 %v5196_v4, %v632_v35  ;;  %v1497_v20 = vrot.slane %v1429_v29, 2  ;;  %v765_v45 = vrot.slane %v699_v38, 1 }
  0x52   : > { %v1171_v44 = vadd.f32 %v5246_v31, %v1089_v36  ;;  %v979_v46 = vrot.slane %v910_v39, 2  ;;  %v2181_v48 = vsel %vm2180_vm2, %v5308_v40, 0.0  ;;  %v2173_v49 = vsel %vm2172_vm3, %v5310_v41, 0.0  ;;  %p4915_p6 = pneg %p4914_p5 }
  0x53   : > { %v5318_v51 = vadd.f32 %v2013_v22, %v1897_v42  ;;  %v2367_v52 = vmul.f32 %v5310_v41, %v5310_v41  ;;  %2182 = vadd.xlane.f32.xlu1 %v2181_v48  ;;  %2174 = vadd.xlane.f32.xlu0 %v2173_v49  ;;  %vm2176_vm4 = vcmask 261120   ;;  %v1803_v54 = vrot.slane %v5298_v30, 1 }
  0x54   : > { %v1380_v53 = vadd.f32 %v1284_v26, %v1171_v44  ;;  %v766_v55 = vsel %vm760_vm1, %v764_v14, %v765_v45  ;;  %v2016_v57 = vrot.slane %v1948_v37, 2  ;;  %v1138_v60 = vmul.f32 %v5204_v8, %v5240_v28  ;;  %p4920_p13 = pnand %p4919_p10, %p4915_p6 }
  0x55   : > { %v2368_v56 = vmul.f32 %v5318_v51, %v5318_v51  ;;  %v861_v59 = vadd.f32 %v766_v55, %v665_v43  ;;  %v2369_v61 = vmul.f32 %v5308_v40, %v5308_v40  ;;  %v980_v63 = vsel %vm972_vm0, %v978_v15, %v979_v46 }
  0x56   : > { %v1608_v62 = vadd.f32 %v1497_v20, %v1380_v53  ;;  %v1220_v1 = vmul.f32 %v5206_v9, %v5213_v12  ;;  %v2415_v13 = vsel %vm2172_vm3, %v2367_v52, 0.0  ;;  %v1430_v17 = vmul.f32 %v5208_v10, %v5213_v12  ;;  %v5369_v53 = vld [vmem:[%s5170_s11 + $0x30] sm:$0xff] }
  0x57   : > { %v2418_v2 = vsel %vm2176_vm4, %v2368_v56, 0.0  ;;  %v1090_v14 = vadd.f32 %v980_v63, %v861_v59  ;;  %v5343_v22 = vmul.f32 %v5210_v11, %v5327_v58  ;;  %v1949_v15 = vmul.f32 %v5237_v27, %v5327_v58 }
  0x58   : > { %2419 = vadd.xlane.f32.xlu2 %v2418_v2  ;;  %v1690_v18 = vadd.f32 %v5266_v47, %v1608_v62  ;;  %v1285_v19 = vrot.slane %v1220_v1, 1  ;;  %v2177_v24 = vsel %vm2176_vm4, %v5318_v51, 0.0  ;;  %v1498_v30 = vrot.slane %v1430_v17, 2 }
  0x59   : > { %v1172_v29 = vadd.f32 %v1138_v60, %v1090_v14  ;;  %v633_v32 = vmul.f32 %v5198_v5, %v5191_v3  ;;  %v1804_v35 = vrot.slane %v5343_v22, 1  ;;  %v2017_v36 = vrot.slane %v1949_v15, 2 }
  0x5a   : > { %v1899_v33 = vadd.f32 %v1803_v54, %v1690_v18  ;;  %v1286_v34 = vsel %vm760_vm1, %v1284_v26, %v1285_v19  ;;  %v1499_v38 = vsel %vm972_vm0, %v1497_v20, %v1498_v30  ;;  %v1657_v39 = vmul.f32 %v5218_v16, %v5281_v0 }
  0x5b   : > { %v1381_v37 = vadd.f32 %v1286_v34, %v1172_v29  ;;  %v666_v42 = vadd.f32 %v5196_v4, %v633_v32  ;;  %2416 = vadd.xlane.f32.xlu1 %v2415_v13  ;;  %2178 = vadd.xlane.f32.xlu0 %v2177_v24  ;;  %v2421_v43 = vsel %vm2180_vm2, %v2369_v61, 0.0  ;;  %v981_v26 = vsel %vm972_vm0, %v979_v46, %v5231_v23 }
  0x5c   : > { %v5358_v3 = vadd.f32 %v2016_v57, %v1899_v33  ;;  %v1139_v44 = vmul.f32 %v5204_v8, %v5213_v12  ;;  %v1805_v20 = vsel %vm760_vm1, %v1803_v54, %v1804_v35  ;;  %v2018_v49 = vsel %vm972_vm0, %v2016_v57, %v2017_v36 }
  0x5d   : > { %v1609_v48 = vadd.f32 %v1499_v38, %v1381_v37  ;;  %v862_v52 = vadd.f32 %v765_v45, %v666_v42  ;;  %v1500_v55 = vsel %vm972_vm0, %v1498_v30, %v5233_v25  ;;  %v1658_v56 = vmul.f32 %v5218_v16, %v5327_v58 }
  0x5e   : > { %v2370_v46 = vmul.f32 %v5358_v3, %v5358_v3  ;;  %v700_v59 = vmul.f32 %v5200_v6, %v5240_v28  ;;  %v911_v54 = vmul.f32 %v5202_v7, %v5240_v28  ;;  %v1221_v45 = vmul.f32 %v5206_v9, %v5281_v0 }
  0x5f   : > { %v1691_v60 = vadd.f32 %v1657_v39, %v1609_v48  ;;  %v1091_v61 = vadd.f32 %v981_v26, %v862_v52  ;;  %v2184_v57 = vsel %vm2172_vm3, %v5358_v3, 0.0  ;;  %v5387_v63 = vmul.f32 %v5208_v10, %v5281_v0 }
  0x60   : > { %2422 = vadd.xlane.f32.xlu2 %v2421_v43  ;;  %v767_v62 = vrot.slane %v700_v59, 1  ;;  %v5391_v1 = vmul.f32 %v5210_v11, %v5369_v53  ;;  %v2019_v14 = vsel %vm972_vm0, %v2017_v36, %v5270_v50  ;;  %v982_v17 = vrot.slane %v911_v54, 2 }
  0x61   : > { %v1900_v2 = vadd.f32 %v1805_v20, %v1691_v60  ;;  %v1173_v13 = vadd.f32 %v1139_v44, %v1091_v61  ;;  %v2424_v18 = vsel %vm2172_vm3, %v2370_v46, 0.0  ;;  %v1287_v24 = vrot.slane %v1221_v45, 1  ;;  %v5416_v44 = vld [vmem:[%s5170_s11 + $0x38] sm:$0xff] }
  0x62   : > { %v863_v15 = vadd.f32 %v767_v62, %v5229_v21  ;;  %v1950_v29 = vmul.f32 %v5237_v27, %v5369_v53  ;;  %v634_v33 = vmul.f32 %v5198_v5, %v5240_v28  ;;  %v701_v34 = vmul.f32 %v5200_v6, %v5213_v12 }
  0x63   : > { %v5399_v30 = vadd.f32 %v2018_v49, %v1900_v2  ;;  %v1382_v32 = vadd.f32 %v1285_v19, %v1173_v13  ;;  %2185 = vadd.xlane.f32.xlu0 %v2184_v57  ;;  %v1501_v37 = vrot.slane %v5387_v63, 2  ;;  %v1806_v38 = vrot.slane %v5391_v1, 1 }
  0x64   : > { %v1092_v36 = vadd.f32 %v982_v17, %v863_v15  ;;  %v912_v39 = vmul.f32 %v5202_v7, %v5213_v12  ;;  %v667_v28 = vadd.f32 %v5196_v4, %v634_v33  ;;  %v768_v48 = vrot.slane %v701_v34, 1 }
  0x65   : > { %v2187_v42 = vsel %vm2176_vm4, %v5399_v30, 0.0  ;;  %v1610_v43 = vadd.f32 %v1500_v55, %v1382_v32  ;;  %v2371_v19 = vmul.f32 %v5399_v30, %v5399_v30  ;;  %v1222_v49 = vmul.f32 %v5206_v9, %v5327_v58 }
  0x66   : > { %2188 = vadd.xlane.f32.xlu1 %v2187_v42  ;;  %v1174_v26 = vadd.f32 %v5246_v31, %v1092_v36  ;;  %v983_v20 = vrot.slane %v912_v39, 2  ;;  %v2020_v46 = vrot.slane %v1950_v29, 2  ;;  %v1140_v55 = vmul.f32 %v5204_v8, %v5281_v0 }
  0x67   : > { %v1692_v52 = vadd.f32 %v1658_v56, %v1610_v43  ;;  %v1432_v59 = vmul.f32 %v5208_v10, %v5327_v58  ;;  %v769_v61 = vsel %vm760_vm1, %v767_v62, %v768_v48  ;;  %v1288_v45 = vrot.slane %v1222_v49, 1 }
  0x68   : > { %v1383_v60 = vadd.f32 %v1287_v24, %v1174_v26  ;;  %v984_v54 = vsel %vm972_vm0, %v982_v17, %v983_v20  ;;  %v2427_v63 = vsel %vm2176_vm4, %v2371_v19, 0.0  ;;  %v864_v1 = vadd.f32 %v769_v61, %v667_v28 }
  0x69   : > { %v1901_v57 = vadd.f32 %v1804_v35, %v1692_v52  ;;  %v5431_v56 = vmul.f32 %v5210_v11, %v5416_v44  ;;  %v1502_v13 = vrot.slane %v1432_v59, 2  ;;  %v1951_v15 = vmul.f32 %v5237_v27, %v5416_v44 }
  0x6a   : > { %v1611_v2 = vadd.f32 %v1501_v37, %v1383_v60  ;;  %v635_v62 = vmul.f32 %v5198_v5, %v5213_v12  ;;  %v1093_v29 = vadd.f32 %v984_v54, %v864_v1  ;;  %v1659_v22 = vmul.f32 %v5218_v16, %v5369_v53 }
  0x6b   : > { %v5437_v17 = vadd.f32 %v2019_v14, %v1901_v57  ;;  %v1807_v35 = vrot.slane %v5431_v56, 1  ;;  %2425 = vadd.xlane.f32.xlu0 %v2424_v18  ;;  %v1289_v33 = vsel %vm760_vm1, %v1287_v24, %v1288_v45  ;;  %v2021_v34 = vrot.slane %v1951_v15, 2 }
  0x6c   : > { %v1693_v32 = vadd.f32 %v5266_v47, %v1611_v2  ;;  %v668_v36 = vadd.f32 %v5196_v4, %v635_v62  ;;  %v1175_v14 = vadd.f32 %v1140_v55, %v1093_v29  ;;  %v985_v42 = vsel %vm972_vm0, %v983_v20, %v5231_v23 }
  0x6d   : > { %9307 = vst [vmem:[#allocation28_spill] sm:$0xff] %v5437_v17  ;;  %v2190_v39 = vsel %vm2180_vm2, %v5437_v17, 0.0  ;;  %v2372_v12 = vmul.f32 %v5437_v17, %v5437_v17  ;;  %v1503_v43 = vsel %vm972_vm0, %v1501_v37, %v1502_v13  ;;  %v1808_v28 = vsel %vm760_vm1, %v1806_v38, %v1807_v35 }
  0x6e   : > { %2191 = vadd.xlane.f32.xlu2 %v2190_v39  ;;  %2428 = vadd.xlane.f32.xlu1 %v2427_v63  ;;  %v1902_v18 = vadd.f32 %v1806_v38, %v1693_v32  ;;  %v865_v24 = vadd.f32 %v768_v48, %v668_v36  ;;  %v1384_v19 = vadd.f32 %v1289_v33, %v1175_v14  ;;  %v5464_v48 = vld [vmem:[%s5170_s11 + $0x40] sm:$0xff] }
  0x6f   : > { %v2022_v26 = vsel %vm972_vm0, %v2020_v46, %v2021_v34  ;;  %v1141_v49 = vmul.f32 %v5204_v8, %v5327_v58  ;;  %v2430_v52 = vsel %vm2180_vm2, %v2372_v12, 0.0  ;;  %v1504_v59 = vsel %vm972_vm0, %v1502_v13, %v5233_v25 }
  0x70   : > { %v5459_v55 = vadd.f32 %v2020_v46, %v1902_v18  ;;  %v1094_v20 = vadd.f32 %v985_v42, %v865_v24  ;;  %v1612_v37 = vadd.f32 %v1503_v43, %v1384_v19  ;;  %v702_v60 = vmul.f32 %v5200_v6, %v5281_v0 }
  0x71   : > { %v913_v38 = vmul.f32 %v5202_v7, %v5281_v0  ;;  %v1223_v61 = vmul.f32 %v5206_v9, %v5369_v53  ;;  %v1433_v63 = vmul.f32 %v5208_v10, %v5369_v53  ;;  %v1660_v2 = vmul.f32 %v5218_v16, %v5416_v44 }
  0x72   : > { %9308 = vst [vmem:[#allocation29_spill] sm:$0xff] %v5459_v55  ;;  %v2193_v46 = vsel %vm2172_vm3, %v5459_v55, 0.0  ;;  %v1176_v54 = vadd.f32 %v1141_v49, %v1094_v20  ;;  %v2373_v57 = vmul.f32 %v5459_v55, %v5459_v55  ;;  %v1694_v1 = vadd.f32 %v1659_v22, %v1612_v37 }
  0x73   : > { %v770_v13 = vrot.slane %v702_v60, 1  ;;  %v986_v15 = vrot.slane %v913_v38, 2  ;;  %2194 = vadd.xlane.f32.xlu0 %v2193_v46  ;;  %v2023_v29 = vsel %vm972_vm0, %v2021_v34, %v5270_v50  ;;  %v1290_v32 = vrot.slane %v1223_v61, 1 }
  0x74   : > { %v1385_v62 = vadd.f32 %v1288_v45, %v1176_v54  ;;  %v1742_v33 = vmul.f32 %v5210_v11, %v5464_v48  ;;  %v1903_v36 = vadd.f32 %v1808_v28, %v1694_v1  ;;  %v2433_v39 = vsel %vm2172_vm3, %v2373_v57, 0.0 }
  0x75   : > { %v866_v12 = vadd.f32 %v770_v13, %v5229_v21  ;;  %v636_v22 = vmul.f32 %v5198_v5, %v5281_v0  ;;  %v1505_v42 = vrot.slane %v1433_v63, 2  ;;  %v703_v45 = vmul.f32 %v5200_v6, %v5327_v58 }
  0x76   : > { %2431 = vadd.xlane.f32.xlu2 %v2430_v52  ;;  %v1613_v14 = vadd.f32 %v1504_v59, %v1385_v62  ;;  %v914_v34 = vmul.f32 %v5202_v7, %v5327_v58  ;;  %v5492_v18 = vadd.f32 %v2022_v26, %v1903_v36  ;;  %v1952_v24 = vmul.f32 %v5237_v27, %v5464_v48  ;;  %v5503_v26 = vld [vmem:[%s5170_s11 + $0x48] sm:$0xff] }
  0x77   : > { %v1095_v43 = vadd.f32 %v986_v15, %v866_v12  ;;  %v669_v19 = vadd.f32 %v5196_v4, %v636_v22  ;;  %v1809_v0 = vrot.slane %v1742_v33, 1  ;;  %v771_v49 = vrot.slane %v703_v45, 1 }
  0x78   : > { %9309 = vst [vmem:[#allocation30_spill] sm:$0xff] %v5492_v18  ;;  %v1695_v28 = vadd.f32 %v1660_v2, %v1613_v14  ;;  %v987_v52 = vrot.slane %v914_v34, 2  ;;  %v2196_v20 = vsel %vm2176_vm4, %v5492_v18, 0.0  ;;  %v2374_v59 = vmul.f32 %v5492_v18, %v5492_v18 }
  0x79   : > { %v1177_v37 = vadd.f32 %v5246_v31, %v1095_v43  ;;  %v5507_v60 = vmul.f32 %v5206_v9, %v5416_v44  ;;  %2197 = vadd.xlane.f32.xlu1 %v2196_v20  ;;  %v772_v61 = vsel %vm760_vm1, %v770_v13, %v771_v49  ;;  %v1434_v54 = vmul.f32 %v5208_v10, %v5416_v44 }
  0x7a   : > { %v1904_v38 = vadd.f32 %v1807_v35, %v1695_v28  ;;  %v988_v46 = vsel %vm972_vm0, %v986_v15, %v987_v52  ;;  %v867_v63 = vadd.f32 %v772_v61, %v669_v19  ;;  %v1142_v1 = vmul.f32 %v5204_v8, %v5369_v53  ;;  %v5547_v61 = vld [vmem:[%s5170_s11 + $0x50] sm:$0xff] }
  0x7b   : > { %v1386_v57 = vadd.f32 %v1290_v32, %v1177_v37  ;;  %v1291_v2 = vrot.slane %v5507_v60, 1  ;;  %2434 = vadd.xlane.f32.xlu0 %v2433_v39  ;;  %v2024_v33 = vrot.slane %v1952_v24, 2  ;;  %v1506_v56 = vrot.slane %v1434_v54, 2 }
  0x7c   : > { %v5518_v62 = vadd.f32 %v2023_v29, %v1904_v38  ;;  %v5522_v35 = vmul.f32 %v5210_v11, %v5503_v26  ;;  %v2436_v13 = vsel %vm2176_vm4, %v2374_v59, 0.0  ;;  %v1096_v36 = vadd.f32 %v988_v46, %v867_v63 }
  0x7d   : > { %v1614_v15 = vadd.f32 %v1505_v42, %v1386_v57  ;;  %v1953_v12 = vmul.f32 %v5237_v27, %v5503_v26  ;;  %v1292_v39 = vsel %vm760_vm1, %v1290_v32, %v1291_v2  ;;  %v637_v24 = vmul.f32 %v5198_v5, %v5327_v58 }
  0x7e   : > { %9310 = vst [vmem:[#allocation31_spill] sm:$0xff] %v5518_v62  ;;  %v2199_v22 = vsel %vm2180_vm2, %v5518_v62, 0.0  ;;  %v2375_v29 = vmul.f32 %v5518_v62, %v5518_v62  ;;  %v1810_v14 = vrot.slane %v5522_v35, 1  ;;  %v1178_v34 = vadd.f32 %v1142_v1, %v1096_v36 }
  0x7f   : > { %2200 = vadd.xlane.f32.xlu2 %v2199_v22  ;;  %v1696_v45 = vadd.f32 %v5266_v47, %v1614_v15  ;;  %v2025_v43 = vrot.slane %v1953_v12, 2  ;;  %v1507_v28 = vsel %vm972_vm0, %v1505_v42, %v1506_v56  ;;  %v1661_v20 = vmul.f32 %v5218_v16, %v5464_v48 }
  0x80   : > { %v2439_v19 = vsel %vm2180_vm2, %v2375_v29, 0.0  ;;  %v1811_v32 = vsel %vm760_vm1, %v1809_v0, %v1810_v14  ;;  %v1387_v37 = vadd.f32 %v1292_v39, %v1178_v34  ;;  %v670_v60 = vadd.f32 %v5196_v4, %v637_v24 }
  0x81   : > { %v1905_v59 = vadd.f32 %v1809_v0, %v1696_v45  ;;  %v989_v38 = vsel %vm972_vm0, %v987_v52, %v5231_v23  ;;  %2437 = vadd.xlane.f32.xlu1 %v2436_v13  ;;  %v2026_v58 = vsel %vm972_vm0, %v2024_v33, %v2025_v43  ;;  %v1143_v42 = vmul.f32 %v5204_v8, %v5416_v44 }
  0x82   : > { %v1508_v46 = vsel %vm972_vm0, %v1506_v56, %v5233_v25  ;;  %v704_v0 = vmul.f32 %v5200_v6, %v5369_v53  ;;  %v1615_v57 = vadd.f32 %v1507_v28, %v1387_v37  ;;  %v868_v63 = vadd.f32 %v771_v49, %v670_v60 }
  0x83   : > { %v5556_v54 = vadd.f32 %v2024_v33, %v1905_v59  ;;  %v915_v52 = vmul.f32 %v5202_v7, %v5369_v53  ;;  %v1225_v13 = vmul.f32 %v5206_v9, %v5464_v48  ;;  %v1435_v15 = vmul.f32 %v5208_v10, %v5464_v48 }
  0x84   : > { %v773_v1 = vrot.slane %v704_v0, 1  ;;  %v5566_v56 = vmul.f32 %v5210_v11, %v5547_v61  ;;  %v1697_v36 = vadd.f32 %v1661_v20, %v1615_v57  ;;  %v1097_v12 = vadd.f32 %v989_v38, %v868_v63 }
  0x85   : > { %9311 = vst [vmem:[#allocation32_spill] sm:$0xff] %v5556_v54  ;;  %v2202_v33 = vsel %vm2172_vm3, %v5556_v54, 0.0  ;;  %v2376_v49 = vmul.f32 %v5556_v54, %v5556_v54  ;;  %v1662_v22 = vmul.f32 %v5218_v16, %v5503_v26  ;;  %v2027_v29 = vsel %vm972_vm0, %v2025_v43, %v5270_v50 }
  0x86   : > { %2203 = vadd.xlane.f32.xlu0 %v2202_v33  ;;  %v869_v39 = vadd.f32 %v773_v1, %v5229_v21  ;;  %v990_v45 = vrot.slane %v915_v52, 2  ;;  %v1906_v34 = vadd.f32 %v1811_v32, %v1697_v36  ;;  %v1179_v24 = vadd.f32 %v1143_v42, %v1097_v12 }
  0x87   : > { %2440 = vadd.xlane.f32.xlu2 %v2439_v19  ;;  %v1293_v28 = vrot.slane %v1225_v13, 1  ;;  %v1509_v59 = vrot.slane %v1435_v15, 2  ;;  %v2442_v20 = vsel %vm2172_vm3, %v2376_v49, 0.0  ;;  %v638_v60 = vmul.f32 %v5198_v5, %v5369_v53 }
  0x88   : > { %v1098_v37 = vadd.f32 %v990_v45, %v869_v39  ;;  %v705_v38 = vmul.f32 %v5200_v6, %v5416_v44  ;;  %v5582_v0 = vadd.f32 %v2026_v58, %v1906_v34  ;;  %v1388_v43 = vadd.f32 %v1291_v2, %v1179_v24 }
  0x89   : > { %v1812_v57 = vrot.slane %v5566_v56, 1  ;;  %v916_v19 = vmul.f32 %v5202_v7, %v5416_v44  ;;  %v1954_v42 = vmul.f32 %v5237_v27, %v5547_v61  ;;  %v671_v63 = vadd.f32 %v5196_v4, %v638_v60  ;;  %v5596_v56 = vld [vmem:[%s5170_s11 + $0x58] sm:$0xff] }
  0x8a   : > { %9312 = vst [vmem:[#allocation33_spill] sm:$0xff] %v5582_v0  ;;  %v1180_v32 = vadd.f32 %v5246_v31, %v1098_v37  ;;  %v774_v53 = vrot.slane %v705_v38, 1  ;;  %v2205_v52 = vsel %vm2176_vm4, %v5582_v0, 0.0  ;;  %v1616_v13 = vadd.f32 %v1508_v46, %v1388_v43 }
  0x8b   : > { %v2377_v2 = vmul.f32 %v5582_v0, %v5582_v0  ;;  %v991_v58 = vrot.slane %v916_v19, 2  ;;  %2206 = vadd.xlane.f32.xlu1 %v2205_v52  ;;  %v1226_v36 = vmul.f32 %v5206_v9, %v5503_v26  ;;  %v1436_v12 = vmul.f32 %v5208_v10, %v5503_v26 }
  0x8c   : > { %v1389_v15 = vadd.f32 %v1293_v28, %v1180_v32  ;;  %v775_v33 = vsel %vm760_vm1, %v773_v1, %v774_v53  ;;  %v1698_v49 = vadd.f32 %v1662_v22, %v1616_v13  ;;  %v1144_v34 = vmul.f32 %v5204_v8, %v5464_v48 }
  0x8d   : > { %v870_v39 = vadd.f32 %v775_v33, %v671_v63  ;;  %v992_v46 = vsel %vm972_vm0, %v990_v45, %v991_v58  ;;  %v2028_v37 = vrot.slane %v1954_v42, 2  ;;  %v1294_v60 = vrot.slane %v1226_v36, 1 }
  0x8e   : > { %2443 = vadd.xlane.f32.xlu0 %v2442_v20  ;;  %v1617_v24 = vadd.f32 %v1509_v59, %v1389_v15  ;;  %v1510_v38 = vrot.slane %v1436_v12, 2  ;;  %v1907_v1 = vadd.f32 %v1810_v14, %v1698_v49  ;;  %v5610_v19 = vmul.f32 %v5210_v11, %v5596_v56 }
  0x8f   : > { %v1099_v43 = vadd.f32 %v992_v46, %v870_v39  ;;  %v1955_v22 = vmul.f32 %v5237_v27, %v5596_v56  ;;  %v2445_v45 = vsel %vm2176_vm4, %v2377_v2, 0.0  ;;  %v1295_v20 = vsel %vm760_vm1, %v1293_v28, %v1294_v60 }
  0x90   : > { %v1699_v32 = vadd.f32 %v5266_v47, %v1617_v24  ;;  %v639_v42 = vmul.f32 %v5198_v5, %v5416_v44  ;;  %v5619_v63 = vadd.f32 %v2027_v29, %v1907_v1  ;;  %v1813_v14 = vrot.slane %v5610_v19, 1  ;;  %v5642_v1 = vld [vmem:[%s5170_s11 + $0x60] sm:$0xff] }
  0x91   : > { %v1181_v35 = vadd.f32 %v1144_v34, %v1099_v43  ;;  %v2029_v52 = vrot.slane %v1955_v22, 2  ;;  %v1511_v15 = vsel %vm972_vm0, %v1509_v59, %v1510_v38  ;;  %v1663_v2 = vmul.f32 %v5218_v16, %v5547_v61 }
  0x92   : > { %9313 = vst [vmem:[#allocation34_spill] sm:$0xff] %v5619_v63  ;;  %v1908_v13 = vadd.f32 %v1812_v57, %v1699_v32  ;;  %v672_v33 = vadd.f32 %v5196_v4, %v639_v42  ;;  %v2208_v28 = vsel %vm2180_vm2, %v5619_v63, 0.0  ;;  %v2378_v44 = vmul.f32 %v5619_v63, %v5619_v63 }
  0x93   : > { %v1390_v29 = vadd.f32 %v1295_v20, %v1181_v35  ;;  %v993_v36 = vsel %vm972_vm0, %v991_v58, %v5231_v23  ;;  %2209 = vadd.xlane.f32.xlu2 %v2208_v28  ;;  %2446 = vadd.xlane.f32.xlu1 %v2445_v45  ;;  %v1145_v49 = vmul.f32 %v5204_v8, %v5503_v26 }
  0x94   : > { %v5632_v12 = vadd.f32 %v2028_v37, %v1908_v13  ;;  %v871_v59 = vadd.f32 %v774_v53, %v672_v33  ;;  %v2448_v39 = vsel %vm2180_vm2, %v2378_v44, 0.0  ;;  %v1814_v34 = vsel %vm760_vm1, %v1812_v57, %v1813_v14 }
  0x95   : > { %v1618_v46 = vadd.f32 %v1511_v15, %v1390_v29  ;;  %v2030_v24 = vsel %vm972_vm0, %v2028_v37, %v2029_v52  ;;  %v1512_v53 = vsel %vm972_vm0, %v1510_v38, %v5233_v25  ;;  %v706_v32 = vmul.f32 %v5200_v6, %v5464_v48 }
  0x96   : > { %9314 = vst [vmem:[#allocation35_spill] sm:$0xff] %v5632_v12  ;;  %v2211_v58 = vsel %vm2172_vm3, %v5632_v12, 0.0  ;;  %v1100_v43 = vadd.f32 %v993_v36, %v871_v59  ;;  %v2379_v22 = vmul.f32 %v5632_v12, %v5632_v12  ;;  %v917_v57 = vmul.f32 %v5202_v7, %v5464_v48 }
  0x97   : > { %2212 = vadd.xlane.f32.xlu0 %v2211_v58  ;;  %v1700_v45 = vadd.f32 %v1663_v2, %v1618_v46  ;;  %v1227_v37 = vmul.f32 %v5206_v9, %v5547_v61  ;;  %v1664_v42 = vmul.f32 %v5218_v16, %v5596_v56  ;;  %v1437_v38 = vmul.f32 %v5208_v10, %v5547_v61 }
  0x98   : > { %v1182_v20 = vadd.f32 %v1145_v49, %v1100_v43  ;;  %v5662_v35 = vmul.f32 %v5210_v11, %v5642_v1  ;;  %v2031_v15 = vsel %vm972_vm0, %v2029_v52, %v5270_v50  ;;  %v776_v2 = vrot.slane %v706_v32, 1 }
  0x99   : > { %v1909_v13 = vadd.f32 %v1814_v34, %v1700_v45  ;;  %v994_v33 = vrot.slane %v917_v57, 2  ;;  %v2451_v44 = vsel %vm2172_vm3, %v2379_v22, 0.0  ;;  %v1296_v29 = vrot.slane %v1227_v37, 1  ;;  %v5687_v57 = vld [vmem:[%s5170_s11 + $0x68] sm:$0xff] }
  0x9a   : > { %v1391_v28 = vadd.f32 %v1294_v60, %v1182_v20  ;;  %v5669_v36 = vmul.f32 %v5237_v27, %v5642_v1  ;;  %v872_v49 = vadd.f32 %v776_v2, %v5229_v21  ;;  %v640_v46 = vmul.f32 %v5198_v5, %v5464_v48 }
  0x9b   : > { %v5671_v59 = vadd.f32 %v2030_v24, %v1909_v13  ;;  %v707_v52 = vmul.f32 %v5200_v6, %v5503_v26  ;;  %2449 = vadd.xlane.f32.xlu2 %v2448_v39  ;;  %v1513_v34 = vrot.slane %v1437_v38, 2  ;;  %v1815_v58 = vrot.slane %v5662_v35, 1 }
  0x9c   : > { %v1619_v60 = vadd.f32 %v1512_v53, %v1391_v28  ;;  %v918_v43 = vmul.f32 %v5202_v7, %v5503_v26  ;;  %v1101_v45 = vadd.f32 %v994_v33, %v872_v49  ;;  %v673_v48 = vadd.f32 %v5196_v4, %v640_v46 }
  0x9d   : > { %9315 = vst [vmem:[#allocation36_spill] sm:$0xff] %v5671_v59  ;;  %v2214_v24 = vsel %vm2176_vm4, %v5671_v59, 0.0  ;;  %v2380_v22 = vmul.f32 %v5671_v59, %v5671_v59  ;;  %v777_v39 = vrot.slane %v707_v52, 1  ;;  %v1228_v37 = vmul.f32 %v5206_v9, %v5596_v56 }
  0x9e   : > { %2215 = vadd.xlane.f32.xlu1 %v2214_v24  ;;  %v1701_v32 = vadd.f32 %v1664_v42, %v1619_v60  ;;  %v995_v53 = vrot.slane %v918_v43, 2  ;;  %v1183_v20 = vadd.f32 %v5246_v31, %v1101_v45  ;;  %v2032_v38 = vrot.slane %v5669_v36, 2 }
  0x9f   : > { %2452 = vadd.xlane.f32.xlu0 %v2451_v44  ;;  %v1146_v35 = vmul.f32 %v5204_v8, %v5547_v61  ;;  %v1438_v13 = vmul.f32 %v5208_v10, %v5596_v56  ;;  %v778_v28 = vsel %vm760_vm1, %v776_v2, %v777_v39  ;;  %v1297_v46 = vrot.slane %v1228_v37, 1 }
  0xa0   : > { %v1910_v42 = vadd.f32 %v1813_v14, %v1701_v32  ;;  %v996_v49 = vsel %vm972_vm0, %v994_v33, %v995_v53  ;;  %v2454_v44 = vsel %vm2176_vm4, %v2380_v22, 0.0  ;;  %v1392_v52 = vadd.f32 %v1296_v29, %v1183_v20 }
  0xa1   : > { %v873_v60 = vadd.f32 %v778_v28, %v673_v48  ;;  %v5704_v36 = vmul.f32 %v5210_v11, %v5687_v57  ;;  %v1514_v24 = vrot.slane %v1438_v13, 2  ;;  %v1957_v19 = vmul.f32 %v5237_v27, %v5687_v57 }
  0xa2   : > { %v5706_v43 = vadd.f32 %v2031_v15, %v1910_v42  ;;  %v641_v14 = vmul.f32 %v5198_v5, %v5503_v26  ;;  %v1620_v2 = vadd.f32 %v1513_v34, %v1392_v52  ;;  %v1298_v45 = vsel %vm760_vm1, %v1296_v29, %v1297_v46 }
  0xa3   : > { %v1102_v33 = vadd.f32 %v996_v49, %v873_v60  ;;  %v1816_v22 = vrot.slane %v5704_v36, 1  ;;  %v2033_v32 = vrot.slane %v1957_v19, 2  ;;  %v997_v13 = vsel %vm972_vm0, %v995_v53, %v5231_v23 }
  0xa4   : > { %9316 = vst [vmem:[#allocation37_spill] sm:$0xff] %v5706_v43  ;;  %v2217_v48 = vsel %vm2180_vm2, %v5706_v43, 0.0  ;;  %v2381_v15 = vmul.f32 %v5706_v43, %v5706_v43  ;;  %v674_v37 = vadd.f32 %v5196_v4, %v641_v14  ;;  %v1702_v20 = vadd.f32 %v5266_v47, %v1620_v2  ;;  %v5733_v14 = vld [vmem:[%s5170_s11 + $0x70] sm:$0xff] }
  0xa5   : > { %2218 = vadd.xlane.f32.xlu2 %v2217_v48  ;;  %v1184_v26 = vadd.f32 %v1146_v35, %v1102_v33  ;;  %v1515_v29 = vsel %vm972_vm0, %v1513_v34, %v1514_v24  ;;  %v1665_v42 = vmul.f32 %v5218_v16, %v5642_v1  ;;  %v1147_v49 = vmul.f32 %v5204_v8, %v5596_v56 }
  0xa6   : > { %2455 = vadd.xlane.f32.xlu1 %v2454_v44  ;;  %v874_v28 = vadd.f32 %v777_v39, %v674_v37  ;;  %v2457_v52 = vsel %vm2180_vm2, %v2381_v15, 0.0  ;;  %v1911_v60 = vadd.f32 %v1815_v58, %v1702_v20  ;;  %v1817_v35 = vsel %vm760_vm1, %v1815_v58, %v1816_v22 }
  0xa7   : > { %v1393_v19 = vadd.f32 %v1298_v45, %v1184_v26  ;;  %v2034_v53 = vsel %vm972_vm0, %v2032_v38, %v2033_v32  ;;  %v708_v34 = vmul.f32 %v5200_v6, %v5547_v61  ;;  %v919_v39 = vmul.f32 %v5202_v7, %v5547_v61 }
  0xa8   : > { %v1103_v44 = vadd.f32 %v997_v13, %v874_v28  ;;  %v5739_v2 = vadd.f32 %v2032_v38, %v1911_v60  ;;  %v1229_v45 = vmul.f32 %v5206_v9, %v5642_v1  ;;  %v5745_v58 = vmul.f32 %v5208_v10, %v5642_v1 }
  0xa9   : > { %v1621_v33 = vadd.f32 %v1515_v29, %v1393_v19  ;;  %v1516_v15 = vsel %vm972_vm0, %v1514_v24, %v5233_v25  ;;  %v779_v37 = vrot.slane %v708_v34, 1  ;;  %v998_v20 = vrot.slane %v919_v39, 2 }
  0xaa   : > { %9317 = vst [vmem:[#allocation38_spill] sm:$0xff] %v5739_v2  ;;  %v1185_v48 = vadd.f32 %v1147_v49, %v1103_v44  ;;  %v2220_v26 = vsel %vm2172_vm3, %v5739_v2, 0.0  ;;  %v2382_v38 = vmul.f32 %v5739_v2, %v5739_v2  ;;  %v5755_v29 = vmul.f32 %v5210_v11, %v5733_v14 }
  0xab   : > { %v1703_v13 = vadd.f32 %v1665_v42, %v1621_v33  ;;  %2221 = vadd.xlane.f32.xlu0 %v2220_v26  ;;  %v1666_v49 = vmul.f32 %v5218_v16, %v5687_v57  ;;  %v2035_v24 = vsel %vm972_vm0, %v2033_v32, %v5270_v50  ;;  %v875_v60 = vadd.f32 %v779_v37, %v5229_v21 }
  0xac   : > { %v1394_v28 = vadd.f32 %v1297_v46, %v1185_v48  ;;  %v1299_v42 = vrot.slane %v1229_v45, 1  ;;  %v1517_v44 = vrot.slane %v5745_v58, 2  ;;  %v642_v34 = vmul.f32 %v5198_v5, %v5547_v61 }
  0xad   : > { %2458 = vadd.xlane.f32.xlu2 %v2457_v52  ;;  %v1912_v19 = vadd.f32 %v1817_v35, %v1703_v13  ;;  %v1104_v33 = vadd.f32 %v998_v20, %v875_v60  ;;  %v709_v46 = vmul.f32 %v5200_v6, %v5596_v56  ;;  %v920_v48 = vmul.f32 %v5202_v7, %v5596_v56  ;;  %v5780_v60 = vld [vmem:[%s5170_s11 + $0x78] sm:$0xff] }
  0xae   : > { %v1622_v39 = vadd.f32 %v1516_v15, %v1394_v28  ;;  %v2460_v52 = vsel %vm2172_vm3, %v2382_v38, 0.0  ;;  %v1818_v35 = vrot.slane %v5755_v29, 1  ;;  %v675_v45 = vadd.f32 %v5196_v4, %v642_v34 }
  0xaf   : > { %v5769_v32 = vadd.f32 %v2034_v53, %v1912_v19  ;;  %v1186_v26 = vadd.f32 %v5246_v31, %v1104_v33  ;;  %v780_v61 = vrot.slane %v709_v46, 1  ;;  %v999_v15 = vrot.slane %v920_v48, 2 }
  0xb0   : > { %v1704_v58 = vadd.f32 %v1666_v49, %v1622_v39  ;;  %v1958_v28 = vmul.f32 %v5237_v27, %v5733_v14  ;;  %v5784_v53 = vmul.f32 %v5206_v9, %v5687_v57  ;;  %v1440_v4 = vmul.f32 %v5208_v10, %v5687_v57 }
  0xb1   : > { %9318 = vst [vmem:[#allocation39_spill] sm:$0xff] %v5769_v32  ;;  %v2223_v13 = vsel %vm2176_vm4, %v5769_v32, 0.0  ;;  %v1395_v29 = vadd.f32 %v1299_v42, %v1186_v26  ;;  %v781_v49 = vsel %vm760_vm1, %v779_v37, %v780_v61  ;;  %v1000_v19 = vsel %vm972_vm0, %v998_v20, %v999_v15 }
  0xb2   : > { %2224 = vadd.xlane.f32.xlu1 %v2223_v13  ;;  %v1913_v38 = vadd.f32 %v1816_v22, %v1704_v58  ;;  %v2383_v34 = vmul.f32 %v5769_v32, %v5769_v32  ;;  %v876_v39 = vadd.f32 %v781_v49, %v675_v45  ;;  %v1148_v33 = vmul.f32 %v5204_v8, %v5642_v1 }
  0xb3   : > { %v1300_v46 = vrot.slane %v5784_v53, 1  ;;  %2461 = vadd.xlane.f32.xlu0 %v2460_v52  ;;  %v1623_v13 = vadd.f32 %v1517_v44, %v1395_v29  ;;  %v1518_v36 = vrot.slane %v1440_v4, 2  ;;  %v5801_v22 = vmul.f32 %v5210_v11, %v5780_v60 }
  0xb4   : > { %v5797_v48 = vadd.f32 %v2035_v24, %v1913_v38  ;;  %v2036_v37 = vrot.slane %v1958_v28, 2  ;;  %v1105_v20 = vadd.f32 %v1000_v19, %v876_v39  ;;  %v1959_v45 = vmul.f32 %v5237_v27, %v5780_v60 }
  0xb5   : > { %v1301_v58 = vsel %vm760_vm1, %v1299_v42, %v1300_v46  ;;  %v1705_v52 = vadd.f32 %v5266_v47, %v1623_v13  ;;  %v2463_v4 = vsel %vm2176_vm4, %v2383_v34, 0.0  ;;  %v643_v42 = vmul.f32 %v5198_v5, %v5596_v56  ;;  %v5827_v56 = vld [vmem:[%s9136_s4] ss:$0 sm:$0xff] }
  0xb6   : > { %9319 = vst [vmem:[#allocation40_spill] sm:$0xff] %v5797_v48  ;;  %v2226_v26 = vsel %vm2180_vm2, %v5797_v48, 0.0  ;;  %v2384_v24 = vmul.f32 %v5797_v48, %v5797_v48  ;;  %v1187_v28 = vadd.f32 %v1148_v33, %v1105_v20  ;;  %v2037_v38 = vrot.slane %v1959_v45, 2  ;;  %v5854_v48 = vld [vmem:[%s5170_s11 + $0x80] sm:$0xff] }
  0xb7   : > { %2227 = vadd.xlane.f32.xlu2 %v2226_v26  ;;  %v1914_v29 = vadd.f32 %v1818_v35, %v1705_v52  ;;  %v1519_v49 = vsel %vm972_vm0, %v1517_v44, %v1518_v36  ;;  %v1667_v19 = vmul.f32 %v5218_v16, %v5733_v14  ;;  %v1001_v39 = vsel %vm972_vm0, %v999_v15, %v5231_v23 }
  0xb8   : > { %v2466_v13 = vsel %vm2180_vm2, %v2384_v24, 0.0  ;;  %v1396_v53 = vadd.f32 %v1301_v58, %v1187_v28  ;;  %v9320_v26 = vrot.slane %v5801_v22, 1  ;;  %v676_v44 = vadd.f32 %v5827_v56, %v643_v42 }
  0xb9   : > { %v5830_v33 = vadd.f32 %v2036_v37, %v1914_v29  ;;  %v2038_v20 = vsel %vm972_vm0, %v2036_v37, %v2037_v38  ;;  %v1149_v15 = vmul.f32 %v5204_v8, %v5687_v57  ;;  %v710_v58 = vmul.f32 %v5200_v6, %v5642_v1 }
  0xba   : > { %v1820_v34 = vsel %vm760_vm1, %v1818_v35, %v9320_v26  ;;  %2464 = vadd.xlane.f32.xlu1 %v2463_v4  ;;  %v1624_v35 = vadd.f32 %v1519_v49, %v1396_v53  ;;  %v877_v45 = vadd.f32 %v780_v61, %v676_v44  ;;  %v921_v24 = vmul.f32 %v5202_v7, %v5642_v1 }
  0xbb   : > { %9321 = vst [vmem:[#allocation41_spill] sm:$0xff] %v5830_v33  ;;  %v1231_v52 = vmul.f32 %v5206_v9, %v5733_v14  ;;  %v2229_v4 = vsel %vm2172_vm3, %v5830_v33, 0.0  ;;  %v2385_v37 = vmul.f32 %v5830_v33, %v5830_v33  ;;  %v782_v28 = vrot.slane %v710_v58, 1 }
  0xbc   : > { %v1441_v42 = vmul.f32 %v5208_v10, %v5733_v14  ;;  %2230 = vadd.xlane.f32.xlu0 %v2229_v4  ;;  %v1706_v29 = vadd.f32 %v1667_v19, %v1624_v35  ;;  %v1106_v53 = vadd.f32 %v1001_v39, %v877_v45  ;;  %v1520_v61 = vsel %vm972_vm0, %v1518_v36, %v5233_v25 }
  0xbd   : > { %v1002_v49 = vrot.slane %v921_v24, 2  ;;  %v1668_v26 = vmul.f32 %v5218_v16, %v5780_v60  ;;  %v2039_v44 = vsel %vm972_vm0, %v2037_v38, %v5270_v50  ;;  %v878_v58 = vadd.f32 %v782_v28, %v5229_v21 }
  0xbe   : > { %v1302_v33 = vrot.slane %v1231_v52, 1  ;;  %v1915_v32 = vadd.f32 %v1820_v34, %v1706_v29  ;;  %v1188_v4 = vadd.f32 %v1149_v15, %v1106_v53  ;;  %v2469_v19 = vsel %vm2172_vm3, %v2385_v37, 0.0 }
  0xbf   : > { %2467 = vadd.xlane.f32.xlu2 %v2466_v13  ;;  %v644_v36 = vmul.f32 %v5198_v5, %v5642_v1  ;;  %v1107_v39 = vadd.f32 %v1002_v49, %v878_v58  ;;  %v1521_v35 = vrot.slane %v1441_v42, 2  ;;  %v711_v45 = vmul.f32 %v5200_v6, %v5687_v57 }
  0xc0   : > { %v922_v38 = vmul.f32 %v5202_v7, %v5687_v57  ;;  %v5864_v24 = vadd.f32 %v2038_v20, %v1915_v32  ;;  %v1397_v52 = vadd.f32 %v1300_v46, %v1188_v4  ;;  %v1750_v13 = vmul.f32 %v5210_v11, %v5854_v48  ;;  %v5877_v46 = vld [vmem:[%s5170_s11 + $0x88] sm:$0xff] }
  0xc1   : > { %v677_v34 = vadd.f32 %v5827_v56, %v644_v36  ;;  %v1189_v15 = vadd.f32 %v5246_v31, %v1107_v39  ;;  %v1960_v1 = vmul.f32 %v5237_v27, %v5854_v48  ;;  %v783_v37 = vrot.slane %v711_v45, 1 }
  0xc2   : > { %9322 = vst [vmem:[#allocation42_spill] sm:$0xff] %v5864_v24  ;;  %v1003_v42 = vrot.slane %v922_v38, 2  ;;  %v2232_v29 = vsel %vm2176_vm4, %v5864_v24, 0.0  ;;  %v1625_v53 = vadd.f32 %v1520_v61, %v1397_v52  ;;  %v2386_v32 = vmul.f32 %v5864_v24, %v5864_v24 }
  0xc3   : > { %v5881_v20 = vmul.f32 %v5206_v9, %v5780_v60  ;;  %2233 = vadd.xlane.f32.xlu1 %v2232_v29  ;;  %v1398_v58 = vadd.f32 %v1302_v33, %v1189_v15  ;;  %v784_v4 = vsel %vm760_vm1, %v782_v28, %v783_v37  ;;  %v1442_v39 = vmul.f32 %v5208_v10, %v5780_v60 }
  0xc4   : > { %v1004_v36 = vsel %vm972_vm0, %v1002_v49, %v1003_v42  ;;  %v1707_v45 = vadd.f32 %v1668_v26, %v1625_v53  ;;  %2470 = vadd.xlane.f32.xlu0 %v2469_v19  ;;  %v879_v61 = vadd.f32 %v784_v4, %v677_v34  ;;  %v1150_v38 = vmul.f32 %v5204_v8, %v5733_v14 }
  0xc5   : > { %v1303_v52 = vrot.slane %v5881_v20, 1  ;;  %v1626_v24 = vadd.f32 %v1521_v35, %v1398_v58  ;;  %v1821_v2 = vrot.slane %v1750_v13, 1  ;;  %v1522_v43 = vrot.slane %v1442_v39, 2 }
  0xc6   : > { %v5892_v15 = vmul.f32 %v5210_v11, %v5877_v46  ;;  %v9323_v28 = vrot.slane %v5801_v22, 1  ;;  %v2040_v29 = vrot.slane %v1960_v1, 2  ;;  %v1108_v59 = vadd.f32 %v1004_v36, %v879_v61  ;;  %v2183_v19 = vpop.xlane.xlu1 %2182  ;;  %v2175_v34 = vpop.xlane.xlu0 %2174 }
  0xc7   : > { %v5898_v26 = vmul.f32 %v5237_v27, %v5877_v46  ;;  %v2472_v53 = vsel %vm2176_vm4, %v2386_v32, 0.0  ;;  %v1708_v13 = vadd.f32 %v5266_v47, %v1626_v24  ;;  %v1304_v20 = vsel %vm760_vm1, %v1302_v33, %v1303_v52 }
  0xc8   : > { %v1916_v49 = vadd.f32 %v9323_v28, %v1707_v45  ;;  %v645_v58 = vmul.f32 %v5198_v5, %v5687_v57  ;;  %v1190_v22 = vadd.f32 %v1150_v38, %v1108_v59  ;;  %v1523_v1 = vsel %vm972_vm0, %v1521_v35, %v1522_v43 }
  0xc9   : > { %v1669_v36 = vmul.f32 %v5218_v16, %v5854_v48  ;;  %v1917_v39 = vadd.f32 %v1821_v2, %v1708_v13  ;;  %v1822_v45 = vrot.slane %v5892_v15, 1  ;;  %v2041_v32 = vrot.slane %v5898_v26, 2 }
  0xca   : > { %v5905_v4 = vadd.f32 %v2039_v44, %v1916_v49  ;;  %v678_v24 = vadd.f32 %v5827_v56, %v645_v58  ;;  %v1399_v61 = vadd.f32 %v1304_v20, %v1190_v22  ;;  %v1005_v57 = vsel %vm972_vm0, %v1003_v42, %v5231_v23 }
  0xcb   : > { %v1151_v59 = vmul.f32 %v5204_v8, %v5780_v60  ;;  %v2420_v44 = vpop.xlane.xlu2 %2419  ;;  %2473 = vadd.xlane.f32.xlu1 %v2472_v53  ;;  %v5921_v38 = vadd.f32 %v2040_v29, %v1917_v39  ;;  %v1823_v26 = vsel %vm760_vm1, %v1821_v2, %v1822_v45  ;;  %v2042_v42 = vsel %vm972_vm0, %v2040_v29, %v2041_v32 }
  0xcc   : > { %9324 = vst [vmem:[#allocation43_spill] sm:$0xff] %v5905_v4  ;;  %v2235_v33 = vsel %vm2180_vm2, %v5905_v4, 0.0  ;;  %v2387_v35 = vmul.f32 %v5905_v4, %v5905_v4  ;;  %v880_v15 = vadd.f32 %v783_v37, %v678_v24  ;;  %v1627_v28 = vadd.f32 %v1523_v1, %v1399_v61 }
  0xcd   : > { %2236 = vadd.xlane.f32.xlu2 %v2235_v33  ;;  %9325 = vst [vmem:[#allocation44_spill] sm:$0xff] %v5921_v38  ;;  %v2238_v49 = vsel %vm2172_vm3, %v5921_v38, 0.0  ;;  %v1524_v53 = vsel %vm972_vm0, %v1522_v43, %v5233_v25  ;;  %v5929_v58 = vmul.f32 0.03125, %v2183_v19  ;;  %v2388_v22 = vmul.f32 %v5921_v38, %v5921_v38 }
  0xce   : > { %v1109_v13 = vadd.f32 %v1005_v57, %v880_v15  ;;  %2239 = vadd.xlane.f32.xlu0 %v2238_v49  ;;  %v1709_v20 = vadd.f32 %v1669_v36, %v1627_v28  ;;  %v2417_v37 = vpop.xlane.xlu1 %2416  ;;  %v2179_v1 = vpop.xlane.xlu0 %2178  ;;  %v2475_v39 = vsel %vm2180_vm2, %v2387_v35, 0.0  ;;  %v5938_v2 = vmul.f32 %v5200_v6, %v5733_v14 }
  0xcf   : > { %v5934_v33 = vmul.f32 0.03125, %v2179_v1  ;;  %v1670_v43 = vmul.f32 %v5218_v16, %v5877_v46  ;;  %v5942_v19 = vmul.f32 0.03125, %v2175_v34  ;;  %v2560_v36 = vmul.f32 0.03125, %v2420_v44 }
  0xd0   : > { %v1191_v24 = vadd.f32 %v1151_v59, %v1109_v13  ;;  %v1918_v29 = vadd.f32 %v1823_v26, %v1709_v20  ;;  %v2559_v57 = vmul.f32 0.03125, %v2417_v37  ;;  %v785_v59 = vrot.slane %v5938_v2, 1 }
  0xd1   : > { %v2608_v15 = vmul.f32 %v5934_v33, %v5934_v33  ;;  %v2478_v28 = vsel %vm2172_vm3, %v2388_v22, 0.0  ;;  %v5952_v26 = vmul.f32 %v5202_v7, %v5733_v14  ;;  %v5956_v34 = vmul.f32 %v5206_v9, %v5854_v48 }
  0xd2   : > { %v1400_v61 = vadd.f32 %v1303_v52, %v1191_v24  ;;  %v5947_v35 = vadd.f32 %v2042_v42, %v1918_v29  ;;  %v881_v20 = vadd.f32 %v785_v59, %v5229_v21  ;;  %v2609_v1 = vmul.f32 %v5929_v58, %v5929_v58 }
  0xd3   : > { %v2423_v49 = vpop.xlane.xlu2 %2422  ;;  %v2656_v44 = vsub.f32 %v2560_v36, %v2608_v15  ;;  %v1006_v22 = vrot.slane %v5952_v26, 2  ;;  %v2607_v24 = vmul.f32 %v5942_v19, %v5942_v19 }
  0xd4   : > { %9326 = vst [vmem:[#allocation45_spill] sm:$0xff] %v5947_v35  ;;  %v1628_v52 = vadd.f32 %v1524_v53, %v1400_v61  ;;  %v2561_v13 = vmul.f32 0.03125, %v2423_v49  ;;  %v2241_v42 = vsel %vm2176_vm4, %v5947_v35, 0.0  ;;  %v5969_v53 = vld [vmem:[%s5170_s11 + $0x90] sm:$0xff]  ;;  %v2389_v29 = vmul.f32 %v5947_v35, %v5947_v35 }
  0xd5   : > { %2476 = vadd.xlane.f32.xlu2 %v2475_v39  ;;  %2242 = vadd.xlane.f32.xlu1 %v2241_v42  ;;  %v5966_v2 = vadd.f32 1e-06, %v2656_v44  ;;  %v2043_v39 = vsel %vm972_vm0, %v2041_v32, %v5270_v50  ;;  %v1110_v36 = vadd.f32 %v1006_v22, %v881_v20  ;;  %v2655_v15 = vsub.f32 %v2559_v57, %v2607_v24 }
  0xd6   : > { %v1710_v37 = vadd.f32 %v1670_v43, %v1628_v52  ;;  %2479 = vadd.xlane.f32.xlu0 %v2478_v28  ;;  %v1305_v43 = vrot.slane %v5956_v34, 1  ;;  %v2657_v49 = vsub.f32 %v2561_v13, %v2609_v1  ;;  %v1443_v52 = vmul.f32 %v5208_v10, %v5854_v48  ;;  %v2186_v12 = vpop.xlane.xlu0 %2185 }
  0xd7   : > { %4636 = vrsqrt.f32 %v5966_v2  ;;  %v1192_v26 = vadd.f32 %v5246_v31, %v1110_v36  ;;  %v5982_v32 = vmul.f32 %v5210_v11, %v5969_v53  ;;  %v646_v44 = vmul.f32 %v5198_v5, %v5733_v14 }
  0xd8   : > { %v1919_v61 = vadd.f32 %v1822_v45, %v1710_v37  ;;  %v2481_v45 = vsel %vm2176_vm4, %v2389_v29, 0.0  ;;  %v1525_v34 = vrot.slane %v1443_v52, 2  ;;  %v5991_v13 = vmul.f32 %v5237_v27, %v5969_v53 }
  0xd9   : > { %v1401_v57 = vadd.f32 %v1305_v43, %v1192_v26  ;;  %v5995_v42 = vadd.f32 1e-06, %v2655_v15  ;;  %v5997_v37 = vadd.f32 1e-06, %v2657_v49  ;;  %v713_v1 = vmul.f32 %v5200_v6, %v5780_v60  ;;  %v2189_v54 = vpop.xlane.xlu1 %2188 }
  0xda   : > { %v5984_v28 = vadd.f32 %v2043_v39, %v1919_v61  ;;  %v1824_v24 = vrot.slane %v5982_v32, 1  ;;  %v924_v39 = vmul.f32 %v5202_v7, %v5780_v60  ;;  %v6006_v29 = vmul.f32 %v5206_v9, %v5877_v46 }
  0xdb   : > { %v1629_v14 = vadd.f32 %v1525_v34, %v1401_v57  ;;  %v679_v61 = vadd.f32 %v5827_v56, %v646_v44  ;;  %v786_v15 = vrot.slane %v713_v1, 1  ;;  %v2044_v52 = vrot.slane %v5991_v13, 2 }
  0xdc   : > { %9327 = vst [vmem:[#allocation46_spill] sm:$0xff] %v5984_v28  ;;  %v2244_v20 = vsel %vm2180_vm2, %v5984_v28, 0.0  ;;  %v2390_v36 = vmul.f32 %v5984_v28, %v5984_v28  ;;  %v1007_v32 = vrot.slane %v924_v39, 2  ;;  %4638 = vrsqrt.f32 %v5995_v42  ;;  %v6021_v28 = vld [vmem:[%s5170_s11 + $0x98] sm:$0xff] }
  0xdd   : > { %2245 = vadd.xlane.f32.xlu2 %v2244_v20  ;;  %2482 = vadd.xlane.f32.xlu1 %v2481_v45  ;;  %v6011_v49 = vpop.eup %4636  ;;  %v1711_v26 = vadd.f32 %v5266_v47, %v1629_v14  ;;  %v787_v57 = vsel %vm760_vm1, %v785_v59, %v786_v15  ;;  %v1444_v45 = vmul.f32 %v5208_v10, %v5877_v46  ;;  %4640 = vrsqrt.f32 %v5997_v37 }
  0xde   : > { %v1152_v44 = vmul.f32 %v5204_v8, %v5854_v48  ;;  %v1306_v1 = vrot.slane %v6006_v29, 1  ;;  %v2484_v13 = vsel %vm2180_vm2, %v2390_v36, 0.0  ;;  %v2810_v14 = vmul.f32 %v6011_v49, %v5966_v2 }
  0xdf   : > { %v1920_v20 = vadd.f32 %v1824_v24, %v1711_v26  ;;  %v882_v39 = vadd.f32 %v787_v57, %v679_v61  ;;  %v1008_v59 = vsel %vm972_vm0, %v1006_v22, %v1007_v32  ;;  %v1526_v38 = vrot.slane %v1444_v45, 2 }
  0xe0   : > { %v6034_v26 = vmul.f32 %v5210_v11, %v6021_v28  ;;  %v1307_v36 = vsel %vm760_vm1, %v1305_v43, %v1306_v1  ;;  %v2811_v61 = vmul.f32 %v6011_v49, %v2810_v14  ;;  %v6044_v57 = vmul.f32 %v5237_v27, %v6021_v28 }
  0xe1   : > { %v6030_v35 = vadd.f32 %v2044_v52, %v1920_v20  ;;  %v1111_v4 = vadd.f32 %v1008_v59, %v882_v39  ;;  %v1527_v20 = vsel %vm972_vm0, %v1525_v34, %v1526_v38  ;;  %v647_v39 = vmul.f32 %v5198_v5, %v5780_v60  ;;  %v2192_v18 = vpop.xlane.xlu2 %2191 }
  0xe2   : > { %v6039_v63 = vpop.eup %4638  ;;  %v1671_v59 = vmul.f32 %v5218_v16, %v5969_v53  ;;  %v6072_v17 = vmul.f32 0.03125, %v2186_v12  ;;  %vm2816_vm5 = vweird.f32 %v6011_v49  ;;  %vm2815_vm6 = vweird.f32 %v5966_v2 }
  0xe3   : > { %9328 = vst [vmem:[#allocation47_spill] sm:$0xff] %v6030_v35  ;;  %v2247_v29 = vsel %vm2172_vm3, %v6030_v35, 0.0  ;;  %v1193_v22 = vadd.f32 %v1152_v44, %v1111_v4  ;;  %v6046_v45 = vpop.eup %4640  ;;  %v2800_v4 = vmul.f32 %v6039_v63, %v5995_v42  ;;  %v2045_v44 = vrot.slane %v6044_v57, 2  ;;  %vm6115_vm7 = vmor %vm2815_vm6, %vm2816_vm5 }
  0xe4   : > { %2248 = vadd.xlane.f32.xlu0 %v2247_v29  ;;  %v680_v14 = vadd.f32 %v5827_v56, %v647_v39  ;;  %v2812_v29 = vmul.f32 0.5, %v2811_v61  ;;  %v2820_v34 = vmul.f32 %v6046_v45, %v5997_v37  ;;  %vm2806_vm8 = vweird.f32 %v6039_v63 }
  0xe5   : > { %2485 = vadd.xlane.f32.xlu2 %v2484_v13  ;;  %v1825_v13 = vrot.slane %v6034_v26, 1  ;;  %v1402_v43 = vadd.f32 %v1307_v36, %v1193_v22  ;;  %v1009_v26 = vsel %vm972_vm0, %v1007_v32, %v5231_v23  ;;  %v1153_v22 = vmul.f32 %v5204_v8, %v5877_v46 }
  0xe6   : > { %v883_v36 = vadd.f32 %v786_v15, %v680_v14  ;;  %v2801_v57 = vmul.f32 %v6039_v63, %v2800_v4  ;;  %v2046_v39 = vsel %vm972_vm0, %v2044_v52, %v2045_v44  ;;  %v2813_v55 = vsub.f32 1.5, %v2812_v29 }
  0xe7   : > { %v1630_v0 = vadd.f32 %v1527_v20, %v1402_v43  ;;  %v1826_v60 = vsel %vm760_vm1, %v1824_v24, %v1825_v13  ;;  %v2821_v20 = vmul.f32 %v6046_v45, %v2820_v34  ;;  %v2391_v32 = vmul.f32 %v6030_v35, %v6030_v35  ;;  %v2426_v24 = vpop.xlane.xlu0 %2425 }
  0xe8   : > { %v1112_v61 = vadd.f32 %v1009_v26, %v883_v36  ;;  %v1672_v4 = vmul.f32 %v5218_v16, %v6021_v28  ;;  %v2562_v34 = vmul.f32 0.03125, %v2426_v24  ;;  %v6084_v26 = vmul.f32 0.5, %v2801_v57 }
  0xe9   : > { %v1712_v62 = vadd.f32 %v1671_v59, %v1630_v0  ;;  %v2487_v29 = vsel %vm2172_vm3, %v2391_v32, 0.0  ;;  %v6087_v12 = vmul.f32 %v6011_v49, %v2813_v55  ;;  %v6099_v57 = vmul.f32 %v5202_v7, %v5854_v48  ;;  %v2429_v32 = vpop.xlane.xlu1 %2428 }
  0xea   : > { %v1194_v14 = vadd.f32 %v1153_v22, %v1112_v61  ;;  %v714_v22 = vmul.f32 %v5200_v6, %v5854_v48  ;;  %v6102_v55 = vmul.f32 0.03125, %v2189_v54  ;;  %v2047_v2 = vsel %vm972_vm0, %v2045_v44, %v5270_v50 }
  0xeb   : > { %v1921_v43 = vadd.f32 %v1826_v60, %v1712_v62  ;;  %v1528_v62 = vsel %vm972_vm0, %v1526_v38, %v5233_v25  ;;  %v6089_v60 = vmul.f32 0.5, %v2821_v20  ;;  %v6153_v0 = vmul.f32 %v5200_v6, %v5877_v46 }
  0xec   : > { %v1403_v59 = vadd.f32 %v1306_v1, %v1194_v14  ;;  %2488 = vadd.xlane.f32.xlu0 %v2487_v29  ;;  %v2610_v1 = vmul.f32 %v6072_v17, %v6072_v17  ;;  %v788_v24 = vrot.slane %v714_v22, 1  ;;  %v6110_v14 = vmul.f32 %v5206_v9, %v5969_v53 }
  0xed   : > { %v6077_v52 = vadd.f32 %v2046_v39, %v1921_v43  ;;  %v6104_v39 = vmul.f32 0.03125, %v2192_v18  ;;  %v2611_v44 = vmul.f32 %v6102_v55, %v6102_v55  ;;  %v648_v18 = vmul.f32 %v5198_v5, %v5854_v48  ;;  %v4533_v48 = vld [vmem:[%s9139_s7 + $0x8] sm:$0xff] }
  0xee   : > { %v1631_v38 = vadd.f32 %v1528_v62, %v1403_v59  ;;  %v2658_v43 = vsub.f32 %v2562_v34, %v2610_v1  ;;  %v2803_v62 = vsub.f32 1.5, %v6084_v26  ;;  %v1010_v59 = vrot.slane %v6099_v57, 2  ;;  %v2432_v34 = vpop.xlane.xlu2 %2431  ;;  %v6128_v26 = vld [vmem:[%s5170_s11 + $0xa0] sm:$0xff]  ;;  %3682 = vmatpush.bf16.msra.mxu0 %v4533_v48  ;;  %4544 = vmatpush.bf16.msra.mxu3 %v4533_v48 }
  0xef   : > { %9329 = vst [vmem:[#allocation48_spill] sm:$0xff] %v6077_v52  ;;  %v2250_v36 = vsel %vm2176_vm4, %v6077_v52, 0.0  ;;  %v2392_v61 = vmul.f32 %v6077_v52, %v6077_v52  ;;  %v2612_v1 = vmul.f32 %v6104_v39, %v6104_v39  ;;  %v2563_v57 = vmul.f32 0.03125, %v2429_v32 }
  0xf0   : > { %2251 = vadd.xlane.f32.xlu1 %v2250_v36  ;;  %v1713_v20 = vadd.f32 %v1672_v4, %v1631_v38  ;;  %v2818_v4 = vsel %vm6115_vm7, %v6011_v49, %v6087_v12  ;;  %v884_v36 = vadd.f32 %v788_v24, %v5229_v21  ;;  %v6133_v38 = vmul.f32 %v5208_v10, %v5969_v53 }
  0xf1   : > { %v2490_v22 = vsel %vm2176_vm4, %v2392_v61, 0.0  ;;  %v2564_v54 = vmul.f32 0.03125, %v2432_v34  ;;  %v6147_v15 = vmul.f32 %v5210_v11, %v6128_v26  ;;  %v681_v34 = vadd.f32 %v5827_v56, %v648_v18 }
  0xf2   : > { %v1922_v29 = vadd.f32 %v1825_v13, %v1713_v20  ;;  %v6142_v13 = vadd.f32 1e-06, %v2658_v43  ;;  %v1113_v12 = vadd.f32 %v1010_v59, %v884_v36  ;;  %v1308_v20 = vrot.slane %v6110_v14, 1 }
  0xf3   : > { %v1529_v32 = vrot.slane %v6133_v38, 2  ;;  %v6161_v14 = vmul.f32 %v5202_v7, %v5877_v46  ;;  %v9194_v36 = vrot.slane %v6153_v0, 1  ;;  %vm2805_vm9 = vweird.f32 %v5995_v42 }
  0xf4   : > { %v6140_v49 = vadd.f32 %v2047_v2, %v1922_v29  ;;  %v1195_v43 = vadd.f32 %v5246_v31, %v1113_v12  ;;  %v2659_v2 = vsub.f32 %v2563_v57, %v2611_v44  ;;  %v6169_v29 = vmul.f32 %v5237_v27, %v6128_v26  ;;  %vm6257_vm11 = vmor %vm2805_vm9, %vm2806_vm8 }
  0xf5   : > { %4642 = vrsqrt.f32 %v6142_v13  ;;  %v2660_v44 = vsub.f32 %v2564_v54, %v2612_v1  ;;  %v790_v18 = vsel %vm760_vm1, %v788_v24, %v9194_v36  ;;  %v6183_v57 = vmul.f32 %v5206_v9, %v6021_v28 }
  0xf6   : > { %9332 = vst [vmem:[#allocation49_spill] sm:$0xff] %v6140_v49  ;;  %v2253_v61 = vsel %vm2180_vm2, %v6140_v49, 0.0  ;;  %v2393_v38 = vmul.f32 %v6140_v49, %v6140_v49  ;;  %v1827_v12 = vrot.slane %v6147_v15, 1  ;;  %v885_v48 = vadd.f32 %v790_v18, %v681_v34  ;;  %v6204_v34 = vld [vmem:[%s5170_s11 + $0xa8] sm:$0xff] }
  0xf7   : > { %2254 = vadd.xlane.f32.xlu2 %v2253_v61  ;;  %v6187_v61 = vmul.f32 %v5208_v10, %v6021_v28  ;;  %v1154_v49 = vmul.f32 %v5204_v8, %v5969_v53  ;;  %v9333_v1 = vsub.f32 %v5318_v51, %v5934_v33  ;;  %v6195_v24 = vadd.f32 1e-06, %v2659_v2  ;;  %v6211_v33 = vld [vmem:[%s9137_s5] ss:$0 sm:$0xff] }
  0xf8   : > { %2491 = vadd.xlane.f32.xlu1 %v2490_v22  ;;  %v1404_v22 = vadd.f32 %v1308_v20, %v1195_v43  ;;  %v2048_v36 = vrot.slane %v6169_v29, 2  ;;  %v9334_v52 = vrot.slane %v6161_v14, 2  ;;  %v9199_v31 = vrot.slane %v6183_v57, 1  ;;  %9335 = vst [vmem:[#allocation50_spill] sm:$0xff] %v6211_v33 }
  0xf9   : > { %v3280_v54 = vmul.f32 %v2818_v4, %v9333_v1  ;;  %v2804_v51 = vmul.f32 %v6039_v63, %v2803_v62  ;;  %vm2826_vm10 = vweird.f32 %v6046_v45  ;;  %v6214_v4 = vadd.f32 1e-06, %v2660_v44 }
  0xfa   : > { %v1632_v43 = vadd.f32 %v1529_v32, %v1404_v22  ;;  %v1012_v35 = vsel %vm972_vm0, %v1010_v59, %v9334_v52  ;;  %v2493_v22 = vsel %vm2180_vm2, %v2393_v38, 0.0  ;;  %v1530_v52 = vrot.slane %v6187_v61, 2 }
  0xfb   : > { %v1114_v18 = vadd.f32 %v1012_v35, %v885_v48  ;;  %v6217_v59 = vpop.eup %4642  ;;  %v9336_v2 = vsub.f32 1.5, %v6089_v60  ;;  %v1310_v62 = vsel %vm760_vm1, %v1308_v20, %v9199_v31  ;;  %v3332_v48 = vmul.f32 %v6211_v33, %v3280_v54 }
  0xfc   : > { %v1714_v15 = vadd.f32 %v5266_v47, %v1632_v43  ;;  %v2195_v43 = vpop.xlane.xlu0 %2194  ;;  %4644 = vrsqrt.f32 %v6195_v24  ;;  %v1531_v44 = vsel %vm972_vm0, %v1529_v32, %v1530_v52  ;;  %v6232_v60 = vmul.f32 %v5210_v11, %v6204_v34 }
  0xfd   : > { %v2824_v35 = vmul.f32 %v6046_v45, %v9336_v2  ;;  %v1196_v38 = vadd.f32 %v1154_v49, %v1114_v18  ;;  %v1673_v20 = vmul.f32 %v5218_v16, %v6128_v26  ;;  %v6240_v54 = vmul.f32 %v5237_v27, %v6204_v34 }
  0xfe   : > { %v1923_v29 = vadd.f32 %v1827_v12, %v1714_v15  ;;  %v2830_v32 = vmul.f32 %v6217_v59, %v6142_v13  ;;  %4646 = vrsqrt.f32 %v6214_v4  ;;  %v9200_v15 = vrot.slane %v6232_v60, 1 }
  0xff   : > { %2494 = vadd.xlane.f32.xlu2 %v2493_v22  ;;  %v1405_v49 = vadd.f32 %v1310_v62, %v1196_v38  ;;  %v4532_v22 = vld [vmem:[%s9139_s7] sm:$0xff]  ;;  %v649_v18 = vmul.f32 %v5198_v5, %v5877_v46  ;;  %v2703_v2 = vsub.f32 %v5310_v41, %v5942_v19  ;;  %vm2825_vm12 = vweird.f32 %v5997_v37 }
 0x100   : > { %v6234_v1 = vadd.f32 %v2048_v36, %v1923_v29  ;;  %v6264_v38 = vld [vmem:[%s9138_s6] ss:$0 sm:$0xff]  ;;  %3683 = vmatpush.bf16.msra.mxu0 %v4532_v22  ;;  %4545 = vmatpush.bf16.msra.mxu3 %v4532_v22  ;;  %v2808_v41 = vsel %vm6257_vm11, %v6039_v63, %v2804_v51  ;;  %vm6274_vm13 = vmor %vm2825_vm12, %vm2826_vm10  ;;  %v1829_v42 = vsel %vm760_vm1, %v1827_v12, %v9200_v15  ;;  %v2049_v37 = vrot.slane %v6240_v54, 2 }
 0x101   : > { %v1633_v62 = vadd.f32 %v1531_v44, %v1405_v49  ;;  %v682_v44 = vadd.f32 %v5827_v56, %v649_v18  ;;  %v6284_v49 = vadd.f32 %v6264_v38, %v3332_v48  ;;  %v2828_v63 = vsel %vm6274_vm13, %v6046_v45, %v2824_v35  ;;  %v2201_v45 = vpop.xlane.xlu2 %2200 }
 0x102   : > { %9337 = vst [vmem:[#allocation51_spill] sm:$0xff] %v6234_v1  ;;  %v2256_v46 = vsel %vm2172_vm3, %v6234_v1, 0.0  ;;  %v9342_v22 = vrot.slane %v6161_v14, 2  ;;  %v6293_v31 = vpop.eup %4644  ;;  %v2831_v12 = vmul.f32 %v6217_v59, %v2830_v32  ;;  %v2050_v54 = vsel %vm972_vm0, %v2048_v36, %v2049_v37 }
 0x103   : > { %2257 = vadd.xlane.f32.xlu0 %v2256_v46  ;;  %v1715_v51 = vadd.f32 %v1673_v20, %v1633_v62  ;;  %v2198_v46 = vpop.xlane.xlu1 %2197  ;;  %v9343_v48 = vrot.slane %v6153_v0, 1  ;;  %v1155_v19 = vmul.f32 %v5204_v8, %v6021_v28  ;;  %v6303_v14 = vmul.f32 %v2808_v41, %v2703_v2 }
 0x104   : > { %v1013_v29 = vsel %vm972_vm0, %v9342_v22, %v5231_v23  ;;  %v6301_v20 = vpop.eup %4646  ;;  %v9344_v62 = vsub.f32 %v5308_v40, %v5929_v58  ;;  %v2840_v2 = vmul.f32 %v6293_v31, %v6195_v24  ;;  %v6321_v58 = vmul.f32 0.03125, %v2195_v43 }
 0x105   : > { %v886_v18 = vadd.f32 %v9343_v48, %v682_v44  ;;  %v1924_v35 = vadd.f32 %v1829_v42, %v1715_v51  ;;  %v2394_v42 = vmul.f32 %v6234_v1, %v6234_v1  ;;  %v2435_v51 = vpop.xlane.xlu0 %2434  ;;  %v6317_v48 = vmul.f32 0.5, %v2831_v12 }
 0x106   : > { %v6308_v22 = vmul.f32 %v2828_v63, %v9344_v62  ;;  %v2850_v63 = vmul.f32 %v6301_v20, %v6214_v4  ;;  %v1532_v12 = vsel %vm972_vm0, %v1530_v52, %v5233_v25  ;;  %v1674_v43 = vmul.f32 %v5218_v16, %v6204_v34  ;;  %v9347_v62 = vld [vmem:[#allocation28_spill] sm:$0xff] }
 0x107   : > { %v1115_v32 = vadd.f32 %v1013_v29, %v886_v18  ;;  %v6313_v44 = vadd.f32 %v2050_v54, %v1924_v35  ;;  %v9346_v54 = vrot.slane %v6183_v57, 1  ;;  %v2565_v35 = vmul.f32 0.03125, %v2435_v51 }
 0x108   : > { %v716_v61 = vmul.f32 %v5200_v6, %v5969_v53  ;;  %v927_v57 = vmul.f32 %v5202_v7, %v5969_v53  ;;  %v2833_v52 = vsub.f32 1.5, %v6317_v48  ;;  %v2851_v51 = vmul.f32 %v6301_v20, %v2850_v63 }
 0x109   : > { %9345 = vst [vmem:[#allocation52_spill] sm:$0xff] %v6313_v44  ;;  %v1197_v40 = vadd.f32 %v1155_v19, %v1115_v32  ;;  %v2259_v29 = vsel %vm2176_vm4, %v6313_v44, 0.0  ;;  %v2496_v19 = vsel %vm2172_vm3, %v2394_v42, 0.0  ;;  %v2395_v41 = vmul.f32 %v6313_v44, %v6313_v44 }
 0x10a   : > { %2260 = vadd.xlane.f32.xlu1 %v2259_v29  ;;  %v2613_v42 = vmul.f32 %v6321_v58, %v6321_v58  ;;  %v1014_v32 = vrot.slane %v927_v57, 2  ;;  %v6353_v36 = vmul.f32 %v5206_v9, %v6128_v26  ;;  %v6355_v15 = vmul.f32 0.03125, %v2198_v46 }
 0x10b   : > { %v1406_v18 = vadd.f32 %v9346_v54, %v1197_v40  ;;  %2497 = vadd.xlane.f32.xlu0 %v2496_v19  ;;  %v2841_v40 = vmul.f32 %v6293_v31, %v2840_v2  ;;  %v2438_v54 = vpop.xlane.xlu1 %2437  ;;  %v791_v19 = vrot.slane %v716_v61, 1  ;;  %v6357_v48 = vmul.f32 0.03125, %v2201_v45 }
 0x10c   : > { %9348 = vst [vmem:[#allocation28_spill] sm:$0xff] %v6355_v15  ;;  %v2661_v2 = vsub.f32 %v2565_v35, %v2613_v42  ;;  %v2499_v63 = vsel %vm2176_vm4, %v2395_v41, 0.0  ;;  %v6365_v61 = vmul.f32 %v5208_v10, %v6128_v26  ;;  %v9350_v46 = vrot.slane %v6232_v60, 1 }
 0x10d   : > { %v1634_v29 = vadd.f32 %v1532_v12, %v1406_v18  ;;  %9349 = vst [vmem:[#allocation53_spill] sm:$0xff] %v6357_v48  ;;  %v2441_v12 = vpop.xlane.xlu2 %2440  ;;  %v2051_v18 = vsel %vm972_vm0, %v2049_v37, %v5270_v50  ;;  %v887_v44 = vadd.f32 %v791_v19, %v5229_v21  ;;  %v6367_v57 = vmul.f32 0.5, %v2841_v40 }
 0x10e   : > { %v2566_v45 = vmul.f32 0.03125, %v2438_v54  ;;  %v650_v35 = vmul.f32 %v5198_v5, %v5969_v53  ;;  %v6376_v37 = vmul.f32 0.5, %v2851_v51  ;;  %v2567_v41 = vmul.f32 0.03125, %v2441_v12  ;;  %v9352_v53 = vld [vmem:[#allocation25_spill] sm:$0xff] }
 0x10f   : > { %v1716_v0 = vadd.f32 %v1674_v43, %v1634_v29  ;;  %v6372_v29 = vld [vmem:[%s5170_s11 + $0xb0] sm:$0xff]  ;;  %v1116_v42 = vadd.f32 %v1014_v32, %v887_v44  ;;  %v1311_v1 = vrot.slane %v6353_v36, 1  ;;  %v2614_v40 = vmul.f32 %v6355_v15, %v6355_v15 }
 0x110   : > { %v2615_v60 = vmul.f32 %v6357_v48, %v6357_v48  ;;  %vm2836_vm14 = vweird.f32 %v6217_v59  ;;  %v1533_v54 = vrot.slane %v6365_v61, 2  ;;  %v6392_v36 = vmul.f32 %v5210_v11, %v6372_v29 }
 0x111   : > { %v1925_v43 = vadd.f32 %v9350_v46, %v1716_v0  ;;  %v6385_v0 = vadd.f32 1e-06, %v2661_v2  ;;  %v1198_v51 = vadd.f32 %v9352_v53, %v1116_v42  ;;  %v6396_v44 = vmul.f32 %v5200_v6, %v6021_v28 }
 0x112   : > { %2500 = vadd.xlane.f32.xlu1 %v2499_v63  ;;  %v683_v2 = vadd.f32 %v5827_v56, %v650_v35  ;;  %v6403_v63 = vmul.f32 %v5202_v7, %v6021_v28  ;;  %vm2835_vm15 = vweird.f32 %v6142_v13  ;;  %v2663_v61 = vsub.f32 %v2567_v41, %v2615_v60  ;;  %v6430_v35 = vld [vmem:[%s5170_s11 + $0xb8] sm:$0xff] }
 0x113   : > { %v6379_v50 = vadd.f32 %v2051_v18, %v1925_v43  ;;  %v2662_v18 = vsub.f32 %v2566_v45, %v2614_v40  ;;  %v1407_v46 = vadd.f32 %v1311_v1, %v1198_v51  ;;  %v6408_v43 = vmul.f32 %v5237_v27, %v6372_v29  ;;  %vm6470_vm8 = vmor %vm2835_vm15, %vm2836_vm14 }
 0x114   : > { %v9215_v42 = vrot.slane %v6396_v44, 1  ;;  %v6416_v40 = vmul.f32 %v5206_v9, %v6204_v34  ;;  %4648 = vrsqrt.f32 %v6385_v0  ;;  %v1830_v60 = vrot.slane %v6392_v36, 1 }
 0x115   : > { %9351 = vst [vmem:[#allocation54_spill] sm:$0xff] %v6379_v50  ;;  %v2262_v12 = vsel %vm2180_vm2, %v6379_v50, 0.0  ;;  %v2396_v45 = vmul.f32 %v6379_v50, %v6379_v50  ;;  %v1635_v41 = vadd.f32 %v1533_v54, %v1407_v46  ;;  %v6427_v50 = vadd.f32 1e-06, %v2662_v18 }
 0x116   : > { %2263 = vadd.xlane.f32.xlu2 %v2262_v12  ;;  %v6420_v12 = vmul.f32 %v5208_v10, %v6204_v34  ;;  %v793_v51 = vsel %vm760_vm1, %v791_v19, %v9215_v42  ;;  %v9353_v21 = vrot.slane %v6403_v63, 2  ;;  %v1156_v10 = vmul.f32 %v5204_v8, %v6128_v26 }
 0x117   : > { %v888_v53 = vadd.f32 %v793_v51, %v683_v2  ;;  %v2834_v46 = vmul.f32 %v6217_v59, %v2833_v52  ;;  %vm2845_vm5 = vweird.f32 %v6195_v24  ;;  %vm2846_vm6 = vweird.f32 %v6293_v31 }
 0x118   : > { %v1016_v48 = vsel %vm972_vm0, %v1014_v32, %v9353_v21  ;;  %v1717_v19 = vadd.f32 %v5266_v47, %v1635_v41  ;;  %v2052_v36 = vrot.slane %v6408_v43, 2  ;;  %v2502_v18 = vsel %vm2180_vm2, %v2396_v45, 0.0  ;;  %v2210_v45 = vpop.xlane.xlu2 %2209  ;;  %vm6511_vm10 = vmor %vm2845_vm5, %vm2846_vm6 }
 0x119   : > { %v1117_v2 = vadd.f32 %v1016_v48, %v888_v53  ;;  %v9218_v51 = vrot.slane %v6416_v40, 1  ;;  %v9219_v21 = vrot.slane %v6420_v12, 2  ;;  %v2843_v32 = vsub.f32 1.5, %v6367_v57 }
 0x11a   : > { %v2853_v42 = vsub.f32 1.5, %v6376_v37  ;;  %v1926_v52 = vadd.f32 %v1830_v60, %v1717_v19  ;;  %v6449_v15 = vmul.f32 %v5210_v11, %v6430_v35  ;;  %4650 = vrsqrt.f32 %v6427_v50  ;;  %v6457_v53 = vpop.eup %4648 }
 0x11b   : > { %v6452_v41 = vadd.f32 1e-06, %v2663_v61  ;;  %v1199_v43 = vadd.f32 %v1156_v10, %v1117_v2  ;;  %v1313_v48 = vsel %vm760_vm1, %v1311_v1, %v9218_v51  ;;  %vm2856_vm7 = vweird.f32 %v6301_v20  ;;  %v2207_v2 = vpop.xlane.xlu1 %2206 }
 0x11c   : > { %v6460_v57 = vadd.f32 %v2052_v36, %v1926_v52  ;;  %v1535_v37 = vsel %vm972_vm0, %v1533_v54, %v9219_v21  ;;  %v1675_v61 = vmul.f32 %v5218_v16, %v6372_v29  ;;  %v6478_v19 = vmul.f32 %v5237_v27, %v6430_v35 }
 0x11d   : > { %v1408_v1 = vadd.f32 %v1313_v48, %v1199_v43  ;;  %v3331_v54 = vmul.f32 %v6211_v33, %v6303_v14  ;;  %v2838_v13 = vsel %vm6470_vm8, %v6217_v59, %v2834_v46  ;;  %v2844_v52 = vmul.f32 %v6293_v31, %v2843_v32 }
 0x11e   : > { %2503 = vadd.xlane.f32.xlu2 %v2502_v18  ;;  %9354 = vst [vmem:[#allocation55_spill] sm:$0xff] %v6460_v57  ;;  %v2204_v18 = vpop.xlane.xlu0 %2203  ;;  %v2854_v43 = vmul.f32 %v6301_v20, %v2853_v42  ;;  %v2265_v48 = vsel %vm2172_vm3, %v6460_v57, 0.0  ;;  %v2860_v51 = vmul.f32 %v6457_v53, %v6385_v0  ;;  %4652 = vrsqrt.f32 %v6452_v41 }
 0x11f   : > { %2266 = vadd.xlane.f32.xlu0 %v2265_v48  ;;  %v1636_v14 = vadd.f32 %v1535_v37, %v1408_v1  ;;  %v9220_v21 = vrot.slane %v6478_v19, 2  ;;  %vm2855_vm9 = vweird.f32 %v6214_v4  ;;  %v9357_v59 = vrot.slane %v6449_v15, 1 }
 0x120   : > { %v3333_v42 = vmul.f32 %v6211_v33, %v6308_v22  ;;  %v3383_v32 = vadd.f32 %v6264_v38, %v3331_v54  ;;  %v6500_v10 = vpop.eup %4650  ;;  %v9358_v48 = vsub.f32 %v5358_v3, %v6072_v17  ;;  %vm3479_vm11 = vcmask 1040384   ;;  %vm6522_vm12 = vmor %vm2855_vm9, %vm2856_vm7 }
 0x121   : > { %v1832_v46 = vsel %vm760_vm1, %v1830_v60, %v9357_v59  ;;  %v1718_v60 = vadd.f32 %v1675_v61, %v1636_v14  ;;  %v651_v22 = vmul.f32 %v5198_v5, %v6021_v28  ;;  %v2848_v1 = vsel %vm6511_vm10, %v6293_v31, %v2844_v52 }
 0x122   : > { %v6505_v37 = vmul.f32 %v2838_v13, %v9358_v48  ;;  %v2054_v17 = vsel %vm972_vm0, %v2052_v36, %v9220_v21  ;;  %v3385_v24 = vadd.f32 %v6264_v38, %v3333_v42  ;;  %v3480_v61 = vrot.slane %v3383_v32, 7  ;;  %v9381_v21 = vld [vmem:[#allocation27_spill] sm:$0xff] }
 0x123   : > { %v2858_v28 = vsel %vm6522_vm12, %v6301_v20, %v2854_v43  ;;  %v2861_v54 = vmul.f32 %v6457_v53, %v2860_v51  ;;  %v1927_v31 = vadd.f32 %v1832_v46, %v1718_v60  ;;  %v684_v13 = vadd.f32 %v5827_v56, %v651_v22  ;;  %v9369_v22 = vld [vmem:[#allocation29_spill] sm:$0xff] }
 0x124   : > { %v2870_v52 = vmul.f32 %v6500_v10, %v6427_v50  ;;  %v9363_v14 = vrot.slane %v6284_v49, 7  ;;  %v3483_v36 = vrot.slane %v3385_v24, 7  ;;  %v9364_v42 = vrot.slane %v6403_v63, 2  ;;  %v6544_v48 = vpop.eup %4652 }
 0x125   : > { %v9365_v20 = vsub.f32 %v5399_v30, %v6102_v55  ;;  %v6551_v56 = vadd.f32 %v2054_v17, %v1927_v31  ;;  %v9367_v43 = vrot.slane %v6396_v44, 1  ;;  %v1157_v4 = vmul.f32 %v5204_v8, %v6204_v34 }
 0x126   : > { %v3482_v59 = vsel %vm3479_vm11, %v3480_v61, %v9363_v14  ;;  %v1017_v32 = vsel %vm972_vm0, %v9364_v42, %v5231_v23  ;;  %v9368_v63 = vsub.f32 %v9347_v62, %v6104_v39  ;;  %v9370_v30 = vmov %v9363_v14  ;;  %v2444_v39 = vpop.xlane.xlu0 %2443  ;;  %v2447_v62 = vpop.xlane.xlu1 %2446 }
 0x127   : > { %v6549_v51 = vmul.f32 %v2848_v1, %v9365_v20  ;;  %9366 = vst [vmem:[#allocation56_spill] sm:$0xff] %v6551_v56  ;;  %v889_v46 = vadd.f32 %v9367_v43, %v684_v13  ;;  %v3484_v55 = vsel %vm3479_vm11, %v9370_v30, %v3483_v36  ;;  %v6567_v1 = vmul.f32 0.03125, %v2204_v18  ;;  %v2450_v42 = vpop.xlane.xlu2 %2449 }
 0x128   : > { %v6560_v60 = vmul.f32 %v2858_v28, %v9368_v63  ;;  %v2268_v44 = vsel %vm2176_vm4, %v6551_v56, 0.0  ;;  %v3592_v17 = vpack.c.bf16 %v3484_v55, %v3482_v59  ;;  %v2397_v61 = vmul.f32 %v6460_v57, %v6460_v57 }
 0x129   : > { %v1118_v24 = vadd.f32 %v1017_v32, %v889_v46  ;;  %v6573_v28 = vmul.f32 0.5, %v2861_v54  ;;  %v2871_v31 = vmul.f32 %v6500_v10, %v2870_v52  ;;  %v2880_v49 = vmul.f32 %v6544_v48, %v6452_v41  ;;  %2269 = vadd.xlane.f32.xlu1 %v2268_v44 }
 0x12a   : > { %v6578_v18 = vmul.f32 0.03125, %v2207_v2  ;;  %4475 = vmatmul.msk.bf16.vlgmr.msra.gmra.mxu0 %vm2176_vm4, %v3592_v17  ;;  %v9372_v14 = vrot.slane %v6420_v12, 2  ;;  %v6585_v36 = vmul.f32 0.03125, %v2210_v45  ;;  %v2505_v54 = vsel %vm2172_vm3, %v2397_v61, 0.0 }
 0x12b   : > { %v1200_v13 = vadd.f32 %v1157_v4, %v1118_v24  ;;  %v2616_v52 = vmul.f32 %v6567_v1, %v6567_v1  ;;  %2506 = vadd.xlane.f32.xlu0 %v2505_v54  ;;  %v2398_v2 = vmul.f32 %v6551_v56, %v6551_v56  ;;  %v2568_v32 = vmul.f32 0.03125, %v2444_v39  ;;  %v9375_v39 = vld [vmem:[#allocation28_spill] sm:$0xff] }
 0x12c   : > { %9371 = vst [vmem:[#allocation29_spill] sm:$0xff] %v6578_v18  ;;  %v1536_v59 = vsel %vm972_vm0, %v9372_v14, %v5233_v25  ;;  %v2569_v20 = vmul.f32 0.03125, %v2447_v62  ;;  %v9374_v43 = vrot.slane %v6416_v40, 1  ;;  %v1676_v12 = vmul.f32 %v5218_v16, %v6430_v35  ;;  %v9376_v62 = vld [vmem:[#allocation30_spill] sm:$0xff] }
 0x12d   : > { %9373 = vst [vmem:[#allocation57_spill] sm:$0xff] %v6585_v36  ;;  %v718_v45 = vmul.f32 %v5200_v6, %v6128_v26  ;;  %v6600_v4 = vmul.f32 %v5202_v7, %v6128_v26  ;;  %v2617_v63 = vmul.f32 %v6578_v18, %v6578_v18  ;;  %v2664_v30 = vsub.f32 %v2568_v32, %v2616_v52  ;;  %v9377_v52 = vld [vmem:[#allocation23_spill] sm:$0xff]  ;;  %v9378_v32 = vld [vmem:[#allocation53_spill] sm:$0xff] }
 0x12e   : > { %v1409_v46 = vadd.f32 %v9374_v43, %v1200_v13  ;;  %v2570_v55 = vmul.f32 0.03125, %v2450_v42  ;;  %v6606_v40 = vmul.f32 %v5206_v9, %v6372_v29  ;;  %v2508_v17 = vsel %vm2176_vm4, %v2398_v2, 0.0  ;;  %v9379_v43 = vld [vmem:[#allocation31_spill] sm:$0xff] }
 0x12f   : > { %v794_v24 = vrot.slane %v718_v45, 1  ;;  %v1018_v61 = vrot.slane %v6600_v4, 2  ;;  %v2618_v14 = vmul.f32 %v6585_v36, %v6585_v36  ;;  %v2665_v54 = vsub.f32 %v2569_v20, %v2617_v63  ;;  %v9380_v45 = vld [vmem:[#allocation24_spill] sm:$0xff] }
 0x130   : > { %v1637_v44 = vadd.f32 %v1536_v59, %v1409_v46  ;;  %v6616_v42 = vmul.f32 %v9377_v52, %v6372_v29  ;;  %v2863_v59 = vsub.f32 1.5, %v6573_v28  ;;  %v6622_v46 = vld [vmem:[%s5170_s11 + $0xc0] sm:$0xff]  ;;  %vm2866_vm13 = vweird.f32 %v6457_v53 }
 0x131   : > { %v890_v4 = vadd.f32 %v794_v24, %v9380_v45  ;;  %v2881_v13 = vmul.f32 %v6544_v48, %v2880_v49  ;;  %v9382_v20 = vrot.slane %v6478_v19, 2  ;;  %2509 = vadd.xlane.f32.xlu1 %v2508_v17  ;;  %v6631_v56 = vadd.f32 1e-06, %v2664_v30 }
 0x132   : > { %v1719_v2 = vadd.f32 %v1676_v12, %v1637_v44  ;;  %v2666_v3 = vsub.f32 %v2570_v55, %v2618_v14  ;;  %v2872_v57 = vmul.f32 0.5, %v2871_v31  ;;  %v9383_v28 = vrot.slane %v6449_v15, 1  ;;  %v9385_v15 = vld [vmem:[#allocation25_spill] sm:$0xff] }
 0x133   : > { %v2055_v63 = vsel %vm972_vm0, %v9382_v20, %v9381_v21  ;;  %v1119_v44 = vadd.f32 %v1018_v61, %v890_v4  ;;  %v1314_v45 = vrot.slane %v6606_v40, 1  ;;  %vm2865_vm14 = vweird.f32 %v6385_v0 }
 0x134   : > { %v1928_v12 = vadd.f32 %v9383_v28, %v1719_v2  ;;  %v6637_v36 = vadd.f32 1e-06, %v2665_v54  ;;  %v9229_v49 = vrot.slane %v6616_v42, 2  ;;  %v6642_v19 = vmul.f32 %v5210_v11, %v6622_v46  ;;  %vm6712_vm5 = vmor %vm2865_vm14, %vm2866_vm13 }
 0x135   : > { %v652_v30 = vmul.f32 %v5198_v5, %v6128_v26  ;;  %v1201_v55 = vadd.f32 %v9385_v15, %v1119_v44  ;;  %v6651_v40 = vmul.f32 %v5200_v6, %v6204_v34  ;;  %v6655_v17 = vmul.f32 %v5202_v7, %v6204_v34 }
 0x136   : > { %v6646_v31 = vadd.f32 %v2055_v63, %v1928_v12  ;;  %v2882_v14 = vmul.f32 0.5, %v2881_v13  ;;  %4654 = vrsqrt.f32 %v6631_v56  ;;  %v6658_v54 = vadd.f32 1e-06, %v2666_v3  ;;  %v6675_v3 = vld [vmem:[%s9136_s4] ss:$0 sm:$0xff] }
 0x137   : > { %v6662_v26 = vmul.f32 %v5237_v27, %v6622_v46  ;;  %v1410_v4 = vadd.f32 %v1314_v45, %v1201_v55  ;;  %v6669_v63 = vmul.f32 %v5206_v9, %v6430_v35  ;;  %v2873_v13 = vsub.f32 1.5, %v2872_v57 }
 0x138   : > { %9384 = vst [vmem:[#allocation28_spill] sm:$0xff] %v6646_v31  ;;  %v2271_v2 = vsel %vm2180_vm2, %v6646_v31, 0.0  ;;  %4656 = vrsqrt.f32 %v6637_v36  ;;  %v685_v28 = vadd.f32 %v6675_v3, %v652_v30  ;;  %v2399_v44 = vmul.f32 %v6646_v31, %v6646_v31  ;;  %v6692_v30 = vld [vmem:[%s5170_s11 + $0xc8] sm:$0xff] }
 0x139   : > { %2272 = vadd.xlane.f32.xlu2 %v2271_v2  ;;  %v1638_v55 = vadd.f32 %v9229_v49, %v1410_v4  ;;  %v1833_v57 = vrot.slane %v6642_v19, 1  ;;  %v6686_v2 = vmul.f32 %v9377_v52, %v6430_v35  ;;  %v2864_v20 = vmul.f32 %v6457_v53, %v2863_v59 }
 0x13a   : > { %vm2876_vm15 = vweird.f32 %v6500_v10  ;;  %4658 = vrsqrt.f32 %v6658_v54  ;;  %v9386_v12 = vrot.slane %v6651_v40, 1  ;;  %v2056_v19 = vrot.slane %v6662_v26, 2 }
 0x13b   : > { %v1720_v4 = vadd.f32 %v5266_v47, %v1638_v55  ;;  %v9387_v49 = vrot.slane %v6655_v17, 2  ;;  %v9237_v59 = vrot.slane %v6669_v63, 1  ;;  %v2874_v52 = vmul.f32 %v6500_v10, %v2873_v13 }
 0x13c   : > { %v796_v31 = vsel %vm760_vm1, %v794_v24, %v9386_v12  ;;  %v6703_v21 = vpop.eup %4654  ;;  %v2883_v18 = vsub.f32 1.5, %v2882_v14  ;;  %v1158_v7 = vmul.f32 %v5204_v8, %v6372_v29  ;;  %v9238_v26 = vrot.slane %v6686_v2, 2  ;;  %v2216_v24 = vpop.xlane.xlu1 %2215 }
 0x13d   : > { %v1020_v15 = vsel %vm972_vm0, %v1018_v61, %v9387_v49  ;;  %v891_v9 = vadd.f32 %v796_v31, %v685_v28  ;;  %v2511_v61 = vsel %vm2180_vm2, %v2399_v44, 0.0  ;;  %v1929_v49 = vadd.f32 %v1833_v57, %v1720_v4  ;;  %v2213_v4 = vpop.xlane.xlu0 %2212 }
 0x13e   : > { %v6720_v14 = vmul.f32 %v5210_v11, %v6692_v30  ;;  %v6722_v31 = vpop.eup %4656  ;;  %v2868_v13 = vsel %vm6712_vm5, %v6457_v53, %v2864_v20  ;;  %vm2875_vm6 = vweird.f32 %v6427_v50  ;;  %vm2886_vm7 = vweird.f32 %v6544_v48 }
 0x13f   : > { %v1120_v0 = vadd.f32 %v1020_v15, %v891_v9  ;;  %vm6731_vm8 = vmor %vm2875_vm6, %vm2876_vm15  ;;  %v6735_v12 = vadd.f32 %v2056_v19, %v1929_v49  ;;  %v1316_v44 = vsel %vm760_vm1, %v1314_v45, %v9237_v59  ;;  %v6742_v53 = vmul.f32 %v5237_v27, %v6692_v30 }
 0x140   : > { %v3334_v50 = vmul.f32 %v6211_v33, %v6505_v37  ;;  %v6746_v9 = vpop.eup %4658  ;;  %v2878_v15 = vsel %vm6731_vm8, %v6500_v10, %v2874_v52  ;;  %v2884_v20 = vmul.f32 %v6544_v48, %v2883_v18  ;;  %v3335_v45 = vmul.f32 %v6211_v33, %v6549_v51 }
 0x141   : > { %9392 = vst [vmem:[#allocation30_spill] sm:$0xff] %v6735_v12  ;;  %2512 = vadd.xlane.f32.xlu2 %v2511_v61  ;;  %v1202_v55 = vadd.f32 %v1158_v7, %v1120_v0  ;;  %v2274_v49 = vsel %vm2172_vm3, %v6735_v12, 0.0  ;;  %v9393_v37 = vrot.slane %v6616_v42, 2  ;;  %v1677_v10 = vmul.f32 %v5218_v16, %v6622_v46 }
 0x142   : > { %v2890_v7 = vmul.f32 %v6703_v21, %v6631_v56  ;;  %v2900_v51 = vmul.f32 %v6722_v31, %v6637_v36  ;;  %2275 = vadd.xlane.f32.xlu0 %v2274_v49  ;;  %v3336_v61 = vmul.f32 %v6211_v33, %v6560_v60  ;;  %v2910_v42 = vmul.f32 %v6746_v9, %v6658_v54  ;;  %v2219_v60 = vpop.xlane.xlu2 %2218 }
 0x143   : > { %v1539_v59 = vsel %vm972_vm0, %v9393_v37, %v9238_v26  ;;  %v1411_v52 = vadd.f32 %v1316_v44, %v1202_v55  ;;  %v9241_v0 = vrot.slane %v6742_v53, 2  ;;  %v3386_v28 = vadd.f32 %v6264_v38, %v3334_v50 }
 0x144   : > { %v3387_v37 = vadd.f32 %v6264_v38, %v3335_v45  ;;  %v9394_v26 = vsub.f32 %v9369_v22, %v6321_v58  ;;  %vm2885_vm9 = vweird.f32 %v6452_v41  ;;  %v3388_v55 = vadd.f32 %v6264_v38, %v3336_v61  ;;  %v2456_v50 = vpop.xlane.xlu1 %2455 }
 0x145   : > { %v1639_v44 = vadd.f32 %v1539_v59, %v1411_v52  ;;  %v9395_v49 = vsub.f32 %v9376_v62, %v9375_v39  ;;  %vm6789_vm10 = vmor %vm2885_vm9, %vm2886_vm7  ;;  %v9398_v58 = vrot.slane %v6720_v14, 1  ;;  %v3485_v41 = vrot.slane %v3386_v28, 7 }
 0x146   : > { %v6778_v18 = vmul.f32 %v2868_v13, %v9394_v26  ;;  %v3486_v59 = vrot.slane %v3387_v37, 7  ;;  %v2888_v26 = vsel %vm6789_vm10, %v6544_v48, %v2884_v20  ;;  %v3488_v39 = vrot.slane %v3388_v55, 7 }
 0x147   : > { %v6785_v33 = vmul.f32 %v2878_v15, %v9395_v49  ;;  %v1835_v22 = vsel %vm760_vm1, %v1833_v57, %v9398_v58  ;;  %v1721_v13 = vadd.f32 %v1677_v10, %v1639_v44  ;;  %v653_v62 = vmul.f32 %v5198_v5, %v6204_v34  ;;  %v9403_v58 = vld [vmem:[#allocation32_spill] sm:$0xff] }
 0x148   : > { %v2891_v15 = vmul.f32 %v6703_v21, %v2890_v7  ;;  %v2901_v45 = vmul.f32 %v6722_v31, %v2900_v51  ;;  %v2911_v52 = vmul.f32 %v6746_v9, %v2910_v42  ;;  %v2058_v57 = vsel %vm972_vm0, %v2056_v19, %v9241_v0 }
 0x149   : > { %v1930_v61 = vadd.f32 %v1835_v22, %v1721_v13  ;;  %v3487_v28 = vsel %vm3479_vm11, %v3485_v41, %v3486_v59  ;;  %v3489_v48 = vsel %vm3479_vm11, %v3486_v59, %v3488_v39  ;;  %v686_v20 = vadd.f32 %v6675_v3, %v653_v62 }
 0x14a   : > { %v9399_v34 = vsub.f32 %v9379_v43, %v9378_v32  ;;  %v3593_v7 = vpack.c.bf16 %v3489_v48, %v3487_v28  ;;  %v9400_v51 = vrot.slane %v6655_v17, 2  ;;  %v6819_v37 = vmul.f32 0.03125, %v2213_v4  ;;  %v2453_v43 = vpop.xlane.xlu0 %2452  ;;  %v9413_v17 = vld [vmem:[#allocation23_spill] sm:$0xff] }
 0x14b   : > { %v6821_v19 = vadd.f32 %v2058_v57, %v1930_v61  ;;  %v9402_v44 = vrot.slane %v6651_v40, 1  ;;  %v1159_v49 = vmul.f32 %v5204_v8, %v6430_v35  ;;  %v2400_v32 = vmul.f32 %v6735_v12, %v6735_v12  ;;  %v2459_v61 = vpop.xlane.xlu2 %2458 }
 0x14c   : > { %v6813_v10 = vmul.f32 %v2888_v26, %v9399_v34  ;;  %v1021_v42 = vsel %vm972_vm0, %v9400_v51, %v5231_v23  ;;  %v6831_v22 = vmul.f32 0.5, %v2891_v15  ;;  %v6833_v4 = vmul.f32 0.5, %v2901_v45  ;;  %4476 = vmatmul.msk.bf16.gmra.mxu0 %vm2176_vm4, %v3593_v7 }
 0x14d   : > { %9401 = vst [vmem:[#allocation53_spill] sm:$0xff] %v6821_v19  ;;  %v892_v55 = vadd.f32 %v9402_v44, %v686_v20  ;;  %v6836_v41 = vmul.f32 0.03125, %v2216_v24  ;;  %v6838_v40 = vmul.f32 0.5, %v2911_v52  ;;  %v2277_v59 = vsel %vm2176_vm4, %v6821_v19, 0.0 }
 0x14e   : > { %v9404_v13 = vrot.slane %v6686_v2, 2  ;;  %2278 = vadd.xlane.f32.xlu1 %v2277_v59  ;;  %v2619_v62 = vmul.f32 %v6819_v37, %v6819_v37  ;;  %v2514_v15 = vsel %vm2172_vm3, %v2400_v32, 0.0  ;;  %v2571_v45 = vmul.f32 0.03125, %v2453_v43  ;;  %v9405_v2 = vld [vmem:[#allocation21_spill] sm:$0xff]  ;;  %v9407_v32 = vld [vmem:[#allocation22_spill] sm:$0xff] }
 0x14f   : > { %v1121_v26 = vadd.f32 %v1021_v42, %v892_v55  ;;  %v2572_v24 = vmul.f32 0.03125, %v2456_v50  ;;  %2515 = vadd.xlane.f32.xlu0 %v2514_v15  ;;  %v2401_v52 = vmul.f32 %v6821_v19, %v6821_v19  ;;  %v720_v28 = vmul.f32 %v5200_v6, %v6372_v29  ;;  %v9408_v50 = vld [vmem:[#allocation29_spill] sm:$0xff]  ;;  %v9411_v15 = vld [vmem:[#allocation34_spill] sm:$0xff] }
 0x150   : > { %v1540_v39 = vsel %vm972_vm0, %v9404_v13, %v5233_v25  ;;  %v6855_v48 = vmul.f32 %v9405_v2, %v6372_v29  ;;  %v1678_v20 = vmul.f32 %v5218_v16, %v6692_v30  ;;  %v2620_v34 = vmul.f32 %v6836_v41, %v6836_v41  ;;  %v9409_v59 = vld [vmem:[#allocation33_spill] sm:$0xff] }
 0x151   : > { %v1203_v57 = vadd.f32 %v1159_v49, %v1121_v26  ;;  %v6861_v7 = vmul.f32 0.03125, %v2219_v60  ;;  %v2667_v51 = vsub.f32 %v2571_v45, %v2619_v62  ;;  %v9406_v42 = vrot.slane %v6669_v63, 1  ;;  %v9410_v13 = vld [vmem:[#allocation57_spill] sm:$0xff] }
 0x152   : > { %v797_v55 = vrot.slane %v720_v28, 1  ;;  %v1022_v49 = vrot.slane %v6855_v48, 2  ;;  %v6868_v43 = vmul.f32 %v9407_v32, %v6622_v46  ;;  %v2668_v60 = vsub.f32 %v2572_v24, %v2620_v34 }
 0x153   : > { %v1412_v44 = vadd.f32 %v9406_v42, %v1203_v57  ;;  %v2573_v0 = vmul.f32 0.03125, %v2459_v61  ;;  %v2893_v62 = vsub.f32 1.5, %v6831_v22  ;;  %v2517_v45 = vsel %vm2176_vm4, %v2401_v52, 0.0  ;;  %v9412_v57 = vld [vmem:[#allocation24_spill] sm:$0xff]  ;;  %v6890_v52 = vld [vmem:[%s5170_s11 + $0xd0] sm:$0xff] }
 0x154   : > { %v893_v28 = vadd.f32 %v797_v55, %v9412_v57  ;;  %vm2896_vm12 = vweird.f32 %v6703_v21  ;;  %v2903_v48 = vsub.f32 1.5, %v6833_v4  ;;  %v2621_v42 = vmul.f32 %v6861_v7, %v6861_v7  ;;  %v9414_v4 = vld [vmem:[#allocation27_spill] sm:$0xff] }
 0x155   : > { %v1640_v63 = vadd.f32 %v1540_v39, %v1412_v44  ;;  %v6881_v26 = vadd.f32 1e-06, %v2667_v51  ;;  %v6885_v24 = vmul.f32 %v9413_v17, %v6622_v46  ;;  %vm2906_vm13 = vweird.f32 %v6722_v31 }
 0x156   : > { %v2913_v22 = vsub.f32 1.5, %v6838_v40  ;;  %v1122_v61 = vadd.f32 %v1022_v49, %v893_v28  ;;  %v1317_v34 = vrot.slane %v6868_v43, 1  ;;  %vm2895_vm14 = vweird.f32 %v6631_v56  ;;  %2518 = vadd.xlane.f32.xlu1 %v2517_v45  ;;  %v9417_v28 = vld [vmem:[#allocation25_spill] sm:$0xff] }
 0x157   : > { %v1722_v39 = vadd.f32 %v1678_v20, %v1640_v63  ;;  %v9415_v51 = vrot.slane %v6742_v53, 2  ;;  %v6898_v19 = vadd.f32 1e-06, %v2668_v60  ;;  %v2669_v12 = vsub.f32 %v2573_v0, %v2621_v42  ;;  %vm6968_vm5 = vmor %vm2895_vm14, %vm2896_vm12 }
 0x158   : > { %v654_v40 = vmul.f32 %v5198_v5, %v6372_v29  ;;  %v9416_v20 = vrot.slane %v6720_v14, 1  ;;  %v1204_v57 = vadd.f32 %v9417_v28, %v1122_v61  ;;  %v6907_v43 = vmul.f32 %v5200_v6, %v6430_v35 }
 0x159   : > { %v2059_v44 = vsel %vm972_vm0, %v9415_v51, %v9414_v4  ;;  %v6911_v53 = vmul.f32 %v9405_v2, %v6430_v35  ;;  %4660 = vrsqrt.f32 %v6881_v26  ;;  %v1541_v0 = vrot.slane %v6885_v24, 2 }
 0x15a   : > { %v1931_v63 = vadd.f32 %v9416_v20, %v1722_v39  ;;  %v6917_v29 = vmul.f32 %v5210_v11, %v6890_v52  ;;  %v6921_v14 = vmul.f32 %v5237_v27, %v6890_v52  ;;  %v1413_v45 = vadd.f32 %v1317_v34, %v1204_v57 }
 0x15b   : > { %v6928_v39 = vmul.f32 %v9407_v32, %v6692_v30  ;;  %v2894_v24 = vmul.f32 %v6703_v21, %v2893_v62  ;;  %vm2916_vm15 = vweird.f32 %v6746_v9  ;;  %v687_v61 = vadd.f32 %v6675_v3, %v654_v40  ;;  %v6946_v40 = vld [vmem:[%s5170_s11 + $0xd8] sm:$0xff] }
 0x15c   : > { %v6923_v60 = vadd.f32 %v2059_v44, %v1931_v63  ;;  %v2904_v20 = vmul.f32 %v6722_v31, %v2903_v48  ;;  %v2914_v44 = vmul.f32 %v6746_v9, %v2913_v22  ;;  %v6940_v63 = vmul.f32 %v9413_v17, %v6692_v30 }
 0x15d   : > { %v6942_v42 = vadd.f32 1e-06, %v2669_v12  ;;  %v1641_v62 = vadd.f32 %v1541_v0, %v1413_v45  ;;  %v1836_v28 = vrot.slane %v6917_v29, 1  ;;  %v9419_v51 = vrot.slane %v6907_v43, 1 }
 0x15e   : > { %9418 = vst [vmem:[#allocation31_spill] sm:$0xff] %v6923_v60  ;;  %v2280_v57 = vsel %vm2180_vm2, %v6923_v60, 0.0  ;;  %v2402_v22 = vmul.f32 %v6923_v60, %v6923_v60  ;;  %4662 = vrsqrt.f32 %v6898_v19  ;;  %v2060_v4 = vrot.slane %v6921_v14, 2  ;;  %v9446_v60 = vld [vmem:[#allocation25_spill] sm:$0xff] }
 0x15f   : > { %2281 = vadd.xlane.f32.xlu2 %v2280_v57  ;;  %v799_v48 = vsel %vm760_vm1, %v797_v55, %v9419_v51  ;;  %v9248_v57 = vrot.slane %v6928_v39, 1  ;;  %v6956_v12 = vpop.eup %4660  ;;  %v1723_v45 = vadd.f32 %v5266_v47, %v1641_v62  ;;  %v9420_v17 = vrot.slane %v6911_v53, 2 }
 0x160   : > { %v894_v29 = vadd.f32 %v799_v48, %v687_v61  ;;  %v1160_v55 = vmul.f32 %v5204_v8, %v6622_v46  ;;  %vm2905_vm6 = vweird.f32 %v6637_v36  ;;  %vm2915_vm7 = vweird.f32 %v6658_v54 }
 0x161   : > { %v1024_v32 = vsel %vm972_vm0, %v1022_v49, %v9420_v17  ;;  %v1542_v61 = vrot.slane %v6940_v63, 2  ;;  %v6977_v17 = vmul.f32 %v5210_v11, %v6946_v40  ;;  %v2898_v49 = vsel %vm6968_vm5, %v6703_v21, %v2894_v24  ;;  %vm6984_vm8 = vmor %vm2905_vm6, %vm2906_vm13 }
 0x162   : > { %4664 = vrsqrt.f32 %v6942_v42  ;;  %v1932_v36 = vadd.f32 %v1836_v28, %v1723_v45  ;;  %v1123_v54 = vadd.f32 %v1024_v32, %v894_v29  ;;  %v2908_v51 = vsel %vm6984_vm8, %v6722_v31, %v2904_v20  ;;  %vm6994_vm9 = vmor %vm2915_vm7, %vm2916_vm15  ;;  %v2222_v29 = vpop.xlane.xlu0 %2221 }
 0x163   : > { %v2520_v21 = vsel %vm2180_vm2, %v2402_v22, 0.0  ;;  %v1319_v24 = vsel %vm760_vm1, %v1317_v34, %v9248_v57  ;;  %v7004_v48 = vmul.f32 %v5237_v27, %v6946_v40  ;;  %v2918_v31 = vsel %vm6994_vm9, %v6746_v9, %v2914_v44  ;;  %v9429_v44 = vld [vmem:[#allocation50_spill] sm:$0xff]  ;;  %v2228_v57 = vpop.xlane.xlu2 %2227 }
 0x164   : > { %v2920_v32 = vmul.f32 %v6956_v12, %v6881_v26  ;;  %v7011_v20 = vadd.f32 %v2060_v4, %v1932_v36  ;;  %v1205_v45 = vadd.f32 %v1160_v55, %v1123_v54  ;;  %v7013_v22 = vpop.eup %4662  ;;  %v9428_v34 = vsub.f32 %v9403_v58, %v6567_v1  ;;  %v2225_v36 = vpop.xlane.xlu1 %2224 }
 0x165   : > { %v1543_v56 = vsel %vm972_vm0, %v1541_v0, %v1542_v61  ;;  %v9249_v9 = vrot.slane %v6977_v17, 1  ;;  %v3337_v62 = vmul.f32 %v9429_v44, %v6778_v18  ;;  %v1679_v1 = vmul.f32 %v5218_v16, %v6890_v52 }
 0x166   : > { %9427 = vst [vmem:[#allocation32_spill] sm:$0xff] %v7011_v20  ;;  %v7018_v14 = vmul.f32 %v2898_v49, %v9428_v34  ;;  %v2283_v55 = vsel %vm2172_vm3, %v7011_v20, 0.0  ;;  %v1414_v54 = vadd.f32 %v1319_v24, %v1205_v45  ;;  %v3338_v58 = vmul.f32 %v9429_v44, %v6785_v33 }
 0x167   : > { %2521 = vadd.xlane.f32.xlu2 %v2520_v21  ;;  %v9430_v0 = vsub.f32 %v9409_v59, %v9408_v50  ;;  %v9431_v18 = vsub.f32 %v9411_v15, %v9410_v13  ;;  %2284 = vadd.xlane.f32.xlu0 %v2283_v55  ;;  %v9250_v21 = vrot.slane %v7004_v48, 2  ;;  %v3339_v24 = vmul.f32 %v9429_v44, %v6813_v10  ;;  %v9432_v13 = vld [vmem:[#allocation35_spill] sm:$0xff]  ;;  %v9433_v44 = vld [vmem:[#allocation36_spill] sm:$0xff] }
 0x168   : > { %v7045_v45 = vpop.eup %4664  ;;  %v2921_v33 = vmul.f32 %v6956_v12, %v2920_v32  ;;  %v2930_v50 = vmul.f32 %v7013_v22, %v6898_v19  ;;  %v1642_v59 = vadd.f32 %v1543_v56, %v1414_v54  ;;  %v3390_v55 = vadd.f32 %v6264_v38, %v3338_v58 }
 0x169   : > { %v7035_v49 = vmul.f32 %v2908_v51, %v9430_v0  ;;  %v7040_v34 = vmul.f32 %v2918_v31, %v9431_v18  ;;  %v3389_v51 = vadd.f32 %v6264_v38, %v3337_v62  ;;  %v1838_v31 = vsel %vm760_vm1, %v1836_v28, %v9249_v9 }
 0x16a   : > { %v3391_v10 = vadd.f32 %v6264_v38, %v3339_v24  ;;  %v1724_v0 = vadd.f32 %v1679_v1, %v1642_v59  ;;  %v655_v56 = vmul.f32 %v5198_v5, %v6430_v35  ;;  %v2940_v62 = vmul.f32 %v7045_v45, %v6942_v42 }
 0x16b   : > { %v3490_v18 = vrot.slane %v3389_v51, 7  ;;  %v2062_v54 = vsel %vm972_vm0, %v2060_v4, %v9250_v21  ;;  %v3491_v28 = vrot.slane %v3390_v55, 7  ;;  %v2922_v58 = vmul.f32 0.5, %v2921_v33 }
 0x16c   : > { %v3493_v15 = vrot.slane %v3391_v10, 7  ;;  %v2931_v38 = vmul.f32 %v7013_v22, %v2930_v50  ;;  %v1933_v24 = vadd.f32 %v1838_v31, %v1724_v0  ;;  %v688_v32 = vadd.f32 %v6675_v3, %v655_v56  ;;  %v2462_v10 = vpop.xlane.xlu0 %2461  ;;  %v9437_v0 = vld [vmem:[#allocation37_spill] sm:$0xff]  ;;  %v2465_v56 = vpop.xlane.xlu1 %2464 }
 0x16d   : > { %v3492_v1 = vsel %vm3479_vm11, %v3490_v18, %v3491_v28  ;;  %v9434_v35 = vrot.slane %v6911_v53, 2  ;;  %v7075_v9 = vmul.f32 0.03125, %v2222_v29  ;;  %v9436_v33 = vrot.slane %v6907_v43, 1 }
 0x16e   : > { %v3494_v59 = vsel %vm3479_vm11, %v3491_v28, %v3493_v15  ;;  %v7077_v4 = vadd.f32 %v2062_v54, %v1933_v24  ;;  %v1161_v31 = vmul.f32 %v5204_v8, %v6692_v30  ;;  %v2941_v18 = vmul.f32 %v7045_v45, %v2940_v62  ;;  %v2468_v54 = vpop.xlane.xlu2 %2467 }
 0x16f   : > { %v1025_v51 = vsel %vm972_vm0, %v9434_v35, %v5231_v23  ;;  %v3594_v55 = vpack.c.bf16 %v3494_v59, %v3492_v1  ;;  %v895_v50 = vadd.f32 %v9436_v33, %v688_v32  ;;  %v7086_v53 = vmul.f32 0.03125, %v2225_v36 }
 0x170   : > { %9435 = vst [vmem:[#allocation21_spill] sm:$0xff] %v7077_v4  ;;  %v2403_v29 = vmul.f32 %v7011_v20, %v7011_v20  ;;  %v7090_v28 = vmul.f32 0.5, %v2931_v38  ;;  %v2286_v43 = vsel %vm2176_vm4, %v7077_v4, 0.0  ;;  %v7095_v24 = vmul.f32 0.03125, %v2228_v57 }
 0x171   : > { %4477 = vmatmul.msk.bf16.gmra.mxu0 %vm2176_vm4, %v3594_v55  ;;  %v1124_v32 = vadd.f32 %v1025_v51, %v895_v50  ;;  %v2923_v1 = vsub.f32 1.5, %v2922_v58  ;;  %2287 = vadd.xlane.f32.xlu1 %v2286_v43  ;;  %v2622_v36 = vmul.f32 %v7075_v9, %v7075_v9  ;;  %v2404_v59 = vmul.f32 %v7077_v4, %v7077_v4  ;;  %v9440_v43 = vld [vmem:[#allocation22_spill] sm:$0xff] }
 0x172   : > { %9438 = vst [vmem:[#allocation29_spill] sm:$0xff] %v7095_v24  ;;  %v2523_v62 = vsel %vm2172_vm3, %v2403_v29, 0.0  ;;  %v2574_v35 = vmul.f32 0.03125, %v2462_v10  ;;  %v2575_v33 = vmul.f32 0.03125, %v2465_v56  ;;  %v2576_v15 = vmul.f32 0.03125, %v2468_v54 }
 0x173   : > { %v1206_v38 = vadd.f32 %v1161_v31, %v1124_v32  ;;  %2524 = vadd.xlane.f32.xlu0 %v2523_v62  ;;  %v1544_v57 = vsel %vm972_vm0, %v1542_v61, %v5233_v25  ;;  %v2623_v58 = vmul.f32 %v7086_v53, %v7086_v53  ;;  %v722_v51 = vmul.f32 %v5200_v6, %v6622_v46 }
 0x174   : > { %v7112_v55 = vmul.f32 %v9405_v2, %v6622_v46  ;;  %v9439_v50 = vrot.slane %v6928_v39, 1  ;;  %v1680_v10 = vmul.f32 %v5218_v16, %v6946_v40  ;;  %v2624_v63 = vmul.f32 %v7095_v24, %v7095_v24 }
 0x175   : > { %v2670_v61 = vsub.f32 %v2574_v35, %v2622_v36  ;;  %v2671_v29 = vsub.f32 %v2575_v33, %v2623_v58  ;;  %v800_v56 = vrot.slane %v722_v51, 1  ;;  %v7123_v32 = vmul.f32 %v9440_v43, %v6890_v52  ;;  %v9442_v35 = vld [vmem:[#allocation24_spill] sm:$0xff]  ;;  %v7141_v51 = vld [vmem:[%s5170_s11 + $0xe0] sm:$0xff] }
 0x176   : > { %v1415_v31 = vadd.f32 %v9439_v50, %v1206_v38  ;;  %v1026_v54 = vrot.slane %v7112_v55, 2  ;;  %v2526_v39 = vsel %vm2176_vm4, %v2404_v59, 0.0  ;;  %v2672_v38 = vsub.f32 %v2576_v15, %v2624_v63  ;;  %v9441_v50 = vld [vmem:[#allocation23_spill] sm:$0xff] }
 0x177   : > { %v7128_v21 = vmul.f32 %v9441_v50, %v6890_v52  ;;  %vm2926_vm10 = vweird.f32 %v6956_v12  ;;  %vm2936_vm12 = vweird.f32 %v7013_v22  ;;  %v2942_v36 = vmul.f32 0.5, %v2941_v18  ;;  %v9443_v55 = vld [vmem:[#allocation27_spill] sm:$0xff] }
 0x178   : > { %v1643_v62 = vadd.f32 %v1544_v57, %v1415_v31  ;;  %v896_v33 = vadd.f32 %v800_v56, %v9442_v35  ;;  %v7134_v58 = vmul.f32 %v6956_v12, %v2923_v1  ;;  %vm2925_vm13 = vweird.f32 %v6881_v26 }
 0x179   : > { %v2933_v57 = vsub.f32 1.5, %v7090_v28  ;;  %v7138_v15 = vadd.f32 1e-06, %v2670_v61  ;;  %vm2935_vm14 = vweird.f32 %v6898_v19  ;;  %v9444_v31 = vrot.slane %v7004_v48, 2  ;;  %2527 = vadd.xlane.f32.xlu1 %v2526_v39  ;;  %vm7205_vm15 = vmor %vm2925_vm13, %vm2926_vm10 }
 0x17a   : > { %v1725_v59 = vadd.f32 %v1680_v10, %v1643_v62  ;;  %v7148_v63 = vadd.f32 1e-06, %v2671_v29  ;;  %v1125_v1 = vadd.f32 %v1026_v54, %v896_v33  ;;  %v1320_v4 = vrot.slane %v7123_v32, 1  ;;  %vm7227_vm6 = vmor %vm2935_vm14, %vm2936_vm12 }
 0x17b   : > { %v2063_v18 = vsel %vm972_vm0, %v9444_v31, %v9443_v55  ;;  %v9445_v28 = vrot.slane %v6977_v17, 1  ;;  %v7153_v61 = vadd.f32 1e-06, %v2672_v38  ;;  %v1545_v62 = vrot.slane %v7128_v21, 2 }
 0x17c   : > { %v656_v20 = vmul.f32 %v5198_v5, %v6622_v46  ;;  %v1207_v48 = vadd.f32 %v9446_v60, %v1125_v1  ;;  %v7161_v39 = vmul.f32 %v5210_v11, %v7141_v51  ;;  %v7165_v29 = vmul.f32 %v5200_v6, %v6692_v30 }
 0x17d   : > { %v1934_v10 = vadd.f32 %v9445_v28, %v1725_v59  ;;  %v7169_v17 = vmul.f32 %v9405_v2, %v6692_v30  ;;  %4666 = vrsqrt.f32 %v7138_v15  ;;  %v7177_v21 = vmul.f32 %v9440_v43, %v6946_v40 }
 0x17e   : > { %v689_v46 = vadd.f32 %v6675_v3, %v656_v20  ;;  %4668 = vrsqrt.f32 %v7148_v63  ;;  %v1416_v38 = vadd.f32 %v1320_v4, %v1207_v48  ;;  %v7182_v33 = vmul.f32 %v5237_v27, %v7141_v51 }
 0x17f   : > { %v7171_v32 = vadd.f32 %v2063_v18, %v1934_v10  ;;  %v9258_v59 = vrot.slane %v7165_v29, 1  ;;  %v2943_v31 = vsub.f32 1.5, %v2942_v36  ;;  %v7190_v1 = vmul.f32 %v9441_v50, %v6946_v40 }
 0x180   : > { %v2934_v28 = vmul.f32 %v7013_v22, %v2933_v57  ;;  %v1644_v10 = vadd.f32 %v1545_v62, %v1416_v38  ;;  %v1839_v48 = vrot.slane %v7161_v39, 1  ;;  %4670 = vrsqrt.f32 %v7153_v61  ;;  %v7213_v38 = vld [vmem:[%s5170_s11 + $0xe8] sm:$0xff] }
 0x181   : > { %9447 = vst [vmem:[#allocation33_spill] sm:$0xff] %v7171_v32  ;;  %v2289_v18 = vsel %vm2180_vm2, %v7171_v32, 0.0  ;;  %v802_v36 = vsel %vm760_vm1, %v800_v56, %v9258_v59  ;;  %v2405_v24 = vmul.f32 %v7171_v32, %v7171_v32  ;;  %vm2945_vm5 = vweird.f32 %v6942_v42 }
 0x182   : > { %2290 = vadd.xlane.f32.xlu2 %v2289_v18  ;;  %v897_v20 = vadd.f32 %v802_v36, %v689_v46  ;;  %v1726_v56 = vadd.f32 %v5266_v47, %v1644_v10  ;;  %v2064_v39 = vrot.slane %v7182_v33, 2  ;;  %v1162_v46 = vmul.f32 %v5204_v8, %v6890_v52  ;;  %v2234_v10 = vpop.xlane.xlu1 %2233 }
 0x183   : > { %v7217_v18 = vpop.eup %4666  ;;  %v2928_v26 = vsel %vm7205_vm15, %v6956_v12, %v7134_v58  ;;  %vm2946_vm7 = vweird.f32 %v7045_v45  ;;  %v9452_v33 = vrot.slane %v7169_v17, 2  ;;  %v9263_v59 = vrot.slane %v7190_v1, 2 }
 0x184   : > { %v7236_v60 = vpop.eup %4668  ;;  %v2938_v12 = vsel %vm7227_vm6, %v7013_v22, %v2934_v28  ;;  %v2944_v19 = vmul.f32 %v7045_v45, %v2943_v31  ;;  %v1935_v58 = vadd.f32 %v1839_v48, %v1726_v56  ;;  %v2529_v32 = vsel %vm2180_vm2, %v2405_v24, 0.0  ;;  %v7261_v24 = vld [vmem:[%s9137_s5] ss:$0 sm:$0xff]  ;;  %vm7284_vm8 = vmor %vm2945_vm5, %vm2946_vm7 }
 0x185   : > { %v1028_v36 = vsel %vm972_vm0, %v1026_v54, %v9452_v33  ;;  %v9453_v47 = vrot.slane %v7177_v21, 1  ;;  %v7248_v54 = vmul.f32 %v5210_v11, %v7213_v38  ;;  %v7252_v33 = vmul.f32 %v5237_v27, %v7213_v38 }
 0x186   : > { %v1126_v57 = vadd.f32 %v1028_v36, %v897_v20  ;;  %v2950_v22 = vmul.f32 %v7217_v18, %v7138_v15  ;;  %v7256_v31 = vadd.f32 %v2064_v39, %v1935_v58  ;;  %v2960_v28 = vmul.f32 %v7236_v60, %v7148_v63  ;;  %v2231_v36 = vpop.xlane.xlu0 %2230 }
 0x187   : > { %v1322_v55 = vsel %vm760_vm1, %v1320_v4, %v9453_v47  ;;  %v3340_v47 = vmul.f32 %v7261_v24, %v7018_v14  ;;  %v7265_v4 = vpop.eup %4670  ;;  %v1547_v56 = vsel %vm972_vm0, %v1545_v62, %v9263_v59  ;;  %v9455_v58 = vsub.f32 %v9432_v13, %v6819_v37  ;;  %v9463_v14 = vld [vmem:[#allocation38_spill] sm:$0xff] }
 0x188   : > { %9454 = vst [vmem:[#allocation57_spill] sm:$0xff] %v7256_v31  ;;  %v1208_v20 = vadd.f32 %v1162_v46, %v1126_v57  ;;  %v3341_v46 = vmul.f32 %v7261_v24, %v7035_v49  ;;  %v2292_v62 = vsel %vm2172_vm3, %v7256_v31, 0.0  ;;  %v1681_v49 = vmul.f32 %v5218_v16, %v7141_v51 }
 0x189   : > { %v7278_v57 = vmul.f32 %v2928_v26, %v9455_v58  ;;  %v9459_v37 = vsub.f32 %v9433_v44, %v6836_v41  ;;  %v2948_v42 = vsel %vm7284_vm8, %v7045_v45, %v2944_v19  ;;  %2293 = vadd.xlane.f32.xlu0 %v2292_v62  ;;  %v3342_v26 = vmul.f32 %v7261_v24, %v7040_v34  ;;  %v7309_v41 = vld [vmem:[%s9138_s6] ss:$0 sm:$0xff] }
 0x18a   : > { %2530 = vadd.xlane.f32.xlu2 %v2529_v32  ;;  %v1417_v59 = vadd.f32 %v1322_v55, %v1208_v20  ;;  %v2065_v32 = vrot.slane %v7252_v33, 2  ;;  %v2237_v55 = vpop.xlane.xlu2 %2236  ;;  %v2951_v20 = vmul.f32 %v7217_v18, %v2950_v22  ;;  %v2970_v58 = vmul.f32 %v7265_v4, %v7153_v61 }
 0x18b   : > { %9456 = vst [vmem:[#allocation34_spill] sm:$0xff] %v7278_v57  ;;  %v7295_v13 = vmul.f32 %v2938_v12, %v9459_v37  ;;  %v3392_v45 = vadd.f32 %v7309_v41, %v3340_v47  ;;  %v2961_v44 = vmul.f32 %v7236_v60, %v2960_v28  ;;  %v9461_v12 = vrot.slane %v7248_v54, 1 }
 0x18c   : > { %v1645_v57 = vadd.f32 %v1547_v56, %v1417_v59  ;;  %v3393_v19 = vadd.f32 %v7309_v41, %v3341_v46  ;;  %v3394_v22 = vadd.f32 %v7309_v41, %v3342_v26  ;;  %v9462_v59 = vsub.f32 %v9437_v0, %v6861_v7  ;;  %v9464_v26 = vld [vmem:[#allocation39_spill] sm:$0xff] }
 0x18d   : > { %9460 = vst [vmem:[#allocation50_spill] sm:$0xff] %v7295_v13  ;;  %v1841_v34 = vsel %vm760_vm1, %v1839_v48, %v9461_v12  ;;  %v3495_v47 = vrot.slane %v3392_v45, 7  ;;  %v2066_v28 = vsel %vm972_vm0, %v2064_v39, %v2065_v32  ;;  %v657_v46 = vmul.f32 %v5198_v5, %v6692_v30 }
 0x18e   : > { %v7321_v56 = vmul.f32 %v2948_v42, %v9462_v59  ;;  %v1727_v37 = vadd.f32 %v1681_v49, %v1645_v57  ;;  %v3496_v13 = vrot.slane %v3393_v19, 7  ;;  %v3498_v48 = vrot.slane %v3394_v22, 7 }
 0x18f   : > { %v2952_v7 = vmul.f32 0.5, %v2951_v20  ;;  %v2971_v0 = vmul.f32 %v7265_v4, %v2970_v58  ;;  %v2962_v59 = vmul.f32 0.5, %v2961_v44  ;;  %v690_v45 = vadd.f32 %v6675_v3, %v657_v46 }
 0x190   : > { %v1936_v42 = vadd.f32 %v1841_v34, %v1727_v37  ;;  %v3497_v57 = vsel %vm3479_vm11, %v3495_v47, %v3496_v13  ;;  %v3499_v49 = vsel %vm3479_vm11, %v3496_v13, %v3498_v48  ;;  %v9466_v30 = vrot.slane %v7169_v17, 2  ;;  %v2471_v37 = vpop.xlane.xlu0 %2470 }
 0x191   : > { %v3595_v19 = vpack.c.bf16 %v3499_v49, %v3497_v57  ;;  %v7342_v12 = vmul.f32 0.03125, %v2231_v36  ;;  %v9468_v20 = vrot.slane %v7165_v29, 1  ;;  %v1163_v44 = vmul.f32 %v5204_v8, %v6946_v40  ;;  %v2474_v29 = vpop.xlane.xlu1 %2473 }
 0x192   : > { %v7336_v39 = vadd.f32 %v2066_v28, %v1936_v42  ;;  %v1029_v22 = vsel %vm972_vm0, %v9466_v30, %v5231_v23  ;;  %v7348_v34 = vmul.f32 0.03125, %v2234_v10  ;;  %v2406_v13 = vmul.f32 %v7256_v31, %v7256_v31 }
 0x193   : > { %9467 = vst [vmem:[#allocation36_spill] sm:$0xff] %v7342_v12  ;;  %v898_v58 = vadd.f32 %v9468_v20, %v690_v45  ;;  %v2953_v47 = vsub.f32 1.5, %v2952_v7  ;;  %v7352_v28 = vmul.f32 0.5, %v2971_v0  ;;  %4478 = vmatmul.msk.bf16.gmra.mxu0 %vm2176_vm4, %v3595_v19  ;;  %v7357_v36 = vmul.f32 0.03125, %v2237_v55  ;;  %v2477_v0 = vpop.xlane.xlu2 %2476 }
 0x194   : > { %9465 = vst [vmem:[#allocation35_spill] sm:$0xff] %v7336_v39  ;;  %v2295_v17 = vsel %vm2176_vm4, %v7336_v39, 0.0  ;;  %v2963_v48 = vsub.f32 1.5, %v2962_v59  ;;  %v9470_v10 = vrot.slane %v7190_v1, 2  ;;  %v2407_v7 = vmul.f32 %v7336_v39, %v7336_v39 }
 0x195   : > { %9469 = vst [vmem:[#allocation37_spill] sm:$0xff] %v7357_v36  ;;  %2296 = vadd.xlane.f32.xlu1 %v2295_v17  ;;  %v1127_v46 = vadd.f32 %v1029_v22, %v898_v58  ;;  %v1682_v57 = vmul.f32 %v5218_v16, %v7213_v38  ;;  %v2625_v55 = vmul.f32 %v7342_v12, %v7342_v12  ;;  %v2532_v49 = vsel %vm2172_vm3, %v2406_v13, 0.0 }
 0x196   : > { %v1548_v42 = vsel %vm972_vm0, %v9470_v10, %v5233_v25  ;;  %v2577_v59 = vmul.f32 0.03125, %v2471_v37  ;;  %v2626_v19 = vmul.f32 %v7348_v34, %v7348_v34  ;;  %2533 = vadd.xlane.f32.xlu0 %v2532_v49  ;;  %v2578_v1 = vmul.f32 0.03125, %v2474_v29 }
 0x197   : > { %v1209_v45 = vadd.f32 %v1163_v44, %v1127_v46  ;;  %v724_v30 = vmul.f32 %v5200_v6, %v6890_v52  ;;  %v2627_v22 = vmul.f32 %v7357_v36, %v7357_v36  ;;  %v2579_v58 = vmul.f32 0.03125, %v2477_v0 }
 0x198   : > { %v2673_v20 = vsub.f32 %v2577_v59, %v2625_v55  ;;  %v7378_v17 = vmul.f32 %v9405_v2, %v6890_v52  ;;  %vm2955_vm9 = vweird.f32 %v7138_v15  ;;  %v9471_v44 = vrot.slane %v7177_v21, 1 }
 0x199   : > { %v2535_v37 = vsel %vm2176_vm4, %v2407_v7, 0.0  ;;  %v2674_v29 = vsub.f32 %v2578_v1, %v2626_v19  ;;  %v803_v46 = vrot.slane %v724_v30, 1  ;;  %v7389_v0 = vmul.f32 %v9440_v43, %v7141_v51 }
 0x19a   : > { %v1418_v13 = vadd.f32 %v9471_v44, %v1209_v45  ;;  %v7384_v10 = vadd.f32 1e-06, %v2673_v20  ;;  %v1030_v49 = vrot.slane %v7378_v17, 2  ;;  %v7393_v55 = vmul.f32 %v9441_v50, %v7141_v51  ;;  %v9472_v20 = vld [vmem:[#allocation27_spill] sm:$0xff] }
 0x19b   : > { %vm2956_vm10 = vweird.f32 %v7217_v18  ;;  %vm2965_vm12 = vweird.f32 %v7148_v63  ;;  %v899_v7 = vadd.f32 %v803_v46, %v9442_v35  ;;  %v2954_v59 = vmul.f32 %v7217_v18, %v2953_v47  ;;  %v7410_v44 = vld [vmem:[%s5170_s11 + $0xf0] sm:$0xff] }
 0x19c   : > { %v1646_v21 = vadd.f32 %v1548_v42, %v1418_v13  ;;  %vm2966_vm13 = vweird.f32 %v7236_v60  ;;  %v2973_v45 = vsub.f32 1.5, %v7352_v28  ;;  %v2675_v19 = vsub.f32 %v2579_v58, %v2627_v22  ;;  %vm7450_vm15 = vmor %vm2955_vm9, %vm2956_vm10 }
 0x19d   : > { %v2964_v1 = vmul.f32 %v7236_v60, %v2963_v48  ;;  %vm2975_vm14 = vweird.f32 %v7153_v61  ;;  %v2067_v17 = vsel %vm972_vm0, %v2065_v32, %v9472_v20  ;;  %2536 = vadd.xlane.f32.xlu1 %v2535_v37  ;;  %v7407_v42 = vadd.f32 1e-06, %v2674_v29  ;;  %v9474_v37 = vld [vmem:[#allocation25_spill] sm:$0xff]  ;;  %vm7473_vm6 = vmor %vm2965_vm12, %vm2966_vm13 }
 0x19e   : > { %v1728_v30 = vadd.f32 %v1682_v57, %v1646_v21  ;;  %4672 = vrsqrt.f32 %v7384_v10  ;;  %v1128_v47 = vadd.f32 %v1030_v49, %v899_v7  ;;  %v1323_v28 = vrot.slane %v7389_v0, 1  ;;  %v7489_v7 = vld [vmem:[%s5170_s11 + $0xf8] sm:$0xff] }
 0x19f   : > { %v1549_v48 = vrot.slane %v7393_v55, 2  ;;  %v9473_v22 = vrot.slane %v7248_v54, 1  ;;  %v658_v33 = vmul.f32 %v5198_v5, %v6890_v52  ;;  %v7421_v32 = vmul.f32 %v5200_v6, %v6946_v40 }
 0x1a0   : > { %v7425_v58 = vmul.f32 %v9405_v2, %v6946_v40  ;;  %v7427_v13 = vadd.f32 1e-06, %v2675_v19  ;;  %v1210_v29 = vadd.f32 %v9474_v37, %v1128_v47  ;;  %v7432_v0 = vmul.f32 %v5210_v11, %v7410_v44 }
 0x1a1   : > { %v1937_v57 = vadd.f32 %v9473_v22, %v1728_v30  ;;  %v7436_v54 = vmul.f32 %v5237_v27, %v7410_v44  ;;  %4674 = vrsqrt.f32 %v7407_v42  ;;  %v9264_v55 = vrot.slane %v7421_v32, 1 }
 0x1a2   : > { %v7444_v21 = vmul.f32 %v9440_v43, %v7213_v38  ;;  %vm2976_vm5 = vweird.f32 %v7265_v4  ;;  %v1419_v19 = vadd.f32 %v1323_v28, %v1210_v29  ;;  %v691_v30 = vadd.f32 %v6675_v3, %v658_v33 }
 0x1a3   : > { %v7438_v52 = vadd.f32 %v2067_v17, %v1937_v57  ;;  %v9269_v17 = vrot.slane %v7425_v58, 2  ;;  %v2958_v47 = vsel %vm7450_vm15, %v7217_v18, %v2954_v59  ;;  %v2974_v22 = vmul.f32 %v7265_v4, %v2973_v45  ;;  %vm7496_vm7 = vmor %vm2975_vm14, %vm2976_vm5 }
 0x1a4   : > { %v7465_v57 = vmul.f32 %v9441_v50, %v7213_v38  ;;  %v7467_v62 = vpop.eup %4672  ;;  %4676 = vrsqrt.f32 %v7427_v13  ;;  %v1647_v18 = vadd.f32 %v1549_v48, %v1419_v19  ;;  %v1842_v59 = vrot.slane %v7432_v0, 1 }
 0x1a5   : > { %9475 = vst [vmem:[#allocation22_spill] sm:$0xff] %v7438_v52  ;;  %v2298_v15 = vsel %vm2180_vm2, %v7438_v52, 0.0  ;;  %v805_v45 = vsel %vm760_vm1, %v803_v46, %v9264_v55  ;;  %v2968_v33 = vsel %vm7473_vm6, %v7236_v60, %v2964_v1  ;;  %v2408_v63 = vmul.f32 %v7438_v52, %v7438_v52  ;;  %v9482_v46 = vld [vmem:[#allocation26_spill] sm:$0xff]  ;;  %v9483_v55 = vld [vmem:[#allocation29_spill] sm:$0xff] }
 0x1a6   : > { %2299 = vadd.xlane.f32.xlu2 %v2298_v15  ;;  %v2068_v29 = vrot.slane %v7436_v54, 2  ;;  %v1729_v19 = vadd.f32 %v9482_v46, %v1647_v18  ;;  %v900_v60 = vadd.f32 %v805_v45, %v691_v30  ;;  %v1032_v1 = vsel %vm972_vm0, %v1030_v49, %v9269_v17  ;;  %v9484_v15 = vld [vmem:[#allocation40_spill] sm:$0xff] }
 0x1a7   : > { %v1164_v54 = vmul.f32 %v5204_v8, %v7141_v51  ;;  %v7506_v3 = vpop.eup %4674  ;;  %v2720_v52 = vsub.f32 %v9484_v15, %v9483_v55  ;;  %v9485_v61 = vsub.f32 %v9463_v14, %v7075_v9  ;;  %v2978_v30 = vsel %vm7496_vm7, %v7265_v4, %v2974_v22 }
 0x1a8   : > { %v9272_v18 = vrot.slane %v7465_v57, 2  ;;  %v2980_v49 = vmul.f32 %v7467_v62, %v7384_v10  ;;  %v1938_v45 = vadd.f32 %v1842_v59, %v1729_v19  ;;  %v1129_v17 = vadd.f32 %v1032_v1, %v900_v60  ;;  %v9490_v1 = vld [vmem:[#allocation50_spill] sm:$0xff] }
 0x1a9   : > { %v7513_v39 = vmul.f32 %v2958_v47, %v9485_v61  ;;  %v7523_v31 = vmul.f32 %v5210_v11, %v7489_v7  ;;  %v9486_v9 = vsub.f32 %v9464_v26, %v7086_v53  ;;  %v2538_v55 = vsel %vm2180_vm2, %v2408_v63, 0.0  ;;  %v9488_v26 = vld [vmem:[#allocation34_spill] sm:$0xff]  ;;  %v2240_v63 = vpop.xlane.xlu0 %2239 }
 0x1aa   : > { %v9487_v4 = vrot.slane %v7444_v21, 1  ;;  %v7536_v22 = vmul.f32 %v5237_v27, %v7489_v7  ;;  %v7538_v15 = vpop.eup %4676  ;;  %v2990_v0 = vmul.f32 %v7506_v3, %v7407_v42  ;;  %v7542_v19 = vadd.f32 %v2068_v29, %v1938_v45 }
 0x1ab   : > { %v7528_v14 = vmul.f32 %v2968_v33, %v9486_v9  ;;  %v1211_v53 = vadd.f32 %v1164_v54, %v1129_v17  ;;  %v3343_v33 = vmul.f32 %v7261_v24, %v9488_v26  ;;  %v7546_v60 = vmul.f32 %v2978_v30, %v2720_v52  ;;  %v2243_v9 = vpop.xlane.xlu1 %2242 }
 0x1ac   : > { %v1325_v47 = vsel %vm760_vm1, %v1323_v28, %v9487_v4  ;;  %v1551_v28 = vsel %vm972_vm0, %v1549_v48, %v9272_v18  ;;  %v3344_v61 = vmul.f32 %v7261_v24, %v9490_v1  ;;  %v2246_v4 = vpop.xlane.xlu2 %2245  ;;  %v2981_v17 = vmul.f32 %v7467_v62, %v2980_v49  ;;  %v9492_v49 = vld [vmem:[#allocation42_spill] sm:$0xff] }
 0x1ad   : > { %9489 = vst [vmem:[#allocation23_spill] sm:$0xff] %v7546_v60  ;;  %v2301_v54 = vsel %vm2172_vm3, %v7542_v19, 0.0  ;;  %v1420_v45 = vadd.f32 %v1325_v47, %v1211_v53  ;;  %v1683_v52 = vmul.f32 %v5218_v16, %v7410_v44  ;;  %v3000_v26 = vmul.f32 %v7538_v15, %v7427_v13  ;;  %v9493_v60 = vld [vmem:[#allocation43_spill] sm:$0xff] }
 0x1ae   : > { %2539 = vadd.xlane.f32.xlu2 %v2538_v55  ;;  %2302 = vadd.xlane.f32.xlu0 %v2301_v54  ;;  %v3345_v55 = vmul.f32 %v7261_v24, %v7321_v56  ;;  %v2991_v47 = vmul.f32 %v7506_v3, %v2990_v0  ;;  %v3395_v27 = vadd.f32 %v7309_v41, %v3343_v33  ;;  %v9494_v12 = vrot.slane %v7523_v31, 1 }
 0x1af   : > { %v1648_v53 = vadd.f32 %v1551_v28, %v1420_v45  ;;  %v3396_v1 = vadd.f32 %v7309_v41, %v3344_v61  ;;  %v7577_v56 = vmul.f32 0.5, %v2981_v17  ;;  %v659_v0 = vmul.f32 %v5198_v5, %v6946_v40  ;;  %v7590_v61 = vld [vmem:[%s9136_s4] ss:$0 sm:$0xff] }
 0x1b0   : > { %v1844_v54 = vsel %vm760_vm1, %v1842_v59, %v9494_v12  ;;  %v3397_v30 = vadd.f32 %v7309_v41, %v3345_v55  ;;  %v3500_v18 = vrot.slane %v3395_v27, 7  ;;  %v3001_v33 = vmul.f32 %v7538_v15, %v3000_v26 }
 0x1b1   : > { %v1730_v46 = vadd.f32 %v1683_v52, %v1648_v53  ;;  %v9495_v28 = vrot.slane %v7536_v22, 2  ;;  %v3501_v48 = vrot.slane %v3396_v1, 7  ;;  %v7585_v12 = vmul.f32 0.5, %v2991_v47 }
 0x1b2   : > { %v3503_v36 = vrot.slane %v3397_v30, 7  ;;  %v692_v27 = vadd.f32 %v7590_v61, %v659_v0  ;;  %v9496_v40 = vrot.slane %v7425_v58, 2  ;;  %v1165_v30 = vmul.f32 %v5204_v8, %v7213_v38  ;;  %v2480_v58 = vpop.xlane.xlu0 %2479 }
 0x1b3   : > { %v2070_v45 = vsel %vm972_vm0, %v2068_v29, %v9495_v28  ;;  %v1939_v59 = vadd.f32 %v1844_v54, %v1730_v46  ;;  %v3502_v52 = vsel %vm3479_vm11, %v3500_v18, %v3501_v48  ;;  %v7601_v46 = vmul.f32 0.03125, %v2240_v63  ;;  %v2483_v63 = vpop.xlane.xlu1 %2482 }
 0x1b4   : > { %v1033_v17 = vsel %vm972_vm0, %v9496_v40, %v5231_v23  ;;  %v3504_v29 = vsel %vm3479_vm11, %v3501_v48, %v3503_v36  ;;  %v9497_v55 = vrot.slane %v7421_v32, 1  ;;  %v7607_v53 = vmul.f32 0.03125, %v2243_v9  ;;  %v2486_v48 = vpop.xlane.xlu2 %2485 }
 0x1b5   : > { %v7603_v26 = vadd.f32 %v2070_v45, %v1939_v59  ;;  %v3596_v1 = vpack.c.bf16 %v3504_v29, %v3502_v52  ;;  %v2983_v54 = vsub.f32 1.5, %v7577_v56  ;;  %v7610_v0 = vmul.f32 0.5, %v3001_v33 }
 0x1b6   : > { %v901_v47 = vadd.f32 %v9497_v55, %v692_v27  ;;  %v7612_v18 = vmul.f32 0.03125, %v2246_v4  ;;  %v2409_v36 = vmul.f32 %v7542_v19, %v7542_v19  ;;  %v9498_v9 = vrot.slane %v7465_v57, 2 }
 0x1b7   : > { %v2304_v28 = vsel %vm2176_vm4, %v7603_v26, 0.0  ;;  %4479 = vmatmul.msk.bf16.gmra.mxu0 %vm2176_vm4, %v3596_v1  ;;  %v2628_v4 = vmul.f32 %v7601_v46, %v7601_v46  ;;  %v2629_v33 = vmul.f32 %v7607_v53, %v7607_v53  ;;  %v2410_v27 = vmul.f32 %v7603_v26, %v7603_v26 }
 0x1b8   : > { %v1130_v32 = vadd.f32 %v1033_v17, %v901_v47  ;;  %v1552_v56 = vsel %vm972_vm0, %v9498_v9, %v5233_v25  ;;  %2305 = vadd.xlane.f32.xlu1 %v2304_v28  ;;  %v2630_v45 = vmul.f32 %v7612_v18, %v7612_v18  ;;  %v2541_v59 = vsel %vm2172_vm3, %v2409_v36, 0.0 }
 0x1b9   : > { %2542 = vadd.xlane.f32.xlu0 %v2541_v59  ;;  %v2580_v57 = vmul.f32 0.03125, %v2480_v58  ;;  %v2581_v17 = vmul.f32 0.03125, %v2483_v63  ;;  %v2582_v52 = vmul.f32 0.03125, %v2486_v48  ;;  %v1684_v29 = vmul.f32 %v5218_v16, %v7489_v7 }
 0x1ba   : > { %v1212_v40 = vadd.f32 %v1165_v30, %v1130_v32  ;;  %v2544_v1 = vsel %vm2176_vm4, %v2410_v27, 0.0  ;;  %v726_v55 = vmul.f32 %v5200_v6, %v7141_v51  ;;  %v7639_v47 = vmul.f32 %v9405_v2, %v7141_v51 }
 0x1bb   : > { %vm2986_vm8 = vweird.f32 %v7467_v62  ;;  %v9499_v30 = vrot.slane %v7444_v21, 1  ;;  %v2676_v58 = vsub.f32 %v2580_v57, %v2628_v4  ;;  %v2677_v63 = vsub.f32 %v2581_v17, %v2629_v33 }
 0x1bc   : > { %v2678_v48 = vsub.f32 %v2582_v52, %v2630_v45  ;;  %vm2996_vm9 = vweird.f32 %v7506_v3  ;;  %v806_v16 = vrot.slane %v726_v55, 1  ;;  %v1034_v28 = vrot.slane %v7639_v47, 2 }
 0x1bd   : > { %v1421_v36 = vadd.f32 %v9499_v30, %v1212_v40  ;;  %v7648_v32 = vmul.f32 %v9440_v43, %v7410_v44  ;;  %v7652_v9 = vmul.f32 %v9441_v50, %v7410_v44  ;;  %vm2985_vm10 = vweird.f32 %v7384_v10 }
 0x1be   : > { %vm3006_vm12 = vweird.f32 %v7538_v15  ;;  %v7656_v4 = vadd.f32 1e-06, %v2676_v58  ;;  %v7658_v33 = vadd.f32 1e-06, %v2677_v63  ;;  %v7660_v45 = vadd.f32 1e-06, %v2678_v48  ;;  %vm7731_vm15 = vmor %vm2985_vm10, %vm2986_vm8 }
 0x1bf   : > { %v1649_v21 = vadd.f32 %v1552_v56, %v1421_v36  ;;  %v7663_v59 = vmul.f32 %v7467_v62, %v2983_v54  ;;  %v2993_v27 = vsub.f32 1.5, %v7585_v12  ;;  %vm2995_vm13 = vweird.f32 %v7407_v42 }
 0x1c0   : > { %v902_v40 = vadd.f32 %v806_v16, %v9442_v35  ;;  %v660_v57 = vmul.f32 %v5198_v5, %v7141_v51  ;;  %v3003_v56 = vsub.f32 1.5, %v7610_v0  ;;  %vm3005_vm14 = vweird.f32 %v7427_v13  ;;  %2545 = vadd.xlane.f32.xlu1 %v2544_v1  ;;  %vm7746_vm5 = vmor %vm2995_vm13, %vm2996_vm9 }
 0x1c1   : > { %v1731_v17 = vadd.f32 %v1684_v29, %v1649_v21  ;;  %v9500_v52 = vrot.slane %v7536_v22, 2  ;;  %4678 = vrsqrt.f32 %v7656_v4  ;;  %v1326_v35 = vrot.slane %v7648_v32, 1  ;;  %vm7767_vm6 = vmor %vm3005_vm14, %vm3006_vm12 }
 0x1c2   : > { %4680 = vrsqrt.f32 %v7658_v33  ;;  %v1131_v12 = vadd.f32 %v1034_v28, %v902_v40  ;;  %v1766_v51 = vmul.f32 0.0, %v5210_v11  ;;  %v9501_v0 = vrot.slane %v7523_v31, 1  ;;  %v7721_v40 = vpop.xlane.xlu0 %2248 }
 0x1c3   : > { %v2071_v54 = vsel %vm972_vm0, %v9500_v52, %v9472_v20  ;;  %4682 = vrsqrt.f32 %v7660_v45  ;;  %v1553_v29 = vrot.slane %v7652_v9, 2  ;;  %v7686_v22 = vmul.f32 %v5200_v6, %v7213_v38  ;;  %v7738_v52 = vpop.xlane.xlu2 %2254 }
 0x1c4   : > { %v1940_v55 = vadd.f32 %v9501_v0, %v1731_v17  ;;  %v1213_v1 = vadd.f32 %v9474_v37, %v1131_v12  ;;  %v693_v47 = vadd.f32 %v7590_v61, %v660_v57  ;;  %v7692_v30 = vmul.f32 %v9405_v2, %v7213_v38  ;;  %v7723_v57 = vpop.xlane.xlu1 %2251 }
 0x1c5   : > { %v7696_v11 = vmul.f32 %v9440_v43, %v7489_v7  ;;  %v2994_v31 = vmul.f32 %v7506_v3, %v2993_v27  ;;  %v3004_v36 = vmul.f32 %v7538_v15, %v3003_v56  ;;  %v9276_v6 = vrot.slane %v7686_v22, 1 }
 0x1c6   : > { %v7700_v58 = vadd.f32 %v2071_v54, %v1940_v55  ;;  %v1422_v63 = vadd.f32 %v1326_v35, %v1213_v1  ;;  %v7703_v37 = vrot.slane %v1766_v51, 1  ;;  %v9277_v48 = vrot.slane %v7692_v30, 2 }
 0x1c7   : > { %v7708_v2 = vmul.f32 %v9441_v50, %v7489_v7  ;;  %v7710_v32 = vpop.eup %4678  ;;  %v808_v9 = vsel %vm760_vm1, %v806_v16, %v9276_v6  ;;  %v1166_v21 = vmul.f32 %v5204_v8, %v7410_v44  ;;  %v3346_v27 = vmul.f32 %v7261_v24, %v7513_v39 }
 0x1c8   : > { %v2307_v43 = vsel %vm2180_vm2, %v7700_v58, 0.0  ;;  %v7725_v50 = vpop.eup %4680  ;;  %v3010_v44 = vmul.f32 %v7710_v32, %v7656_v4  ;;  %v1650_v16 = vadd.f32 %v1553_v29, %v1422_v63  ;;  %v903_v39 = vadd.f32 %v808_v9, %v693_v47  ;;  %v9508_v63 = vld [vmem:[#allocation26_spill] sm:$0xff] }
 0x1c9   : > { %2308 = vadd.xlane.f32.xlu2 %v2307_v43  ;;  %v9275_v17 = vrot.slane %v7696_v11, 1  ;;  %v7740_v54 = vpop.eup %4682  ;;  %v2411_v12 = vmul.f32 %v7700_v58, %v7700_v58  ;;  %v3020_v51 = vmul.f32 %v7725_v50, %v7658_v33  ;;  %v1036_v0 = vsel %vm972_vm0, %v1034_v28, %v9277_v48 }
 0x1ca   : > { %v3347_v55 = vmul.f32 %v7261_v24, %v7528_v14  ;;  %v2988_v42 = vsel %vm7731_vm15, %v7467_v62, %v7663_v59  ;;  %v3011_v47 = vmul.f32 %v7710_v32, %v3010_v44  ;;  %v1732_v28 = vadd.f32 %v9508_v63, %v1650_v16  ;;  %v9509_v16 = vld [vmem:[#allocation23_spill] sm:$0xff] }
 0x1cb   : > { %v1554_v43 = vrot.slane %v7708_v2, 2  ;;  %v2998_v14 = vsel %vm7746_vm5, %v7506_v3, %v2994_v31  ;;  %v3008_v62 = vsel %vm7767_vm6, %v7538_v15, %v3004_v36  ;;  %v3030_v13 = vmul.f32 %v7740_v54, %v7660_v45 }
 0x1cc   : > { %v1132_v59 = vadd.f32 %v1036_v0, %v903_v39  ;;  %v3021_v9 = vmul.f32 %v7725_v50, %v3020_v51  ;;  %v1941_v56 = vadd.f32 %v7703_v37, %v1732_v28  ;;  %v1328_v44 = vsel %vm760_vm1, %v1326_v35, %v9275_v17  ;;  %v2492_v48 = vpop.xlane.xlu1 %2491 }
 0x1cd   : > { %v3348_v10 = vmul.f32 %v7261_v24, %v9509_v16  ;;  %v2547_v3 = vsel %vm2180_vm2, %v2411_v12, 0.0  ;;  %v3398_v15 = vadd.f32 %v7309_v41, %v3346_v27  ;;  %v3399_v36 = vadd.f32 %v7309_v41, %v3347_v55  ;;  %v9511_v27 = vld [vmem:[#allocation36_spill] sm:$0xff] }
 0x1ce   : > { %v1214_v31 = vadd.f32 %v1166_v21, %v1132_v59  ;;  %v3012_v1 = vmul.f32 0.5, %v3011_v47  ;;  %v7793_v39 = vadd.f32 %v9472_v20, %v1941_v56  ;;  %v1555_v51 = vsel %vm972_vm0, %v1553_v29, %v1554_v43  ;;  %v2489_v21 = vpop.xlane.xlu0 %2488  ;;  %v9510_v59 = vld [vmem:[#allocation41_spill] sm:$0xff] }
 0x1cf   : > { %v3400_v35 = vadd.f32 %v7309_v41, %v3348_v10  ;;  %v3031_v0 = vmul.f32 %v7740_v54, %v3030_v13  ;;  %v3505_v16 = vrot.slane %v3398_v15, 7  ;;  %v3506_v12 = vrot.slane %v3399_v36, 7  ;;  %v9514_v13 = vld [vmem:[#allocation37_spill] sm:$0xff] }
 0x1d0   : > { %v1423_v28 = vadd.f32 %v1328_v44, %v1214_v31  ;;  %v9512_v17 = vsub.f32 %v9510_v59, %v9511_v27  ;;  %v3022_v47 = vmul.f32 0.5, %v3021_v9  ;;  %v2310_v56 = vsel %vm2172_vm3, %v7793_v39, 0.0 }
 0x1d1   : > { %2548 = vadd.xlane.f32.xlu2 %v2547_v3  ;;  %v3508_v6 = vrot.slane %v3400_v35, 7  ;;  %v9513_v29 = vsub.f32 %v9492_v49, %v7348_v34  ;;  %v9515_v44 = vsub.f32 %v9493_v60, %v9514_v13  ;;  %2311 = vadd.xlane.f32.xlu0 %v2310_v56  ;;  %v9517_v3 = vld [vmem:[#allocation45_spill] sm:$0xff]  ;;  %v3507_v35 = vsel %vm3479_vm11, %v3505_v16, %v3506_v12  ;;  %v2495_v49 = vpop.xlane.xlu2 %2494 }
 0x1d2   : > { %v3297_v55 = vmul.f32 %v2988_v42, %v9512_v17  ;;  %v1651_v15 = vadd.f32 %v1555_v51, %v1423_v28  ;;  %v661_v17 = vmul.f32 %v5198_v5, %v7213_v38  ;;  %v9516_v42 = vld [vmem:[#allocation44_spill] sm:$0xff]  ;;  %v2725_v36 = vsub.f32 %v9517_v3, %v7607_v53 }
 0x1d3   : > { %v3298_v10 = vmul.f32 %v2998_v14, %v9513_v29  ;;  %v3299_v31 = vmul.f32 %v3008_v62, %v9515_v44  ;;  %v2724_v9 = vsub.f32 %v9516_v42, %v7601_v46  ;;  %v3509_v34 = vsel %vm3479_vm11, %v3506_v12, %v3508_v6 }
 0x1d4   : > { %v3013_v14 = vsub.f32 1.5, %v3012_v1  ;;  %v7819_v59 = vmul.f32 0.5, %v3031_v0  ;;  %v1733_v60 = vadd.f32 %v9508_v63, %v1651_v15  ;;  %v3597_v62 = vpack.c.bf16 %v3509_v34, %v3507_v35  ;;  %v2261_v29 = vpop.xlane.xlu1 %2260 }
 0x1d5   : > { %vm3015_vm1 = vweird.f32 %v7656_v4  ;;  %vm3016_vm7 = vweird.f32 %v7710_v32  ;;  %v3023_v5 = vsub.f32 1.5, %v3022_v47  ;;  %v694_v38 = vadd.f32 %v7590_v61, %v661_v17 }
 0x1d6   : > { %v1942_v51 = vadd.f32 %v7703_v37, %v1733_v60  ;;  %4480 = vmatmul.msk.bf16.gmra.mxu0 %vm2176_vm4, %v3597_v62  ;;  %v9518_v6 = vrot.slane %v7692_v30, 2  ;;  %v1167_v0 = vmul.f32 %v5204_v8, %v7489_v7  ;;  %v7834_v28 = vmul.f32 0.03125, %v7721_v40  ;;  %v2258_v47 = vpop.xlane.xlu0 %2257 }
 0x1d7   : > { %vm3026_vm8 = vweird.f32 %v7725_v50  ;;  %v9519_v16 = vrot.slane %v7686_v22, 1  ;;  %v7840_v12 = vmul.f32 0.03125, %v7723_v57  ;;  %v7843_v27 = vmul.f32 0.03125, %v7738_v52 }
 0x1d8   : > { %v1037_v1 = vsel %vm972_vm0, %v9518_v6, %v5231_v23  ;;  %v2412_v23 = vmul.f32 %v7793_v39, %v7793_v39  ;;  %v3014_v30 = vmul.f32 %v7710_v32, %v3013_v14  ;;  %v3033_v8 = vsub.f32 1.5, %v7819_v59 }
 0x1d9   : > { %v904_v61 = vadd.f32 %v9519_v16, %v694_v38  ;;  %v7850_v7 = vadd.f32 %v9472_v20, %v1942_v51  ;;  %v2583_v40 = vmul.f32 0.03125, %v2489_v21  ;;  %v7853_v22 = vmul.f32 %v7725_v50, %v3023_v5  ;;  %v2264_v59 = vpop.xlane.xlu2 %2263 }
 0x1da   : > { %vm3025_vm9 = vweird.f32 %v7658_v33  ;;  %vm3036_vm10 = vweird.f32 %v7740_v54  ;;  %v2631_v52 = vmul.f32 %v7834_v28, %v7834_v28  ;;  %v2632_v56 = vmul.f32 %v7840_v12, %v7840_v12 }
 0x1db   : > { %v1133_v57 = vadd.f32 %v1037_v1, %v904_v61  ;;  %v2313_v13 = vsel %vm2176_vm4, %v7850_v7, 0.0  ;;  %v2633_v21 = vmul.f32 %v7843_v27, %v7843_v27  ;;  %v2550_v44 = vsel %vm2172_vm3, %v2412_v23, 0.0  ;;  %vm7880_vm3 = vmor %vm3015_vm1, %vm3016_vm7 }
 0x1dc   : > { %v2413_v15 = vmul.f32 %v7850_v7, %v7850_v7  ;;  %vm3035_vm12 = vweird.f32 %v7660_v45  ;;  %2314 = vadd.xlane.f32.xlu1 %v2313_v13  ;;  %2551 = vadd.xlane.f32.xlu0 %v2550_v44  ;;  %v2679_v35 = vsub.f32 %v2583_v40, %v2631_v52  ;;  %v2584_v34 = vmul.f32 0.03125, %v2492_v48  ;;  %v2501_v52 = vpop.xlane.xlu1 %2500 }
 0x1dd   : > { %v1215_v17 = vadd.f32 %v1167_v0, %v1133_v57  ;;  %v2585_v14 = vmul.f32 0.03125, %v2495_v49  ;;  %v1556_v60 = vsel %vm972_vm0, %v1554_v43, %v5233_v25  ;;  %v3349_v62 = vmul.f32 %v7261_v24, %v3297_v55  ;;  %vm7912_vm0 = vmor %vm3025_vm9, %vm3026_vm8 }
 0x1de   : > { %v3350_v5 = vmul.f32 %v7261_v24, %v3298_v10  ;;  %v3351_v38 = vmul.f32 %v7261_v24, %v3299_v31  ;;  %v9522_v48 = vrot.slane %v7696_v11, 1  ;;  %v7886_v2 = vadd.f32 1e-06, %v2679_v35  ;;  %v2498_v40 = vpop.xlane.xlu0 %2497  ;;  %vm7930_vm13 = vmor %vm3035_vm12, %vm3036_vm10 }
 0x1df   : > { %v2680_v25 = vsub.f32 %v2584_v34, %v2632_v56  ;;  %v2681_v43 = vsub.f32 %v2585_v14, %v2633_v21  ;;  %v3018_v55 = vsel %vm7880_vm3, %v7710_v32, %v3014_v30  ;;  %v3401_v10 = vadd.f32 %v7309_v41, %v3349_v62  ;;  %v9527_v34 = vld [vmem:[#allocation46_spill] sm:$0xff] }
 0x1e0   : > { %v1424_v49 = vadd.f32 %v9522_v48, %v1215_v17  ;;  %v3402_v31 = vadd.f32 %v7309_v41, %v3350_v5  ;;  %v3403_v4 = vadd.f32 %v7309_v41, %v3351_v38  ;;  %v2553_v1 = vsel %vm2176_vm4, %v2413_v15, 0.0 }
 0x1e1   : > { %4684 = vrsqrt.f32 %v7886_v2  ;;  %v7896_v11 = vadd.f32 1e-06, %v2680_v25  ;;  %v7898_v0 = vadd.f32 1e-06, %v2681_v43  ;;  %v3510_v16 = vrot.slane %v3401_v10, 7 }
 0x1e2   : > { %v1652_v6 = vadd.f32 %v1556_v60, %v1424_v49  ;;  %v3511_v61 = vrot.slane %v3402_v31, 7  ;;  %v3513_v23 = vrot.slane %v3403_v4, 7  ;;  %v3034_v32 = vmul.f32 %v7740_v54, %v3033_v8 }
 0x1e3   : > { %4686 = vrsqrt.f32 %v7896_v11  ;;  %v7903_v57 = vmul.f32 0.03125, %v2258_v47  ;;  %v3300_v56 = vmul.f32 %v3018_v55, %v2724_v9  ;;  %v3028_v46 = vsel %vm7912_vm0, %v7725_v50, %v7853_v22  ;;  %v2504_v47 = vpop.xlane.xlu2 %2503 }
 0x1e4   : > { %v1734_v30 = vadd.f32 %v9508_v63, %v1652_v6  ;;  %4688 = vrsqrt.f32 %v7898_v0  ;;  %v3512_v63 = vsel %vm3479_vm11, %v3510_v16, %v3511_v61  ;;  %v3514_v8 = vsel %vm3479_vm11, %v3511_v61, %v3513_v23  ;;  %2554 = vadd.xlane.f32.xlu1 %v2553_v1  ;;  %v2270_v10 = vpop.xlane.xlu1 %2269 }
 0x1e5   : > { %v3598_v9 = vpack.c.bf16 %v3514_v8, %v3512_v63  ;;  %v7924_v33 = vmul.f32 0.03125, %v2261_v29  ;;  %v7934_v44 = vmul.f32 0.03125, %v2264_v59  ;;  %v2586_v15 = vmul.f32 0.03125, %v2498_v40 }
 0x1e6   : > { %v1943_v42 = vadd.f32 %v7703_v37, %v1734_v30  ;;  %v2587_v17 = vmul.f32 0.03125, %v2501_v52  ;;  %v2588_v50 = vmul.f32 0.03125, %v2504_v47  ;;  %v3038_v37 = vsel %vm7930_vm13, %v7740_v54, %v3034_v32  ;;  %v2267_v43 = vpop.xlane.xlu0 %2266  ;;  %v9528_v47 = vld [vmem:[#allocation47_spill] sm:$0xff] }
 0x1e7   : > { %v7936_v22 = vpop.eup %4684  ;;  %v2634_v45 = vmul.f32 %v7903_v57, %v7903_v57  ;;  %v2635_v35 = vmul.f32 %v7924_v33, %v7924_v33  ;;  %v2726_v14 = vsub.f32 %v9527_v34, %v7612_v18  ;;  %4481 = vmatmul.msk.bf16.gmra.mxu0 %vm2176_vm4, %v3598_v9  ;;  %v2636_v54 = vmul.f32 %v7934_v44, %v7934_v44 }
 0x1e8   : > { %v7942_v29 = vadd.f32 %v9472_v20, %v1943_v42  ;;  %v3040_v59 = vmul.f32 %v7936_v22, %v7886_v2  ;;  %v3301_v20 = vmul.f32 %v3028_v46, %v2725_v36  ;;  %v3352_v55 = vmul.f32 %v7261_v24, %v3300_v56 }
 0x1e9   : > { %v7955_v60 = vpop.eup %4686  ;;  %v2682_v5 = vsub.f32 %v2586_v15, %v2634_v45  ;;  %v2683_v38 = vsub.f32 %v2587_v17, %v2635_v35  ;;  %v3302_v51 = vmul.f32 %v3038_v37, %v2726_v14  ;;  %v2684_v25 = vsub.f32 %v2588_v50, %v2636_v54  ;;  %v9529_v15 = vld [vmem:[#allocation48_spill] sm:$0xff] }
 0x1ea   : > { %v2316_v62 = vsel %vm2180_vm2, %v7942_v29, 0.0  ;;  %v7962_v18 = vpop.eup %4688  ;;  %v3041_v48 = vmul.f32 %v7936_v22, %v3040_v59  ;;  %v3050_v49 = vmul.f32 %v7955_v60, %v7896_v11  ;;  %v2414_v53 = vmul.f32 %v7942_v29, %v7942_v29 }
 0x1eb   : > { %2317 = vadd.xlane.f32.xlu2 %v2316_v62  ;;  %v3060_v3 = vmul.f32 %v7962_v18, %v7898_v0  ;;  %v7971_v36 = vadd.f32 1e-06, %v2682_v5  ;;  %v7975_v6 = vadd.f32 1e-06, %v2683_v38  ;;  %v7977_v1 = vadd.f32 1e-06, %v2684_v25  ;;  %v2273_v23 = vpop.xlane.xlu2 %2272  ;;  %v8019_v38 = vpop.f32.mrf.mxu0 }
 0x1ec   : > { %v3042_v31 = vmul.f32 0.5, %v3041_v48  ;;  %v3051_v4 = vmul.f32 %v7955_v60, %v3050_v49  ;;  %v3353_v61 = vmul.f32 %v7261_v24, %v3301_v20  ;;  %v2556_v30 = vsel %vm2180_vm2, %v2414_v53, 0.0  ;;  %v2510_v34 = vpop.xlane.xlu1 %2509 }
 0x1ed   : > { %v3061_v16 = vmul.f32 %v7962_v18, %v3060_v3  ;;  %4690 = vrsqrt.f32 %v7971_v36  ;;  %v3354_v56 = vmul.f32 %v7261_v24, %v3302_v51  ;;  %v3404_v63 = vadd.f32 %v7309_v41, %v3352_v55  ;;  %v4541_v51 = vld [vmem:[%s9532_s15 + $0x38] sm:$0xff]  ;;  %v4540_v3 = vld [vmem:[%s9532_s15 + $0x30] sm:$0xff] }
 0x1ee   : > { %v3043_v40 = vsub.f32 1.5, %v3042_v31  ;;  %v3052_v32 = vmul.f32 0.5, %v3051_v4  ;;  %4692 = vrsqrt.f32 %v7975_v6  ;;  %v3405_v8 = vadd.f32 %v7309_v41, %v3353_v61  ;;  %v2507_v24 = vpop.xlane.xlu0 %2506  ;;  %4137 = vmatpush.bf16.msra.mxu1 %v4541_v51  ;;  %4546 = vmatpush.bf16.msra.mxu2 %v4541_v51  ;;  %v9541_v51 = vld [vmem:[#allocation54_spill] sm:$0xff] }
 0x1ef   : > { %v3062_v52 = vmul.f32 0.5, %v3061_v16  ;;  %4694 = vrsqrt.f32 %v7977_v1  ;;  %vm3046_vm14 = vweird.f32 %v7936_v22  ;;  %v3406_v9 = vadd.f32 %v7309_v41, %v3354_v56 }
 0x1f0   : > { %v3053_v13 = vsub.f32 1.5, %v3052_v32  ;;  %v3044_v46 = vmul.f32 %v7936_v22, %v3043_v40  ;;  %v2727_v21 = vsub.f32 %v9528_v47, %v7834_v28  ;;  %v2728_v17 = vsub.f32 %v9529_v15, %v7840_v12  ;;  %v9538_v47 = vld [vmem:[#allocation51_spill] sm:$0xff] }
 0x1f1   : > { %v3063_v42 = vsub.f32 1.5, %v3062_v52  ;;  %vm3045_vm2 = vweird.f32 %v7886_v2  ;;  %v3515_v37 = vrot.slane %v3404_v63, 7  ;;  %v3516_v45 = vrot.slane %v3405_v8, 7  ;;  %v9537_v63 = vld [vmem:[#allocation49_spill] sm:$0xff] }
 0x1f2   : > { %v3518_v35 = vrot.slane %v3406_v9, 7  ;;  %vm8000_vm15 = vmor %vm3045_vm2, %vm3046_vm14  ;;  %v3054_v28 = vmul.f32 %v7955_v60, %v3053_v13  ;;  %vm3056_vm5 = vweird.f32 %v7955_v60  ;;  %v8008_v59 = vmul.f32 0.03125, %v2267_v43  ;;  %4138 = vmatpush.bf16.msra.mxu1 %v4540_v3  ;;  %v4539_v9 = vld [vmem:[%s9532_s15 + $0x28] sm:$0xff]  ;;  %4547 = vmatpush.bf16.msra.mxu2 %v4540_v3 }
 0x1f3   : > { %2557 = vadd.xlane.f32.xlu2 %v2556_v30  ;;  %v7995_v50 = vpop.eup %4690  ;;  %v3048_v54 = vsel %vm8000_vm15, %v7936_v22, %v3044_v46  ;;  %v3064_v20 = vmul.f32 %v7962_v18, %v3063_v42  ;;  %vm3066_vm6 = vweird.f32 %v7962_v18  ;;  %v2513_v5 = vpop.xlane.xlu2 %2512  ;;  %vm3055_vm1 = vweird.f32 %v7896_v11 }
 0x1f4   : > { %v7998_v14 = vpop.eup %4692  ;;  %v3070_v12 = vmul.f32 %v7995_v50, %v7971_v36  ;;  %v8028_v49 = vmul.f32 0.03125, %v2270_v10  ;;  %vm8032_vm7 = vmor %vm3055_vm1, %vm3056_vm5  ;;  %vm3065_vm8 = vweird.f32 %v7898_v0  ;;  %v3517_v53 = vsel %vm3479_vm11, %v3515_v37, %v3516_v45  ;;  %v2279_v42 = vpop.xlane.xlu1 %2278  ;;  %v8114_v0 = vld [vmem:[%s9138_s6] ss:$0 sm:$0xff] }
 0x1f5   : > { %v8010_v2 = vpop.eup %4694  ;;  %v3080_v62 = vmul.f32 %v7998_v14, %v7975_v6  ;;  %v3519_v11 = vsel %vm3479_vm11, %v3516_v45, %v3518_v35  ;;  %v3303_v55 = vmul.f32 %v3048_v54, %v2727_v21  ;;  %v3058_v10 = vsel %vm8032_vm7, %v7955_v60, %v3054_v28  ;;  %vm8048_vm9 = vmor %vm3065_vm8, %vm3066_vm6  ;;  %v8077_v35 = vld [vmem:[%s9539_s16] ss:$0 sm:$0xff] }
 0x1f6   : > { %v3071_v48 = vmul.f32 %v7995_v50, %v3070_v12  ;;  %v3090_v22 = vmul.f32 %v8010_v2, %v7977_v1  ;;  %v3599_v31 = vpack.c.bf16 %v3519_v11, %v3517_v53  ;;  %v2637_v4 = vmul.f32 %v8008_v59, %v8008_v59  ;;  %v2276_v13 = vpop.xlane.xlu0 %2275  ;;  %v8084_v54 = vld [vmem:[%s9137_s5] ss:$0 sm:$0xff]  ;;  %4139 = vmatpush.bf16.msra.mxu1 %v4539_v9 }
 0x1f7   : > { %v3081_v43 = vmul.f32 %v7998_v14, %v3080_v62  ;;  %v3068_v16 = vsel %vm8048_vm9, %v7962_v18, %v3064_v20  ;;  %v8057_v61 = vmul.f32 0.03125, %v2273_v23  ;;  %v2589_v40 = vmul.f32 0.03125, %v2507_v24  ;;  %v8087_v20 = vpop.f32.mrf.mxu0  ;;  %v9540_v62 = vld [vmem:[#allocation52_spill] sm:$0xff]  ;;  %4548 = vmatpush.bf16.msra.mxu2 %v4539_v9  ;;  %v4538_v11 = vld [vmem:[%s9532_s15 + $0x20] sm:$0xff] }
 0x1f8   : > { %v2590_v32 = vmul.f32 0.03125, %v2510_v34  ;;  %v3072_v60 = vmul.f32 0.5, %v3071_v48  ;;  %v3091_v30 = vmul.f32 %v8010_v2, %v3090_v22  ;;  %4482 = vmatmul.msk.bf16.gmra.mxu0 %vm2176_vm4, %v3599_v31  ;;  %v2638_v52 = vmul.f32 %v8028_v49, %v8028_v49 }
 0x1f9   : > { %v2591_v56 = vmul.f32 0.03125, %v2513_v5  ;;  %v2729_v8 = vsub.f32 %v9537_v63, %v7843_v27  ;;  %v3082_v46 = vmul.f32 0.5, %v3081_v43  ;;  %v2639_v18 = vmul.f32 %v8057_v61, %v8057_v61 }
 0x1fa   : > { %v2685_v23 = vsub.f32 %v2589_v40, %v2637_v4  ;;  %v2730_v21 = vsub.f32 %v9538_v47, %v7903_v57  ;;  %v2686_v15 = vsub.f32 %v2590_v32, %v2638_v52  ;;  %v3304_v24 = vmul.f32 %v3058_v10, %v2728_v17  ;;  %4140 = vmatpush.bf16.msra.mxu1 %v4538_v11  ;;  %v4537_v32 = vld [vmem:[%s9532_s15 + $0x18] sm:$0xff]  ;;  %v4535_v57 = vld [vmem:[%s9532_s15 + $0x8] sm:$0xff] }
 0x1fb   : > { %v3305_v37 = vmul.f32 %v3068_v16, %v2729_v8  ;;  %v2687_v27 = vsub.f32 %v2591_v56, %v2639_v18  ;;  %v2282_v34 = vpop.xlane.xlu2 %2281  ;;  %v3073_v41 = vsub.f32 1.5, %v3072_v60  ;;  %v3092_v28 = vmul.f32 0.5, %v3091_v30  ;;  %4549 = vmatpush.bf16.msra.mxu2 %v4538_v11 }
 0x1fc   : > { %v8072_v45 = vadd.f32 1e-06, %v2685_v23  ;;  %v8079_v12 = vadd.f32 1e-06, %v2686_v15  ;;  %v3355_v17 = vmul.f32 %v8084_v54, %v3303_v55  ;;  %v2731_v5 = vsub.f32 %v9540_v62, %v7924_v33  ;;  %v2519_v52 = vpop.xlane.xlu1 %2518  ;;  %v9548_v33 = vld [vmem:[#allocation55_spill] sm:$0xff] }
 0x1fd   : > { %v2732_v48 = vsub.f32 %v9541_v51, %v7934_v44  ;;  %v3083_v22 = vsub.f32 1.5, %v3082_v46  ;;  %vm3075_vm10 = vweird.f32 %v7971_v36  ;;  %vm3076_vm12 = vweird.f32 %v7995_v50  ;;  %v9550_v51 = vld [vmem:[#allocation28_spill] sm:$0xff] }
 0x1fe   : > { %4696 = vrsqrt.f32 %v8072_v45  ;;  %vm3085_vm3 = vweird.f32 %v7975_v6  ;;  %vm3086_vm0 = vweird.f32 %v7998_v14  ;;  %v8099_v25 = vadd.f32 1e-06, %v2687_v27  ;;  %vm8134_vm2 = vmor %vm3075_vm10, %vm3076_vm12  ;;  %4141 = vmatpush.bf16.msra.mxu1 %v4537_v32 }
 0x1ff   : > { %4698 = vrsqrt.f32 %v8079_v12  ;;  %v8103_v43 = vadd.f32 %v8077_v35, %v8019_v38  ;;  %v3356_v53 = vmul.f32 %v8084_v54, %v3304_v24  ;;  %v3074_v3 = vmul.f32 %v7995_v50, %v3073_v41  ;;  %v2516_v38 = vpop.xlane.xlu0 %2515  ;;  %vm8153_vm15 = vmor %vm3085_vm3, %vm3086_vm0  ;;  %v4536_v41 = vld [vmem:[%s9532_s15 + $0x10] sm:$0xff]  ;;  %4550 = vmatpush.bf16.msra.mxu2 %v4537_v32 }
 0x200   : > { %v3093_v55 = vsub.f32 1.5, %v3092_v28  ;;  %v3357_v10 = vmul.f32 %v8084_v54, %v3305_v37  ;;  %v3407_v31 = vadd.f32 %v8114_v0, %v3355_v17  ;;  %v3084_v4 = vmul.f32 %v7998_v14, %v3083_v22 }
 0x201   : > { %4700 = vrsqrt.f32 %v8099_v25  ;;  %v3408_v16 = vadd.f32 %v8114_v0, %v3356_v53  ;;  %v8120_v40 = vmul.f32 0.03125, %v2276_v13  ;;  %vm3095_vm13 = vweird.f32 %v7977_v1 }
 0x202   : > { %vm3096_vm14 = vweird.f32 %v8010_v2  ;;  %v3409_v60 = vadd.f32 %v8114_v0, %v3357_v10  ;;  %v3520_v30 = vrot.slane %v3407_v31, 7  ;;  %v3765_v63 = vmul.f32 %v8103_v43, %v8103_v43  ;;  %4142 = vmatpush.bf16.msra.mxu1 %v4536_v41 }
 0x203   : > { %v3521_v8 = vrot.slane %v3408_v16, 7  ;;  %v8140_v46 = vmul.f32 0.03125, %v2279_v42  ;;  %v8142_v18 = vmul.f32 0.03125, %v2282_v34  ;;  %v2522_v23 = vpop.xlane.xlu2 %2521  ;;  %v3078_v15 = vsel %vm8134_vm2, %v7995_v50, %v3074_v3  ;;  %vm8179_vm5 = vmor %vm3095_vm13, %vm3096_vm14  ;;  %4551 = vmatpush.bf16.msra.mxu2 %v4536_v41 }
 0x204   : > { %v8128_v56 = vpop.eup %4696  ;;  %v3094_v42 = vmul.f32 %v8010_v2, %v3093_v55  ;;  %v3523_v37 = vrot.slane %v3409_v60, 7  ;;  %v3088_v27 = vsel %vm8153_vm15, %v7998_v14, %v3084_v4  ;;  %v2640_v6 = vmul.f32 %v8120_v40, %v8120_v40  ;;  %v3690_v14 = vpop.f32.mrf.mxu0 }
 0x205   : > { %v8144_v9 = vpop.eup %4698  ;;  %v3100_v24 = vmul.f32 %v8128_v56, %v8072_v45  ;;  %v3522_v34 = vsel %vm3479_vm11, %v3520_v30, %v3521_v8  ;;  %v2592_v22 = vmul.f32 0.03125, %v2516_v38  ;;  %v2593_v53 = vmul.f32 0.03125, %v2519_v52 }
 0x206   : > { %v3110_v50 = vmul.f32 %v8144_v9, %v8079_v12  ;;  %v3524_v17 = vsel %vm3479_vm11, %v3521_v8, %v3523_v37  ;;  %v2641_v10 = vmul.f32 %v8140_v46, %v8140_v46  ;;  %v2642_v31 = vmul.f32 %v8142_v18, %v8142_v18  ;;  %4143 = vmatpush.bf16.msra.mxu1 %v4535_v57 }
 0x207   : > { %v3101_v28 = vmul.f32 %v8128_v56, %v3100_v24  ;;  %v8173_v11 = vpop.eup %4700  ;;  %v3600_v55 = vpack.c.bf16 %v3524_v17, %v3522_v34  ;;  %v2594_v38 = vmul.f32 0.03125, %v2522_v23  ;;  %v3306_v4 = vmul.f32 %v3078_v15, %v2730_v21  ;;  %v2285_v8 = vpop.xlane.xlu0 %2284  ;;  %4552 = vmatpush.bf16.msra.mxu2 %v4535_v57  ;;  %v9551_v17 = vld [vmem:[#allocation30_spill] sm:$0xff] }
 0x208   : > { %v3098_v1 = vsel %vm8179_vm5, %v8010_v2, %v3094_v42  ;;  %v3120_v16 = vmul.f32 %v8173_v11, %v8099_v25  ;;  %v2688_v32 = vsub.f32 %v2592_v22, %v2640_v6  ;;  %v8198_v60 = vadd.f32 %v8077_v35, %v8087_v20  ;;  %v2288_v24 = vpop.xlane.xlu1 %2287 }
 0x209   : > { %4483 = vmatmul.msk.bf16.gmra.mxu0 %vm2176_vm4, %v3600_v55  ;;  %v2689_v30 = vsub.f32 %v2593_v53, %v2641_v10  ;;  %v2690_v52 = vsub.f32 %v2594_v38, %v2642_v31  ;;  %v3307_v2 = vmul.f32 %v3088_v27, %v2731_v5  ;;  %v3102_v47 = vmul.f32 0.5, %v3101_v28  ;;  %v9549_v5 = vld [vmem:[#allocation56_spill] sm:$0xff]  ;;  %v9552_v53 = vld [vmem:[#allocation53_spill] sm:$0xff]  ;;  %v9553_v31 = vld [vmem:[#allocation31_spill] sm:$0xff] }
 0x20a   : > { %v3111_v21 = vmul.f32 %v8144_v9, %v3110_v50  ;;  %v8207_v13 = vadd.f32 1e-06, %v2688_v32  ;;  %v3121_v20 = vmul.f32 %v8173_v11, %v3120_v16  ;;  %v3797_v23 = vmul.f32 %v3765_v63, %v8103_v43  ;;  %v4534_v32 = vld [vmem:[%s9532_s15] sm:$0xff] }
 0x20b   : > { %v8211_v15 = vadd.f32 1e-06, %v2689_v30  ;;  %v3308_v36 = vmul.f32 %v3098_v1, %v2732_v48  ;;  %v2733_v62 = vsub.f32 %v9548_v33, %v8008_v59  ;;  %v2734_v42 = vsub.f32 %v9549_v5, %v8028_v49  ;;  %v2291_v44 = vpop.xlane.xlu2 %2290  ;;  %4144 = vmatpush.bf16.msra.mxu1 %v4534_v32  ;;  %4553 = vmatpush.bf16.msra.mxu2 %v4534_v32  ;;  %v9561_v49 = vld [vmem:[#allocation32_spill] sm:$0xff] }
 0x20c   : > { %4702 = vrsqrt.f32 %v8207_v13  ;;  %v3766_v37 = vmul.f32 %v8198_v60, %v8198_v60  ;;  %v8224_v63 = vadd.f32 1e-06, %v2690_v52  ;;  %v3358_v27 = vmul.f32 %v8084_v54, %v3306_v4  ;;  %v8241_v10 = vpop.f32.mrf.mxu0 }
 0x20d   : > { %4704 = vrsqrt.f32 %v8211_v15  ;;  %v3103_v50 = vsub.f32 1.5, %v3102_v47  ;;  %v3112_v34 = vmul.f32 0.5, %v3111_v21  ;;  %v3359_v6 = vmul.f32 %v8084_v54, %v3307_v2 }
 0x20e   : > { %vm3105_vm6 = vweird.f32 %v8072_v45  ;;  %v3122_v41 = vmul.f32 0.5, %v3121_v20  ;;  %v8231_v28 = vmul.f32 0.044715, %v3797_v23  ;;  %4706 = vrsqrt.f32 %v8224_v63 }
 0x20f   : > { %vm3106_vm1 = vweird.f32 %v8128_v56  ;;  %vm3115_vm7 = vweird.f32 %v8079_v12  ;;  %v3360_v55 = vmul.f32 %v8084_v54, %v3308_v36  ;;  %vm3125_vm8 = vweird.f32 %v8099_v25 }
 0x210   : > { %v3798_v4 = vmul.f32 %v3766_v37, %v8198_v60  ;;  %v3410_v1 = vadd.f32 %v8114_v0, %v3358_v27  ;;  %v3411_v16 = vadd.f32 %v8114_v0, %v3359_v6  ;;  %v3104_v52 = vmul.f32 %v8128_v56, %v3103_v50  ;;  %v2525_v6 = vpop.xlane.xlu0 %2524  ;;  %vm8284_vm12 = vmor %vm3105_vm6, %vm3106_vm1 }
 0x211   : > { %v3113_v57 = vsub.f32 1.5, %v3112_v34  ;;  %v8256_v2 = vadd.f32 %v8077_v35, %v3690_v14  ;;  %v3412_v47 = vadd.f32 %v8114_v0, %v3360_v55  ;;  %v3123_v20 = vsub.f32 1.5, %v3122_v41 }
 0x212   : > { %v8252_v30 = vpop.eup %4702  ;;  %v3525_v36 = vrot.slane %v3410_v1, 7  ;;  %v8263_v37 = vmul.f32 0.03125, %v2285_v8  ;;  %v3526_v50 = vrot.slane %v3411_v16, 7  ;;  %v8267_v14 = vmul.f32 0.03125, %v2288_v24  ;;  %v2528_v24 = vpop.xlane.xlu1 %2527 }
 0x213   : > { %v8259_v21 = vpop.eup %4704  ;;  %v3130_v23 = vmul.f32 %v8252_v30, %v8207_v13  ;;  %v3528_v34 = vrot.slane %v3412_v47, 7  ;;  %vm3116_vm9 = vweird.f32 %v8144_v9  ;;  %vm3126_vm10 = vweird.f32 %v8173_v11 }
 0x214   : > { %v3140_v27 = vmul.f32 %v8259_v21, %v8211_v15  ;;  %v8269_v55 = vpop.eup %4706  ;;  %v3862_v41 = vmul.f32 0.044715, %v3798_v4  ;;  %v3114_v1 = vmul.f32 %v8144_v9, %v3113_v57  ;;  %v3767_v16 = vmul.f32 %v8256_v2, %v8256_v2  ;;  %vm8304_vm3 = vmor %vm3115_vm7, %vm3116_vm9 }
 0x215   : > { %v3131_v8 = vmul.f32 %v8252_v30, %v3130_v23  ;;  %v8278_v47 = vmul.f32 0.03125, %v2291_v44  ;;  %v3124_v4 = vmul.f32 %v8173_v11, %v3123_v20  ;;  %v3150_v57 = vmul.f32 %v8269_v55, %v8224_v63  ;;  %v2531_v44 = vpop.xlane.xlu2 %2530  ;;  %vm8315_vm0 = vmor %vm3125_vm8, %vm3126_vm10 }
 0x216   : > { %v3141_v32 = vmul.f32 %v8259_v21, %v3140_v27  ;;  %v3527_v23 = vsel %vm3479_vm11, %v3525_v36, %v3526_v50  ;;  %v3529_v27 = vsel %vm3479_vm11, %v3526_v50, %v3528_v34  ;;  %v3108_v3 = vsel %vm8284_vm12, %v8128_v56, %v3104_v52 }
 0x217   : > { %v3601_v22 = vpack.c.bf16 %v3529_v27, %v3527_v23  ;;  %v2643_v45 = vmul.f32 %v8263_v37, %v8263_v37  ;;  %v2644_v48 = vmul.f32 %v8267_v14, %v8267_v14  ;;  %v3132_v36 = vmul.f32 0.5, %v3131_v8 }
 0x218   : > { %v3142_v50 = vmul.f32 0.5, %v3141_v32  ;;  %v2595_v34 = vmul.f32 0.03125, %v2525_v6  ;;  %v2596_v38 = vmul.f32 0.03125, %v2528_v24  ;;  %v3118_v56 = vsel %vm8304_vm3, %v8144_v9, %v3114_v1  ;;  %v3695_v32 = vpop.f32.mrf.mxu0 }
 0x219   : > { %v3799_v12 = vmul.f32 %v3767_v16, %v8256_v2  ;;  %4484 = vmatmul.msk.bf16.vlgmr.msra.gmra.mxu3 %vm2176_vm4, %v3601_v22  ;;  %v2645_v6 = vmul.f32 %v8278_v47, %v8278_v47  ;;  %v2597_v8 = vmul.f32 0.03125, %v2531_v44  ;;  %v3128_v9 = vsel %vm8315_vm0, %v8173_v11, %v3124_v4 }
 0x21a   : > { %v3151_v1 = vmul.f32 %v8269_v55, %v3150_v57  ;;  %v2691_v25 = vsub.f32 %v2595_v34, %v2643_v45  ;;  %v2692_v24 = vsub.f32 %v2596_v38, %v2644_v48  ;;  %v3309_v23 = vmul.f32 %v3108_v3, %v2733_v62  ;;  %v2294_v3 = vpop.xlane.xlu0 %2293  ;;  %v9562_v45 = vld [vmem:[#allocation21_spill] sm:$0xff] }
 0x21b   : > { %vm3135_vm13 = vweird.f32 %v8207_v13  ;;  %vm3145_vm14 = vweird.f32 %v8211_v15  ;;  %v2693_v22 = vsub.f32 %v2597_v8, %v2645_v6  ;;  %v3133_v16 = vsub.f32 1.5, %v3132_v36 }
 0x21c   : > { %v3143_v27 = vsub.f32 1.5, %v3142_v50  ;;  %v8332_v44 = vadd.f32 1e-06, %v2691_v25  ;;  %v8334_v20 = vadd.f32 1e-06, %v2692_v24  ;;  %v3310_v11 = vmul.f32 %v3118_v56, %v2734_v42 }
 0x21d   : > { %v9560_v48 = vsub.f32 %v9550_v51, %v8057_v61  ;;  %v8342_v33 = vmul.f32 0.044715, %v3799_v12  ;;  %v8344_v62 = vadd.f32 1e-06, %v2693_v22  ;;  %vm3136_vm2 = vweird.f32 %v8252_v30 }
 0x21e   : > { %v3152_v4 = vmul.f32 0.5, %v3151_v1  ;;  %v8349_v57 = vadd.f32 %v8077_v35, %v8241_v10  ;;  %4708 = vrsqrt.f32 %v8332_v44  ;;  %vm3146_vm15 = vweird.f32 %v8259_v21  ;;  %v2297_v10 = vpop.xlane.xlu1 %2296  ;;  %vm8374_vm1 = vmor %vm3135_vm13, %vm3136_vm2 }
 0x21f   : > { %v3311_v59 = vmul.f32 %v3128_v9, %v9560_v48  ;;  %v2739_v61 = vsub.f32 %v9561_v49, %v8263_v37  ;;  %4710 = vrsqrt.f32 %v8334_v20  ;;  %v8357_v5 = vadd.f32 %v8077_v35, %v3695_v32  ;;  %vm8386_vm7 = vmor %vm3145_vm14, %vm3146_vm15 }
 0x220   : > { %v3134_v42 = vmul.f32 %v8252_v30, %v3133_v16  ;;  %v3144_v51 = vmul.f32 %v8259_v21, %v3143_v27  ;;  %vm3156_vm5 = vweird.f32 %v8269_v55  ;;  %4712 = vrsqrt.f32 %v8344_v62  ;;  %v8393_v1 = vpop.f32.mrf.mxu0 }
 0x221   : > { %vm3155_vm6 = vweird.f32 %v8224_v63  ;;  %v2740_v36 = vsub.f32 %v9562_v45, %v8267_v14  ;;  %v3893_v50 = vadd.f32 %v8231_v28, %v8103_v43  ;;  %v3894_v34 = vadd.f32 %v3862_v41, %v8198_v60  ;;  %v9569_v41 = vld [vmem:[#allocation33_spill] sm:$0xff] }
 0x222   : > { %v3361_v38 = vmul.f32 %v8084_v54, %v3309_v23  ;;  %v3153_v52 = vsub.f32 1.5, %v3152_v4  ;;  %v3768_v12 = vmul.f32 %v8349_v57, %v8349_v57  ;;  %v3362_v6 = vmul.f32 %v8084_v54, %v3310_v11  ;;  %vm8443_vm8 = vmor %vm3155_vm6, %vm3156_vm5 }
 0x223   : > { %v3363_v28 = vmul.f32 %v8084_v54, %v3311_v59  ;;  %v3769_v13 = vmul.f32 %v8357_v5, %v8357_v5  ;;  %v3925_v8 = vmul.f32 0.7978846, %v3893_v50  ;;  %v3926_v32 = vmul.f32 0.7978846, %v3894_v34  ;;  %v2300_v59 = vpop.xlane.xlu2 %2299 }
 0x224   : > { %v3413_v9 = vadd.f32 %v8114_v0, %v3361_v38  ;;  %v8395_v25 = vpop.eup %4708  ;;  %v3138_v24 = vsel %vm8374_vm1, %v8252_v30, %v3134_v42  ;;  %v3148_v15 = vsel %vm8386_vm7, %v8259_v21, %v3144_v51  ;;  %v3414_v23 = vadd.f32 %v8114_v0, %v3362_v6 }
 0x225   : > { %v3415_v22 = vadd.f32 %v8114_v0, %v3363_v28  ;;  %v8405_v16 = vpop.eup %4710  ;;  %v3160_v27 = vmul.f32 %v8395_v25, %v8332_v44  ;;  %4714 = vtanh.f32 %v3925_v8  ;;  %v8409_v48 = vmul.f32 0.03125, %v2294_v3  ;;  %v2534_v3 = vpop.xlane.xlu0 %2533 }
 0x226   : > { %v3530_v11 = vrot.slane %v3413_v9, 7  ;;  %v8411_v4 = vpop.eup %4712  ;;  %v3800_v30 = vmul.f32 %v3768_v12, %v8349_v57  ;;  %v3170_v21 = vmul.f32 %v8405_v16, %v8334_v20  ;;  %4716 = vtanh.f32 %v3926_v32 }
 0x227   : > { %v3531_v42 = vrot.slane %v3414_v23, 7  ;;  %v3154_v51 = vmul.f32 %v8269_v55, %v3153_v52  ;;  %v3161_v50 = vmul.f32 %v8395_v25, %v3160_v27  ;;  %v3180_v34 = vmul.f32 %v8411_v4, %v8344_v62 }
 0x228   : > { %v3533_v38 = vrot.slane %v3415_v22, 7  ;;  %v9567_v56 = vsub.f32 %v9551_v17, %v8120_v40  ;;  %v9568_v12 = vsub.f32 %v9552_v53, %v8140_v46  ;;  %v2741_v52 = vsub.f32 %v9569_v41, %v8278_v47  ;;  %v2537_v22 = vpop.xlane.xlu1 %2536 }
 0x229   : > { %v3171_v8 = vmul.f32 %v8405_v16, %v3170_v21  ;;  %v3532_v32 = vsel %vm3479_vm11, %v3530_v11, %v3531_v42  ;;  %v2646_v23 = vmul.f32 %v8409_v48, %v8409_v48  ;;  %v8437_v40 = vmul.f32 0.03125, %v2297_v10 }
 0x22a   : > { %v8423_v6 = vmul.f32 %v3138_v24, %v9567_v56  ;;  %v8428_v28 = vmul.f32 %v3148_v15, %v9568_v12  ;;  %v3534_v9 = vsel %vm3479_vm11, %v3531_v42, %v3533_v38  ;;  %v3162_v17 = vmul.f32 0.5, %v3161_v50 }
 0x22b   : > { %v3181_v53 = vmul.f32 %v8411_v4, %v3180_v34  ;;  %v3602_v24 = vpack.c.bf16 %v3534_v9, %v3532_v32  ;;  %v2598_v15 = vmul.f32 0.03125, %v2534_v3  ;;  %v4715_v27 = vpop.eup %4714  ;;  %v3158_v10 = vsel %vm8443_vm8, %v8269_v55, %v3154_v51 }
 0x22c   : > { %v3864_v11 = vmul.f32 0.044715, %v3800_v30  ;;  %v3801_v21 = vmul.f32 %v3769_v13, %v8357_v5  ;;  %v3829_v63 = vmul.f32 0.5, %v8103_v43  ;;  %v4717_v42 = vpop.eup %4716  ;;  %vm3165_vm9 = vweird.f32 %v8332_v44  ;;  %v3700_v13 = vpop.f32.mrf.mxu0 }
 0x22d   : > { %v3172_v38 = vmul.f32 0.5, %v3171_v8  ;;  %v3830_v50 = vmul.f32 0.5, %v8198_v60  ;;  %v3989_v34 = vadd.f32 1.0, %v4715_v27  ;;  %4485 = vmatmul.msk.bf16.gmra.mxu3 %vm2176_vm4, %v3602_v24  ;;  %v2694_v3 = vsub.f32 %v2598_v15, %v2646_v23  ;;  %v2540_v24 = vpop.xlane.xlu2 %2539 }
 0x22e   : > { %v3990_v56 = vadd.f32 1.0, %v4717_v42  ;;  %v2647_v12 = vmul.f32 %v8437_v40, %v8437_v40  ;;  %v8458_v55 = vmul.f32 0.03125, %v2300_v59  ;;  %v2599_v30 = vmul.f32 0.03125, %v2537_v22 }
 0x22f   : > { %v3163_v51 = vsub.f32 1.5, %v3162_v17  ;;  %vm3175_vm10 = vweird.f32 %v8334_v20  ;;  %v3182_v43 = vmul.f32 0.5, %v3181_v53  ;;  %v8461_v32 = vadd.f32 1e-06, %v2694_v3 }
 0x230   : > { %v9572_v60 = vsub.f32 %v9553_v31, %v8142_v18  ;;  %v4021_v9 = vmul.f32 %v3989_v34, %v3829_v63  ;;  %v4022_v23 = vmul.f32 %v3990_v56, %v3830_v50  ;;  %v2695_v46 = vsub.f32 %v2599_v30, %v2647_v12  ;;  %v9573_v18 = vld [vmem:[#allocation57_spill] sm:$0xff]  ;;  %v2306_v56 = vpop.xlane.xlu1 %2305 }
 0x231   : > { %v3173_v15 = vsub.f32 1.5, %v3172_v38  ;;  %v8466_v27 = vmul.f32 0.044715, %v3801_v21  ;;  %v8470_v59 = vadd.f32 %v8077_v35, %v8393_v1  ;;  %4718 = vrsqrt.f32 %v8461_v32  ;;  %v2303_v38 = vpop.xlane.xlu0 %2302 }
 0x232   : > { %v3314_v8 = vmul.f32 %v3158_v10, %v9572_v60  ;;  %vm3166_vm12 = vweird.f32 %v8395_v25  ;;  %vm3185_vm3 = vweird.f32 %v8344_v62  ;;  %v4053_v17 = vpack.c.bf16 %v4022_v23, %v4021_v9 }
 0x233   : > { %v2742_v31 = vsub.f32 %v9573_v18, %v8409_v48  ;;  %v2648_v53 = vmul.f32 %v8458_v55, %v8458_v55  ;;  %v3164_v22 = vmul.f32 %v8395_v25, %v3163_v51  ;;  %v3183_v10 = vsub.f32 1.5, %v3182_v43  ;;  %vm8495_vm14 = vmor %vm3165_vm9, %vm3166_vm12 }
 0x234   : > { %v8480_v21 = vadd.f32 1e-06, %v2695_v46  ;;  %v2600_v1 = vmul.f32 0.03125, %v2540_v24  ;;  %vm3176_vm0 = vweird.f32 %v8405_v16  ;;  %vm3186_vm13 = vweird.f32 %v8411_v4  ;;  %4145 = vmatmul.bf16.vlgmr.msra.gmra.mxu1 %v4053_v17  ;;  %v3702_v24 = vpop.f32.mrf.mxu0 }
 0x235   : > { %v3895_v63 = vadd.f32 %v8342_v33, %v8256_v2  ;;  %v3896_v42 = vadd.f32 %v3864_v11, %v8349_v57  ;;  %v3174_v50 = vmul.f32 %v8405_v16, %v3173_v15  ;;  %v3770_v34 = vmul.f32 %v8470_v59, %v8470_v59  ;;  %vm8516_vm2 = vmor %vm3175_vm10, %vm3176_vm0 }
 0x236   : > { %4720 = vrsqrt.f32 %v8480_v21  ;;  %v2696_v3 = vsub.f32 %v2600_v1, %v2648_v53  ;;  %v3364_v30 = vmul.f32 %v8084_v54, %v8423_v6  ;;  %v3365_v51 = vmul.f32 %v8084_v54, %v8428_v28  ;;  %vm8545_vm15 = vmor %vm3185_vm3, %vm3186_vm13  ;;  %v9580_v1 = vld [vmem:[#allocation35_spill] sm:$0xff] }
 0x237   : > { %v3927_v33 = vmul.f32 0.7978846, %v3895_v63  ;;  %v3928_v11 = vmul.f32 0.7978846, %v3896_v42  ;;  %v8503_v43 = vpop.eup %4718  ;;  %v3168_v60 = vsel %vm8495_vm14, %v8395_v25, %v3164_v22  ;;  %v3184_v44 = vmul.f32 %v8411_v4, %v3183_v10  ;;  %v9581_v42 = vld [vmem:[#allocation22_spill] sm:$0xff] }
 0x238   : > { %v8509_v9 = vadd.f32 1e-06, %v2696_v3  ;;  %v3366_v23 = vmul.f32 %v8084_v54, %v3314_v8  ;;  %v3190_v28 = vmul.f32 %v8503_v43, %v8461_v32  ;;  %v8523_v46 = vadd.f32 %v8077_v35, %v3700_v13 }
 0x239   : > { %4722 = vtanh.f32 %v3927_v33  ;;  %v3416_v25 = vadd.f32 %v8114_v0, %v3364_v30  ;;  %v3178_v8 = vsel %vm8516_vm2, %v8405_v16, %v3174_v50  ;;  %v3802_v20 = vmul.f32 %v3770_v34, %v8470_v59  ;;  %v2543_v6 = vpop.xlane.xlu0 %2542 }
 0x23a   : > { %4724 = vrsqrt.f32 %v8509_v9  ;;  %v3417_v15 = vadd.f32 %v8114_v0, %v3365_v51  ;;  %v3191_v17 = vmul.f32 %v8503_v43, %v3190_v28  ;;  %v3418_v13 = vadd.f32 %v8114_v0, %v3366_v23 }
 0x23b   : > { %4726 = vtanh.f32 %v3928_v11  ;;  %v3535_v53 = vrot.slane %v3416_v25, 7  ;;  %v8539_v10 = vmul.f32 %v3168_v60, %v2739_v61  ;;  %v2743_v63 = vsub.f32 %v9580_v1, %v8437_v40 }
 0x23c   : > { %v8534_v22 = vpop.eup %4720  ;;  %v2744_v50 = vsub.f32 %v9581_v42, %v8458_v55  ;;  %v3536_v34 = vrot.slane %v3417_v15, 7  ;;  %v3188_v37 = vsel %vm8545_vm15, %v8411_v4, %v3184_v44  ;;  %v3771_v62 = vmul.f32 %v8523_v46, %v8523_v46  ;;  %v2309_v3 = vpop.xlane.xlu2 %2308 }
 0x23d   : > { %v3200_v49 = vmul.f32 %v8534_v22, %v8480_v21  ;;  %v3538_v61 = vrot.slane %v3418_v13, 7  ;;  %v8563_v12 = vmul.f32 %v3178_v8, %v2740_v36  ;;  %v8565_v33 = vmul.f32 0.044715, %v3802_v20 }
 0x23e   : > { %v8567_v11 = vmul.f32 0.03125, %v2303_v38  ;;  %v8569_v30 = vmul.f32 0.03125, %v2306_v56  ;;  %v3192_v51 = vmul.f32 0.5, %v3191_v17  ;;  %v3537_v44 = vsel %vm3479_vm11, %v3535_v53, %v3536_v34  ;;  %v2546_v56 = vpop.xlane.xlu1 %2545 }
 0x23f   : > { %v4723_v4 = vpop.eup %4722  ;;  %v3201_v60 = vmul.f32 %v8534_v22, %v3200_v49  ;;  %v3539_v23 = vsel %vm3479_vm11, %v3536_v34, %v3538_v61  ;;  %v8579_v14 = vmul.f32 %v3188_v37, %v2741_v52  ;;  %v3831_v45 = vmul.f32 0.5, %v8256_v2  ;;  %v3705_v37 = vpop.f32.mrf.mxu0 }
 0x240   : > { %v8574_v28 = vpop.eup %4724  ;;  %v3991_v36 = vadd.f32 1.0, %v4723_v4  ;;  %v3603_v38 = vpack.c.bf16 %v3539_v23, %v3537_v44  ;;  %vm3195_vm5 = vweird.f32 %v8461_v32  ;;  %v3803_v20 = vmul.f32 %v3771_v62, %v8523_v46 }
 0x241   : > { %v4727_v25 = vpop.eup %4726  ;;  %v3210_v8 = vmul.f32 %v8574_v28, %v8509_v9  ;;  %v3832_v15 = vmul.f32 0.5, %v8349_v57  ;;  %v8587_v17 = vmul.f32 0.03125, %v2309_v3  ;;  %v3202_v47 = vmul.f32 0.5, %v3201_v60 }
 0x242   : > { %v3992_v41 = vadd.f32 1.0, %v4727_v25  ;;  %4486 = vmatmul.msk.bf16.gmra.mxu3 %vm2176_vm4, %v3603_v38  ;;  %v2649_v2 = vmul.f32 %v8567_v11, %v8567_v11  ;;  %v2601_v52 = vmul.f32 0.03125, %v2543_v6  ;;  %v3193_v13 = vsub.f32 1.5, %v3192_v51 }
 0x243   : > { %v2650_v53 = vmul.f32 %v8569_v30, %v8569_v30  ;;  %v8595_v16 = vadd.f32 %v8077_v35, %v3702_v24  ;;  %v2602_v34 = vmul.f32 0.03125, %v2546_v56  ;;  %v3211_v57 = vmul.f32 %v8574_v28, %v3210_v8 }
 0x244   : > { %v4023_v49 = vmul.f32 %v3991_v36, %v3831_v45  ;;  %v4024_v62 = vmul.f32 %v3992_v41, %v3832_v15  ;;  %v2697_v61 = vsub.f32 %v2601_v52, %v2649_v2  ;;  %vm3196_vm6 = vweird.f32 %v8503_v43  ;;  %v2549_v51 = vpop.xlane.xlu2 %2548 }
 0x245   : > { %vm3205_vm1 = vweird.f32 %v8480_v21  ;;  %v2651_v3 = vmul.f32 %v8587_v17, %v8587_v17  ;;  %v2698_v4 = vsub.f32 %v2602_v34, %v2650_v53  ;;  %v3203_v60 = vsub.f32 1.5, %v3202_v47  ;;  %v2312_v47 = vpop.xlane.xlu0 %2311  ;;  %vm8625_vm8 = vmor %vm3195_vm5, %vm3196_vm6 }
 0x246   : > { %v4054_v44 = vpack.c.bf16 %v4024_v62, %v4023_v49  ;;  %v8602_v24 = vadd.f32 1e-06, %v2697_v61  ;;  %v2603_v23 = vmul.f32 0.03125, %v2549_v51  ;;  %v3194_v6 = vmul.f32 %v8503_v43, %v3193_v13 }
 0x247   : > { %v8605_v38 = vmul.f32 0.044715, %v3803_v20  ;;  %v3772_v45 = vmul.f32 %v8595_v16, %v8595_v16  ;;  %v8609_v36 = vadd.f32 1e-06, %v2698_v4  ;;  %v3212_v56 = vmul.f32 0.5, %v3211_v57  ;;  %v3707_v4 = vpop.f32.mrf.mxu0 }
 0x248   : > { %4150 = vmatmul.bf16.gmra.mxu1 %v4054_v44  ;;  %4728 = vrsqrt.f32 %v8602_v24  ;;  %v2699_v25 = vsub.f32 %v2603_v23, %v2651_v3  ;;  %v8613_v8 = vadd.f32 %v8077_v35, %v3705_v37  ;;  %vm3206_vm7 = vweird.f32 %v8534_v22 }
 0x249   : > { %v2745_v15 = vsub.f32 %v7542_v19, %v8567_v11  ;;  %v2746_v20 = vsub.f32 %v7603_v26, %v8569_v30  ;;  %4730 = vrsqrt.f32 %v8609_v36  ;;  %v3204_v2 = vmul.f32 %v8534_v22, %v3203_v60  ;;  %vm8652_vm10 = vmor %vm3205_vm1, %vm3206_vm7 }
 0x24a   : > { %vm3215_vm9 = vweird.f32 %v8509_v9  ;;  %v2747_v52 = vsub.f32 %v7700_v58, %v8587_v17  ;;  %v8633_v13 = vadd.f32 1e-06, %v2699_v25  ;;  %v3897_v53 = vadd.f32 %v8466_v27, %v8357_v5 }
 0x24b   : > { %v3198_v32 = vsel %vm8625_vm8, %v8503_v43, %v3194_v6  ;;  %v3804_v34 = vmul.f32 %v3772_v45, %v8595_v16  ;;  %v3898_v37 = vadd.f32 %v8565_v33, %v8470_v59  ;;  %v3367_v57 = vmul.f32 %v8084_v54, %v8539_v10 }
 0x24c   : > { %v3213_v49 = vsub.f32 1.5, %v3212_v56  ;;  %4732 = vrsqrt.f32 %v8633_v13  ;;  %v3773_v62 = vmul.f32 %v8613_v8, %v8613_v8  ;;  %v3929_v61 = vmul.f32 0.7978846, %v3897_v53 }
 0x24d   : > { %v3930_v43 = vmul.f32 0.7978846, %v3898_v37  ;;  %v3368_v33 = vmul.f32 %v8084_v54, %v8563_v12  ;;  %v3369_v10 = vmul.f32 %v8084_v54, %v8579_v14  ;;  %v3419_v3 = vadd.f32 %v8114_v0, %v3367_v57 }
 0x24e   : > { %v8661_v51 = vpop.eup %4728  ;;  %v8666_v21 = vmul.f32 %v3198_v32, %v2742_v31  ;;  %v3208_v60 = vsel %vm8652_vm10, %v8534_v22, %v3204_v2  ;;  %vm3216_vm12 = vweird.f32 %v8574_v28  ;;  %4734 = vtanh.f32 %v3929_v61 }
 0x24f   : > { %v8672_v12 = vpop.eup %4730  ;;  %v8674_v14 = vmul.f32 0.044715, %v3804_v34  ;;  %v3220_v44 = vmul.f32 %v8661_v51, %v8602_v24  ;;  %4736 = vtanh.f32 %v3930_v43  ;;  %v3420_v23 = vadd.f32 %v8114_v0, %v3368_v33  ;;  %v2315_v48 = vpop.xlane.xlu1 %2314  ;;  %vm8702_vm3 = vmor %vm3215_vm9, %vm3216_vm12 }
 0x250   : > { %v3214_v18 = vmul.f32 %v8574_v28, %v3213_v49  ;;  %v3230_v31 = vmul.f32 %v8672_v12, %v8609_v36  ;;  %v3421_v22 = vadd.f32 %v8114_v0, %v3369_v10  ;;  %v3540_v6 = vrot.slane %v3419_v3, 7  ;;  %v2552_v49 = vpop.xlane.xlu0 %2551 }
 0x251   : > { %v8686_v45 = vmul.f32 %v3208_v60, %v2743_v63  ;;  %v3221_v56 = vmul.f32 %v8661_v51, %v3220_v44  ;;  %v3805_v25 = vmul.f32 %v3773_v62, %v8613_v8  ;;  %v3541_v41 = vrot.slane %v3420_v23, 7 }
 0x252   : > { %v8690_v2 = vpop.eup %4732  ;;  %v3231_v53 = vmul.f32 %v8672_v12, %v3230_v31  ;;  %v3543_v32 = vrot.slane %v3421_v22, 7  ;;  %v8693_v34 = vmul.f32 0.03125, %v2312_v47  ;;  %v8696_v37 = vadd.f32 %v8077_v35, %v3707_v4 }
 0x253   : > { %v3222_v1 = vmul.f32 0.5, %v3221_v56  ;;  %v3240_v63 = vmul.f32 %v8690_v2, %v8633_v13  ;;  %v3833_v57 = vmul.f32 0.5, %v8357_v5  ;;  %v3834_v47 = vmul.f32 0.5, %v8470_v59  ;;  %v3710_v22 = vpop.f32.mrf.mxu0 }
 0x254   : > { %v4735_v62 = vpop.eup %4734  ;;  %v3218_v61 = vsel %vm8702_vm3, %v8574_v28, %v3214_v18  ;;  %v3232_v27 = vmul.f32 0.5, %v3231_v53  ;;  %v3542_v9 = vsel %vm3479_vm11, %v3540_v6, %v3541_v41  ;;  %v3544_v43 = vsel %vm3479_vm11, %v3541_v41, %v3543_v32 }
 0x255   : > { %v4737_v33 = vpop.eup %4736  ;;  %v3241_v10 = vmul.f32 %v8690_v2, %v3240_v63  ;;  %v3993_v3 = vadd.f32 1.0, %v4735_v62  ;;  %v3604_v4 = vpack.c.bf16 %v3544_v43, %v3542_v9  ;;  %v8716_v60 = vmul.f32 0.03125, %v2315_v48 }
 0x256   : > { %v3994_v5 = vadd.f32 1.0, %v4737_v33  ;;  %v2652_v59 = vmul.f32 %v8693_v34, %v8693_v34  ;;  %v3774_v44 = vmul.f32 %v8696_v37, %v8696_v37  ;;  %v2604_v28 = vmul.f32 0.03125, %v2552_v49 }
 0x257   : > { %v3223_v23 = vsub.f32 1.5, %v3222_v1  ;;  %vm3225_vm0 = vweird.f32 %v8602_v24  ;;  %v3233_v18 = vsub.f32 1.5, %v3232_v27  ;;  %vm3235_vm13 = vweird.f32 %v8609_v36  ;;  %4487 = vmatmul.msk.bf16.gmra.mxu3 %vm2176_vm4, %v3604_v4  ;;  %v2555_v31 = vpop.xlane.xlu1 %2554 }
 0x258   : > { %v3242_v48 = vmul.f32 0.5, %v3241_v10  ;;  %v4025_v6 = vmul.f32 %v3993_v3, %v3833_v57  ;;  %v4026_v56 = vmul.f32 %v3994_v5, %v3834_v47  ;;  %v2700_v41 = vsub.f32 %v2604_v28, %v2652_v59 }
 0x259   : > { %v3320_v53 = vmul.f32 %v3218_v61, %v2744_v50  ;;  %v3869_v32 = vmul.f32 0.044715, %v3805_v25  ;;  %v2653_v40 = vmul.f32 %v8716_v60, %v8716_v60  ;;  %v2605_v1 = vmul.f32 0.03125, %v2555_v31 }
 0x25a   : > { %vm3226_vm14 = vweird.f32 %v8661_v51  ;;  %vm3245_vm2 = vweird.f32 %v8633_v13  ;;  %v4055_v63 = vpack.c.bf16 %v4026_v56, %v4025_v6  ;;  %v3806_v49 = vmul.f32 %v3774_v44, %v8696_v37 }
 0x25b   : > { %v8733_v62 = vadd.f32 1e-06, %v2700_v41  ;;  %v3224_v57 = vmul.f32 %v8661_v51, %v3223_v23  ;;  %v3234_v47 = vmul.f32 %v8672_v12, %v3233_v18  ;;  %vm3236_vm15 = vweird.f32 %v8672_v12  ;;  %vm8747_vm5 = vmor %vm3225_vm0, %vm3226_vm14  ;;  %v3712_v36 = vpop.f32.mrf.mxu0 }
 0x25c   : > { %v2701_v55 = vsub.f32 %v2605_v1, %v2653_v40  ;;  %v3243_v42 = vsub.f32 1.5, %v3242_v48  ;;  %4155 = vmatmul.bf16.gmra.mxu1 %v4055_v63  ;;  %v3899_v25 = vadd.f32 %v8605_v38, %v8523_v46  ;;  %v3900_v61 = vadd.f32 %v8674_v14, %v8595_v16  ;;  %vm8758_vm1 = vmor %vm3235_vm13, %vm3236_vm15 }
 0x25d   : > { %4738 = vrsqrt.f32 %v8733_v62  ;;  %vm3246_vm6 = vweird.f32 %v8690_v2  ;;  %v3835_v43 = vmul.f32 0.5, %v8523_v46  ;;  %v3836_v33 = vmul.f32 0.5, %v8595_v16 }
 0x25e   : > { %v2318_v50 = vpop.xlane.xlu2 %2317  ;;  %v8752_v9 = vadd.f32 1e-06, %v2701_v55  ;;  %v3870_v14 = vmul.f32 0.044715, %v3806_v49  ;;  %v3931_v24 = vmul.f32 0.7978846, %v3899_v25  ;;  %v3370_v3 = vmul.f32 %v8084_v54, %v8666_v21  ;;  %vm8799_vm7 = vmor %vm3245_vm2, %vm3246_vm6 }
 0x25f   : > { %v3932_v10 = vmul.f32 0.7978846, %v3900_v61  ;;  %v3228_v4 = vsel %vm8747_vm5, %v8661_v51, %v3224_v57  ;;  %v3238_v46 = vsel %vm8758_vm1, %v8672_v12, %v3234_v47  ;;  %v8772_v16 = vadd.f32 %v8077_v35, %v3710_v22 }
 0x260   : > { %4740 = vrsqrt.f32 %v8752_v9  ;;  %v3244_v5 = vmul.f32 %v8690_v2, %v3243_v42  ;;  %v3371_v21 = vmul.f32 %v8084_v54, %v8686_v45  ;;  %v3372_v59 = vmul.f32 %v8084_v54, %v3320_v53 }
 0x261   : > { %4742 = vtanh.f32 %v3931_v24  ;;  %v8778_v44 = vmul.f32 0.03125, %v2318_v50  ;;  %v3422_v51 = vadd.f32 %v8114_v0, %v3370_v3  ;;  %v8782_v12 = vadd.f32 %v8077_v35, %v3712_v36 }
 0x262   : > { %4744 = vtanh.f32 %v3932_v10  ;;  %v3321_v23 = vmul.f32 %v3228_v4, %v2745_v15  ;;  %v3423_v18 = vadd.f32 %v8114_v0, %v3371_v21  ;;  %v3424_v45 = vadd.f32 %v8114_v0, %v3372_v59  ;;  %v8833_v10 = vld [vmem:[%s9137_s5] ss:$0 sm:$0xff] }
 0x263   : > { %v8784_v28 = vpop.eup %4738  ;;  %v3901_v54 = vadd.f32 %v3869_v32, %v8613_v8  ;;  %v3322_v31 = vmul.f32 %v3238_v46, %v2746_v20  ;;  %v3775_v0 = vmul.f32 %v8772_v16, %v8772_v16  ;;  %v3545_v11 = vrot.slane %v3422_v51, 7 }
 0x264   : > { %v3250_v19 = vmul.f32 %v8784_v28, %v8733_v62  ;;  %v3248_v26 = vsel %vm8799_vm7, %v8690_v2, %v3244_v5  ;;  %v3546_v15 = vrot.slane %v3423_v18, 7  ;;  %v3548_v20 = vrot.slane %v3424_v45, 7  ;;  %v3715_v42 = vpop.f32.mrf.mxu0 }
 0x265   : > { %v3776_v13 = vmul.f32 %v8782_v12, %v8782_v12  ;;  %v2654_v48 = vmul.f32 %v8778_v44, %v8778_v44  ;;  %v3902_v41 = vadd.f32 %v3870_v14, %v8696_v37  ;;  %v3933_v1 = vmul.f32 0.7978846, %v3901_v54 }
 0x266   : > { %v2558_v30 = vpop.xlane.xlu2 %2557  ;;  %v8812_v22 = vpop.eup %4740  ;;  %v3251_v6 = vmul.f32 %v8784_v28, %v3250_v19  ;;  %v3547_v32 = vsel %vm3479_vm11, %v3545_v11, %v3546_v15  ;;  %v3549_v40 = vsel %vm3479_vm11, %v3546_v15, %v3548_v20  ;;  %v3323_v50 = vmul.f32 %v3248_v26, %v2747_v52  ;;  %v8863_v26 = vld [vmem:[%s9539_s16] ss:$0 sm:$0xff] }
 0x267   : > { %v2606_v56 = vmul.f32 0.03125, %v2558_v30  ;;  %v4743_v53 = vpop.eup %4742  ;;  %v3260_v2 = vmul.f32 %v8812_v22, %v8752_v9  ;;  %v3605_v55 = vpack.c.bf16 %v3549_v40, %v3547_v32  ;;  %v3808_v27 = vmul.f32 %v3776_v13, %v8782_v12 }
 0x268   : > { %v4745_v63 = vpop.eup %4744  ;;  %v3252_v49 = vmul.f32 0.5, %v3251_v6  ;;  %v3995_v47 = vadd.f32 1.0, %v4743_v53  ;;  %v3934_v24 = vmul.f32 0.7978846, %v3902_v41  ;;  %v3373_v3 = vmul.f32 %v8833_v10, %v3321_v23 }
 0x269   : > { %v2702_v57 = vsub.f32 %v2606_v56, %v2654_v48  ;;  %v3261_v25 = vmul.f32 %v8812_v22, %v3260_v2  ;;  %v3996_v61 = vadd.f32 1.0, %v4745_v63  ;;  %4488 = vmatmul.msk.bf16.gmra.mxu3 %vm2176_vm4, %v3605_v55  ;;  %4746 = vtanh.f32 %v3933_v1 }
 0x26a   : > { %v3253_v38 = vsub.f32 1.5, %v3252_v49  ;;  %v4027_v17 = vmul.f32 %v3995_v47, %v3835_v43  ;;  %v3807_v4 = vmul.f32 %v3775_v0, %v8772_v16  ;;  %v3374_v46 = vmul.f32 %v8833_v10, %v3322_v31  ;;  %v8844_v43 = vld [vmem:[%s9138_s6] ss:$0 sm:$0xff] }
 0x26b   : > { %v8827_v14 = vadd.f32 1e-06, %v2702_v57  ;;  %v3262_v58 = vmul.f32 0.5, %v3261_v25  ;;  %v4028_v52 = vmul.f32 %v3996_v61, %v3836_v33  ;;  %vm3256_vm8 = vweird.f32 %v8784_v28 }
 0x26c   : > { %v3872_v21 = vmul.f32 0.044715, %v3808_v27  ;;  %v3375_v59 = vmul.f32 %v8833_v10, %v3323_v50  ;;  %v3425_v33 = vadd.f32 %v8844_v43, %v3373_v3  ;;  %v3426_v51 = vadd.f32 %v8844_v43, %v3374_v46  ;;  %v3717_v31 = vpop.f32.mrf.mxu0 }
 0x26d   : > { %4748 = vrsqrt.f32 %v8827_v14  ;;  %v3263_v36 = vsub.f32 1.5, %v3262_v58  ;;  %v4056_v5 = vpack.c.bf16 %v4028_v52, %v4027_v17  ;;  %v3254_v23 = vmul.f32 %v8784_v28, %v3253_v38 }
 0x26e   : > { %4750 = vtanh.f32 %v3934_v24  ;;  %vm3266_vm9 = vweird.f32 %v8812_v22  ;;  %vm3255_vm10 = vweird.f32 %v8733_v62  ;;  %v3871_v45 = vmul.f32 0.044715, %v3807_v4 }
 0x26f   : > { %v3264_v18 = vmul.f32 %v8812_v22, %v3263_v36  ;;  %4160 = vmatmul.bf16.gmra.mxu1 %v4056_v5  ;;  %v3427_v54 = vadd.f32 %v8844_v43, %v3375_v59  ;;  %v4747_v35 = vpop.eup %4746  ;;  %vm8855_vm12 = vmor %vm3255_vm10, %vm3256_vm8  ;;  %vm3265_vm3 = vweird.f32 %v8752_v9  ;;  %v3550_v0 = vrot.slane %v3425_v33, 7 }
 0x270   : > { %v3551_v11 = vrot.slane %v3426_v51, 7  ;;  %v8866_v62 = vadd.f32 %v8863_v26, %v3717_v31  ;;  %v2748_v15 = vsub.f32 %v7793_v39, %v8693_v34  ;;  %v2749_v20 = vsub.f32 %v7850_v7, %v8716_v60  ;;  %vm8874_vm0 = vmor %vm3265_vm3, %vm3266_vm9 }
 0x271   : > { %v3553_v13 = vrot.slane %v3427_v54, 7  ;;  %v3904_v48 = vadd.f32 %v3872_v21, %v8782_v12  ;;  %v3258_v56 = vsel %vm8855_vm12, %v8784_v28, %v3254_v23  ;;  %v3268_v39 = vsel %vm8874_vm0, %v8812_v22, %v3264_v18 }
 0x272   : > { %v3838_v34 = vmul.f32 0.5, %v8696_v37  ;;  %v8888_v60 = vadd.f32 %v8863_v26, %v3715_v42  ;;  %v3903_v2 = vadd.f32 %v3871_v45, %v8772_v16  ;;  %v3997_v40 = vadd.f32 1.0, %v4747_v35 }
 0x273   : > { %v4749_v30 = vpop.eup %4748  ;;  %v3554_v53 = vsel %vm3479_vm11, %v3551_v11, %v3553_v13  ;;  %v3552_v28 = vsel %vm3479_vm11, %v3550_v0, %v3551_v11  ;;  %v3778_v1 = vmul.f32 %v8866_v62, %v8866_v62  ;;  %v3324_v22 = vmul.f32 %v3258_v56, %v2748_v15 }
 0x274   : > { %v4751_v6 = vpop.eup %4750  ;;  %v3270_v7 = vmul.f32 %v4749_v30, %v8827_v14  ;;  %v3325_v63 = vmul.f32 %v3268_v39, %v2749_v20  ;;  %v3606_v49 = vpack.c.bf16 %v3554_v53, %v3552_v28  ;;  %v3936_v57 = vmul.f32 0.7978846, %v3904_v48 }
 0x275   : > { %v3998_v41 = vadd.f32 1.0, %v4751_v6  ;;  %v3837_v47 = vmul.f32 0.5, %v8613_v8  ;;  %v3777_v42 = vmul.f32 %v8888_v60, %v8888_v60  ;;  %v3720_v50 = vpop.f32.mrf.mxu0  ;;  %v3935_v25 = vmul.f32 0.7978846, %v3903_v2 }
 0x276   : > { %v3271_v32 = vmul.f32 %v4749_v30, %v3270_v7  ;;  %vm3276_vm13 = vweird.f32 %v4749_v30  ;;  %v3810_v38 = vmul.f32 %v3778_v1, %v8866_v62  ;;  %4752 = vtanh.f32 %v3936_v57 }
 0x277   : > { %v4030_v55 = vmul.f32 %v3998_v41, %v3838_v34  ;;  %v4029_v27 = vmul.f32 %v3997_v40, %v3837_v47  ;;  %v3376_v24 = vmul.f32 %v8833_v10, %v3324_v22  ;;  %v3377_v3 = vmul.f32 %v8833_v10, %v3325_v63 }
 0x278   : > { %v3272_v37 = vmul.f32 0.5, %v3271_v32  ;;  %vm3275_vm14 = vweird.f32 %v8827_v14  ;;  %v2750_v17 = vsub.f32 %v7942_v29, %v8778_v44  ;;  %v3809_v52 = vmul.f32 %v3777_v42, %v8888_v60 }
 0x279   : > { %4489 = vmatmul.msk.bf16.gmra.mxu3 %vm2176_vm4, %v3606_v49  ;;  %v4057_v8 = vpack.c.bf16 %v4030_v55, %v4029_v27  ;;  %vm3277_vm2 = vmor %vm3275_vm14, %vm3276_vm13  ;;  %4754 = vtanh.f32 %v3935_v25  ;;  %v3874_v46 = vmul.f32 0.044715, %v3810_v38  ;;  %v3428_v5 = vadd.f32 %v8844_v43, %v3376_v24 }
 0x27a   : > { %v3273_v61 = vsub.f32 1.5, %v3272_v37  ;;  %v3429_v21 = vadd.f32 %v8844_v43, %v3377_v3  ;;  %v3873_v33 = vmul.f32 0.044715, %v3809_v52  ;;  %v8915_v35 = vadd.f32 %v8863_v26, %v3720_v50 }
 0x27b   : > { %v3906_v23 = vadd.f32 %v3874_v46, %v8866_v62  ;;  %v3555_v18 = vrot.slane %v3428_v5, 7  ;;  %v3839_v9 = vmul.f32 0.5, %v8772_v16  ;;  %v3842_v50 = vmul.f32 0.5, %v8866_v62 }
 0x27c   : > { %v3274_v58 = vmul.f32 %v4749_v30, %v3273_v61  ;;  %v4753_v59 = vpop.eup %4752  ;;  %v3556_v45 = vrot.slane %v3429_v21, 7  ;;  %v3905_v0 = vadd.f32 %v3873_v33, %v8888_v60  ;;  %v3779_v6 = vmul.f32 %v8915_v35, %v8915_v35 }
 0x27d   : > { %v3722_v51 = vpop.f32.mrf.mxu0  ;;  %v4000_v31 = vadd.f32 1.0, %v4753_v59  ;;  %v3938_v20 = vmul.f32 0.7978846, %v3906_v23  ;;  %v3841_v24 = vmul.f32 0.5, %v8888_v60 }
 0x27e   : > { %v3278_v4 = vsel %vm3277_vm2, %v4749_v30, %v3274_v58  ;;  %v8912_v54 = vadd.f32 %v8863_v26, %v3722_v51  ;;  %v3557_v30 = vsel %vm3479_vm11, %v3555_v18, %v3556_v45  ;;  %v3937_v39 = vmul.f32 0.7978846, %v3905_v0 }
 0x27f   : > { %v3326_v36 = vmul.f32 %v3278_v4, %v2750_v17  ;;  %4165 = vmatmul.bf16.gmra.mxu1 %v4057_v8  ;;  %v4755_v29 = vpop.eup %4754  ;;  %4756 = vtanh.f32 %v3938_v20  ;;  %v3811_v2 = vmul.f32 %v3779_v6, %v8915_v35 }
 0x280   : > { %v3999_v11 = vadd.f32 1.0, %v4755_v29  ;;  %4758 = vtanh.f32 %v3937_v39 }
 0x281   : > { %v3378_v14 = vmul.f32 %v8833_v10, %v3326_v36  ;;  %v3840_v10 = vmul.f32 0.5, %v8782_v12  ;;  %v3875_v1 = vmul.f32 0.044715, %v3811_v2 }
 0x282   : > { %v4031_v7 = vmul.f32 %v3999_v11, %v3839_v9  ;;  %v3843_v11 = vmul.f32 0.5, %v8915_v35 }
 0x283   : > { %v3430_v44 = vadd.f32 %v8844_v43, %v3378_v14  ;;  %v3780_v43 = vmul.f32 %v8912_v54, %v8912_v54  ;;  %v4032_v13 = vmul.f32 %v4000_v31, %v3840_v10  ;;  %v3907_v42 = vadd.f32 %v3875_v1, %v8915_v35 }
 0x285   : > { %v3558_v19 = vrot.slane %v3430_v44, 7  ;;  %v3812_v34 = vmul.f32 %v3780_v43, %v8912_v54  ;;  %v4058_v41 = vpack.c.bf16 %v4032_v13, %v4031_v7  ;;  %v4757_v28 = vpop.eup %4756  ;;  %v3939_v8 = vmul.f32 0.7978846, %v3907_v42 }
 0x286   : > { %v3725_v56 = vpop.f32.mrf.mxu0  ;;  %v4759_v57 = vpop.eup %4758  ;;  %v4002_v47 = vadd.f32 1.0, %v4757_v28 }
 0x287   : > { %v3559_v15 = vsel %vm3479_vm11, %v3556_v45, %v3558_v19  ;;  %v3726_v12 = vadd.f32 %v8863_v26, %v3725_v56  ;;  %v3876_v32 = vmul.f32 0.044715, %v3812_v34  ;;  %v4001_v25 = vadd.f32 1.0, %v4759_v57 }
 0x288   : > { %v3607_v48 = vpack.c.bf16 %v3559_v15, %v3557_v30  ;;  %v4034_v3 = vmul.f32 %v4002_v47, %v3842_v50  ;;  %v3844_v45 = vmul.f32 0.5, %v8912_v54 }
 0x289   : > { %v3781_v53 = vmul.f32 %v3726_v12, %v3726_v12  ;;  %v3908_v37 = vadd.f32 %v3876_v32, %v8912_v54  ;;  %v4033_v17 = vmul.f32 %v4001_v25, %v3841_v24  ;;  %v3845_v29 = vmul.f32 0.5, %v3726_v12  ;;  %v8942_v54 = vld [vmem:[%s9598_s9] ss:$0 sm:$0xff] }
 0x28a   : > { %4490 = vmatmul.msk.bf16.gmra.mxu3 %vm2176_vm4, %v3607_v48 }
 0x28b   : > { %v3813_v16 = vmul.f32 %v3781_v53, %v3726_v12  ;;  %v3940_v38 = vmul.f32 0.7978846, %v3908_v37  ;;  %v4059_v4 = vpack.c.bf16 %v4034_v3, %v4033_v17 }
 0x28d   : > { %v3877_v40 = vmul.f32 0.044715, %v3813_v16 }
 0x28e   : > { %v3727_v22 = vpop.f32.mrf.mxu0 }
 0x28f   : > { %4170 = vmatmul.bf16.gmra.mxu1 %v4058_v41  ;;  %v3728_v63 = vadd.f32 %v8863_v26, %v3727_v22  ;;  %v3909_v49 = vadd.f32 %v3877_v40, %v3726_v12  ;;  %v8947_v12 = vld [vmem:[%s9599_s26] ss:$0 sm:$0xff] }
 0x291   : > { %v3782_v55 = vmul.f32 %v3728_v63, %v3728_v63  ;;  %v3941_v27 = vmul.f32 0.7978846, %v3909_v49  ;;  %v3846_v44 = vmul.f32 0.5, %v3728_v63 }
 0x293   : > { %v3814_v61 = vmul.f32 %v3782_v55, %v3728_v63  ;;  %4760 = vtanh.f32 %v3941_v27 }
 0x294   : > { %4762 = vtanh.f32 %v3940_v38 }
 0x295   : > { %v3878_v58 = vmul.f32 0.044715, %v3814_v61  ;;  %4764 = vtanh.f32 %v3939_v8 }
 0x297   : > { %v3910_v52 = vadd.f32 %v3878_v58, %v3728_v63 }
 0x299   : > { %v3942_v46 = vmul.f32 0.7978846, %v3910_v52  ;;  %v4761_v36 = vpop.eup %4760 }
 0x29a   : > { %v4763_v5 = vpop.eup %4762  ;;  %v4005_v60 = vadd.f32 1.0, %v4761_v36 }
 0x29b   : > { %4766 = vtanh.f32 %v3942_v46  ;;  %v4765_v59 = vpop.eup %4764  ;;  %v4004_v51 = vadd.f32 1.0, %v4763_v5 }
 0x29c   : > { %v3730_v62 = vpop.f32.mrf.mxu3  ;;  %v4003_v31 = vadd.f32 1.0, %v4765_v59  ;;  %v4037_v0 = vmul.f32 %v4005_v60, %v3845_v29 }
 0x29d   : > { %v3731_v21 = vadd.f32 %v8863_v26, %v3730_v62  ;;  %v4036_v30 = vmul.f32 %v4004_v51, %v3844_v45 }
 0x29e   : > { %v4035_v13 = vmul.f32 %v4003_v31, %v3843_v11 }
 0x29f   : > { %4175 = vmatmul.bf16.gmra.mxu1 %v4059_v4  ;;  %v3783_v33 = vmul.f32 %v3731_v21, %v3731_v21  ;;  %v3847_v37 = vmul.f32 0.5, %v3731_v21 }
 0x2a0   : > { %v4060_v6 = vpack.c.bf16 %v4036_v30, %v4035_v13 }
 0x2a1   : > { %v4767_v14 = vpop.eup %4766  ;;  %v3815_v23 = vmul.f32 %v3783_v33, %v3731_v21 }
 0x2a2   : > { %v4006_v18 = vadd.f32 1.0, %v4767_v14 }
 0x2a3   : > { %v3879_v19 = vmul.f32 0.044715, %v3815_v23 }
 0x2a4   : > { %v4038_v10 = vmul.f32 %v4006_v18, %v3846_v44  ;;  %v3732_v15 = vpop.f32.mrf.mxu3 }
 0x2a5   : > { %v3733_v43 = vadd.f32 %v8863_v26, %v3732_v15  ;;  %v3911_v9 = vadd.f32 %v3879_v19, %v3731_v21 }
 0x2a6   : > { %v4061_v20 = vpack.c.bf16 %v4038_v10, %v4037_v0 }
 0x2a7   : > { %v3784_v48 = vmul.f32 %v3733_v43, %v3733_v43  ;;  %v3943_v39 = vmul.f32 0.7978846, %v3911_v9  ;;  %v3848_v42 = vmul.f32 0.5, %v3733_v43 }
 0x2a8   : > { %4185 = vmatmul.bf16.vlgmr.msra.gmra.mxu2 %v4061_v20 }
 0x2a9   : > { %v3816_v56 = vmul.f32 %v3784_v48, %v3733_v43  ;;  %4768 = vtanh.f32 %v3943_v39 }
 0x2ab   : > { %v3880_v7 = vmul.f32 0.044715, %v3816_v56 }
 0x2ad   : > { %v3912_v35 = vadd.f32 %v3880_v7, %v3733_v43 }
 0x2af   : > { %4180 = vmatmul.bf16.gmra.mxu1 %v4060_v6  ;;  %v3944_v41 = vmul.f32 0.7978846, %v3912_v35  ;;  %v4769_v40 = vpop.eup %4768 }
 0x2b0   : > { %v3735_v34 = vpop.f32.mrf.mxu3  ;;  %v4007_v63 = vadd.f32 1.0, %v4769_v40 }
 0x2b1   : > { %v4146_v53 = vpop.f32.mrf.mxu1  ;;  %v3736_v2 = vadd.f32 %v8863_v26, %v3735_v34  ;;  %4770 = vtanh.f32 %v3944_v41 }
 0x2b2   : > { %v4147_v16 = vadd.f32 %v8942_v54, %v4146_v53  ;;  %v4039_v38 = vmul.f32 %v4007_v63, %v3847_v37 }
 0x2b3   : > { %v3785_v32 = vmul.f32 %v3736_v2, %v3736_v2  ;;  %v3849_v45 = vmul.f32 0.5, %v3736_v2 }
 0x2b4   : > { %v4230_v28 = vmul.f32 %v8947_v12, %v4147_v16 }
 0x2b5   : > { %v3817_v1 = vmul.f32 %v3785_v32, %v3736_v2 }
 0x2b6   : > { %4262 = vst.msk [vmem:[%s8954_s19] sm:$0xff] %vm2176_vm4, %v4230_v28 }
 0x2b7   : > { %v3881_v22 = vmul.f32 0.044715, %v3817_v1  ;;  %v4771_v49 = vpop.eup %4770 }
 0x2b8   : > { %v3737_v57 = vpop.f32.mrf.mxu3  ;;  %v4008_v50 = vadd.f32 1.0, %v4771_v49 }
 0x2b9   : > { %v4148_v47 = vpop.f32.mrf.mxu1  ;;  %v3738_v55 = vadd.f32 %v8863_v26, %v3737_v57  ;;  %v3913_v25 = vadd.f32 %v3881_v22, %v3736_v2 }
 0x2ba   : > { %v4149_v61 = vadd.f32 %v8942_v54, %v4148_v47  ;;  %v4040_v24 = vmul.f32 %v4008_v50, %v3848_v42 }
 0x2bb   : > { %v3786_v27 = vmul.f32 %v3738_v55, %v3738_v55  ;;  %v3945_v17 = vmul.f32 0.7978846, %v3913_v25  ;;  %v3850_v31 = vmul.f32 0.5, %v3738_v55 }
 0x2bc   : > { %v4231_v3 = vmul.f32 %v8947_v12, %v4149_v61  ;;  %v4062_v8 = vpack.c.bf16 %v4040_v24, %v4039_v38 }
 0x2bd   : > { %v3818_v58 = vmul.f32 %v3786_v27, %v3738_v55  ;;  %4772 = vtanh.f32 %v3945_v17 }
 0x2be   : > { %4263 = vst.msk [vmem:[%s8954_s19 + $0x8] sm:$0xff] %vm2176_vm4, %v4231_v3  ;;  %4190 = vmatmul.bf16.gmra.mxu2 %v4062_v8 }
 0x2bf   : > { %v3882_v52 = vmul.f32 0.044715, %v3818_v58 }
 0x2c1   : > { %v3914_v4 = vadd.f32 %v3882_v52, %v3738_v55 }
 0x2c3   : > { %v3946_v46 = vmul.f32 0.7978846, %v3914_v4  ;;  %v4773_v59 = vpop.eup %4772 }
 0x2c4   : > { %v4009_v51 = vadd.f32 1.0, %v4773_v59 }
 0x2c5   : > { %v4151_v36 = vpop.f32.mrf.mxu1  ;;  %v3740_v62 = vpop.f32.mrf.mxu3  ;;  %4774 = vtanh.f32 %v3946_v46 }
 0x2c6   : > { %v4152_v5 = vadd.f32 %v8942_v54, %v4151_v36  ;;  %v3741_v21 = vadd.f32 %v8863_v26, %v3740_v62  ;;  %v4041_v30 = vmul.f32 %v4009_v51, %v3849_v45 }
 0x2c8   : > { %v4232_v33 = vmul.f32 %v8947_v12, %v4152_v5  ;;  %v3787_v60 = vmul.f32 %v3741_v21, %v3741_v21  ;;  %v3851_v63 = vmul.f32 0.5, %v3741_v21 }
 0x2ca   : > { %4264 = vst.msk [vmem:[%s8954_s19 + $0x10] sm:$0xff] %vm2176_vm4, %v4232_v33  ;;  %v3819_v14 = vmul.f32 %v3787_v60, %v3741_v21 }
 0x2cb   : > { %v4775_v23 = vpop.eup %4774 }
 0x2cc   : > { %v3883_v29 = vmul.f32 0.044715, %v3819_v14  ;;  %v4010_v19 = vadd.f32 1.0, %v4775_v23 }
 0x2cd   : > { %v4153_v44 = vpop.f32.mrf.mxu1  ;;  %v3742_v18 = vpop.f32.mrf.mxu3 }
 0x2ce   : > { %v4154_v0 = vadd.f32 %v8942_v54, %v4153_v44  ;;  %v3743_v10 = vadd.f32 %v8863_v26, %v3742_v18  ;;  %v3915_v11 = vadd.f32 %v3883_v29, %v3741_v21  ;;  %v4042_v15 = vmul.f32 %v4010_v19, %v3850_v31 }
 0x2d0   : > { %v4233_v43 = vmul.f32 %v8947_v12, %v4154_v0  ;;  %v3788_v20 = vmul.f32 %v3743_v10, %v3743_v10  ;;  %v4063_v9 = vpack.c.bf16 %v4042_v15, %v4041_v30  ;;  %v3947_v48 = vmul.f32 0.7978846, %v3915_v11 }
 0x2d1   : > { %v3852_v49 = vmul.f32 0.5, %v3743_v10 }
 0x2d2   : > { %4265 = vst.msk [vmem:[%s8954_s19 + $0x18] sm:$0xff] %vm2176_vm4, %v4233_v43  ;;  %v3820_v13 = vmul.f32 %v3788_v20, %v3743_v10  ;;  %4195 = vmatmul.bf16.gmra.mxu2 %v4063_v9  ;;  %4776 = vtanh.f32 %v3947_v48 }
 0x2d4   : > { %v3884_v6 = vmul.f32 0.044715, %v3820_v13 }
 0x2d6   : > { %v3916_v56 = vadd.f32 %v3884_v6, %v3743_v10 }
 0x2d8   : > { %v3948_v39 = vmul.f32 0.7978846, %v3916_v56  ;;  %v4777_v53 = vpop.eup %4776 }
 0x2d9   : > { %v4156_v7 = vpop.f32.mrf.mxu1  ;;  %v4011_v40 = vadd.f32 1.0, %v4777_v53 }
 0x2da   : > { %v4157_v35 = vadd.f32 %v8942_v54, %v4156_v7  ;;  %v3745_v34 = vpop.f32.mrf.mxu3  ;;  %4778 = vtanh.f32 %v3948_v39 }
 0x2db   : > { %v3746_v41 = vadd.f32 %v8863_v26, %v3745_v34  ;;  %v4043_v42 = vmul.f32 %v4011_v40, %v3851_v63 }
 0x2dc   : > { %v4234_v2 = vmul.f32 %v8947_v12, %v4157_v35 }
 0x2dd   : > { %v3789_v16 = vmul.f32 %v3746_v41, %v3746_v41  ;;  %v3853_v31 = vmul.f32 0.5, %v3746_v41 }
 0x2de   : > { %4266 = vst.msk [vmem:[%s8954_s19 + $0x20] sm:$0xff] %vm2176_vm4, %v4234_v2 }
 0x2df   : > { %v3821_v32 = vmul.f32 %v3789_v16, %v3746_v41 }
 0x2e0   : > { %v4779_v28 = vpop.eup %4778 }
 0x2e1   : > { %v3885_v1 = vmul.f32 0.044715, %v3821_v32  ;;  %v4158_v22 = vpop.f32.mrf.mxu1  ;;  %v4012_v57 = vadd.f32 1.0, %v4779_v28 }
 0x2e2   : > { %v4159_v37 = vadd.f32 %v8942_v54, %v4158_v22  ;;  %v3747_v47 = vpop.f32.mrf.mxu3 }
 0x2e3   : > { %v3748_v55 = vadd.f32 %v8863_v26, %v3747_v47  ;;  %v4044_v50 = vmul.f32 %v4012_v57, %v3852_v49  ;;  %v3917_v25 = vadd.f32 %v3885_v1, %v3746_v41 }
 0x2e4   : > { %v4235_v61 = vmul.f32 %v8947_v12, %v4159_v37 }
 0x2e5   : > { %v3790_v27 = vmul.f32 %v3748_v55, %v3748_v55  ;;  %v4064_v38 = vpack.c.bf16 %v4044_v50, %v4043_v42  ;;  %v3949_v3 = vmul.f32 0.7978846, %v3917_v25  ;;  %v3854_v19 = vmul.f32 0.5, %v3748_v55 }
 0x2e6   : > { %4267 = vst.msk [vmem:[%s8954_s19 + $0x28] sm:$0xff] %vm2176_vm4, %v4235_v61 }
 0x2e7   : > { %v3822_v24 = vmul.f32 %v3790_v27, %v3748_v55  ;;  %4200 = vmatmul.bf16.gmra.mxu2 %v4064_v38  ;;  %4780 = vtanh.f32 %v3949_v3 }
 0x2e9   : > { %v3886_v58 = vmul.f32 0.044715, %v3822_v24 }
 0x2eb   : > { %v3918_v17 = vadd.f32 %v3886_v58, %v3748_v55 }
 0x2ec   : > { %v4161_v8 = vpop.f32.mrf.mxu1  ;;  %v3750_v4 = vpop.f32.mrf.mxu3 }
 0x2ed   : > { %v4162_v52 = vadd.f32 %v8942_v54, %v4161_v8  ;;  %v3751_v46 = vadd.f32 %v8863_v26, %v3750_v4  ;;  %v3950_v36 = vmul.f32 0.7978846, %v3918_v17  ;;  %v4781_v21 = vpop.eup %4780 }
 0x2ee   : > { %v4013_v23 = vadd.f32 1.0, %v4781_v21 }
 0x2ef   : > { %v4236_v62 = vmul.f32 %v8947_v12, %v4162_v52  ;;  %v3791_v5 = vmul.f32 %v3751_v46, %v3751_v46  ;;  %4782 = vtanh.f32 %v3950_v36  ;;  %v3855_v37 = vmul.f32 0.5, %v3751_v46 }
 0x2f0   : > { %v4045_v11 = vmul.f32 %v4013_v23, %v3853_v31 }
 0x2f1   : > { %4268 = vst.msk [vmem:[%s8954_s19 + $0x30] sm:$0xff] %vm2176_vm4, %v4236_v62  ;;  %v3823_v59 = vmul.f32 %v3791_v5, %v3751_v46 }
 0x2f3   : > { %v3887_v33 = vmul.f32 0.044715, %v3823_v59 }
 0x2f4   : > { %v4163_v60 = vpop.f32.mrf.mxu1  ;;  %v3752_v51 = vpop.f32.mrf.mxu3 }
 0x2f5   : > { %v4164_v14 = vadd.f32 %v8942_v54, %v4163_v60  ;;  %v4783_v29 = vpop.eup %4782  ;;  %v3753_v44 = vadd.f32 %v8863_v26, %v3752_v51  ;;  %v3919_v18 = vadd.f32 %v3887_v33, %v3751_v46 }
 0x2f6   : > { %v4014_v0 = vadd.f32 1.0, %v4783_v29 }
 0x2f7   : > { %v4237_v45 = vmul.f32 %v8947_v12, %v4164_v14  ;;  %v3792_v10 = vmul.f32 %v3753_v44, %v3753_v44  ;;  %v3951_v43 = vmul.f32 0.7978846, %v3919_v18  ;;  %v3856_v47 = vmul.f32 0.5, %v3753_v44 }
 0x2f8   : > { %v4046_v30 = vmul.f32 %v4014_v0, %v3854_v19 }
 0x2f9   : > { %4269 = vst.msk [vmem:[%s8954_s19 + $0x38] sm:$0xff] %vm2176_vm4, %v4237_v45  ;;  %v3824_v15 = vmul.f32 %v3792_v10, %v3753_v44  ;;  %4784 = vtanh.f32 %v3951_v43 }
 0x2fa   : > { %v4065_v20 = vpack.c.bf16 %v4046_v30, %v4045_v11 }
 0x2fb   : > { %v3888_v9 = vmul.f32 0.044715, %v3824_v15 }
 0x2fc   : > { %v4166_v13 = vpop.f32.mrf.mxu1  ;;  %v3755_v6 = vpop.f32.mrf.mxu3  ;;  %4205 = vmatmul.bf16.gmra.mxu2 %v4065_v20 }
 0x2fd   : > { %v4167_v48 = vadd.f32 %v8942_v54, %v4166_v13  ;;  %v3756_v56 = vadd.f32 %v8863_v26, %v3755_v6  ;;  %v3920_v39 = vadd.f32 %v3888_v9, %v3753_v44 }
 0x2ff   : > { %v4238_v7 = vmul.f32 %v8947_v12, %v4167_v48  ;;  %v3793_v35 = vmul.f32 %v3756_v56, %v3756_v56  ;;  %v3952_v34 = vmul.f32 0.7978846, %v3920_v39  ;;  %v4785_v53 = vpop.eup %4784  ;;  %v3857_v18 = vmul.f32 0.5, %v3756_v56 }
 0x300   : > { %v4015_v63 = vadd.f32 1.0, %v4785_v53 }
 0x301   : > { %4270 = vst.msk [vmem:[%s8954_s19 + $0x40] sm:$0xff] %vm2176_vm4, %v4238_v7  ;;  %v3825_v41 = vmul.f32 %v3793_v35, %v3756_v56  ;;  %4786 = vtanh.f32 %v3952_v34 }
 0x302   : > { %v4047_v25 = vmul.f32 %v4015_v63, %v3855_v37 }
 0x303   : > { %v3889_v2 = vmul.f32 0.044715, %v3825_v41 }
 0x304   : > { %v4168_v16 = vpop.f32.mrf.mxu1  ;;  %v3757_v40 = vpop.f32.mrf.mxu3 }
 0x305   : > { %v4169_v32 = vadd.f32 %v8942_v54, %v4168_v16  ;;  %v3758_v28 = vadd.f32 %v8863_v26, %v3757_v40  ;;  %v3921_v1 = vadd.f32 %v3889_v2, %v3756_v56 }
 0x307   : > { %v4239_v22 = vmul.f32 %v8947_v12, %v4169_v32  ;;  %v4787_v49 = vpop.eup %4786  ;;  %v3794_v57 = vmul.f32 %v3758_v28, %v3758_v28  ;;  %v3953_v50 = vmul.f32 0.7978846, %v3921_v1  ;;  %v3858_v45 = vmul.f32 0.5, %v3758_v28 }
 0x308   : > { %v4016_v55 = vadd.f32 1.0, %v4787_v49 }
 0x309   : > { %4271 = vst.msk [vmem:[%s8954_s19 + $0x48] sm:$0xff] %vm2176_vm4, %v4239_v22  ;;  %v3826_v42 = vmul.f32 %v3794_v57, %v3758_v28  ;;  %4788 = vtanh.f32 %v3953_v50 }
 0x30a   : > { %v4048_v61 = vmul.f32 %v4016_v55, %v3856_v47 }
 0x30b   : > { %v3890_v27 = vmul.f32 0.044715, %v3826_v42 }
 0x30c   : > { %v4171_v38 = vpop.f32.mrf.mxu1  ;;  %v4066_v58 = vpack.c.bf16 %v4048_v61, %v4047_v25 }
 0x30d   : > { %v4172_v24 = vadd.f32 %v8942_v54, %v4171_v38  ;;  %v3760_v3 = vpop.f32.mrf.mxu3  ;;  %v3922_v17 = vadd.f32 %v3890_v27, %v3758_v28 }
 0x30e   : > { %v3761_v8 = vadd.f32 %v8863_v26, %v3760_v3  ;;  %4210 = vmatmul.bf16.gmra.mxu2 %v4066_v58 }
 0x30f   : > { %v4240_v52 = vmul.f32 %v8947_v12, %v4172_v24  ;;  %v3954_v46 = vmul.f32 0.7978846, %v3922_v17  ;;  %v4789_v62 = vpop.eup %4788 }
 0x310   : > { %v3795_v4 = vmul.f32 %v3761_v8, %v3761_v8  ;;  %v4017_v23 = vadd.f32 1.0, %v4789_v62  ;;  %v3859_v34 = vmul.f32 0.5, %v3761_v8 }
 0x311   : > { %4272 = vst.msk [vmem:[%s8954_s19 + $0x50] sm:$0xff] %vm2176_vm4, %v4240_v52  ;;  %4790 = vtanh.f32 %v3954_v46 }
 0x312   : > { %v3827_v36 = vmul.f32 %v3795_v4, %v3761_v8  ;;  %v4049_v10 = vmul.f32 %v4017_v23, %v3857_v18 }
 0x314   : > { %v3891_v5 = vmul.f32 0.044715, %v3827_v36  ;;  %v4173_v21 = vpop.f32.mrf.mxu1 }
 0x315   : > { %v4174_v59 = vadd.f32 %v8942_v54, %v4173_v21  ;;  %v3762_v33 = vpop.f32.mrf.mxu3 }
 0x316   : > { %v3763_v60 = vadd.f32 %v8863_v26, %v3762_v33  ;;  %v3923_v14 = vadd.f32 %v3891_v5, %v3761_v8 }
 0x317   : > { %v4241_v51 = vmul.f32 %v8947_v12, %v4174_v59  ;;  %v4791_v29 = vpop.eup %4790 }
 0x318   : > { %v3796_v44 = vmul.f32 %v3763_v60, %v3763_v60  ;;  %v4018_v31 = vadd.f32 1.0, %v4791_v29  ;;  %v3955_v0 = vmul.f32 0.7978846, %v3923_v14  ;;  %v3860_v41 = vmul.f32 0.5, %v3763_v60 }
 0x319   : > { %4273 = vst.msk [vmem:[%s8954_s19 + $0x58] sm:$0xff] %vm2176_vm4, %v4241_v51 }
 0x31a   : > { %v3828_v19 = vmul.f32 %v3796_v44, %v3763_v60  ;;  %v4050_v11 = vmul.f32 %v4018_v31, %v3858_v45  ;;  %4792 = vtanh.f32 %v3955_v0 }
 0x31c   : > { %v3892_v30 = vmul.f32 0.044715, %v3828_v19  ;;  %v4176_v15 = vpop.f32.mrf.mxu1  ;;  %v4067_v43 = vpack.c.bf16 %v4050_v11, %v4049_v10 }
 0x31d   : > { %v4177_v26 = vadd.f32 %v8942_v54, %v4176_v15 }
 0x31e   : > { %v3924_v20 = vadd.f32 %v3892_v30, %v3763_v60  ;;  %4215 = vmatmul.bf16.gmra.mxu2 %v4067_v43 }
 0x31f   : > { %v4242_v9 = vmul.f32 %v8947_v12, %v4177_v26 }
 0x320   : > { %v3956_v13 = vmul.f32 0.7978846, %v3924_v20  ;;  %v4793_v48 = vpop.eup %4792 }
 0x321   : > { %4274 = vst.msk [vmem:[%s8954_s19 + $0x60] sm:$0xff] %vm2176_vm4, %v4242_v9  ;;  %v4019_v7 = vadd.f32 1.0, %v4793_v48 }
 0x322   : > { %4794 = vtanh.f32 %v3956_v13 }
 0x323   : > { %v4051_v2 = vmul.f32 %v4019_v7, %v3859_v34 }
 0x324   : > { %v4178_v6 = vpop.f32.mrf.mxu1 }
 0x325   : > { %v4179_v56 = vadd.f32 %v8942_v54, %v4178_v6 }
 0x327   : > { %v4243_v39 = vmul.f32 %v8947_v12, %v4179_v56 }
 0x328   : > { %v4795_v35 = vpop.eup %4794 }
 0x329   : > { %4275 = vst.msk [vmem:[%s8954_s19 + $0x68] sm:$0xff] %vm2176_vm4, %v4243_v39  ;;  %v4020_v53 = vadd.f32 1.0, %v4795_v35 }
 0x32b   : > { %v4052_v16 = vmul.f32 %v4020_v53, %v3860_v41  ;;  %v4186_v1 = vpop.f32.mrf.mxu2 }
 0x32c   : > { %v4181_v32 = vpop.f32.mrf.mxu1  ;;  %v4187_v22 = vadd.f32 %v8942_v54, %v4186_v1 }
 0x32d   : > { %v4182_v40 = vadd.f32 %v8942_v54, %v4181_v32  ;;  %v4068_v28 = vpack.c.bf16 %v4052_v16, %v4051_v2 }
 0x32e   : > { %v4246_v49 = vmul.f32 %v8947_v12, %v4187_v22 }
 0x32f   : > { %v4244_v63 = vmul.f32 %v8947_v12, %v4182_v40  ;;  %4220 = vmatmul.bf16.gmra.mxu2 %v4068_v28 }
 0x330   : > { %4278 = vst.msk [vmem:[%s8954_s19 + $0x80] sm:$0xff] %vm2176_vm4, %v4246_v49 }
 0x331   : > { %4276 = vst.msk [vmem:[%s8954_s19 + $0x70] sm:$0xff] %vm2176_vm4, %v4244_v63 }
 0x333   : > { %v4188_v47 = vpop.f32.mrf.mxu2 }
 0x334   : > { %v4183_v57 = vpop.f32.mrf.mxu1  ;;  %v4189_v55 = vadd.f32 %v8942_v54, %v4188_v47 }
 0x335   : > { %v4184_v37 = vadd.f32 %v8942_v54, %v4183_v57 }
 0x336   : > { %v4247_v50 = vmul.f32 %v8947_v12, %v4189_v55 }
 0x337   : > { %v4245_v42 = vmul.f32 %v8947_v12, %v4184_v37 }
 0x338   : > { %4279 = vst.msk [vmem:[%s8954_s19 + $0x88] sm:$0xff] %vm2176_vm4, %v4247_v50 }
 0x339   : > { %4277 = vst.msk [vmem:[%s8954_s19 + $0x78] sm:$0xff] %vm2176_vm4, %v4245_v42 }
 0x341   : > { %v4191_v25 = vpop.f32.mrf.mxu2 }
 0x342   : > { %v4192_v61 = vadd.f32 %v8942_v54, %v4191_v25 }
 0x344   : > { %v4248_v27 = vmul.f32 %v8947_v12, %v4192_v61 }
 0x346   : > { %4280 = vst.msk [vmem:[%s8954_s19 + $0x90] sm:$0xff] %vm2176_vm4, %v4248_v27 }
 0x349   : > { %v4193_v38 = vpop.f32.mrf.mxu2 }
 0x34a   : > { %v4194_v24 = vadd.f32 %v8942_v54, %v4193_v38 }
 0x34c   : > { %v4249_v3 = vmul.f32 %v8947_v12, %v4194_v24 }
 0x34e   : > { %4281 = vst.msk [vmem:[%s8954_s19 + $0x98] sm:$0xff] %vm2176_vm4, %v4249_v3 }
 0x355   : > { %v4196_v58 = vpop.f32.mrf.mxu2 }
 0x356   : > { %v4197_v8 = vadd.f32 %v8942_v54, %v4196_v58 }
 0x358   : > { %v4250_v17 = vmul.f32 %v8947_v12, %v4197_v8 }
 0x35a   : > { %4282 = vst.msk [vmem:[%s8954_s19 + $0xa0] sm:$0xff] %vm2176_vm4, %v4250_v17 }
 0x35d   : > { %v4198_v52 = vpop.f32.mrf.mxu2 }
 0x35e   : > { %v4199_v4 = vadd.f32 %v8942_v54, %v4198_v52 }
 0x360   : > { %v4251_v46 = vmul.f32 %v8947_v12, %v4199_v4 }
 0x362   : > { %4283 = vst.msk [vmem:[%s8954_s19 + $0xa8] sm:$0xff] %vm2176_vm4, %v4251_v46 }
 0x36a   : > { %v4201_v36 = vpop.f32.mrf.mxu2 }
 0x36b   : > { %v4202_v62 = vadd.f32 %v8942_v54, %v4201_v36 }
 0x36d   : > { %v4252_v5 = vmul.f32 %v8947_v12, %v4202_v62 }
 0x36f   : > { %4284 = vst.msk [vmem:[%s8954_s19 + $0xb0] sm:$0xff] %vm2176_vm4, %v4252_v5 }
 0x372   : > { %v4203_v21 = vpop.f32.mrf.mxu2 }
 0x373   : > { %v4204_v59 = vadd.f32 %v8942_v54, %v4203_v21 }
 0x375   : > { %v4253_v33 = vmul.f32 %v8947_v12, %v4204_v59 }
 0x377   : > { %4285 = vst.msk [vmem:[%s8954_s19 + $0xb8] sm:$0xff] %vm2176_vm4, %v4253_v33 }
 0x37f   : > { %v4206_v60 = vpop.f32.mrf.mxu2 }
 0x380   : > { %v4207_v14 = vadd.f32 %v8942_v54, %v4206_v60 }
 0x382   : > { %v4254_v51 = vmul.f32 %v8947_v12, %v4207_v14 }
 0x384   : > { %4286 = vst.msk [vmem:[%s8954_s19 + $0xc0] sm:$0xff] %vm2176_vm4, %v4254_v51 }
 0x387   : > { %v4208_v23 = vpop.f32.mrf.mxu2 }
 0x388   : > { %v4209_v29 = vadd.f32 %v8942_v54, %v4208_v23 }
 0x38a   : > { %v4255_v44 = vmul.f32 %v8947_v12, %v4209_v29 }
 0x38c   : > { %4287 = vst.msk [vmem:[%s8954_s19 + $0xc8] sm:$0xff] %vm2176_vm4, %v4255_v44 }
 0x391   : > { %v4211_v18 = vpop.f32.mrf.mxu2 }
 0x392   : > { %v4212_v45 = vadd.f32 %v8942_v54, %v4211_v18 }
 0x394   : > { %v4256_v31 = vmul.f32 %v8947_v12, %v4212_v45 }
 0x396   : > { %4288 = vst.msk [vmem:[%s8954_s19 + $0xd0] sm:$0xff] %vm2176_vm4, %v4256_v31 }
 0x399   : > { %v4213_v19 = vpop.f32.mrf.mxu2 }
 0x39a   : > { %v4214_v0 = vadd.f32 %v8942_v54, %v4213_v19 }
 0x39c   : > { %v4257_v10 = vmul.f32 %v8947_v12, %v4214_v0 }
 0x39e   : > { %4289 = vst.msk [vmem:[%s8954_s19 + $0xd8] sm:$0xff] %vm2176_vm4, %v4257_v10 }
 0x3a1   : > { %v4216_v11 = vpop.f32.mrf.mxu2 }
 0x3a2   : > { %v4217_v30 = vadd.f32 %v8942_v54, %v4216_v11 }
 0x3a4   : > { %v4258_v15 = vmul.f32 %v8947_v12, %v4217_v30 }
 0x3a6   : > { %4290 = vst.msk [vmem:[%s8954_s19 + $0xe0] sm:$0xff] %vm2176_vm4, %v4258_v15 }
 0x3a9   : > { %v4218_v26 = vpop.f32.mrf.mxu2 }
 0x3aa   : > { %v4219_v43 = vadd.f32 %v8942_v54, %v4218_v26 }
 0x3ac   : > { %v4259_v20 = vmul.f32 %v8947_v12, %v4219_v43 }
 0x3ae   : > { %4291 = vst.msk [vmem:[%s8954_s19 + $0xe8] sm:$0xff] %vm2176_vm4, %v4259_v20 }
 0x3b2   : > { %v4221_v9 = vpop.f32.mrf.mxu2 }
 0x3b3   : > { %v4222_v13 = vadd.f32 %v8942_v54, %v4221_v9 }
 0x3b5   : > { %v4260_v48 = vmul.f32 %v8947_v12, %v4222_v13 }
 0x3b7   : > { %4292 = vst.msk [vmem:[%s8954_s19 + $0xf0] sm:$0xff] %vm2176_vm4, %v4260_v48 }
 0x3ba   : > { %v4223_v6 = vpop.f32.mrf.mxu2 }
 0x3bb   : > { %v4224_v56 = vadd.f32 %v8942_v54, %v4223_v6 }
 0x3bd   : > { %v4261_v39 = vmul.f32 %v8947_v12, %v4224_v56 }
 0x3bf   : > { %4293 = vst.msk [vmem:[%s8954_s19 + $0xf8] sm:$0xff] %vm2176_vm4, %v4261_v39 }
 0x3c0   : > { %4923 = shalt.err (!%p4920_p13)
}
 0x3c1   : > { %s4986_s1 = smov 128   ;;  %s4987_s25 = smov 8  }
 0x3c2   : > { %4560 = dma.vmem_to_hbm [thread:$0]  (%p5108_p9), %s4311_s17, 4096, %s4313_s21, %s4295_s18, %s4986_s1, %s4986_s1, %s4987_s25  }
 0x3c3 PF: > { %s9603_s26 = sld [smem:[#allocation12_spill]]  ;;  %p4573_p0 = pnand %p4452_p12, %p5115_p11 }
 0x3c4   : > { %s9605_s8 = sld [smem:[#allocation16_spill]] }
 0x3c5   : > { %p4574_p1 = pneg %p4573_p0 }
 0x3c9   : > { %s4327_s20 = sand.u32 1, %s9603_s26  }
 0x3ca   : > { %s4328_s11 = scalar_lea.sflag [#allocation4], %s4327_s20 }
 0x3cb   : > { %4957 = dma.done.wait (%p4574_p1), %s4328_s11, 4096  }
 0x3cc   : > { %4959 = vsyncadd (%p4574_p1), %s4328_s11, 4294963200  ;;  %s31_s26 = sadd.s32 1, %s9605_s8   ;;  %s9606_s14 = sld [smem:[#allocation13_spill]] }
 0x3cd   : > { %p28_p2 = scmp.ge.s32.totalorder %s31_s26, 4   ;;  %s9607_s23 = sld [smem:[#allocation19_spill]] }
 0x3ce   : > { %s9608_s24 = sld [smem:[#allocation15_spill]]  ;;  %s9610_s21 = smov %s4966_s22 }
 0x3cf   : > { %s9609_s25 = sld [smem:[#allocation17_spill]]  ;;  %30 = sbr.rel (!%p28_p2) target bundleno = 15 (0xf), region = 137 }
 0x3d2   : > { %s9611_s22 = smov %s9606_s14 }
 0x3d4   :  { %4334 = vsyncpa [#allocation3], 1 }
 0x3d5   :  { %4336 = vsyncpa [#allocation3 + $0x1], 1 }
 0x3d6   :  { %4337 = vsyncpa [#allocation6], 1 }
 0x3d7   :  { %4339 = vsyncpa [#allocation6 + $0x1], 1 }
 0x3d8   :  { %4340 = vsyncpa [#allocation4], 1 }
 0x3d9   :  { %4342 = vsyncpa [#allocation4 + $0x1], 1 }

</bundles_post_ra>
